<compile_context>
chip_gen: v7x
topology: tpu7x:2x2x1
jax: 0.10.0
libtpu: 0.0.40
codegen_flags: <defaults>
</compile_context>

<pallas_src>
import jax
import jax.numpy as jnp
from jax import lax
from jax.experimental import pallas as pl
from jax.experimental.pallas import tpu as pltpu

BN_EPS = 1e-5
LANE = 128

# Non-zero taps of the hexagonal 3x3 mask (corners (0,2) and (2,0) are zero).
HEX_TAPS = ((0, 0), (0, 1), (1, 0), (1, 1), (1, 2), (2, 1), (2, 2))


# ----------------------------------------------------------------------------
# In-kernel helpers
# ----------------------------------------------------------------------------
def _fill_slab(xs_ref, prev_blk, cur_blk, next_blk, *, upsample, transform=None):
    """Fill the (N, TH+2, W+2, C) zero-padded row slab for the current tile.

    Interior rows come from cur_blk (2x row-duplicated when `upsample` -- the
    height half of the unpooling); the 1-row top/bottom halos come from the
    neighbouring tiles' edge rows, or are zeroed on the first/last tile
    (border-only zeroing).  If the input blocks are narrower than the slab
    (no width pad baked in), the two 1-pixel side columns are zeroed too.
    `transform` (e.g. bn1+relu) is applied to every loaded row before storing.
    """
    t = pl.program_id(0)
    last = pl.num_programs(0) - 1
    N, thp2, wp, C = xs_ref.shape
    TH = thp2 - 2
    cw = cur_blk.shape[2]
    woff = (wp - cw) // 2  # 0 if the input already carries the width pad

    def prep(v):
        v = v if transform is None else transform(v)
        return v.astype(xs_ref.dtype)

    if woff:
        zcol = jnp.zeros((N, thp2, woff, C), xs_ref.dtype)
        xs_ref[:, :, 0:woff] = zcol
        xs_ref[:, :, wp - woff:wp] = zcol

    cur = prep(cur_blk[...])
    if upsample:
        # height half of the 2x nearest-neighbour unpooling, folded in here
        for k in range(TH // 2):
            row = cur[:, k:k + 1]
            xs_ref[:, 1 + 2 * k:2 + 2 * k, woff:woff + cw] = row
            xs_ref[:, 2 + 2 * k:3 + 2 * k, woff:woff + cw] = row
    else:
        xs_ref[:, 1:TH + 1, woff:woff + cw] = cur

    zrow = jnp.zeros((N, 1, cw, C), xs_ref.dtype)

    @pl.when(t == 0)
    def _():
        xs_ref[:, 0:1, woff:woff + cw] = zrow

    @pl.when(t > 0)
    def _():
        xs_ref[:, 0:1, woff:woff + cw] = prep(prev_blk[...])

    @pl.when(t == last)
    def _():
        xs_ref[:, TH + 1:TH + 2, woff:woff + cw] = zrow

    @pl.when(t < last)
    def _():
        xs_ref[:, TH + 1:TH + 2, woff:woff + cw] = prep(next_blk[...])


def _hex_conv_acc(xs_ref, w_ref):
    """7-tap hexagonal conv as per-tap bf16 MXU matmuls with f32 accumulation.

    xs_ref: (N, TH+2, W+2, Cin) zero-padded slab (bf16).
    w_ref : (7, Cin, Cout) per-tap weights (bf16).
    Returns (N*TH*W, Cout) float32.
    """
    N, thp2, wp, cin = xs_ref.shape
    TH, W = thp2 - 2, wp - 2
    M = N * TH * W
    acc = None
    for i, (dh, dw) in enumerate(HEX_TAPS):
        a = xs_ref[:, dh:dh + TH, dw:dw + W, :].reshape(M, cin)
        p = jnp.dot(a, w_ref[i], preferred_element_type=jnp.float32)
        acc = p if acc is None else acc + p
    return acc


def _store_stats(stats_ref, acc):
    """Per-channel partial (sum, sum-of-squares) for the two-pass BatchNorm."""
    c = acc.shape[-1]
    stats_ref[:, 0:1, :] = jnp.sum(acc, axis=0, keepdims=True).reshape(1, 1, c)
    stats_ref[:, 1:2, :] = jnp.sum(acc * acc, axis=0, keepdims=True).reshape(1, 1, c)


# ----------------------------------------------------------------------------
# Pallas kernels
# ----------------------------------------------------------------------------
def _stage1_kernel(xw_prev, xw_cur, xw_next, w13_ref,
                   t1_ref, idn_ref, stats_ref, xs_ref):
    """Pass 1 (Final=False): fused conv1|conv3 on the unpooled, padded input
    plus bn1/bn3 partial stats.  Pre-BN biases are dropped (BN cancels them)."""
    _fill_slab(xs_ref, xw_prev, xw_cur, xw_next, upsample=True)
    acc = _hex_conv_acc(xs_ref, w13_ref)                 # (M, 2*Cout) f32
    _store_stats(stats_ref, acc)
    N, TH, W, cout = t1_ref.shape
    t1_ref[...] = acc[:, :cout].reshape(N, TH, W, cout).astype(t1_ref.dtype)
    idn_ref[...] = acc[:, cout:].reshape(N, TH, W, cout).astype(idn_ref.dtype)


def _stage1_final_kernel(xw_prev, xw_cur, xw_next, w1_ref,
                         t1_ref, stats_ref, xs_ref):
    """Pass 1 (Final=True): conv1 on the padded input + bn1 partial stats."""
    _fill_slab(xs_ref, xw_prev, xw_cur, xw_next, upsample=False)
    acc = _hex_conv_acc(xs_ref, w1_ref)
    _store_stats(stats_ref, acc)
    N, TH, W, cout = t1_ref.shape
    t1_ref[...] = acc.reshape(N, TH, W, cout).astype(t1_ref.dtype)


def _stage2_kernel(t1_prev, t1_cur, t1_next, sc1_ref, sh1_ref, w2_ref,
                   t2_ref, stats_ref, ts_ref):
    """Pass 2: bn1+relu fused into the halo slab fill, then conv2 + bn2 stats."""
    sc1 = sc1_ref[...]
    sh1 = sh1_ref[...]

    def bn_relu(v):  # v: (N, rows, W, Cout) f32
        return jnp.maximum(v * sc1 + sh1, 0.0)

    _fill_slab(ts_ref, t1_prev, t1_cur, t1_next, upsample=False, transform=bn_relu)
    acc = _hex_conv_acc(ts_ref, w2_ref)                  # (M, Cout) f32
    _store_stats(stats_ref, acc)
    N, TH, W, cout = t2_ref.shape
    t2_ref[...] = acc.reshape(N, TH, W, cout).astype(t2_ref.dtype)


def _combine_kernel(t2_ref, idn_ref, sc2_ref, sh2_ref, sc3_ref, sh3_ref, out_ref):
    """Pass 3: relu( bn2(conv2) + bn3(conv3) ), pure element-wise, tiled."""
    t2 = t2_ref[...] * sc2_ref[...] + sh2_ref[...]
    idn = idn_ref[...] * sc3_ref[...] + sh3_ref[...]
    out_ref[...] = jnp.maximum(t2 + idn, 0.0).astype(out_ref.dtype)


def _final_head_kernel(t1_ref, sc1_ref, sh1_ref, w2_ref, b2_ref, out_ref):
    """Final=True pass 2: 1x1 conv (with bias) on relu(bn1(conv1))."""
    N, TH, W, cout = out_ref.shape
    t1 = jnp.maximum(t1_ref[...] * sc1_ref[...] + sh1_ref[...], 0.0)
    y = jnp.dot(t1.reshape(N * TH * W, t1.shape[-1]).astype(jnp.bfloat16),
                w2_ref[...], preferred_element_type=jnp.float32) + b2_ref[...]
    out_ref[...] = y.reshape(N, TH, W, cout).astype(out_ref.dtype)


# ----------------------------------------------------------------------------
# Wrapper glue
# ----------------------------------------------------------------------------
def _ceil_to(v, m):
    return ((v + m - 1) // m) * m


def _pad_last(a, target):
    if a.shape[-1] == target:
        return a
    return jnp.pad(a, [(0, 0)] * (a.ndim - 1) + [(0, target - a.shape[-1])])


def _tap_weights(ws, cin_p, cout_p):
    """Stack the 7 hex taps of one or more HWIO conv kernels into
    (7, cin_p, n*cout_p) bf16 (multiple kernels fused along the output axis)."""
    taps = []
    for dh, dw in HEX_TAPS:
        cols = [jnp.pad(w[dh, dw],
                        ((0, cin_p - w.shape[2]), (0, cout_p - w.shape[3])))
                for w in ws]
        taps.append(jnp.concatenate(cols, axis=-1))
    return jnp.stack(taps, axis=0).astype(jnp.bfloat16)


def _bn_affine(stats, count, gamma, beta):
    """Reduce per-tile partial sums -> training-mode BN (scale, shift)."""
    s = jnp.sum(stats, axis=0)                       # (2, C)
    mean = s[0] / count
    var = jnp.maximum(s[1] / count - mean * mean, 0.0)
    scale = gamma.reshape(-1) * lax.rsqrt(var + BN_EPS)
    shift = beta.reshape(-1) - mean * scale
    return scale.reshape(1, -1).astype(jnp.float32), shift.reshape(1, -1).astype(jnp.float32)


def _pick_tile_rows(H, need_even, max_rows):
    best = 0
    for th in range(1, min(H, max_rows) + 1):
        if H % th:
            continue
        if need_even and th % 2:
            continue
        best = th
    return best or H


def resblock_dec_nhwc(x, level, params, final=False,
                      out_dtype=jnp.float32, max_tile_rows=None):
    """Forward pass of ResBlock_dec on NHWC input; returns NHWC."""
    del level  # TODO(synk): level-dependent spherical padding approximated.
    x = x.astype(jnp.float32)
    N, h_in, w_in, cin = x.shape
    cout = params["w1"].shape[-1]
    cin_p = _ceil_to(cin, LANE)
    cout_p = _ceil_to(cout, LANE)

    if final:
        H, W = h_in, w_in
        xw = x
    else:
        # width half of the 2x unpooling here; height half folded into pass 1.
        H, W = 2 * h_in, 2 * w_in
        xw = jnp.repeat(x, 2, axis=2)
    # 1-pixel width pad + lane pad, bf16 (halves the HBM read of the input).
    xw = jnp.pad(xw, ((0, 0), (0, 0), (1, 1), (0, cin_p - cin))).astype(jnp.bfloat16)
    Hx = xw.shape[1]
    Wp = W + 2

    if max_tile_rows is None:
        # crude per-tile VMEM budget (v7x-safe: 64 MiB physical VMEM).
        per_row = N * Wp * max(cin_p, cout_p) * 2        # bf16 slab
        per_row += N * W * 2 * cout_p * 4                # f32 accumulator
        per_row += 4 * N * W * cout_p * 4                # double-buffered IO tiles
        max_tile_rows = max(2, int((8 << 20) // max(per_row, 1)))
    TH = _pick_tile_rows(H, need_even=not final, max_rows=max_tile_rows)
    T = H // TH
    Hb = TH // 2 if not final else TH                    # xw rows per tile
    count = float(N * H * W)

    cp = pltpu.CompilerParams(dimension_semantics=("parallel",),
                              vmem_limit_bytes=48 * 1024 * 1024)

    # halo row BlockSpecs (prev / cur / next) on the input; clamped at borders,
    # border rows are replaced by zeros inside the kernel.
    xw_prev_spec = pl.BlockSpec((N, 1, Wp, cin_p),
                                lambda t: (0, jnp.maximum(t * Hb - 1, 0), 0, 0))
    xw_cur_spec = pl.BlockSpec((N, Hb, Wp, cin_p), lambda t: (0, t, 0, 0))
    xw_next_spec = pl.BlockSpec((N, 1, Wp, cin_p),
                                lambda t: (0, jnp.minimum((t + 1) * Hb, Hx - 1), 0, 0))
    tile_spec = pl.BlockSpec((N, TH, W, cout_p), lambda t: (0, t, 0, 0))
    vec_spec = pl.BlockSpec((1, cout_p), lambda t: (0, 0))

    g1 = _pad_last(params["g1"], cout_p)
    be1 = _pad_last(params["be1"], cout_p)

    if not final:
        # ---- pass 1: fused conv1|conv3 (256-wide MXU output) + bn1/bn3 stats
        w13 = _tap_weights([params["w1"], params["w3"]], cin_p, cout_p)
        c2 = 2 * cout_p
        t1_raw, idn_raw, stats13 = pl.pallas_call(
            _stage1_kernel,
            grid=(T,),
            in_specs=[xw_prev_spec, xw_cur_spec, xw_next_spec,
                      pl.BlockSpec((7, cin_p, c2), lambda t: (0, 0, 0))],
            out_specs=(tile_spec, tile_spec,
                       pl.BlockSpec((1, 2, c2), lambda t: (t, 0, 0))),
            out_shape=(jax.ShapeDtypeStruct((N, H, W, cout_p), jnp.float32),
                       jax.ShapeDtypeStruct((N, H, W, cout_p), jnp.float32),
                       jax.ShapeDtypeStruct((T, 2, c2), jnp.float32)),
            scratch_shapes=[pltpu.VMEM((N, TH + 2, Wp, cin_p), jnp.bfloat16)],
            compiler_params=cp,
        )(xw, xw, xw, w13)

        sc1, sh1 = _bn_affine(stats13[:, :, :cout_p], count, g1, be1)
        sc3, sh3 = _bn_affine(stats13[:, :, cout_p:], count,
                              _pad_last(params["g3"], cout_p),
                              _pad_last(params["be3"], cout_p))

        # ---- pass 2: bn1+relu (fused into slab fill) -> conv2 + bn2 stats
        w2 = _tap_weights([params["w2"]], cout_p, cout_p)
        t1_prev_spec = pl.BlockSpec((N, 1, W, cout_p),
                                    lambda t: (0, jnp.maximum(t * TH - 1, 0), 0, 0))
        t1_next_spec = pl.BlockSpec((N, 1, W, cout_p),
                                    lambda t: (0, jnp.minimum((t + 1) * TH, H - 1), 0, 0))
        t2_raw, stats2 = pl.pallas_call(
            _stage2_kernel,
            grid=(T,),
            in_specs=[t1_prev_spec, tile_spec, t1_next_spec, vec_spec, vec_spec,
                      pl.BlockSpec((7, cout_p, cout_p), lambda t: (0, 0, 0))],
            out_specs=(tile_spec, pl.BlockSpec((1, 2, cout_p), lambda t: (t, 0, 0))),
            out_shape=(jax.ShapeDtypeStruct((N, H, W, cout_p), jnp.float32),
                       jax.ShapeDtypeStruct((T, 2, cout_p), jnp.float32)),
            scratch_shapes=[pltpu.VMEM((N, TH + 2, Wp, cout_p), jnp.bfloat16)],
            compiler_params=cp,
        )(t1_raw, t1_raw, t1_raw, sc1, sh1, w2)

        sc2, sh2 = _bn_affine(stats2, count,
                              _pad_last(params["g2"], cout_p),
                              _pad_last(params["be2"], cout_p))

        # ---- pass 3: bn2 + bn3 + add + relu
        out = pl.pallas_call(
            _combine_kernel,
            grid=(T,),
            in_specs=[tile_spec, tile_spec, vec_spec, vec_spec, vec_spec, vec_spec],
            out_specs=tile_spec,
            out_shape=jax.ShapeDtypeStruct((N, H, W, cout_p), out_dtype),
            compiler_params=cp,
        )(t2_raw, idn_raw, sc2, sh2, sc3, sh3)
        return out[..., :cout]

    # ------------------------------------------------------------------ final
    w1 = _tap_weights([params["w1"]], cin_p, cout_p)
    t1_raw, stats1 = pl.pallas_call(
        _stage1_final_kernel,
        grid=(T,),
        in_specs=[xw_prev_spec, xw_cur_spec, xw_next_spec,
                  pl.BlockSpec((7, cin_p, cout_p), lambda t: (0, 0, 0))],
        out_specs=(tile_spec, pl.BlockSpec((1, 2, cout_p), lambda t: (t, 0, 0))),
        out_shape=(jax.ShapeDtypeStruct((N, H, W, cout_p), jnp.float32),
                   jax.ShapeDtypeStruct((T, 2, cout_p), jnp.float32)),
        scratch_shapes=[pltpu.VMEM((N, TH + 2, Wp, cin_p), jnp.bfloat16)],
        compiler_params=cp,
    )(xw, xw, xw, w1)

    sc1, sh1 = _bn_affine(stats1, count, g1, be1)

    w2 = jnp.pad(params["w2"], ((0, cout_p - cout), (0, cout_p - cout))).astype(jnp.bfloat16)
    b2 = _pad_last(params["b2"], cout_p)

    out = pl.pallas_call(
        _final_head_kernel,
        grid=(T,),
        in_specs=[tile_spec, vec_spec, vec_spec,
                  pl.BlockSpec((cout_p, cout_p), lambda t: (0, 0)), vec_spec],
        out_specs=tile_spec,
        out_shape=jax.ShapeDtypeStruct((N, H, W, cout_p), out_dtype),
        compiler_params=cp,
    )(t1_raw, sc1, sh1, w2, b2)
    return out[..., :cout]


def resblock_dec(x_nchw, level, params, final=False, **kw):
    """Forward pass of ResBlock_dec; NCHW in / NCHW out (PyTorch layout).

    For a full decoder stack prefer resblock_dec_nhwc end-to-end (optionally
    with out_dtype=jnp.bfloat16) to avoid per-block transposes / f32 traffic.
    """
    x = jnp.transpose(x_nchw, (0, 2, 3, 1))
    out = resblock_dec_nhwc(x, level, params, final=final, **kw)
    return jnp.transpose(out, (0, 3, 1, 2))


# ----------------------------------------------------------------------------
# Deterministic parameter initialization (matches the PyTorch module's params;
# the pre-BN conv biases b1/b2/b3 exist but are mathematically cancelled by
# training-mode BN, so the kernels skip them while the reference keeps them).
# ----------------------------------------------------------------------------
def _hex_mask():
    m = jnp.ones((3, 3), jnp.float32)
    m = m.at[0, 2].set(0.0).at[2, 0].set(0.0)
    return m[:, :, None, None]


def init_params(key, in_channels, out_channels, final=False):
    ks = jax.random.split(key, 16)

    def phd_w(k, ci, co):
        return (0.1 * jax.random.normal(k, (3, 3, ci, co), jnp.float32)) * _hex_mask()

    def vec(k, scale=0.1, offset=0.0):
        return offset + scale * jax.random.normal(k, (1, out_channels), jnp.float32)

    p = {
        "w1": phd_w(ks[0], in_channels, out_channels),
        "b1": vec(ks[1]),
        "g1": vec(ks[2], offset=1.0),
        "be1": vec(ks[3]),
        "b2": vec(ks[5]),
        "g2": vec(ks[6], offset=1.0),
        "be2": vec(ks[7]),
        "w3": phd_w(ks[8], in_channels, out_channels),
        "b3": vec(ks[9]),
        "g3": vec(ks[10], offset=1.0),
        "be3": vec(ks[11]),
    }
    if final:
        p["w2"] = 0.1 * jax.random.normal(ks[4], (out_channels, out_channels), jnp.float32)
    else:
        p["w2"] = phd_w(ks[4], out_channels, out_channels)
    return p


# ----------------------------------------------------------------------------
# Pure-JAX reference (full f32, faithful to the PyTorch forward)
# ----------------------------------------------------------------------------
def _zero_pad1(x_nhwc):
    return jnp.pad(x_nhwc, ((0, 0), (1, 1), (1, 1), (0, 0)))


def _ref_conv3x3(xpad, w, b):
    out = lax.conv_general_dilated(
        xpad, w, window_strides=(1, 1), padding="VALID",
        dimension_numbers=("NHWC", "HWIO", "NHWC"),
        precision=lax.Precision.HIGHEST)
    return out + b.reshape(1, 1, 1, -1)


def _ref_bn(t, g, be):
    mean = jnp.mean(t, axis=(0, 1, 2), keepdims=True)
    var = jnp.mean(jnp.square(t - mean), axis=(0, 1, 2), keepdims=True)
    return (t - mean) * lax.rsqrt(var + BN_EPS) * g.reshape(1, 1, 1, -1) \
        + be.reshape(1, 1, 1, -1)


def resblock_dec_ref(x_nchw, level, params, final=False):
    del level
    x = jnp.transpose(x_nchw, (0, 2, 3, 1)).astype(jnp.float32)
    if not final:
        x = jnp.repeat(jnp.repeat(x, 2, axis=1), 2, axis=2)
    xpad = _zero_pad1(x)
    t1 = jnp.maximum(
        _ref_bn(_ref_conv3x3(xpad, params["w1"], params["b1"]),
                params["g1"], params["be1"]), 0.0)
    if final:
        t2 = jnp.einsum("nhwc,cd->nhwd", t1, params["w2"],
                        precision=lax.Precision.HIGHEST) + params["b2"].reshape(1, 1, 1, -1)
        return jnp.transpose(t2, (0, 3, 1, 2))
    t1pad = _zero_pad1(t1)
    t2 = _ref_bn(_ref_conv3x3(t1pad, params["w2"], params["b2"]),
                 params["g2"], params["be2"])
    idn = _ref_bn(_ref_conv3x3(xpad, params["w3"], params["b3"]),
                  params["g3"], params["be3"])
    return jnp.transpose(jnp.maximum(t2 + idn, 0.0), (0, 3, 1, 2))


# ----------------------------------------------------------------------------
if __name__ == "__main__":
    key = jax.random.PRNGKey(0)
    kx, kp, kpf = jax.random.split(key, 3)

    in_channels, out_channels = 4, 8
    x = jax.random.normal(kx, (2, in_channels, 16, 16), jnp.float32)
    level = 3

    # Final=False path (unpooling -> 32x32 output), 4 row tiles in the grid.
    params = init_params(kp, in_channels, out_channels, final=False)
    y = jax.block_until_ready(resblock_dec(x, level, params, final=False,
                                           max_tile_rows=8))
    y_ref = resblock_dec_ref(x, level, params, final=False)
    assert y.shape == (2, out_channels, 32, 32), y.shape
    max_err = float(jnp.max(jnp.abs(y - y_ref)))
    assert jnp.allclose(y, y_ref, rtol=5e-2, atol=5e-2), max_err

    # Final=True path (no unpooling, 1x1 conv2, early return), 2 row tiles.
    params_f = init_params(kpf, in_channels, out_channels, final=True)
    y_f = jax.block_until_ready(resblock_dec(x, level, params_f, final=True,
                                             max_tile_rows=8))
    y_f_ref = resblock_dec_ref(x, level, params_f, final=True)
    assert y_f.shape == (2, out_channels, 16, 16), y_f.shape
    max_err_f = float(jnp.max(jnp.abs(y_f - y_f_ref)))
    assert jnp.allclose(y_f, y_f_ref, rtol=5e-2, atol=5e-2), max_err_f

    print("KERNEL_OK")
</pallas_src>

<mosaic_0001>
module attributes {stable_mosaic.version = 11 : i64} {
  func.func @_stage1_kernel(%arg0: i32, %arg1: memref<2x1x34x128xbf16, #tpu.memory_space<vmem>>, %arg2: memref<2x4x34x128xbf16, #tpu.memory_space<vmem>>, %arg3: memref<2x1x34x128xbf16, #tpu.memory_space<vmem>>, %arg4: memref<7x128x256xbf16, #tpu.memory_space<vmem>>, %arg5: memref<2x8x32x128xf32, #tpu.memory_space<vmem>>, %arg6: memref<2x8x32x128xf32, #tpu.memory_space<vmem>>, %arg7: memref<1x2x256xf32, #tpu.memory_space<vmem>>, %arg8: memref<2x10x34x128xbf16, #tpu.memory_space<vmem>>) attributes {dimension_semantics = [#tpu.dimension_semantics<parallel>], iteration_bounds = array<i64: 4>, scalar_prefetch = 0 : i64, scratch_operands = 1 : i64, tpu.core_type = #tpu.core_type<tc>, window_params = [{transform_indices = @transform_0, window_bounds = array<i64: 2, 1, 34, 128>}, {transform_indices = @transform_1, window_bounds = array<i64: 2, 4, 34, 128>}, {transform_indices = @transform_2, window_bounds = array<i64: 2, 1, 34, 128>}, {pipeline_mode = #tpu.pipeline_mode<synchronous>, transform_indices = @transform_3, window_bounds = array<i64: 7, 128, 256>}, {transform_indices = @transform_4, window_bounds = array<i64: 2, 8, 32, 128>}, {transform_indices = @transform_5, window_bounds = array<i64: 2, 8, 32, 128>}, {transform_indices = @transform_6, window_bounds = array<i64: 1, 2, 256>}]} {
    %c0 = arith.constant 0 : index
    %c0_0 = arith.constant 0 : index
    %c0_1 = arith.constant 0 : index
    %c0_2 = arith.constant 0 : index
    %0 = vector.load %arg2[%c0, %c0_0, %c0_1, %c0_2] : memref<2x4x34x128xbf16, #tpu.memory_space<vmem>>, vector<2x4x34x128xbf16>
    %1 = vector.extract_strided_slice %0 {offsets = [0, 0, 0, 0], sizes = [2, 1, 34, 128], strides = [1, 1, 1, 1]} : vector<2x4x34x128xbf16> to vector<2x1x34x128xbf16>
    %c0_3 = arith.constant 0 : index
    %c1 = arith.constant 1 : index
    %c0_4 = arith.constant 0 : index
    %c0_5 = arith.constant 0 : index
    %2 = vector.load %arg8[%c0_3, %c1, %c0_4, %c0_5] : memref<2x10x34x128xbf16, #tpu.memory_space<vmem>>, vector<2x1x34x128xbf16>
    tpu.vector_store %arg8[%c0_3, %c1, %c0_4, %c0_5], %1 {strides = array<i32>} : memref<2x10x34x128xbf16, #tpu.memory_space<vmem>>, vector<2x1x34x128xbf16>,
    %c0_6 = arith.constant 0 : index
    %c2 = arith.constant 2 : index
    %c0_7 = arith.constant 0 : index
    %c0_8 = arith.constant 0 : index
    %3 = vector.load %arg8[%c0_6, %c2, %c0_7, %c0_8] : memref<2x10x34x128xbf16, #tpu.memory_space<vmem>>, vector<2x1x34x128xbf16>
    tpu.vector_store %arg8[%c0_6, %c2, %c0_7, %c0_8], %1 {strides = array<i32>} : memref<2x10x34x128xbf16, #tpu.memory_space<vmem>>, vector<2x1x34x128xbf16>,
    %4 = vector.extract_strided_slice %0 {offsets = [0, 1, 0, 0], sizes = [2, 1, 34, 128], strides = [1, 1, 1, 1]} : vector<2x4x34x128xbf16> to vector<2x1x34x128xbf16>
    %c0_9 = arith.constant 0 : index
    %c3 = arith.constant 3 : index
    %c0_10 = arith.constant 0 : index
    %c0_11 = arith.constant 0 : index
    %5 = vector.load %arg8[%c0_9, %c3, %c0_10, %c0_11] : memref<2x10x34x128xbf16, #tpu.memory_space<vmem>>, vector<2x1x34x128xbf16>
    tpu.vector_store %arg8[%c0_9, %c3, %c0_10, %c0_11], %4 {strides = array<i32>} : memref<2x10x34x128xbf16, #tpu.memory_space<vmem>>, vector<2x1x34x128xbf16>,
    %c0_12 = arith.constant 0 : index
    %c4 = arith.constant 4 : index
    %c0_13 = arith.constant 0 : index
    %c0_14 = arith.constant 0 : index
    %6 = vector.load %arg8[%c0_12, %c4, %c0_13, %c0_14] : memref<2x10x34x128xbf16, #tpu.memory_space<vmem>>, vector<2x1x34x128xbf16>
    tpu.vector_store %arg8[%c0_12, %c4, %c0_13, %c0_14], %4 {strides = array<i32>} : memref<2x10x34x128xbf16, #tpu.memory_space<vmem>>, vector<2x1x34x128xbf16>,
    %7 = vector.extract_strided_slice %0 {offsets = [0, 2, 0, 0], sizes = [2, 1, 34, 128], strides = [1, 1, 1, 1]} : vector<2x4x34x128xbf16> to vector<2x1x34x128xbf16>
    %c0_15 = arith.constant 0 : index
    %c5 = arith.constant 5 : index
    %c0_16 = arith.constant 0 : index
    %c0_17 = arith.constant 0 : index
    %8 = vector.load %arg8[%c0_15, %c5, %c0_16, %c0_17] : memref<2x10x34x128xbf16, #tpu.memory_space<vmem>>, vector<2x1x34x128xbf16>
    tpu.vector_store %arg8[%c0_15, %c5, %c0_16, %c0_17], %7 {strides = array<i32>} : memref<2x10x34x128xbf16, #tpu.memory_space<vmem>>, vector<2x1x34x128xbf16>,
    %c0_18 = arith.constant 0 : index
    %c6 = arith.constant 6 : index
    %c0_19 = arith.constant 0 : index
    %c0_20 = arith.constant 0 : index
    %9 = vector.load %arg8[%c0_18, %c6, %c0_19, %c0_20] : memref<2x10x34x128xbf16, #tpu.memory_space<vmem>>, vector<2x1x34x128xbf16>
    tpu.vector_store %arg8[%c0_18, %c6, %c0_19, %c0_20], %7 {strides = array<i32>} : memref<2x10x34x128xbf16, #tpu.memory_space<vmem>>, vector<2x1x34x128xbf16>,
    %10 = vector.extract_strided_slice %0 {offsets = [0, 3, 0, 0], sizes = [2, 1, 34, 128], strides = [1, 1, 1, 1]} : vector<2x4x34x128xbf16> to vector<2x1x34x128xbf16>
    %c0_21 = arith.constant 0 : index
    %c7 = arith.constant 7 : index
    %c0_22 = arith.constant 0 : index
    %c0_23 = arith.constant 0 : index
    %11 = vector.load %arg8[%c0_21, %c7, %c0_22, %c0_23] : memref<2x10x34x128xbf16, #tpu.memory_space<vmem>>, vector<2x1x34x128xbf16>
    tpu.vector_store %arg8[%c0_21, %c7, %c0_22, %c0_23], %10 {strides = array<i32>} : memref<2x10x34x128xbf16, #tpu.memory_space<vmem>>, vector<2x1x34x128xbf16>,
    %c0_24 = arith.constant 0 : index
    %c8 = arith.constant 8 : index
    %c0_25 = arith.constant 0 : index
    %c0_26 = arith.constant 0 : index
    %12 = vector.load %arg8[%c0_24, %c8, %c0_25, %c0_26] : memref<2x10x34x128xbf16, #tpu.memory_space<vmem>>, vector<2x1x34x128xbf16>
    tpu.vector_store %arg8[%c0_24, %c8, %c0_25, %c0_26], %10 {strides = array<i32>} : memref<2x10x34x128xbf16, #tpu.memory_space<vmem>>, vector<2x1x34x128xbf16>,
    %cst = arith.constant 0.000000e+00 : bf16
    %13 = vector.broadcast %cst : bf16 to vector<2x1x34x128xbf16>
    %c0_i32 = arith.constant 0 : i32
    %14 = arith.cmpi eq, %arg0, %c0_i32 : i32
    %15 = arith.extui %14 : i1 to i32
    %c0_i32_27 = arith.constant 0 : i32
    %16 = arith.cmpi ne, %15, %c0_i32_27 : i32
    scf.if %16 {
      %c0_105 = arith.constant 0 : index
      %c0_106 = arith.constant 0 : index
      %c0_107 = arith.constant 0 : index
      %c0_108 = arith.constant 0 : index
      %82 = vector.load %arg8[%c0_105, %c0_106, %c0_107, %c0_108] : memref<2x10x34x128xbf16, #tpu.memory_space<vmem>>, vector<2x1x34x128xbf16>
      tpu.vector_store %arg8[%c0_105, %c0_106, %c0_107, %c0_108], %13 {strides = array<i32>} : memref<2x10x34x128xbf16, #tpu.memory_space<vmem>>, vector<2x1x34x128xbf16>,
    } else {
    }
    %c0_i32_28 = arith.constant 0 : i32
    %17 = arith.cmpi sgt, %arg0, %c0_i32_28 : i32
    %18 = arith.extui %17 : i1 to i32
    %c0_i32_29 = arith.constant 0 : i32
    %19 = arith.cmpi ne, %18, %c0_i32_29 : i32
    scf.if %19 {
      %c0_105 = arith.constant 0 : index
      %c0_106 = arith.constant 0 : index
      %c0_107 = arith.constant 0 : index
      %c0_108 = arith.constant 0 : index
      %82 = vector.load %arg1[%c0_105, %c0_106, %c0_107, %c0_108] : memref<2x1x34x128xbf16, #tpu.memory_space<vmem>>, vector<2x1x34x128xbf16>
      %c0_109 = arith.constant 0 : index
      %c0_110 = arith.constant 0 : index
      %c0_111 = arith.constant 0 : index
      %c0_112 = arith.constant 0 : index
      %83 = vector.load %arg8[%c0_109, %c0_110, %c0_111, %c0_112] : memref<2x10x34x128xbf16, #tpu.memory_space<vmem>>, vector<2x1x34x128xbf16>
      tpu.vector_store %arg8[%c0_109, %c0_110, %c0_111, %c0_112], %82 {strides = array<i32>} : memref<2x10x34x128xbf16, #tpu.memory_space<vmem>>, vector<2x1x34x128xbf16>,
    } else {
    }
    %c3_i32 = arith.constant 3 : i32
    %20 = arith.cmpi eq, %arg0, %c3_i32 : i32
    %21 = arith.extui %20 : i1 to i32
    %c0_i32_30 = arith.constant 0 : i32
    %22 = arith.cmpi ne, %21, %c0_i32_30 : i32
    scf.if %22 {
      %c0_105 = arith.constant 0 : index
      %c9 = arith.constant 9 : index
      %c0_106 = arith.constant 0 : index
      %c0_107 = arith.constant 0 : index
      %82 = vector.load %arg8[%c0_105, %c9, %c0_106, %c0_107] : memref<2x10x34x128xbf16, #tpu.memory_space<vmem>>, vector<2x1x34x128xbf16>
      tpu.vector_store %arg8[%c0_105, %c9, %c0_106, %c0_107], %13 {strides = array<i32>} : memref<2x10x34x128xbf16, #tpu.memory_space<vmem>>, vector<2x1x34x128xbf16>,
    } else {
    }
    %c3_i32_31 = arith.constant 3 : i32
    %23 = arith.cmpi slt, %arg0, %c3_i32_31 : i32
    %24 = arith.extui %23 : i1 to i32
    %c0_i32_32 = arith.constant 0 : i32
    %25 = arith.cmpi ne, %24, %c0_i32_32 : i32
    scf.if %25 {
      %c0_105 = arith.constant 0 : index
      %c0_106 = arith.constant 0 : index
      %c0_107 = arith.constant 0 : index
      %c0_108 = arith.constant 0 : index
      %82 = vector.load %arg3[%c0_105, %c0_106, %c0_107, %c0_108] : memref<2x1x34x128xbf16, #tpu.memory_space<vmem>>, vector<2x1x34x128xbf16>
      %c0_109 = arith.constant 0 : index
      %c9 = arith.constant 9 : index
      %c0_110 = arith.constant 0 : index
      %c0_111 = arith.constant 0 : index
      %83 = vector.load %arg8[%c0_109, %c9, %c0_110, %c0_111] : memref<2x10x34x128xbf16, #tpu.memory_space<vmem>>, vector<2x1x34x128xbf16>
      tpu.vector_store %arg8[%c0_109, %c9, %c0_110, %c0_111], %82 {strides = array<i32>} : memref<2x10x34x128xbf16, #tpu.memory_space<vmem>>, vector<2x1x34x128xbf16>,
    } else {
    }
    %c0_33 = arith.constant 0 : index
    %c0_34 = arith.constant 0 : index
    %c0_35 = arith.constant 0 : index
    %c0_36 = arith.constant 0 : index
    %26 = vector.load %arg8[%c0_33, %c0_34, %c0_35, %c0_36] : memref<2x10x34x128xbf16, #tpu.memory_space<vmem>>, vector<2x8x32x128xbf16>
    %27 = vector.shape_cast %26 : vector<2x8x32x128xbf16> to vector<512x128xbf16>
    %c0_37 = arith.constant 0 : index
    %c0_38 = arith.constant 0 : index
    %c0_39 = arith.constant 0 : index
    %28 = vector.load %arg4[%c0_37, %c0_38, %c0_39] : memref<7x128x256xbf16, #tpu.memory_space<vmem>>, vector<1x128x256xbf16>
    %29 = vector.shape_cast %28 : vector<1x128x256xbf16> to vector<128x256xbf16>
    %cst_40 = arith.constant dense<0.000000e+00> : vector<512x256xf32>
    %30 = tpu.matmul %27, %29, %cst_40 {dimension_numbers = #tpu.dot_dimension_numbers<[1], [0], [0], [1], [0, 0, 1, 1], [], []>} : vector<512x128xbf16>, vector<128x256xbf16>, vector<512x256xf32> -> vector<512x256xf32>
    %c0_41 = arith.constant 0 : index
    %c0_42 = arith.constant 0 : index
    %c1_43 = arith.constant 1 : index
    %c0_44 = arith.constant 0 : index
    %31 = vector.load %arg8[%c0_41, %c0_42, %c1_43, %c0_44] : memref<2x10x34x128xbf16, #tpu.memory_space<vmem>>, vector<2x8x32x128xbf16>
    %32 = vector.shape_cast %31 : vector<2x8x32x128xbf16> to vector<512x128xbf16>
    %c1_45 = arith.constant 1 : index
    %c0_46 = arith.constant 0 : index
    %c0_47 = arith.constant 0 : index
    %33 = vector.load %arg4[%c1_45, %c0_46, %c0_47] : memref<7x128x256xbf16, #tpu.memory_space<vmem>>, vector<1x128x256xbf16>
    %34 = vector.shape_cast %33 : vector<1x128x256xbf16> to vector<128x256xbf16>
    %cst_48 = arith.constant dense<0.000000e+00> : vector<512x256xf32>
    %35 = tpu.matmul %32, %34, %cst_48 {dimension_numbers = #tpu.dot_dimension_numbers<[1], [0], [0], [1], [0, 0, 1, 1], [], []>} : vector<512x128xbf16>, vector<128x256xbf16>, vector<512x256xf32> -> vector<512x256xf32>
    %36 = arith.addf %30, %35 : vector<512x256xf32>
    %c0_49 = arith.constant 0 : index
    %c1_50 = arith.constant 1 : index
    %c0_51 = arith.constant 0 : index
    %c0_52 = arith.constant 0 : index
    %37 = vector.load %arg8[%c0_49, %c1_50, %c0_51, %c0_52] : memref<2x10x34x128xbf16, #tpu.memory_space<vmem>>, vector<2x8x32x128xbf16>
    %38 = vector.shape_cast %37 : vector<2x8x32x128xbf16> to vector<512x128xbf16>
    %c2_53 = arith.constant 2 : index
    %c0_54 = arith.constant 0 : index
    %c0_55 = arith.constant 0 : index
    %39 = vector.load %arg4[%c2_53, %c0_54, %c0_55] : memref<7x128x256xbf16, #tpu.memory_space<vmem>>, vector<1x128x256xbf16>
    %40 = vector.shape_cast %39 : vector<1x128x256xbf16> to vector<128x256xbf16>
    %cst_56 = arith.constant dense<0.000000e+00> : vector<512x256xf32>
    %41 = tpu.matmul %38, %40, %cst_56 {dimension_numbers = #tpu.dot_dimension_numbers<[1], [0], [0], [1], [0, 0, 1, 1], [], []>} : vector<512x128xbf16>, vector<128x256xbf16>, vector<512x256xf32> -> vector<512x256xf32>
    %42 = arith.addf %36, %41 : vector<512x256xf32>
    %c0_57 = arith.constant 0 : index
    %c1_58 = arith.constant 1 : index
    %c1_59 = arith.constant 1 : index
    %c0_60 = arith.constant 0 : index
    %43 = vector.load %arg8[%c0_57, %c1_58, %c1_59, %c0_60] : memref<2x10x34x128xbf16, #tpu.memory_space<vmem>>, vector<2x8x32x128xbf16>
    %44 = vector.shape_cast %43 : vector<2x8x32x128xbf16> to vector<512x128xbf16>
    %c3_61 = arith.constant 3 : index
    %c0_62 = arith.constant 0 : index
    %c0_63 = arith.constant 0 : index
    %45 = vector.load %arg4[%c3_61, %c0_62, %c0_63] : memref<7x128x256xbf16, #tpu.memory_space<vmem>>, vector<1x128x256xbf16>
    %46 = vector.shape_cast %45 : vector<1x128x256xbf16> to vector<128x256xbf16>
    %cst_64 = arith.constant dense<0.000000e+00> : vector<512x256xf32>
    %47 = tpu.matmul %44, %46, %cst_64 {dimension_numbers = #tpu.dot_dimension_numbers<[1], [0], [0], [1], [0, 0, 1, 1], [], []>} : vector<512x128xbf16>, vector<128x256xbf16>, vector<512x256xf32> -> vector<512x256xf32>
    %48 = arith.addf %42, %47 : vector<512x256xf32>
    %c0_65 = arith.constant 0 : index
    %c1_66 = arith.constant 1 : index
    %c2_67 = arith.constant 2 : index
    %c0_68 = arith.constant 0 : index
    %49 = vector.load %arg8[%c0_65, %c1_66, %c2_67, %c0_68] : memref<2x10x34x128xbf16, #tpu.memory_space<vmem>>, vector<2x8x32x128xbf16>
    %50 = vector.shape_cast %49 : vector<2x8x32x128xbf16> to vector<512x128xbf16>
    %c4_69 = arith.constant 4 : index
    %c0_70 = arith.constant 0 : index
    %c0_71 = arith.constant 0 : index
    %51 = vector.load %arg4[%c4_69, %c0_70, %c0_71] : memref<7x128x256xbf16, #tpu.memory_space<vmem>>, vector<1x128x256xbf16>
    %52 = vector.shape_cast %51 : vector<1x128x256xbf16> to vector<128x256xbf16>
    %cst_72 = arith.constant dense<0.000000e+00> : vector<512x256xf32>
    %53 = tpu.matmul %50, %52, %cst_72 {dimension_numbers = #tpu.dot_dimension_numbers<[1], [0], [0], [1], [0, 0, 1, 1], [], []>} : vector<512x128xbf16>, vector<128x256xbf16>, vector<512x256xf32> -> vector<512x256xf32>
    %54 = arith.addf %48, %53 : vector<512x256xf32>
    %c0_73 = arith.constant 0 : index
    %c2_74 = arith.constant 2 : index
    %c1_75 = arith.constant 1 : index
    %c0_76 = arith.constant 0 : index
    %55 = vector.load %arg8[%c0_73, %c2_74, %c1_75, %c0_76] : memref<2x10x34x128xbf16, #tpu.memory_space<vmem>>, vector<2x8x32x128xbf16>
    %56 = vector.shape_cast %55 : vector<2x8x32x128xbf16> to vector<512x128xbf16>
    %c5_77 = arith.constant 5 : index
    %c0_78 = arith.constant 0 : index
    %c0_79 = arith.constant 0 : index
    %57 = vector.load %arg4[%c5_77, %c0_78, %c0_79] : memref<7x128x256xbf16, #tpu.memory_space<vmem>>, vector<1x128x256xbf16>
    %58 = vector.shape_cast %57 : vector<1x128x256xbf16> to vector<128x256xbf16>
    %cst_80 = arith.constant dense<0.000000e+00> : vector<512x256xf32>
    %59 = tpu.matmul %56, %58, %cst_80 {dimension_numbers = #tpu.dot_dimension_numbers<[1], [0], [0], [1], [0, 0, 1, 1], [], []>} : vector<512x128xbf16>, vector<128x256xbf16>, vector<512x256xf32> -> vector<512x256xf32>
    %60 = arith.addf %54, %59 : vector<512x256xf32>
    %c0_81 = arith.constant 0 : index
    %c2_82 = arith.constant 2 : index
    %c2_83 = arith.constant 2 : index
    %c0_84 = arith.constant 0 : index
    %61 = vector.load %arg8[%c0_81, %c2_82, %c2_83, %c0_84] : memref<2x10x34x128xbf16, #tpu.memory_space<vmem>>, vector<2x8x32x128xbf16>
    %62 = vector.shape_cast %61 : vector<2x8x32x128xbf16> to vector<512x128xbf16>
    %c6_85 = arith.constant 6 : index
    %c0_86 = arith.constant 0 : index
    %c0_87 = arith.constant 0 : index
    %63 = vector.load %arg4[%c6_85, %c0_86, %c0_87] : memref<7x128x256xbf16, #tpu.memory_space<vmem>>, vector<1x128x256xbf16>
    %64 = vector.shape_cast %63 : vector<1x128x256xbf16> to vector<128x256xbf16>
    %cst_88 = arith.constant dense<0.000000e+00> : vector<512x256xf32>
    %65 = tpu.matmul %62, %64, %cst_88 {dimension_numbers = #tpu.dot_dimension_numbers<[1], [0], [0], [1], [0, 0, 1, 1], [], []>} : vector<512x128xbf16>, vector<128x256xbf16>, vector<512x256xf32> -> vector<512x256xf32>
    %66 = arith.addf %60, %65 : vector<512x256xf32>
    %cst_89 = arith.constant dense<0.000000e+00> : vector<256xf32>
    %67 = vector.multi_reduction <add>, %66, %cst_89 [0] : vector<512x256xf32> to vector<256xf32>
    %68 = vector.shape_cast %67 : vector<256xf32> to vector<1x256xf32>
    %69 = vector.shape_cast %68 : vector<1x256xf32> to vector<1x1x256xf32>
    %c0_90 = arith.constant 0 : index
    %c0_91 = arith.constant 0 : index
    %c0_92 = arith.constant 0 : index
    %70 = vector.load %arg7[%c0_90, %c0_91, %c0_92] : memref<1x2x256xf32, #tpu.memory_space<vmem>>, vector<1x1x256xf32>
    tpu.vector_store %arg7[%c0_90, %c0_91, %c0_92], %69 {strides = array<i32>} : memref<1x2x256xf32, #tpu.memory_space<vmem>>, vector<1x1x256xf32>,
    %71 = arith.mulf %66, %66 : vector<512x256xf32>
    %cst_93 = arith.constant dense<0.000000e+00> : vector<256xf32>
    %72 = vector.multi_reduction <add>, %71, %cst_93 [0] : vector<512x256xf32> to vector<256xf32>
    %73 = vector.shape_cast %72 : vector<256xf32> to vector<1x256xf32>
    %74 = vector.shape_cast %73 : vector<1x256xf32> to vector<1x1x256xf32>
    %c0_94 = arith.constant 0 : index
    %c1_95 = arith.constant 1 : index
    %c0_96 = arith.constant 0 : index
    %75 = vector.load %arg7[%c0_94, %c1_95, %c0_96] : memref<1x2x256xf32, #tpu.memory_space<vmem>>, vector<1x1x256xf32>
    tpu.vector_store %arg7[%c0_94, %c1_95, %c0_96], %74 {strides = array<i32>} : memref<1x2x256xf32, #tpu.memory_space<vmem>>, vector<1x1x256xf32>,
    %76 = vector.extract_strided_slice %66 {offsets = [0, 0], sizes = [512, 128], strides = [1, 1]} : vector<512x256xf32> to vector<512x128xf32>
    %77 = vector.shape_cast %76 : vector<512x128xf32> to vector<2x8x32x128xf32>
    %c0_97 = arith.constant 0 : index
    %c0_98 = arith.constant 0 : index
    %c0_99 = arith.constant 0 : index
    %c0_100 = arith.constant 0 : index
    %78 = vector.load %arg5[%c0_97, %c0_98, %c0_99, %c0_100] : memref<2x8x32x128xf32, #tpu.memory_space<vmem>>, vector<2x8x32x128xf32>
    tpu.vector_store %arg5[%c0_97, %c0_98, %c0_99, %c0_100], %77 {strides = array<i32>} : memref<2x8x32x128xf32, #tpu.memory_space<vmem>>, vector<2x8x32x128xf32>,
    %79 = vector.extract_strided_slice %66 {offsets = [0, 128], sizes = [512, 128], strides = [1, 1]} : vector<512x256xf32> to vector<512x128xf32>
    %80 = vector.shape_cast %79 : vector<512x128xf32> to vector<2x8x32x128xf32>
    %c0_101 = arith.constant 0 : index
    %c0_102 = arith.constant 0 : index
    %c0_103 = arith.constant 0 : index
    %c0_104 = arith.constant 0 : index
    %81 = vector.load %arg6[%c0_101, %c0_102, %c0_103, %c0_104] : memref<2x8x32x128xf32, #tpu.memory_space<vmem>>, vector<2x8x32x128xf32>
    tpu.vector_store %arg6[%c0_101, %c0_102, %c0_103, %c0_104], %80 {strides = array<i32>} : memref<2x8x32x128xf32, #tpu.memory_space<vmem>>, vector<2x8x32x128xf32>,
    return
  }
  func.func @transform_0(%arg0: i32) -> (i32, i32, i32, i32) {
    %c4_i32 = arith.constant 4 : i32
    %0 = arith.muli %arg0, %c4_i32 : i32
    %c1_i32 = arith.constant 1 : i32
    %1 = arith.subi %0, %c1_i32 : i32
    %c0_i32 = arith.constant 0 : i32
    %2 = arith.maxsi %1, %c0_i32 : i32
    %c0_i32_0 = arith.constant 0 : i32
    %c0_i32_1 = arith.constant 0 : i32
    %c0_i32_2 = arith.constant 0 : i32
    %c0_i32_3 = arith.constant 0 : i32
    return %c0_i32_0, %2, %c0_i32_1, %c0_i32_2 : i32, i32, i32, i32
  }
  func.func @transform_1(%arg0: i32) -> (i32, i32, i32, i32) {
    %c0_i32 = arith.constant 0 : i32
    %c0_i32_0 = arith.constant 0 : i32
    %c0_i32_1 = arith.constant 0 : i32
    %c0_i32_2 = arith.constant 0 : i32
    return %c0_i32, %arg0, %c0_i32_0, %c0_i32_1 : i32, i32, i32, i32
  }
  func.func @transform_2(%arg0: i32) -> (i32, i32, i32, i32) {
    %c1_i32 = arith.constant 1 : i32
    %0 = arith.addi %arg0, %c1_i32 : i32
    %c4_i32 = arith.constant 4 : i32
    %1 = arith.muli %0, %c4_i32 : i32
    %c15_i32 = arith.constant 15 : i32
    %2 = arith.minsi %1, %c15_i32 : i32
    %c0_i32 = arith.constant 0 : i32
    %c0_i32_0 = arith.constant 0 : i32
    %c0_i32_1 = arith.constant 0 : i32
    %c0_i32_2 = arith.constant 0 : i32
    return %c0_i32, %2, %c0_i32_0, %c0_i32_1 : i32, i32, i32, i32
  }
  func.func @transform_3(%arg0: i32) -> (i32, i32, i32) {
    %c0_i32 = arith.constant 0 : i32
    %c0_i32_0 = arith.constant 0 : i32
    %c0_i32_1 = arith.constant 0 : i32
    %c0_i32_2 = arith.constant 0 : i32
    return %c0_i32, %c0_i32_0, %c0_i32_1 : i32, i32, i32
  }
  func.func @transform_4(%arg0: i32) -> (i32, i32, i32, i32) {
    %c0_i32 = arith.constant 0 : i32
    %c0_i32_0 = arith.constant 0 : i32
    %c0_i32_1 = arith.constant 0 : i32
    %c0_i32_2 = arith.constant 0 : i32
    return %c0_i32, %arg0, %c0_i32_0, %c0_i32_1 : i32, i32, i32, i32
  }
  func.func @transform_5(%arg0: i32) -> (i32, i32, i32, i32) {
    %c0_i32 = arith.constant 0 : i32
    %c0_i32_0 = arith.constant 0 : i32
    %c0_i32_1 = arith.constant 0 : i32
    %c0_i32_2 = arith.constant 0 : i32
    return %c0_i32, %arg0, %c0_i32_0, %c0_i32_1 : i32, i32, i32, i32
  }
  func.func @transform_6(%arg0: i32) -> (i32, i32, i32) {
    %c0_i32 = arith.constant 0 : i32
    %c0_i32_0 = arith.constant 0 : i32
    %c0_i32_1 = arith.constant 0 : i32
    return %arg0, %c0_i32, %c0_i32_0 : i32, i32, i32
  }
}

</mosaic_0001>

<bundles_post_ra>
// kernel: tpu_custom_call.1
= control target key start
LH: loop header
LB: loop body
LE: loop exit
PB: predicated region body
PF: predicated region fallthrough
CT: control target
= control target key end

     0   :  { %s13690_s0 = inlined_call_operand.vmem [shape: bf16[2,16,34,128], index: 0, kind: input, shape index: {}]   ;;  %s13691_s1 = inlined_call_operand.vmem [shape: bf16[2,16,34,128], index: 1, kind: input, shape index: {}]   ;;  %s13692_s2 = inlined_call_operand.vmem [shape: bf16[2,16,34,128], index: 2, kind: input, shape index: {}]   ;;  %s13693_s3 = inlined_call_operand.vmem [shape: bf16[7,128,256], index: 3, kind: input, shape index: {}]   ;;  %s13694_s4 = inlined_call_operand.hbm [shape: f32[2,32,32,128], index: 4, kind: output, shape index: {0}]   ;;  %s13695_s5 = inlined_call_operand.hbm [shape: f32[2,32,32,128], index: 5, kind: output, shape index: {1}]   ;;  %s13696_s6 = inlined_call_operand.hbm [shape: f32[4,2,256], index: 6, kind: output, shape index: {2}]  }
   0x1   :  { %13702 = sst [smem:[#allocation56_spill]] %s13690_s0 }
   0x2   :  { %12 = vsyncpa [#allocation7], 0 }
   0x3   :  { %14 = vsyncpa [#allocation7 + $0x1], 0 }
   0x4   :  { %15 = vsyncpa [#allocation9], 0 }
   0x5   :  { %17 = vsyncpa [#allocation9 + $0x1], 0  ;;  %s11616_s21 = smov 0   ;;  %s11618_s22 = smov 0  }
   0x6   :  { %s11620_s23 = smov 0   ;;  %s11622_s24 = smov 0  }
   0x7   :  { %s11624_s25 = smov 0   ;;  %s11626_s26 = smov 0  }
   0x8   :  { %s11628_s27 = smov 0   ;;  %s11630_s28 = smov 0  }
   0x9 LB: > { %s11657_s29 = sadd.s32 4294967295, %s11560_s28   ;;  %s13699_s30 = sadd.s32 4294967294, %s11560_s28   ;;  %s11560_s28 = sphi %s11630_s28, %s13790_s28   ;;  %s11556_s27 = sphi %s11628_s27, %s13799_s27   ;;  %s11552_s26 = sphi %s11626_s26, %s13798_s26   ;;  %s11548_s25 = sphi %s11624_s25, %s13797_s25   ;;  %s11544_s24 = sphi %s11622_s24, %s13796_s24   ;;  %s11540_s23 = sphi %s11620_s23, %s13795_s23   ;;  %s11536_s22 = sphi %s11618_s22, %s13794_s22   ;;  %s11532_s21 = sphi %s11616_s21, %s13793_s21  }
   0xa   : > { %s11661_s7 = sadd.s32 1, %s11560_s28   ;;  %s9603_s8 = sshll.u32 %s11560_s28, 2 }
   0xb   : > { %13703 = sst [smem:[#allocation17_spill]] %s11661_s7  ;;  %s9604_s9 = sadd.s32 4294967295, %s9603_s8 }
   0xc   : > { %s10106_s10 = sadd.s32 4, %s9603_s8  ;;  %p29_p0 = scmp.gt.s32.totalorder %s9604_s9, 0 }
   0xd   : > { %s9606_s11 = sadd.s32 4294967295, %s10106_s10  ;;  %s38_s12 = sadd.s32 1, %s11556_s27 }
   0xe   : > { %p33_p1 = scmp.gt.s32.totalorder %s9606_s11, 0  ;;  %s13801_s9 = smov (!%p29_p0, %s9604_s9), 0 }
   0xf   : > { %p45_p2 = scmp.ne.s32.totalorder %s11556_s27, %s11552_s26  ;;  %p46_p3 = scmp.eq.s32.totalorder %s11560_s28, 0 }
  0x10   : > { %s13803_s11 = smov (!%p33_p1, %s9606_s11), 0  ;;  %s61_s14 = ssub.s32 %s11560_s28, %s11661_s7 }
  0x11   : > { %s35_s13 = ssub.s32 %s13801_s9, %s13803_s11  ;;  %p11675_p5 = por %p46_p3, %p45_p2 }
  0x12   : > { %p36_p4 = scmp.eq.s32.totalorder %s35_s13, 0  ;;  %p62_p6 = scmp.eq.s32.totalorder %s61_s14, 0 }
  0x13   : > { %s64_s16 = sadd.s32 1, %s11548_s25  ;;  %p71_p7 = scmp.ne.s32.totalorder %s11548_s25, %s11544_s24 }
  0x14   : > { %s11681_s17 = scalar_select %p36_p4, %s11556_s27, %s38_s12  }
  0x15   : > { %s11684_s18 = scalar_select %p62_p6, %s11548_s25, %s64_s16  }
  0x16   : > { %13705 = sst [smem:[#allocation18_spill]] %s11681_s17  ;;  %p89_p8 = scmp.lt.s32.totalorder %s10106_s10, 15 }
  0x17   : > { %13706 = sst [smem:[#allocation19_spill]] %s11684_s18  ;;  %s10110_s19 = sadd.s32 4, %s10106_s10 }
  0x18   : > { %s98_s20 = sadd.s32 1, %s11540_s23  ;;  %p11694_p9 = por %p71_p7, %p46_p3 }
  0x19   : > { %p93_p10 = scmp.lt.s32.totalorder %s10110_s19, 15  ;;  %s13805_s10 = smov (!%p89_p8, %s10106_s10), 15 }
  0x1a   : > { %p105_p11 = scmp.ne.s32.totalorder %s11540_s23, %s11536_s22  ;;  %p156_p12 = scmp.eq.s32.totalorder %s11657_s29, 3 }
  0x1b   : > { %s13807_s19 = smov (!%p93_p10, %s10110_s19), 15  ;;  %p161_p13 = scmp.ne.s32.totalorder %s11544_s24, %s11532_s21 }
  0x1c   : > { %s95_s11 = ssub.s32 %s13805_s10, %s13807_s19  ;;  %p11708_p1 = por %p105_p11, %p46_p3 }
  0x1d   : > { %p96_p0 = scmp.eq.s32.totalorder %s95_s11, 0  ;;  %p11715_p2 = por %p156_p12, %p71_p7 }
  0x1e   : > { %p162_p4 = scmp.eq.s32.totalorder %s13699_s30, 3  ;;  %p9610_p8 = scmp.ge.s32.totalorder %s11560_s28, 4 }
  0x1f   : > { %s11722_s14 = scalar_select %p96_p0, %s11540_s23, %s98_s20  }
  0x20   : > { %p11724_p6 = por %p162_p4, %p161_p13  ;;  %233 = sbr.rel (%p9610_p8) target bundleno = 74 (0x4a), region = 20 }
  0x27   : > { %236 = sbr.rel (!%p11675_p5) target bundleno = 51 (0x33), region = 24  ;;  %s238_s19 = sand.u32 (%p11675_p5), 1, %s11556_s27  }
  0x28   : > { %s10905_s11 = smul.u32 (%p11675_p5), 20, %s13801_s9  ;;  %s13711_s0 = sld [smem:[#allocation56_spill]] (%p11675_p5) }
  0x29   : > { %s10904_s17 = smul.u32 (%p11675_p5), 40, %s238_s19 }
  0x2b   : > { %s240_s30 = scalar_lea.vmem (%p11675_p5), [#allocation3], %s10904_s17 }
  0x2e   : > { %s247_s20 = scalar_lea.vmem %s13711_s0, %s10905_s11 }
  0x2f   : > { %v263_v0 = vld [vmem:[%s247_s20] sm:$0xff]   ;;  %v267_v1 = vld [vmem:[%s247_s20 + $0x8] sm:$0xff]   ;;  %v271_v2 = vld [vmem:[%s247_s20 + $0x10] sm:$0xf] }
  0x30   : > { %264 = vst [vmem:[%s240_s30] sm:$0xff] %v263_v0   ;;  %268 = vst [vmem:[%s240_s30 + $0x8] sm:$0xff] %v267_v1   ;;  %v273_v3 = vld [vmem:[%s247_s20 + $0x140] sm:$0xff]   ;;  %v277_v4 = vld [vmem:[%s247_s20 + $0x148] sm:$0xff]  }
  0x31   : > { %272 = vst [vmem:[%s240_s30 + $0x10] sm:$0xf] %v271_v2  ;;  %v281_v5 = vld [vmem:[%s247_s20 + $0x150] sm:$0xf]  ;;  %274 = vst [vmem:[%s240_s30 + $0x14] sm:$0xff] %v273_v3  }
  0x32   : > { %278 = vst [vmem:[%s240_s30 + $0x1c] sm:$0xff] %v277_v4   ;;  %282 = vst [vmem:[%s240_s30 + $0x24] sm:$0xf] %v281_v5 }
  0x33 PF: > { %325 = sbr.rel (!%p11694_p9) target bundleno = 66 (0x42), region = 65  ;;  %s327_s7 = sand.u32 (%p11694_p9), 1, %s11548_s25  }
  0x34   : > { %s10907_s9 = smul.u32 (%p11694_p9), 80, %s11560_s28 }
  0x35   : > { %s10906_s15 = smul.u32 (%p11694_p9), 160, %s327_s7 }
  0x36   : > { %s11743_s19 = scalar_lea.vmem (%p11694_p9), %s13691_s1, %s10907_s9 }
  0x37   : > { %v349_v6 = vld [vmem:[%s11743_s19] sm:$0xff] (%p11694_p9)   ;;  %v353_v7 = vld [vmem:[%s11743_s19 + $0x8] sm:$0xff] (%p11694_p9)   ;;  %v357_v8 = vld [vmem:[%s11743_s19 + $0x10] sm:$0xff] (%p11694_p9)   ;;  %s11748_s30 = scalar_lea.vmem (%p11694_p9), [#allocation4], %s10906_s15 }
  0x38   : > { %350 = vst [vmem:[%s11748_s30] sm:$0xff] (%p11694_p9), %v349_v6   ;;  %354 = vst [vmem:[%s11748_s30 + $0x8] sm:$0xff] (%p11694_p9), %v353_v7   ;;  %v361_v9 = vld [vmem:[%s11743_s19 + $0x18] sm:$0xff] (%p11694_p9)   ;;  %v365_v10 = vld [vmem:[%s11743_s19 + $0x20] sm:$0xff] (%p11694_p9)  }
  0x39   : > { %358 = vst [vmem:[%s11748_s30 + $0x10] sm:$0xff] (%p11694_p9), %v357_v8   ;;  %v369_v11 = vld [vmem:[%s11743_s19 + $0x28] sm:$0xff] (%p11694_p9)   ;;  %362 = vst [vmem:[%s11748_s30 + $0x18] sm:$0xff] (%p11694_p9), %v361_v9   ;;  %v373_v12 = vld [vmem:[%s11743_s19 + $0x30] sm:$0xff] (%p11694_p9)  }
  0x3a   : > { %366 = vst [vmem:[%s11748_s30 + $0x20] sm:$0xff] %v365_v10   ;;  %370 = vst [vmem:[%s11748_s30 + $0x28] sm:$0xff] %v369_v11   ;;  %v377_v13 = vld [vmem:[%s11743_s19 + $0x38] sm:$0xff]   ;;  %v381_v14 = vld [vmem:[%s11743_s19 + $0x40] sm:$0xff]  }
  0x3b   : > { %374 = vst [vmem:[%s11748_s30 + $0x30] sm:$0xff] %v373_v12   ;;  %378 = vst [vmem:[%s11748_s30 + $0x38] sm:$0xff] %v377_v13   ;;  %v385_v15 = vld [vmem:[%s11743_s19 + $0x48] sm:$0xff]   ;;  %v389_v16 = vld [vmem:[%s11743_s19 + $0x140] sm:$0xff]  }
  0x3c   : > { %382 = vst [vmem:[%s11748_s30 + $0x40] sm:$0xff] %v381_v14   ;;  %v393_v17 = vld [vmem:[%s11743_s19 + $0x148] sm:$0xff]   ;;  %386 = vst [vmem:[%s11748_s30 + $0x48] sm:$0xff] %v385_v15   ;;  %v397_v18 = vld [vmem:[%s11743_s19 + $0x150] sm:$0xff]  }
  0x3d   : > { %390 = vst [vmem:[%s11748_s30 + $0x50] sm:$0xff] %v389_v16   ;;  %394 = vst [vmem:[%s11748_s30 + $0x58] sm:$0xff] %v393_v17   ;;  %v401_v19 = vld [vmem:[%s11743_s19 + $0x158] sm:$0xff]   ;;  %v405_v20 = vld [vmem:[%s11743_s19 + $0x160] sm:$0xff]  }
  0x3e   : > { %398 = vst [vmem:[%s11748_s30 + $0x60] sm:$0xff] %v397_v18   ;;  %402 = vst [vmem:[%s11748_s30 + $0x68] sm:$0xff] %v401_v19   ;;  %v409_v21 = vld [vmem:[%s11743_s19 + $0x168] sm:$0xff]   ;;  %v413_v22 = vld [vmem:[%s11743_s19 + $0x170] sm:$0xff]  }
  0x3f   : > { %406 = vst [vmem:[%s11748_s30 + $0x70] sm:$0xff] %v405_v20   ;;  %v417_v23 = vld [vmem:[%s11743_s19 + $0x178] sm:$0xff]   ;;  %410 = vst [vmem:[%s11748_s30 + $0x78] sm:$0xff] %v409_v21   ;;  %v421_v24 = vld [vmem:[%s11743_s19 + $0x180] sm:$0xff]  }
  0x40   : > { %414 = vst [vmem:[%s11748_s30 + $0x80] sm:$0xff] %v413_v22   ;;  %418 = vst [vmem:[%s11748_s30 + $0x88] sm:$0xff] %v417_v23   ;;  %v425_v25 = vld [vmem:[%s11743_s19 + $0x188] sm:$0xff]  }
  0x41   : > { %422 = vst [vmem:[%s11748_s30 + $0x90] sm:$0xff] %v421_v24   ;;  %426 = vst [vmem:[%s11748_s30 + $0x98] sm:$0xff] %v425_v25  }
  0x42 PF: > { %531 = sbr.rel (!%p11708_p1) target bundleno = 74 (0x4a), region = 106  ;;  %s533_s8 = sand.u32 (%p11708_p1), 1, %s11540_s23  }
  0x43   : > { %s10909_s11 = smul.u32 (%p11708_p1), 20, %s13805_s10 }
  0x44   : > { %s10908_s20 = smul.u32 (%p11708_p1), 40, %s533_s8 }
  0x45   : > { %s542_s15 = scalar_lea.vmem (%p11708_p1), %s13692_s2, %s10909_s11 }
  0x46   : > { %v558_v26 = vld [vmem:[%s542_s15] sm:$0xff] (%p11708_p1)   ;;  %v562_v27 = vld [vmem:[%s542_s15 + $0x8] sm:$0xff] (%p11708_p1)   ;;  %v566_v28 = vld [vmem:[%s542_s15 + $0x10] sm:$0xf] (%p11708_p1)  ;;  %s535_s18 = scalar_lea.vmem (%p11708_p1), [#allocation5], %s10908_s20 }
  0x47   : > { %559 = vst [vmem:[%s535_s18] sm:$0xff] (%p11708_p1), %v558_v26   ;;  %563 = vst [vmem:[%s535_s18 + $0x8] sm:$0xff] (%p11708_p1), %v562_v27   ;;  %v568_v29 = vld [vmem:[%s542_s15 + $0x140] sm:$0xff] (%p11708_p1)   ;;  %v572_v30 = vld [vmem:[%s542_s15 + $0x148] sm:$0xff] (%p11708_p1)  }
  0x48   : > { %567 = vst [vmem:[%s535_s18 + $0x10] sm:$0xf] (%p11708_p1), %v566_v28  ;;  %v576_v31 = vld [vmem:[%s542_s15 + $0x150] sm:$0xf] (%p11708_p1)  ;;  %569 = vst [vmem:[%s535_s18 + $0x14] sm:$0xff] (%p11708_p1), %v568_v29  }
  0x49   : > { %573 = vst [vmem:[%s535_s18 + $0x1c] sm:$0xff] %v572_v30   ;;  %577 = vst [vmem:[%s535_s18 + $0x24] sm:$0xf] %v576_v31 }
  0x4a PF: > { %p9619_p3 = scmp.ge.s32.totalorder %s11560_s28, 1  ;;  %p619_p5 = scmp.lt.s32.totalorder %s11560_s28, 5 }
  0x4c   : > { %p620_p7 = pnand %p9619_p3, %p619_p5 }
  0x4e   : > { %623 = sbr.rel (%p620_p7) target bundleno = 1370 (0x55a), region = 147 }
  0x55   : > { %s626_s10 = sand.u32 1, %s11552_s26   ;;  %s11798_s12 = sand.u32 1, %s11544_s24  }
  0x56   : > { %s11800_s17 = smul.u32 40, %s626_s10  ;;  %s640_s19 = sand.u32 1, %s11536_s22  }
  0x57   : > { %s10911_s30 = smul.u32 160, %s11798_s12  ;;  %s9620_s8 = sshll.u32 %s11798_s12, 9 }
  0x58   : > { %s11805_s11 = smul.u32 40, %s640_s19  ;;  %s9622_s26 = sshll.u32 %s11798_s12, 2 }
  0x59   : > { %s11807_s20 = scalar_lea.vmem [#allocation4], %s10911_s30  ;;  %s628_s22 = scalar_lea.vmem [#allocation3], %s11800_s17 }
  0x5a   : > { %v699_v32 = vld [vmem:[%s11807_s20] sm:$0xf]  ;;  %v700_v33 = vld [vmem:[%s11807_s20 + $0x4] sm:$0xf]  ;;  %v701_v34 = vld [vmem:[%s11807_s20 + $0x8] sm:$0xf] }
  0x5b   : > { %740 = vst [vmem:[#allocation2 + $0x14] sm:$0xf] %v699_v32  ;;  %751 = vst [vmem:[#allocation2 + $0x28] sm:$0xf] %v699_v32  ;;  %v702_v35 = vld [vmem:[%s11807_s20 + $0xc] sm:$0xf] }
  0x5c   : > { %741 = vst [vmem:[#allocation2 + $0x18] sm:$0xf] %v700_v33  ;;  %752 = vst [vmem:[#allocation2 + $0x2c] sm:$0xf] %v700_v33  ;;  %v703_v36 = vld [vmem:[%s11807_s20 + $0x10] sm:$0x1] }
  0x5d   : > { %742 = vst [vmem:[#allocation2 + $0x1c] sm:$0xf] %v701_v34  ;;  %753 = vst [vmem:[#allocation2 + $0x30] sm:$0xf] %v701_v34  ;;  %v719_v37 = vld [vmem:[%s11807_s20 + $0x50] sm:$0xf] }
  0x5e   : > { %743 = vst [vmem:[#allocation2 + $0x20] sm:$0xf] %v702_v35  ;;  %754 = vst [vmem:[#allocation2 + $0x34] sm:$0xf] %v702_v35  ;;  %v720_v38 = vld [vmem:[%s11807_s20 + $0x54] sm:$0xf] }
  0x5f   : > { %744 = vst [vmem:[#allocation2 + $0x24] sm:$0x1] %v703_v36  ;;  %755 = vst [vmem:[#allocation2 + $0x38] sm:$0x1] %v703_v36  ;;  %v721_v39 = vld [vmem:[%s11807_s20 + $0x58] sm:$0xf] }
  0x60   : > { %745 = vst [vmem:[#allocation2 + $0xdc] sm:$0xf] %v719_v37  ;;  %756 = vst [vmem:[#allocation2 + $0xf0] sm:$0xf] %v719_v37  ;;  %v722_v40 = vld [vmem:[%s11807_s20 + $0x5c] sm:$0xf] }
  0x61   : > { %746 = vst [vmem:[#allocation2 + $0xe0] sm:$0xf] %v720_v38  ;;  %757 = vst [vmem:[#allocation2 + $0xf4] sm:$0xf] %v720_v38  ;;  %v723_v41 = vld [vmem:[%s11807_s20 + $0x60] sm:$0x1] }
  0x62   : > { %747 = vst [vmem:[#allocation2 + $0xe4] sm:$0xf] %v721_v39  ;;  %758 = vst [vmem:[#allocation2 + $0xf8] sm:$0xf] %v721_v39  ;;  %v704_v42 = vld [vmem:[%s11807_s20 + $0x14] sm:$0xf] }
  0x63   : > { %748 = vst [vmem:[#allocation2 + $0xe8] sm:$0xf] %v722_v40  ;;  %759 = vst [vmem:[#allocation2 + $0xfc] sm:$0xf] %v722_v40  ;;  %v705_v43 = vld [vmem:[%s11807_s20 + $0x18] sm:$0xf] }
  0x64   : > { %749 = vst [vmem:[#allocation2 + $0xec] sm:$0x1] %v723_v41  ;;  %760 = vst [vmem:[#allocation2 + $0x100] sm:$0x1] %v723_v41  ;;  %v706_v44 = vld [vmem:[%s11807_s20 + $0x1c] sm:$0xf] }
  0x65   : > { %762 = vst [vmem:[#allocation2 + $0x3c] sm:$0xf] %v704_v42  ;;  %773 = vst [vmem:[#allocation2 + $0x50] sm:$0xf] %v704_v42  ;;  %v707_v45 = vld [vmem:[%s11807_s20 + $0x20] sm:$0xf] }
  0x66   : > { %763 = vst [vmem:[#allocation2 + $0x40] sm:$0xf] %v705_v43  ;;  %774 = vst [vmem:[#allocation2 + $0x54] sm:$0xf] %v705_v43  ;;  %v708_v46 = vld [vmem:[%s11807_s20 + $0x24] sm:$0x1] }
  0x67   : > { %764 = vst [vmem:[#allocation2 + $0x44] sm:$0xf] %v706_v44  ;;  %775 = vst [vmem:[#allocation2 + $0x58] sm:$0xf] %v706_v44  ;;  %v724_v47 = vld [vmem:[%s11807_s20 + $0x64] sm:$0xf] }
  0x68   : > { %765 = vst [vmem:[#allocation2 + $0x48] sm:$0xf] %v707_v45  ;;  %776 = vst [vmem:[#allocation2 + $0x5c] sm:$0xf] %v707_v45  ;;  %v725_v48 = vld [vmem:[%s11807_s20 + $0x68] sm:$0xf] }
  0x69   : > { %766 = vst [vmem:[#allocation2 + $0x4c] sm:$0x1] %v708_v46  ;;  %777 = vst [vmem:[#allocation2 + $0x60] sm:$0x1] %v708_v46  ;;  %v726_v49 = vld [vmem:[%s11807_s20 + $0x6c] sm:$0xf] }
  0x6a   : > { %767 = vst [vmem:[#allocation2 + $0x104] sm:$0xf] %v724_v47  ;;  %778 = vst [vmem:[#allocation2 + $0x118] sm:$0xf] %v724_v47  ;;  %v727_v50 = vld [vmem:[%s11807_s20 + $0x70] sm:$0xf] }
  0x6b   : > { %768 = vst [vmem:[#allocation2 + $0x108] sm:$0xf] %v725_v48  ;;  %779 = vst [vmem:[#allocation2 + $0x11c] sm:$0xf] %v725_v48  ;;  %v728_v51 = vld [vmem:[%s11807_s20 + $0x74] sm:$0x1] }
  0x6c   : > { %769 = vst [vmem:[#allocation2 + $0x10c] sm:$0xf] %v726_v49  ;;  %780 = vst [vmem:[#allocation2 + $0x120] sm:$0xf] %v726_v49  ;;  %v709_v52 = vld [vmem:[%s11807_s20 + $0x28] sm:$0xf] }
  0x6d   : > { %770 = vst [vmem:[#allocation2 + $0x110] sm:$0xf] %v727_v50  ;;  %781 = vst [vmem:[#allocation2 + $0x124] sm:$0xf] %v727_v50  ;;  %v710_v53 = vld [vmem:[%s11807_s20 + $0x2c] sm:$0xf] }
  0x6e   : > { %771 = vst [vmem:[#allocation2 + $0x114] sm:$0x1] %v728_v51  ;;  %782 = vst [vmem:[#allocation2 + $0x128] sm:$0x1] %v728_v51  ;;  %v711_v54 = vld [vmem:[%s11807_s20 + $0x30] sm:$0xf] }
  0x6f   : > { %784 = vst [vmem:[#allocation2 + $0x64] sm:$0xf] %v709_v52  ;;  %795 = vst [vmem:[#allocation2 + $0x78] sm:$0xf] %v709_v52  ;;  %v712_v55 = vld [vmem:[%s11807_s20 + $0x34] sm:$0xf] }
  0x70   : > { %785 = vst [vmem:[#allocation2 + $0x68] sm:$0xf] %v710_v53  ;;  %796 = vst [vmem:[#allocation2 + $0x7c] sm:$0xf] %v710_v53  ;;  %v713_v56 = vld [vmem:[%s11807_s20 + $0x38] sm:$0x1] }
  0x71   : > { %786 = vst [vmem:[#allocation2 + $0x6c] sm:$0xf] %v711_v54  ;;  %797 = vst [vmem:[#allocation2 + $0x80] sm:$0xf] %v711_v54  ;;  %v729_v57 = vld [vmem:[%s11807_s20 + $0x78] sm:$0xf] }
  0x72   : > { %787 = vst [vmem:[#allocation2 + $0x70] sm:$0xf] %v712_v55  ;;  %798 = vst [vmem:[#allocation2 + $0x84] sm:$0xf] %v712_v55  ;;  %v730_v58 = vld [vmem:[%s11807_s20 + $0x7c] sm:$0xf] }
  0x73   : > { %788 = vst [vmem:[#allocation2 + $0x74] sm:$0x1] %v713_v56  ;;  %799 = vst [vmem:[#allocation2 + $0x88] sm:$0x1] %v713_v56  ;;  %v731_v59 = vld [vmem:[%s11807_s20 + $0x80] sm:$0xf] }
  0x74   : > { %789 = vst [vmem:[#allocation2 + $0x12c] sm:$0xf] %v729_v57  ;;  %800 = vst [vmem:[#allocation2 + $0x140] sm:$0xf] %v729_v57  ;;  %v732_v60 = vld [vmem:[%s11807_s20 + $0x84] sm:$0xf] }
  0x75   : > { %790 = vst [vmem:[#allocation2 + $0x130] sm:$0xf] %v730_v58  ;;  %801 = vst [vmem:[#allocation2 + $0x144] sm:$0xf] %v730_v58  ;;  %v733_v61 = vld [vmem:[%s11807_s20 + $0x88] sm:$0x1] }
  0x76   : > { %791 = vst [vmem:[#allocation2 + $0x134] sm:$0xf] %v731_v59  ;;  %802 = vst [vmem:[#allocation2 + $0x148] sm:$0xf] %v731_v59  ;;  %v714_v62 = vld [vmem:[%s11807_s20 + $0x3c] sm:$0xf] }
  0x77   : > { %792 = vst [vmem:[#allocation2 + $0x138] sm:$0xf] %v732_v60  ;;  %803 = vst [vmem:[#allocation2 + $0x14c] sm:$0xf] %v732_v60  ;;  %v715_v63 = vld [vmem:[%s11807_s20 + $0x40] sm:$0xf] }
  0x78   : > { %793 = vst [vmem:[#allocation2 + $0x13c] sm:$0x1] %v733_v61  ;;  %804 = vst [vmem:[#allocation2 + $0x150] sm:$0x1] %v733_v61  ;;  %v716_v0 = vld [vmem:[%s11807_s20 + $0x44] sm:$0xf] }
  0x79   : > { %806 = vst [vmem:[#allocation2 + $0x8c] sm:$0xf] %v714_v62  ;;  %817 = vst [vmem:[#allocation2 + $0xa0] sm:$0xf] %v714_v62  ;;  %v717_v1 = vld [vmem:[%s11807_s20 + $0x48] sm:$0xf] }
  0x7a   : > { %807 = vst [vmem:[#allocation2 + $0x90] sm:$0xf] %v715_v63  ;;  %818 = vst [vmem:[#allocation2 + $0xa4] sm:$0xf] %v715_v63  ;;  %v718_v2 = vld [vmem:[%s11807_s20 + $0x4c] sm:$0x1] }
  0x7b   : > { %808 = vst [vmem:[#allocation2 + $0x94] sm:$0xf] %v716_v0  ;;  %819 = vst [vmem:[#allocation2 + $0xa8] sm:$0xf] %v716_v0  ;;  %v734_v3 = vld [vmem:[%s11807_s20 + $0x8c] sm:$0xf] }
  0x7c   : > { %809 = vst [vmem:[#allocation2 + $0x98] sm:$0xf] %v717_v1  ;;  %820 = vst [vmem:[#allocation2 + $0xac] sm:$0xf] %v717_v1  ;;  %v735_v4 = vld [vmem:[%s11807_s20 + $0x90] sm:$0xf] }
  0x7d   : > { %810 = vst [vmem:[#allocation2 + $0x9c] sm:$0x1] %v718_v2  ;;  %821 = vst [vmem:[#allocation2 + $0xb0] sm:$0x1] %v718_v2  ;;  %v736_v5 = vld [vmem:[%s11807_s20 + $0x94] sm:$0xf] }
  0x7e   : > { %811 = vst [vmem:[#allocation2 + $0x154] sm:$0xf] %v734_v3  ;;  %822 = vst [vmem:[#allocation2 + $0x168] sm:$0xf] %v734_v3  ;;  %v737_v6 = vld [vmem:[%s11807_s20 + $0x98] sm:$0xf] }
  0x7f   : > { %812 = vst [vmem:[#allocation2 + $0x158] sm:$0xf] %v735_v4  ;;  %823 = vst [vmem:[#allocation2 + $0x16c] sm:$0xf] %v735_v4  ;;  %v738_v7 = vld [vmem:[%s11807_s20 + $0x9c] sm:$0x1] }
  0x80   : > { %813 = vst [vmem:[#allocation2 + $0x15c] sm:$0xf] %v736_v5  ;;  %824 = vst [vmem:[#allocation2 + $0x170] sm:$0xf] %v736_v5  ;;  %s11852_s7 = scalar_lea.vmem [#allocation5], %s11805_s11  ;;  %s11856_s9 = scalar_lea.vmem [#allocation6], %s9620_s8 }
  0x81   : > { %814 = vst [vmem:[#allocation2 + $0x160] sm:$0xf] %v737_v6  ;;  %825 = vst [vmem:[#allocation2 + $0x174] sm:$0xf] %v737_v6  ;;  %s11860_s15 = scalar_lea.vmem [#allocation8], %s9620_s8  ;;  %s11864_s18 = scalar_lea.vmem [#allocation10], %s9622_s26 }
  0x82   : > { %815 = vst [vmem:[#allocation2 + $0x164] sm:$0x1] %v738_v7  ;;  %826 = vst [vmem:[#allocation2 + $0x178] sm:$0x1] %v738_v7  ;;  %p9623_p9 = scmp.ne.s32.totalorder %s11657_s29, 0 }
  0x83   : > { %v11562_v8 = vmov (!%p9623_p9), 0  }
  0x84   : > { %830 = sbr.rel (%p9623_p9) target bundleno = 139 (0x8b), region = 163  ;;  %831 = vst [vmem:[#allocation2] sm:$0xf] (!%p9623_p9), %v11562_v8  ;;  %832 = vst [vmem:[#allocation2 + $0x4] sm:$0xf] (!%p9623_p9), %v11562_v8 }
  0x85   : > { %833 = vst [vmem:[#allocation2 + $0x8] sm:$0xf] (!%p9623_p9), %v11562_v8  ;;  %834 = vst [vmem:[#allocation2 + $0xc] sm:$0xf] (!%p9623_p9), %v11562_v8 }
  0x86   : > { %835 = vst [vmem:[#allocation2 + $0x10] sm:$0x1] (!%p9623_p9), %v11562_v8  ;;  %836 = vst [vmem:[#allocation2 + $0xc8] sm:$0xf] (!%p9623_p9), %v11562_v8 }
  0x87   : > { %837 = vst [vmem:[#allocation2 + $0xcc] sm:$0xf] (!%p9623_p9), %v11562_v8  ;;  %838 = vst [vmem:[#allocation2 + $0xd0] sm:$0xf] (!%p9623_p9), %v11562_v8 }
  0x88   : > { %839 = vst [vmem:[#allocation2 + $0xd4] sm:$0xf] (!%p9623_p9), %v11562_v8  ;;  %840 = vst [vmem:[#allocation2 + $0xd8] sm:$0x1] (!%p9623_p9), %v11562_v8 }
  0x8b PF: > { %p9624_p10 = scmp.le.s32.totalorder %s11657_s29, 0 }
  0x8c   : > { %v845_v9 = vld [vmem:[%s628_s22] sm:$0xff] (!%p9624_p10)   ;;  %v847_v10 = vld [vmem:[%s628_s22 + $0x8] sm:$0xff] (!%p9624_p10)   ;;  %v849_v11 = vld [vmem:[%s628_s22 + $0x10] sm:$0x1] (!%p9624_p10) }
  0x8d   : > { %844 = sbr.rel (%p9624_p10) target bundleno = 148 (0x94), region = 167  ;;  %855 = vst [vmem:[#allocation2] sm:$0xff] (!%p9624_p10), %v845_v9   ;;  %857 = vst [vmem:[#allocation2 + $0x8] sm:$0xff] (!%p9624_p10), %v847_v10   ;;  %v850_v12 = vld [vmem:[%s628_s22 + $0x14] sm:$0xff] (!%p9624_p10)   ;;  %v852_v13 = vld [vmem:[%s628_s22 + $0x1c] sm:$0xff] (!%p9624_p10)  }
  0x8e   : > { %859 = vst [vmem:[#allocation2 + $0x10] sm:$0x1] (!%p9624_p10), %v849_v11  ;;  %v854_v14 = vld [vmem:[%s628_s22 + $0x24] sm:$0x1] (!%p9624_p10)  ;;  %860 = vst [vmem:[#allocation2 + $0xc8] sm:$0xff] (!%p9624_p10), %v850_v12  }
  0x8f   : > { %862 = vst [vmem:[#allocation2 + $0xd0] sm:$0xff] (!%p9624_p10), %v852_v13   ;;  %864 = vst [vmem:[#allocation2 + $0xd8] sm:$0x1] (!%p9624_p10), %v854_v14 }
  0x94 PF: > { %p9625_p11 = scmp.ne.s32.totalorder %s11657_s29, 3 }
  0x95   : > { %v11563_v15 = vmov (!%p9625_p11), 0  }
  0x96   : > { %868 = sbr.rel (%p9625_p11) target bundleno = 157 (0x9d), region = 171  ;;  %870 = vst [vmem:[#allocation2 + $0xb4] sm:$0xf] (!%p9625_p11), %v11563_v15  ;;  %871 = vst [vmem:[#allocation2 + $0xb8] sm:$0xf] (!%p9625_p11), %v11563_v15 }
  0x97   : > { %872 = vst [vmem:[#allocation2 + $0xbc] sm:$0xf] (!%p9625_p11), %v11563_v15  ;;  %873 = vst [vmem:[#allocation2 + $0xc0] sm:$0xf] (!%p9625_p11), %v11563_v15 }
  0x98   : > { %874 = vst [vmem:[#allocation2 + $0xc4] sm:$0x1] (!%p9625_p11), %v11563_v15  ;;  %875 = vst [vmem:[#allocation2 + $0x17c] sm:$0xf] (!%p9625_p11), %v11563_v15 }
  0x99   : > { %876 = vst [vmem:[#allocation2 + $0x180] sm:$0xf] (!%p9625_p11), %v11563_v15  ;;  %877 = vst [vmem:[#allocation2 + $0x184] sm:$0xf] (!%p9625_p11), %v11563_v15 }
  0x9a   : > { %878 = vst [vmem:[#allocation2 + $0x188] sm:$0xf] (!%p9625_p11), %v11563_v15  ;;  %879 = vst [vmem:[#allocation2 + $0x18c] sm:$0x1] (!%p9625_p11), %v11563_v15 }
  0x9d PF: > { %p9626_p12 = scmp.ge.s32.totalorder %s11657_s29, 3 }
  0x9e   : > { %v884_v16 = vld [vmem:[%s11852_s7] sm:$0xff] (!%p9626_p12)   ;;  %v886_v17 = vld [vmem:[%s11852_s7 + $0x8] sm:$0xff] (!%p9626_p12)   ;;  %v888_v18 = vld [vmem:[%s11852_s7 + $0x10] sm:$0x1] (!%p9626_p12) }
  0x9f   : > { %883 = sbr.rel (%p9626_p12) target bundleno = 166 (0xa6), region = 175  ;;  %895 = vst [vmem:[#allocation2 + $0xb4] sm:$0xff] (!%p9626_p12), %v884_v16   ;;  %897 = vst [vmem:[#allocation2 + $0xbc] sm:$0xff] (!%p9626_p12), %v886_v17   ;;  %v889_v19 = vld [vmem:[%s11852_s7 + $0x14] sm:$0xff] (!%p9626_p12)   ;;  %v891_v20 = vld [vmem:[%s11852_s7 + $0x1c] sm:$0xff] (!%p9626_p12)  }
  0xa0   : > { %899 = vst [vmem:[#allocation2 + $0xc4] sm:$0x1] (!%p9626_p12), %v888_v18  ;;  %v893_v21 = vld [vmem:[%s11852_s7 + $0x24] sm:$0x1] (!%p9626_p12)  ;;  %900 = vst [vmem:[#allocation2 + $0x17c] sm:$0xff] (!%p9626_p12), %v889_v19  }
  0xa1   : > { %902 = vst [vmem:[#allocation2 + $0x184] sm:$0xff] (!%p9626_p12), %v891_v20   ;;  %904 = vst [vmem:[#allocation2 + $0x18c] sm:$0x1] (!%p9626_p12), %v893_v21 }
  0xa6 PF: > { %v11024_v22 = vld [vmem:[%s13693_s3 + $0x84] ss:$8 sps:$4 sm:$0xff]   ;;  %v13700_v24 = vmov 0   ;;  %v11028_v25 = vld [vmem:[%s13693_s3 + $0x80] ss:$8 sps:$4 sm:$0xff]   ;;  %vm5331_vm3 = vcmask 1042432  }
  0xa7   : > { %v11026_v23 = vld [vmem:[%s13693_s3 + $0x184] ss:$8 sps:$4 sm:$0xff]   ;;  %1965 = vmatprep.mubr.bf16.mxu1 %v13700_v24  ;;  %4786 = vmatprep.mubr.bf16.mxu0 %v13700_v24  ;;  %v11029_v26 = vld [vmem:[%s13693_s3 + $0x180] ss:$8 sps:$4 sm:$0xff]   ;;  %v11030_v27 = vld [vmem:[%s13693_s3 + $0x94] ss:$8 sps:$4 sm:$0xff]  }
  0xa8   : > { %1933 = vmatprep.subr.bf16.mxu1 %v11024_v22  ;;  %4754 = vmatprep.subr.bf16.mxu0 %v11026_v23  ;;  %v11032_v28 = vld [vmem:[%s13693_s3 + $0x194] ss:$8 sps:$4 sm:$0xff]   ;;  %v11034_v29 = vld [vmem:[%s13693_s3 + $0x90] ss:$8 sps:$4 sm:$0xff]   ;;  %v11036_v31 = vld [vmem:[%s13693_s3 + $0xa4] ss:$8 sps:$4 sm:$0xff]  }
  0xa9   : > { %1934 = vmatpush1.bf16.msra.mxu1 %v11028_v25  ;;  %4755 = vmatpush1.bf16.msra.mxu0 %v11029_v26  ;;  %v11035_v30 = vld [vmem:[%s13693_s3 + $0x190] ss:$8 sps:$4 sm:$0xff]   ;;  %v11038_v32 = vld [vmem:[%s13693_s3 + $0x1a4] ss:$8 sps:$4 sm:$0xff]   ;;  %v11040_v33 = vld [vmem:[%s13693_s3 + $0xa0] ss:$8 sps:$4 sm:$0xff]  }
  0xaa   : > { %1935 = vmatprep.subr.bf16.mxu1 %v11030_v27  ;;  %4756 = vmatprep.subr.bf16.mxu0 %v11032_v28  ;;  %v11041_v34 = vld [vmem:[%s13693_s3 + $0x1a0] ss:$8 sps:$4 sm:$0xff]   ;;  %v11042_v35 = vld [vmem:[%s13693_s3 + $0xb4] ss:$8 sps:$4 sm:$0xff]   ;;  %v11046_v37 = vld [vmem:[%s13693_s3 + $0xb0] ss:$8 sps:$4 sm:$0xff]  }
  0xab   : > { %v11044_v36 = vld [vmem:[%s13693_s3 + $0x1b4] ss:$8 sps:$4 sm:$0xff]   ;;  %v11047_v38 = vld [vmem:[%s13693_s3 + $0x1b0] ss:$8 sps:$4 sm:$0xff]   ;;  %v11048_v39 = vld [vmem:[%s13693_s3 + $0xc4] ss:$8 sps:$4 sm:$0xff]  }
  0xac   : > { %v11050_v40 = vld [vmem:[%s13693_s3 + $0x1c4] ss:$8 sps:$4 sm:$0xff]   ;;  %v11052_v41 = vld [vmem:[%s13693_s3 + $0xc0] ss:$8 sps:$4 sm:$0xff]   ;;  %v11054_v43 = vld [vmem:[%s13693_s3 + $0xd4] ss:$8 sps:$4 sm:$0xff]  }
  0xad   : > { %1936 = vmatpush1.bf16.msra.mxu1 %v11034_v29  ;;  %4757 = vmatpush1.bf16.msra.mxu0 %v11035_v30  ;;  %v11053_v42 = vld [vmem:[%s13693_s3 + $0x1c0] ss:$8 sps:$4 sm:$0xff]   ;;  %v11056_v44 = vld [vmem:[%s13693_s3 + $0x1d4] ss:$8 sps:$4 sm:$0xff]   ;;  %vm1001_vm0 = vsmask.f32 3328 }
  0xae   : > { %1937 = vmatprep.subr.bf16.mxu1 %v11036_v31  ;;  %4758 = vmatprep.subr.bf16.mxu0 %v11038_v32  ;;  %v11058_v45 = vld [vmem:[%s13693_s3 + $0xd0] ss:$8 sps:$4 sm:$0xff]   ;;  %vm1002_vm1 = vsmask.f32 7440  ;;  %v11060_v47 = vld [vmem:[%s13693_s3 + $0xe4] ss:$8 sps:$4 sm:$0xff]  }
  0xaf   : > { %v11059_v46 = vld [vmem:[%s13693_s3 + $0x1d0] ss:$8 sps:$4 sm:$0xff]   ;;  %v11062_v48 = vld [vmem:[%s13693_s3 + $0x1e4] ss:$8 sps:$4 sm:$0xff]   ;;  %v905_v49 = vld [vmem:[#allocation2] sm:$0xf] }
  0xb0   : > { %v906_v50 = vld [vmem:[#allocation2 + $0x4] sm:$0xf]  ;;  %v11064_v51 = vld [vmem:[%s13693_s3 + $0xe0] ss:$8 sps:$4 sm:$0xff]   ;;  %v1005_v54 = vshrl.u32 %v905_v49, 16  ;;  %v1008_v55 = vshll.u32 %v905_v49, 16  ;;  %vm11982_vm2 = vmor %vm1001_vm0, %vm1002_vm1 }
  0xb1   : > { %1938 = vmatpush1.bf16.msra.mxu1 %v11040_v33  ;;  %4759 = vmatpush1.bf16.msra.mxu0 %v11041_v34  ;;  %v11065_v52 = vld [vmem:[%s13693_s3 + $0x1e0] ss:$8 sps:$4 sm:$0xff]   ;;  %v1014_v56 = vshll.u32 %v906_v50, 16  ;;  %v1018_v57 = vshrl.u32 %v906_v50, 16  ;;  %v11066_v58 = vld [vmem:[%s13693_s3 + $0xf4] ss:$8 sps:$4 sm:$0xff]  }
  0xb2   : > { %1939 = vmatprep.subr.bf16.mxu1 %v11042_v35  ;;  %4760 = vmatprep.subr.bf16.mxu0 %v11044_v36  ;;  %v907_v53 = vld [vmem:[#allocation2 + $0x8] sm:$0xf]  ;;  %v11068_v61 = vld [vmem:[%s13693_s3 + $0x1f4] ss:$8 sps:$4 sm:$0xff]   ;;  %v1007_v62 = vrot.slane %v1005_v54, 4  ;;  %v1010_v63 = vrot.slane %v1008_v55, 5 }
  0xb3   : > { %v1024_v59 = vshll.u32 %v907_v53, 16  ;;  %v1028_v60 = vshrl.u32 %v907_v53, 16  ;;  %v1016_v0 = vrot.slane %v1014_v56, 5  ;;  %v1020_v1 = vrot.slane %v1018_v57, 4  ;;  %v3745_v3 = vld [vmem:[#allocation2 + $0x14] sm:$0xf] }
  0xb4   : > { %v11970_v4 = vld [vmem:[#allocation2 + $0x18] sm:$0xf]  ;;  %v1011_v7 = vor.u32 %v1010_v63, %v1007_v62  ;;  %v11978_v9 = vld [vmem:[#allocation2 + $0x1c] sm:$0xf]  ;;  %v3826_v10 = vshrl.u32 %v3745_v3, 16  ;;  %v3829_v11 = vshll.u32 %v3745_v3, 16 }
  0xb5   : > { %1940 = vmatpush1.bf16.msra.mxu1 %v11046_v37  ;;  %4761 = vmatpush1.bf16.msra.mxu0 %v11047_v38  ;;  %v11968_v2 = vrot.slane %v1024_v59, 5  ;;  %v11070_v5 = vld [vmem:[%s13693_s3 + $0xf0] ss:$8 sps:$4 sm:$0xff]   ;;  %v1021_v8 = vor.u32 %v1020_v1, %v1016_v0  ;;  %v11074_v13 = vld [vmem:[%s13693_s3 + $0x4] ss:$8 sps:$4 sm:$0xff]   ;;  %v3835_v14 = vshll.u32 %v11970_v4, 16 }
  0xb6   : > { %1941 = vmatprep.subr.bf16.mxu1 %v11048_v39  ;;  %4762 = vmatprep.subr.bf16.mxu0 %v11050_v40  ;;  %v11071_v6 = vld [vmem:[%s13693_s3 + $0x1f0] ss:$8 sps:$4 sm:$0xff]   ;;  %v3839_v15 = vshrl.u32 %v11970_v4, 16  ;;  %v3845_v16 = vshll.u32 %v11978_v9, 16  ;;  %v5336_v17 = vrot.slane %v11970_v4, 5  ;;  %v1012_v18 = vrot.slane %v1011_v7, 4 }
  0xb7   : > { %v1022_v19 = vrot.slane %v1021_v8, 4  ;;  %v3828_v20 = vrot.slane %v3826_v10, 4  ;;  %v3831_v21 = vrot.slane %v3829_v11, 5  ;;  %v11077_v22 = vld [vmem:[%s13693_s3 + $0x204] ss:$8 sps:$4 sm:$0xff]   ;;  %v3837_v23 = vrot.slane %v3835_v14, 5 }
  0xb8   : > { %v3841_v25 = vrot.slane %v3839_v15, 4  ;;  %v3847_v26 = vrot.slane %v3845_v16, 5  ;;  %v11998_v27 = vrot.slane %v5336_v17, 4  ;;  %v908_v28 = vld [vmem:[#allocation2 + $0xc] sm:$0xf]  ;;  %v1017_v29 = vsel %vm11982_vm2, %v1012_v18, %v1016_v0  ;;  %s9328_s20 = sand.u32 1, %s11657_s29  }
  0xb9   : > { %1942 = vmatpush1.bf16.msra.mxu1 %v11052_v41  ;;  %4763 = vmatpush1.bf16.msra.mxu0 %v11053_v42  ;;  %v1027_v30 = vsel %vm11982_vm2, %v1022_v19, %v11968_v2  ;;  %v3832_v31 = vor.u32 %v3831_v21, %v3828_v20  ;;  %v5339_v32 = vrot.slane %v11978_v9, 5  ;;  %v985_v33 = vld [vmem:[#allocation2 + $0x10] sm:$0x1]  ;;  %v3748_v34 = vld [vmem:[#allocation2 + $0x20] sm:$0xf]  ;;  %v1030_v37 = vrot.slane %v1028_v60, 4 }
  0xba   : > { %1943 = vmatprep.subr.bf16.mxu1 %v11054_v43  ;;  %4764 = vmatprep.subr.bf16.mxu0 %v11056_v44  ;;  %v9643_v35 = vcombine.low %v1017_v29, %v1027_v30  ;;  %v3842_v36 = vor.u32 %v3841_v25, %v3837_v23  ;;  %v1034_v38 = vshll.u32 %v908_v28, 16  ;;  %v11072_v39 = vld [vmem:[%s13693_s3] ss:$8 sps:$4 sm:$0xff]   ;;  %v1038_v41 = vshrl.u32 %v908_v28, 16  ;;  %v909_v54 = vld [vmem:[#allocation2 + $0x14] sm:$0xf] }
  0xbb   : > { %v3833_v40 = vrot.slane %v3832_v31, 4  ;;  %v1044_v42 = vshll.u32 %v985_v33, 16  ;;  %v3849_v43 = vshrl.u32 %v11978_v9, 16  ;;  %v3855_v49 = vshll.u32 %v3748_v34, 16  ;;  %v910_v59 = vld [vmem:[#allocation2 + $0x18] sm:$0xf] }
  0xbc   : > { %v3843_v44 = vrot.slane %v3842_v36, 4  ;;  %v12019_v0 = vld [vmem:[#allocation2 + $0x1c] sm:$0xf]  ;;  %v1049_v3 = vshrl.u32 %v909_v54, 16  ;;  %v3751_v14 = vld [vmem:[#allocation2 + $0x2c] sm:$0xf] }
  0xbd   : > { %1944 = vmatpush1.bf16.msra.mxu1 %v11058_v45  ;;  %4765 = vmatpush1.bf16.msra.mxu0 %v11059_v46  ;;  %v11075_v45 = vld [vmem:[%s13693_s3 + $0x200] ss:$8 sps:$4 sm:$0xff]   ;;  %v1031_v46 = vor.u32 %v1030_v37, %v11968_v2  ;;  %v3838_v50 = vsel %vm11982_vm2, %v3833_v40, %v3837_v23  ;;  %v3851_v53 = vrot.slane %v3849_v43, 4  ;;  %v3857_v57 = vrot.slane %v3855_v49, 5  ;;  %v11080_v7 = vld [vmem:[%s13693_s3 + $0x214] ss:$8 sps:$4 sm:$0xff]  }
  0xbe   : > { %1945 = vmatprep.subr.bf16.mxu1 %v11060_v47  ;;  %4766 = vmatprep.subr.bf16.mxu0 %v11062_v48  ;;  %v1036_v47 = vrot.slane %v1034_v38, 5  ;;  %v3749_v48 = vld [vmem:[#allocation2 + $0x24] sm:$0x1]  ;;  %v3848_v55 = vsel %vm11982_vm2, %v3843_v44, %v3847_v26  ;;  %v1051_v16 = vrot.slane %v1049_v3, 4  ;;  %v1062_v19 = vshrl.u32 %v910_v59, 16  ;;  %s9324_s26 = scalar_lea.sflag [#allocation7], %s11798_s12 }
  0xbf   : > { %v1032_v56 = vrot.slane %v1031_v46, 4  ;;  %v9819_v60 = vcombine.low %v3838_v50, %v3848_v55  ;;  %v3852_v62 = vor.u32 %v3851_v53, %v3847_v26  ;;  %v3865_v63 = vshll.u32 %v3749_v48, 16  ;;  %v11078_v20 = vld [vmem:[%s13693_s3 + $0x210] ss:$8 sps:$4 sm:$0xff]   ;;  %v912_v37 = vld [vmem:[#allocation2 + $0x20] sm:$0xf] }
  0xc0   : > { %v1068_v25 = vshll.u32 %v12019_v0, 16  ;;  %v1064_v30 = vrot.slane %v1062_v19, 4  ;;  %v3752_v31 = vld [vmem:[#allocation2 + $0x30] sm:$0xf]  ;;  %v3879_v36 = vshll.u32 %v3751_v14, 16  ;;  %v1078_v55 = vshll.u32 %v912_v37, 16 }
  0xc1   : > { %1946 = vmatpush1.bf16.msra.mxu1 %v11064_v51  ;;  %4767 = vmatpush1.bf16.msra.mxu0 %v11065_v52  ;;  %v1040_v51 = vrot.slane %v1038_v41, 4  ;;  %v1046_v52 = vrot.slane %v1044_v42, 5  ;;  %v1037_v1 = vsel %vm11982_vm2, %v1032_v56, %v1036_v47  ;;  %v3853_v10 = vrot.slane %v3852_v62, 4  ;;  %v11081_v42 = vld [vmem:[%s13693_s3 + $0x10] ss:$8 sps:$4 sm:$0xff]   ;;  %s13601_s22 = scalar_lea.sflag [#allocation9], %s9328_s20 }
  0xc2   : > { %1947 = vmatprep.subr.bf16.mxu1 %v11066_v58  ;;  %4768 = vmatprep.subr.bf16.mxu0 %v11068_v61  ;;  %v3859_v58 = vshrl.u32 %v3748_v34, 16  ;;  %v3867_v11 = vrot.slane %v3865_v63, 5  ;;  %v1070_v33 = vrot.slane %v1068_v25, 5  ;;  %v3883_v41 = vshrl.u32 %v3751_v14, 16  ;;  %v11083_v43 = vld [vmem:[%s13693_s3 + $0x14] ss:$8 sps:$4 sm:$0xff]  }
  0xc3   : > { %v1041_v61 = vor.u32 %v1040_v51, %v1036_v47  ;;  %v3881_v47 = vrot.slane %v3879_v36, 5  ;;  %v986_v48 = vld [vmem:[#allocation2 + $0x24] sm:$0x1]  ;;  %v1082_v56 = vshrl.u32 %v912_v37, 16  ;;  %v11084_v62 = vld [vmem:[%s13693_s3 + $0x220] ss:$8 sps:$4 sm:$0xff]  }
  0xc4   : > { %v3861_v2 = vrot.slane %v3859_v58, 4  ;;  %v3885_v51 = vrot.slane %v3883_v41, 4  ;;  %v11086_v63 = vld [vmem:[%s13693_s3 + $0x224] ss:$8 sps:$4 sm:$0xff]   ;;  %v1080_v3 = vrot.slane %v1078_v55, 5  ;;  %vm5332_vm4 = vcmask 1046532  }
  0xc5   : > { %1948 = vmatpush1.bf16.msra.mxu1 %v11070_v5  ;;  %4769 = vmatpush1.bf16.msra.mxu0 %v11071_v6  ;;  %v1052_v5 = vshll.u32 %v909_v54, 16  ;;  %v3750_v6 = vld [vmem:[#allocation2 + $0x28] sm:$0xf]  ;;  %v1042_v8 = vrot.slane %v1041_v61, 4  ;;  %v1072_v54 = vshrl.u32 %v12019_v0, 16  ;;  %v1088_v61 = vshll.u32 %v986_v48, 16  ;;  %vm12263_vm5 = vmor %vm5331_vm3, %vm5332_vm4 }
  0xc6   : > { %2558 = vmatprep.subr.bf16.mxu1 %v11074_v13  ;;  %5767 = vmatprep.subr.bf16.mxu0 %v11077_v22  ;;  %v1058_v13 = vshll.u32 %v910_v59, 16  ;;  %v3862_v15 = vor.u32 %v3861_v2, %v3857_v57  ;;  %v3858_v22 = vsel %vm11982_vm2, %v3853_v10, %v3857_v57  ;;  %v3870_v34 = vshrl.u32 %v3750_v6, 16  ;;  %v3753_v57 = vld [vmem:[#allocation2 + $0x34] sm:$0xf] }
  0xc7   : > { %v1054_v18 = vrot.slane %v1052_v5, 5  ;;  %v1047_v21 = vsel %vm11982_vm2, %v1042_v8, %v1046_v52  ;;  %v3889_v52 = vshll.u32 %v3752_v31, 16  ;;  %v3886_v59 = vor.u32 %v3885_v51, %v3881_v47  ;;  %v3754_v5 = vld [vmem:[#allocation2 + $0x38] sm:$0x1] }
  0xc8   : > { %1966 = vmatmul.mubr.bf16.vlgmr.msra.gmra.mrb[0].mxu1 %v9643_v35  ;;  %4787 = vmatmul.mubr.bf16.vlgmr.msra.gmra.mrb[0].mxu0 %v9819_v60  ;;  %v1060_v23 = vrot.slane %v1058_v13, 5  ;;  %v9644_v26 = vcombine.low %v1037_v1, %v1047_v21  ;;  %v3863_v28 = vrot.slane %v3862_v15, 4  ;;  %v3873_v35 = vshll.u32 %v3750_v6, 16 }
  0xc9   : > { %2559 = vmatpush1.bf16.msra.mxu1 %v11072_v39  ;;  %1975 = vmatprep.mubr.bf16.mxu1 %v13700_v24  ;;  %v1055_v29 = vor.u32 %v1054_v18, %v1051_v16  ;;  %v3891_v60 = vrot.slane %v3889_v52, 5  ;;  %v1074_v2 = vrot.slane %v1072_v54, 4  ;;  %v3887_v6 = vrot.slane %v3886_v59, 4  ;;  %v913_v16 = vld [vmem:[#allocation2 + $0x28] sm:$0xf] }
  0xca   : > { %5768 = vmatpush1.bf16.msra.mxu0 %v11075_v45  ;;  %4796 = vmatprep.mubr.bf16.mxu0 %v13700_v24  ;;  %v3868_v38 = vsel %vm11982_vm2, %v3863_v28, %v3867_v11  ;;  %v1065_v40 = vor.u32 %v1064_v30, %v1060_v23  ;;  %v3872_v45 = vrot.slane %v3870_v34, 4  ;;  %v3875_v46 = vrot.slane %v3873_v35, 5 }
  0xcb   : > { %5769 = vmatprep.subr.bf16.mxu0 %v11080_v7  ;;  %v1056_v39 = vrot.slane %v1055_v29, 4  ;;  %v9820_v44 = vcombine.low %v3858_v22, %v3868_v38  ;;  %2560 = vmatprep.subr.bf16.mxu1 %v11083_v43  ;;  %v1084_v7 = vrot.slane %v1082_v56, 4  ;;  %v1090_v8 = vrot.slane %v1088_v61, 5  ;;  %v914_v22 = vld [vmem:[#allocation2 + $0x2c] sm:$0xf] }
  0xcc   : > { %v1066_v50 = vrot.slane %v1065_v40, 4  ;;  %v3876_v53 = vor.u32 %v3875_v46, %v3872_v45  ;;  %v3893_v10 = vshrl.u32 %v3752_v31, 16  ;;  %v1075_v13 = vor.u32 %v1074_v2, %v1070_v33  ;;  %v3756_v40 = vld [vmem:[#allocation2 + $0x40] sm:$0xf]  ;;  %v11087_v45 = vld [vmem:[%s13693_s3 + $0x230] ss:$8 sps:$4 sm:$0xff]  }
  0xcd   : > { %v1061_v49 = vsel %vm11982_vm2, %v1056_v39, %v1060_v23  ;;  %2561 = vmatpush1.bf16.msra.mxu1 %v11081_v42  ;;  %v3899_v14 = vshll.u32 %v3753_v57, 16  ;;  %v3903_v15 = vshrl.u32 %v3753_v57, 16  ;;  %v3892_v18 = vsel %vm11982_vm2, %v3887_v6, %v3891_v60  ;;  %v3755_v39 = vld [vmem:[#allocation2 + $0x3c] sm:$0xf]  ;;  %v3757_v57 = vld [vmem:[#allocation2 + $0x44] sm:$0xf] }
  0xce   : > { %5770 = vmatpush1.bf16.msra.mxu0 %v11078_v20  ;;  %v1071_v58 = vsel %vm11982_vm2, %v1066_v50, %v1070_v33  ;;  %v3877_v1 = vrot.slane %v3876_v53, 4  ;;  %v1085_v19 = vor.u32 %v1084_v7, %v1080_v3  ;;  %v3895_v20 = vrot.slane %v3893_v10, 4  ;;  %v915_v33 = vld [vmem:[#allocation2 + $0x30] sm:$0xf]  ;;  %v11089_v50 = vld [vmem:[%s13693_s3 + $0x234] ss:$8 sps:$4 sm:$0xff]  }
  0xcf   : > { %v9645_v0 = vcombine.low %v1061_v49, %v1071_v58  ;;  %5771 = vmatprep.subr.bf16.mxu0 %v11086_v63  ;;  %v3909_v21 = vshll.u32 %v3754_v5, 16  ;;  %v1076_v25 = vrot.slane %v1075_v13, 4  ;;  %v3905_v28 = vrot.slane %v3903_v15, 4  ;;  %v987_v6 = vld [vmem:[#allocation2 + $0x38] sm:$0x1] }
  0xd0   : > { %1976 = vmatmul.mubr.bf16.gmra.mrb[4].mxu1 %v9644_v26  ;;  %4797 = vmatmul.mubr.bf16.gmra.mrb[4].mxu0 %v9820_v44  ;;  %v3882_v11 = vsel %vm11982_vm2, %v3877_v1, %v3881_v47  ;;  %v3901_v26 = vrot.slane %v3899_v14, 5  ;;  %v1086_v29 = vrot.slane %v1085_v19, 4  ;;  %v3896_v30 = vor.u32 %v3895_v20, %v3891_v60  ;;  %v916_v60 = vld [vmem:[#allocation2 + $0x34] sm:$0xf]  ;;  %v3758_v13 = vld [vmem:[#allocation2 + $0x48] sm:$0xf] }
  0xd1   : > { %1985 = vmatprep.mubr.bf16.mxu1 %v13700_v24  ;;  %4806 = vmatprep.mubr.bf16.mxu0 %v13700_v24  ;;  %v9821_v23 = vcombine.low %v3882_v11, %v3892_v18  ;;  %v3911_v31 = vrot.slane %v3909_v21, 5  ;;  %v1093_v34 = vshrl.u32 %v913_v16, 16  ;;  %v1081_v35 = vsel %vm11982_vm2, %v1076_v25, %v1080_v3  ;;  %v11090_v19 = vld [vmem:[%s13693_s3 + $0x20] ss:$8 sps:$4 sm:$0xff]   ;;  %v11092_v20 = vld [vmem:[%s13693_s3 + $0x24] ss:$8 sps:$4 sm:$0xff]  }
  0xd2   : > { %5772 = vmatpush1.bf16.msra.mxu0 %v11084_v62  ;;  %v3906_v36 = vor.u32 %v3905_v28, %v3901_v26  ;;  %v1096_v37 = vshll.u32 %v913_v16, 16  ;;  %v1102_v38 = vshll.u32 %v914_v22, 16  ;;  %v1091_v41 = vsel %vm11982_vm2, %v1086_v29, %v1090_v8  ;;  %2562 = vmatprep.subr.bf16.mxu1 %v11092_v20 }
  0xd3   : > { %v3897_v42 = vrot.slane %v3896_v30, 4  ;;  %v1095_v43 = vrot.slane %v1093_v34, 4  ;;  %v1106_v44 = vshrl.u32 %v914_v22, 16  ;;  %v9646_v46 = vcombine.low %v1081_v35, %v1091_v41  ;;  %5773 = vmatprep.subr.bf16.mxu0 %v11089_v50  ;;  %2563 = vmatpush1.bf16.msra.mxu1 %v11090_v19 }
  0xd4   : > { %v3907_v47 = vrot.slane %v3906_v36, 4  ;;  %v1098_v48 = vrot.slane %v1096_v37, 5  ;;  %v1104_v49 = vrot.slane %v1102_v38, 5  ;;  %v1112_v53 = vshll.u32 %v915_v33, 16  ;;  %v11093_v37 = vld [vmem:[%s13693_s3 + $0x240] ss:$8 sps:$4 sm:$0xff]  }
  0xd5   : > { %v3902_v51 = vsel %vm11982_vm2, %v3897_v42, %v3901_v26  ;;  %v1108_v52 = vrot.slane %v1106_v44, 4  ;;  %v3914_v54 = vshrl.u32 %v3755_v39, 16  ;;  %v3917_v58 = vshll.u32 %v3755_v39, 16  ;;  %v917_v42 = vld [vmem:[#allocation2 + $0x3c] sm:$0xf] }
  0xd6   : > { %v3912_v55 = vsel %vm11982_vm2, %v3907_v47, %v3911_v31  ;;  %v1099_v56 = vor.u32 %v1098_v48, %v1095_v43  ;;  %v3923_v59 = vshll.u32 %v3756_v40, 16  ;;  %v1114_v63 = vrot.slane %v1112_v53, 5  ;;  %5774 = vmatpush1.bf16.msra.mxu0 %v11087_v45  ;;  %v3759_v31 = vld [vmem:[#allocation2 + $0x4c] sm:$0x1] }
  0xd7   : > { %v9822_v61 = vcombine.low %v3902_v51, %v3912_v55  ;;  %v1109_v62 = vor.u32 %v1108_v52, %v1104_v49  ;;  %v3919_v2 = vrot.slane %v3917_v58, 5  ;;  %v3927_v5 = vshrl.u32 %v3756_v40, 16  ;;  %v11095_v43 = vld [vmem:[%s13693_s3 + $0x244] ss:$8 sps:$4 sm:$0xff]   ;;  %v918_v52 = vld [vmem:[#allocation2 + $0x40] sm:$0xf] }
  0xd8   : > { %1986 = vmatmul.mubr.bf16.gmra.mrb[8].mxu1 %v9645_v0  ;;  %4807 = vmatmul.mubr.bf16.gmra.mrb[8].mxu0 %v9821_v23  ;;  %v3916_v0 = vrot.slane %v3914_v54, 4  ;;  %v1100_v1 = vrot.slane %v1099_v56, 4  ;;  %v3925_v3 = vrot.slane %v3923_v59, 5  ;;  %v3933_v8 = vshll.u32 %v3757_v57, 16  ;;  %v919_v56 = vld [vmem:[#allocation2 + $0x44] sm:$0xf] }
  0xd9   : > { %1995 = vmatprep.mubr.bf16.mxu1 %v13700_v24  ;;  %4816 = vmatprep.mubr.bf16.mxu0 %v13700_v24  ;;  %v1110_v7 = vrot.slane %v1109_v62, 4  ;;  %v1116_v10 = vshrl.u32 %v915_v33, 16  ;;  %v1122_v11 = vshll.u32 %v916_v60, 16  ;;  %v3929_v16 = vrot.slane %v3927_v5, 4  ;;  %v3760_v62 = vld [vmem:[#allocation2 + $0x50] sm:$0xf] }
  0xda   : > { %v1105_v14 = vsel %vm11982_vm2, %v1100_v1, %v1104_v49  ;;  %v3920_v15 = vor.u32 %v3919_v2, %v3916_v0  ;;  %v1126_v18 = vshrl.u32 %v916_v60, 16  ;;  %v3935_v22 = vrot.slane %v3933_v8, 5  ;;  %5775 = vmatprep.subr.bf16.mxu0 %v11095_v43 }
  0xdb   : > { %v1115_v21 = vsel %vm11982_vm2, %v1110_v7, %v1114_v63  ;;  %v1118_v23 = vrot.slane %v1116_v10, 4  ;;  %v1124_v25 = vrot.slane %v1122_v11, 5  ;;  %v3930_v29 = vor.u32 %v3929_v16, %v3925_v3  ;;  %5776 = vmatpush1.bf16.msra.mxu0 %v11093_v37  ;;  %v3762_v10 = vld [vmem:[#allocation2 + $0x58] sm:$0xf]  ;;  %v920_v16 = vld [vmem:[#allocation2 + $0x48] sm:$0xf] }
  0xdc   : > { %v9647_v26 = vcombine.low %v1105_v14, %v1115_v21  ;;  %v3921_v28 = vrot.slane %v3920_v15, 4  ;;  %v1128_v30 = vrot.slane %v1126_v18, 4  ;;  %v1132_v34 = vshll.u32 %v987_v6, 16  ;;  %v988_v37 = vld [vmem:[#allocation2 + $0x4c] sm:$0x1] }
  0xdd   : > { %v1119_v33 = vor.u32 %v1118_v23, %v1114_v63  ;;  %v3937_v35 = vshrl.u32 %v3757_v57, 16  ;;  %v3943_v36 = vshll.u32 %v3758_v13, 16  ;;  %v3931_v39 = vrot.slane %v3930_v29, 4  ;;  %v11098_v23 = vld [vmem:[%s13693_s3 + $0x254] ss:$8 sps:$4 sm:$0xff]  }
  0xde   : > { %v3926_v38 = vsel %vm11982_vm2, %v3921_v28, %v3925_v3  ;;  %v1129_v40 = vor.u32 %v1128_v30, %v1124_v25  ;;  %v3947_v41 = vshrl.u32 %v3758_v13, 16  ;;  %v1134_v45 = vrot.slane %v1132_v34, 5  ;;  %v3761_v3 = vld [vmem:[#allocation2 + $0x54] sm:$0xf]  ;;  %5777 = vmatprep.subr.bf16.mxu0 %v11098_v23 }
  0xdf   : > { %v1120_v44 = vrot.slane %v1119_v33, 4  ;;  %v3945_v47 = vrot.slane %v3943_v36, 5  ;;  %v3936_v48 = vsel %vm11982_vm2, %v3931_v39, %v3935_v22  ;;  %v3953_v51 = vshll.u32 %v3759_v31, 16 }
  0xe0   : > { %1996 = vmatmul.mubr.bf16.gmra.mrb[12].mxu1 %v9646_v46  ;;  %4817 = vmatmul.mubr.bf16.gmra.mrb[12].mxu0 %v9822_v61  ;;  %v3939_v46 = vrot.slane %v3937_v35, 4  ;;  %v1130_v49 = vrot.slane %v1129_v40, 4  ;;  %v3949_v50 = vrot.slane %v3947_v41, 4  ;;  %v9823_v53 = vcombine.low %v3926_v38, %v3936_v48  ;;  %v3763_v48 = vld [vmem:[#allocation2 + $0x5c] sm:$0xf] }
  0xe1   : > { %2005 = vmatprep.mubr.bf16.mxu1 %v13700_v24  ;;  %4826 = vmatprep.mubr.bf16.mxu0 %v13700_v24  ;;  %v1125_v54 = vsel %vm11982_vm2, %v1120_v44, %v1124_v25  ;;  %v1137_v57 = vshrl.u32 %v917_v42, 16  ;;  %v3955_v60 = vrot.slane %v3953_v51, 5  ;;  %v1140_v61 = vshll.u32 %v917_v42, 16 }
  0xe2   : > { %v3940_v55 = vor.u32 %v3939_v46, %v3935_v22  ;;  %v1135_v58 = vsel %vm11982_vm2, %v1130_v49, %v1134_v45  ;;  %v3950_v59 = vor.u32 %v3949_v50, %v3945_v47  ;;  %v1146_v2 = vshll.u32 %v918_v52, 16  ;;  %v11096_v22 = vld [vmem:[%s13693_s3 + $0x250] ss:$8 sps:$4 sm:$0xff]  }
  0xe3   : > { %v9648_v63 = vcombine.low %v1125_v54, %v1135_v58  ;;  %v1139_v1 = vrot.slane %v1137_v57, 4  ;;  %v1142_v6 = vrot.slane %v1140_v61, 5  ;;  %v1150_v7 = vshrl.u32 %v918_v52, 16  ;;  %5778 = vmatpush1.bf16.msra.mxu0 %v11096_v22  ;;  %v3764_v52 = vld [vmem:[#allocation2 + $0x60] sm:$0x1] }
  0xe4   : > { %v3941_v0 = vrot.slane %v3940_v55, 4  ;;  %v3951_v5 = vrot.slane %v3950_v59, 4  ;;  %v1156_v8 = vshll.u32 %v919_v56, 16  ;;  %v1148_v13 = vrot.slane %v1146_v2, 5  ;;  %v921_v54 = vld [vmem:[#allocation2 + $0x50] sm:$0xf] }
  0xe5   : > { %v3958_v14 = vshrl.u32 %v3760_v62, 16  ;;  %v3961_v15 = vshll.u32 %v3760_v62, 16  ;;  %v1143_v19 = vor.u32 %v1142_v6, %v1139_v1  ;;  %v1152_v20 = vrot.slane %v1150_v7, 4  ;;  %v11099_v59 = vld [vmem:[%s13693_s3 + $0x30] ss:$8 sps:$4 sm:$0xff]  }
  0xe6   : > { %v3946_v11 = vsel %vm11982_vm2, %v3941_v0, %v3945_v47  ;;  %v3956_v18 = vsel %vm11982_vm2, %v3951_v5, %v3955_v60  ;;  %v1158_v21 = vrot.slane %v1156_v8, 5  ;;  %v3967_v29 = vshll.u32 %v3761_v3, 16  ;;  %v11101_v60 = vld [vmem:[%s13693_s3 + $0x34] ss:$8 sps:$4 sm:$0xff]  }
  0xe7   : > { %v9824_v25 = vcombine.low %v3946_v11, %v3956_v18  ;;  %v3963_v28 = vrot.slane %v3961_v15, 5  ;;  %v1144_v30 = vrot.slane %v1143_v19, 4  ;;  %v1153_v31 = vor.u32 %v1152_v20, %v1148_v13  ;;  %2564 = vmatprep.subr.bf16.mxu1 %v11101_v60  ;;  %v923_v19 = vld [vmem:[#allocation2 + $0x58] sm:$0xf]  ;;  %v11104_v20 = vld [vmem:[%s13693_s3 + $0x264] ss:$8 sps:$4 sm:$0xff]  }
  0xe8   : > { %2006 = vmatmul.mubr.bf16.gmra.mrb[16].mxu1 %v9647_v26  ;;  %4827 = vmatmul.mubr.bf16.gmra.mrb[16].mxu0 %v9823_v53  ;;  %v3960_v26 = vrot.slane %v3958_v14, 4  ;;  %v3971_v33 = vshrl.u32 %v3761_v3, 16  ;;  %v3977_v34 = vshll.u32 %v3762_v10, 16  ;;  %v3969_v36 = vrot.slane %v3967_v29, 5 }
  0xe9   : > { %2015 = vmatprep.mubr.bf16.mxu1 %v13700_v24  ;;  %4836 = vmatprep.mubr.bf16.mxu0 %v13700_v24  ;;  %v1160_v38 = vshrl.u32 %v919_v56, 16  ;;  %v1166_v39 = vshll.u32 %v920_v16, 16  ;;  %v1149_v40 = vsel %vm11982_vm2, %v1144_v30, %v1148_v13  ;;  %v1154_v41 = vrot.slane %v1153_v31, 4  ;;  %v11102_v13 = vld [vmem:[%s13693_s3 + $0x260] ss:$8 sps:$4 sm:$0xff]  }
  0xea   : > { %v3964_v35 = vor.u32 %v3963_v28, %v3960_v26  ;;  %v3973_v42 = vrot.slane %v3971_v33, 4  ;;  %v3979_v43 = vrot.slane %v3977_v34, 5  ;;  %v1170_v47 = vshrl.u32 %v920_v16, 16  ;;  %2565 = vmatpush1.bf16.msra.mxu1 %v11099_v59  ;;  %v3765_v26 = vld [vmem:[#allocation2 + $0x64] sm:$0xf]  ;;  %5779 = vmatprep.subr.bf16.mxu0 %v11104_v20 }
  0xeb   : > { %v1162_v45 = vrot.slane %v1160_v38, 4  ;;  %v1168_v46 = vrot.slane %v1166_v39, 5  ;;  %v1159_v49 = vsel %vm11982_vm2, %v1154_v41, %v1158_v21  ;;  %v1176_v51 = vshll.u32 %v988_v37, 16  ;;  %v3766_v33 = vld [vmem:[#allocation2 + $0x68] sm:$0xf]  ;;  %5780 = vmatpush1.bf16.msra.mxu0 %v11102_v13 }
  0xec   : > { %v3965_v44 = vrot.slane %v3964_v35, 4  ;;  %v3974_v50 = vor.u32 %v3973_v42, %v3969_v36  ;;  %v3981_v53 = vshrl.u32 %v3762_v10, 16  ;;  %v9649_v55 = vcombine.low %v1149_v40, %v1159_v49  ;;  %v922_v10 = vld [vmem:[#allocation2 + $0x54] sm:$0xf] }
  0xed   : > { %v1163_v57 = vor.u32 %v1162_v45, %v1158_v21  ;;  %v1172_v58 = vrot.slane %v1170_v47, 4  ;;  %v1178_v62 = vrot.slane %v1176_v51, 5  ;;  %v3987_v0 = vshll.u32 %v3763_v48, 16  ;;  %v924_v51 = vld [vmem:[#allocation2 + $0x5c] sm:$0xf] }
  0xee   : > { %v3970_v56 = vsel %vm11982_vm2, %v3965_v44, %v3969_v36  ;;  %v3975_v61 = vrot.slane %v3974_v50, 4  ;;  %v3991_v3 = vshrl.u32 %v3763_v48, 16  ;;  %v3997_v5 = vshll.u32 %v3764_v52, 16  ;;  %v3767_v44 = vld [vmem:[#allocation2 + $0x6c] sm:$0xf] }
  0xef   : > { %v1164_v1 = vrot.slane %v1163_v57, 4  ;;  %v1173_v2 = vor.u32 %v1172_v58, %v1168_v46  ;;  %v3989_v8 = vrot.slane %v3987_v0, 5  ;;  %v1181_v11 = vshrl.u32 %v921_v54, 16  ;;  %v989_v0 = vld [vmem:[#allocation2 + $0x60] sm:$0x1] }
  0xf0   : > { %2016 = vmatmul.mubr.bf16.gmra.mrb[20].mxu1 %v9648_v63  ;;  %4837 = vmatmul.mubr.bf16.gmra.mrb[20].mxu0 %v9824_v25  ;;  %v3983_v63 = vrot.slane %v3981_v53, 4  ;;  %v3980_v6 = vsel %vm11982_vm2, %v3975_v61, %v3979_v43  ;;  %v3993_v18 = vrot.slane %v3991_v3, 4  ;;  %v3999_v22 = vrot.slane %v3997_v5, 5  ;;  %v11107_v61 = vld [vmem:[%s13693_s3 + $0x274] ss:$8 sps:$4 sm:$0xff]  }
  0xf1   : > { %2025 = vmatprep.mubr.bf16.mxu1 %v13700_v24  ;;  %4846 = vmatprep.mubr.bf16.mxu0 %v13700_v24  ;;  %v9825_v14 = vcombine.low %v3970_v56, %v3980_v6  ;;  %v1169_v15 = vsel %vm11982_vm2, %v1164_v1, %v1168_v46  ;;  %v1174_v16 = vrot.slane %v1173_v2, 4  ;;  %v1183_v23 = vrot.slane %v1181_v11, 4  ;;  %v11105_v56 = vld [vmem:[%s13693_s3 + $0x270] ss:$8 sps:$4 sm:$0xff]  }
  0xf2   : > { %v3984_v7 = vor.u32 %v3983_v63, %v3979_v43  ;;  %v1184_v25 = vshll.u32 %v921_v54, 16  ;;  %v3994_v29 = vor.u32 %v3993_v18, %v3989_v8  ;;  %v1190_v30 = vshll.u32 %v922_v10, 16  ;;  %5781 = vmatprep.subr.bf16.mxu0 %v11107_v61 }
  0xf3   : > { %v1179_v28 = vsel %vm11982_vm2, %v1174_v16, %v1178_v62  ;;  %v1194_v31 = vshrl.u32 %v922_v10, 16  ;;  %v1200_v37 = vshll.u32 %v923_v19, 16  ;;  %v4002_v41 = vshrl.u32 %v3765_v26, 16  ;;  %5782 = vmatpush1.bf16.msra.mxu0 %v11105_v56 }
  0xf4   : > { %v3985_v21 = vrot.slane %v3984_v7, 4  ;;  %v9650_v34 = vcombine.low %v1169_v15, %v1179_v28  ;;  %v1186_v36 = vrot.slane %v1184_v25, 5  ;;  %v3995_v38 = vrot.slane %v3994_v29, 4  ;;  %v3769_v15 = vld [vmem:[#allocation2 + $0x74] sm:$0x1] }
  0xf5   : > { %v1192_v39 = vrot.slane %v1190_v30, 5  ;;  %v1196_v40 = vrot.slane %v1194_v31, 4  ;;  %v1202_v43 = vrot.slane %v1200_v37, 5  ;;  %v4005_v45 = vshll.u32 %v3765_v26, 16  ;;  %v926_v28 = vld [vmem:[#allocation2 + $0x68] sm:$0xf] }
  0xf6   : > { %v3990_v35 = vsel %vm11982_vm2, %v3985_v21, %v3989_v8  ;;  %v1187_v42 = vor.u32 %v1186_v36, %v1183_v23  ;;  %v4011_v46 = vshll.u32 %v3766_v33, 16  ;;  %v4000_v47 = vsel %vm11982_vm2, %v3995_v38, %v3999_v22  ;;  %v3768_v8 = vld [vmem:[#allocation2 + $0x70] sm:$0xf]  ;;  %v925_v21 = vld [vmem:[#allocation2 + $0x64] sm:$0xf] }
  0xf7   : > { %v1197_v48 = vor.u32 %v1196_v40, %v1192_v39  ;;  %v4004_v49 = vrot.slane %v4002_v41, 4  ;;  %v4015_v50 = vshrl.u32 %v3766_v33, 16  ;;  %v9826_v52 = vcombine.low %v3990_v35, %v4000_v47  ;;  %v11108_v29 = vld [vmem:[%s13693_s3 + $0x40] ss:$8 sps:$4 sm:$0xff]   ;;  %v11110_v35 = vld [vmem:[%s13693_s3 + $0x44] ss:$8 sps:$4 sm:$0xff]  }
  0xf8   : > { %2026 = vmatmul.mubr.bf16.gmra.mrb[24].mxu1 %v9649_v55  ;;  %4847 = vmatmul.mubr.bf16.gmra.mrb[24].mxu0 %v9825_v14  ;;  %v1188_v53 = vrot.slane %v1187_v42, 4  ;;  %v4007_v54 = vrot.slane %v4005_v45, 5  ;;  %v4013_v55 = vrot.slane %v4011_v46, 5  ;;  %v4021_v59 = vshll.u32 %v3767_v44, 16  ;;  %v927_v47 = vld [vmem:[#allocation2 + $0x6c] sm:$0xf] }
  0xf9   : > { %2035 = vmatprep.mubr.bf16.mxu1 %v13700_v24  ;;  %4856 = vmatprep.mubr.bf16.mxu0 %v13700_v24  ;;  %v1198_v57 = vrot.slane %v1197_v48, 4  ;;  %v4017_v58 = vrot.slane %v4015_v50, 4  ;;  %v1204_v60 = vshrl.u32 %v923_v19, 16  ;;  %v1210_v1 = vshll.u32 %v924_v51, 16  ;;  %v3770_v50 = vld [vmem:[#allocation2 + $0x78] sm:$0xf] }
  0xfa   : > { %v1193_v62 = vsel %vm11982_vm2, %v1188_v53, %v1192_v39  ;;  %v4008_v63 = vor.u32 %v4007_v54, %v4004_v49  ;;  %v1214_v2 = vshrl.u32 %v924_v51, 16  ;;  %v4023_v6 = vrot.slane %v4021_v59, 5  ;;  %2566 = vmatprep.subr.bf16.mxu1 %v11110_v35  ;;  %v3774_v35 = vld [vmem:[#allocation2 + $0x88] sm:$0x1] }
  0xfb   : > { %v1203_v3 = vsel %vm11982_vm2, %v1198_v57, %v1202_v43  ;;  %v4018_v5 = vor.u32 %v4017_v58, %v4013_v55  ;;  %v1206_v7 = vrot.slane %v1204_v60, 4  ;;  %v1212_v13 = vrot.slane %v1210_v1, 5  ;;  %2567 = vmatpush1.bf16.msra.mxu1 %v11108_v29  ;;  %v3773_v29 = vld [vmem:[#allocation2 + $0x84] sm:$0xf] }
  0xfc   : > { %v9651_v10 = vcombine.low %v1193_v62, %v1203_v3  ;;  %v4009_v11 = vrot.slane %v4008_v63, 4  ;;  %v1216_v14 = vrot.slane %v1214_v2, 4  ;;  %v1220_v19 = vshll.u32 %v989_v0, 16  ;;  %v3772_v3 = vld [vmem:[#allocation2 + $0x80] sm:$0xf] }
  0xfd   : > { %v4019_v16 = vrot.slane %v4018_v5, 4  ;;  %v1207_v18 = vor.u32 %v1206_v7, %v1202_v43  ;;  %v4025_v20 = vshrl.u32 %v3767_v44, 16  ;;  %v4031_v25 = vshll.u32 %v3768_v8, 16  ;;  %v11113_v44 = vld [vmem:[%s13693_s3 + $0x284] ss:$8 sps:$4 sm:$0xff]  }
  0xfe   : > { %v4014_v22 = vsel %vm11982_vm2, %v4009_v11, %v4013_v55  ;;  %v1217_v23 = vor.u32 %v1216_v14, %v1212_v13  ;;  %v4035_v26 = vshrl.u32 %v3768_v8, 16  ;;  %v1222_v33 = vrot.slane %v1220_v19, 5  ;;  %v3771_v55 = vld [vmem:[#allocation2 + $0x7c] sm:$0xf]  ;;  %7257 = vmatprep.subr.bf16.mxu0 %v11113_v44 }
  0xff   : > { %v4024_v30 = vsel %vm11982_vm2, %v4019_v16, %v4023_v6  ;;  %v1208_v31 = vrot.slane %v1207_v18, 4  ;;  %v4033_v38 = vrot.slane %v4031_v25, 5  ;;  %v4041_v42 = vshll.u32 %v3769_v15, 16 }
 0x100   : > { %2036 = vmatmul.mubr.bf16.gmra.mrb[28].mxu1 %v9650_v34  ;;  %4857 = vmatmul.mubr.bf16.gmra.mrb[28].mxu0 %v9826_v52  ;;  %v4027_v34 = vrot.slane %v4025_v20, 4  ;;  %v9827_v36 = vcombine.low %v4014_v22, %v4024_v30  ;;  %v1218_v37 = vrot.slane %v1217_v23, 4  ;;  %v4037_v39 = vrot.slane %v4035_v26, 4  ;;  %v990_v20 = vld [vmem:[#allocation2 + $0x74] sm:$0x1] }
 0x101   : > { %2045 = vmatprep.mubr.bf16.mxu1 %v13700_v24  ;;  %4866 = vmatprep.mubr.bf16.mxu0 %v13700_v24  ;;  %v1213_v40 = vsel %vm11982_vm2, %v1208_v31, %v1212_v13  ;;  %v1225_v43 = vshrl.u32 %v925_v21, 16  ;;  %v1228_v48 = vshll.u32 %v925_v21, 16  ;;  %v1234_v49 = vshll.u32 %v926_v28, 16 }
 0x102   : > { %v4028_v41 = vor.u32 %v4027_v34, %v4023_v6  ;;  %v1223_v45 = vsel %vm11982_vm2, %v1218_v37, %v1222_v33  ;;  %v4038_v46 = vor.u32 %v4037_v39, %v4033_v38  ;;  %v4043_v53 = vrot.slane %v4041_v42, 5  ;;  %v928_v6 = vld [vmem:[#allocation2 + $0x70] sm:$0xf] }
 0x103   : > { %v9652_v51 = vcombine.low %v1213_v40, %v1223_v45  ;;  %v1227_v54 = vrot.slane %v1225_v43, 4  ;;  %v1230_v57 = vrot.slane %v1228_v48, 5  ;;  %v1236_v58 = vrot.slane %v1234_v49, 5  ;;  %v11114_v40 = vld [vmem:[%s13693_s3 + $0x50] ss:$8 sps:$4 sm:$0xff]  }
 0x104   : > { %v4029_v52 = vrot.slane %v4028_v41, 4  ;;  %v4039_v56 = vrot.slane %v4038_v46, 4  ;;  %v1238_v59 = vshrl.u32 %v926_v28, 16  ;;  %v1244_v61 = vshll.u32 %v927_v47, 16  ;;  %v11116_v41 = vld [vmem:[%s13693_s3 + $0x54] ss:$8 sps:$4 sm:$0xff]  }
 0x105   : > { %v4046_v62 = vshrl.u32 %v3770_v50, 16  ;;  %v4049_v63 = vshll.u32 %v3770_v50, 16  ;;  %v1231_v1 = vor.u32 %v1230_v57, %v1227_v54  ;;  %v4055_v5 = vshll.u32 %v3771_v55, 16  ;;  %v929_v46 = vld [vmem:[#allocation2 + $0x78] sm:$0xf]  ;;  %2568 = vmatprep.subr.bf16.mxu1 %v11116_v41 }
 0x106   : > { %v4034_v60 = vsel %vm11982_vm2, %v4029_v52, %v4033_v38  ;;  %v4044_v0 = vsel %vm11982_vm2, %v4039_v56, %v4043_v53  ;;  %v1240_v2 = vrot.slane %v1238_v59, 4  ;;  %v1246_v8 = vrot.slane %v1244_v61, 5  ;;  %2569 = vmatpush1.bf16.msra.mxu1 %v11114_v40  ;;  %v11122_v41 = vld [vmem:[%s13693_s3 + $0x64] ss:$8 sps:$4 sm:$0xff]  }
 0x107   : > { %v9828_v7 = vcombine.low %v4034_v60, %v4044_v0  ;;  %v4051_v11 = vrot.slane %v4049_v63, 5  ;;  %v1232_v13 = vrot.slane %v1231_v1, 4  ;;  %v4057_v15 = vrot.slane %v4055_v5, 5  ;;  %v931_v0 = vld [vmem:[#allocation2 + $0x80] sm:$0xf]  ;;  %2570 = vmatprep.subr.bf16.mxu1 %v11122_v41 }
 0x108   : > { %2046 = vmatmul.mubr.bf16.gmra.mrb[32].mxu1 %v9651_v10  ;;  %4867 = vmatmul.mubr.bf16.gmra.mrb[32].mxu0 %v9827_v36  ;;  %v4048_v10 = vrot.slane %v4046_v62, 4  ;;  %v1241_v14 = vor.u32 %v1240_v2, %v1236_v58  ;;  %v4059_v16 = vshrl.u32 %v3771_v55, 16  ;;  %v4065_v19 = vshll.u32 %v3772_v3, 16  ;;  %v3775_v1 = vld [vmem:[#allocation2 + $0x8c] sm:$0xf] }
 0x109   : > { %2055 = vmatprep.mubr.bf16.mxu1 %v13700_v24  ;;  %4876 = vmatprep.mubr.bf16.mxu0 %v13700_v24  ;;  %v1248_v21 = vshrl.u32 %v927_v47, 16  ;;  %v1254_v22 = vshll.u32 %v928_v6, 16  ;;  %v1237_v23 = vsel %vm11982_vm2, %v1232_v13, %v1236_v58  ;;  %v1258_v28 = vshrl.u32 %v928_v6, 16  ;;  %v930_v58 = vld [vmem:[#allocation2 + $0x7c] sm:$0xf] }
 0x10a   : > { %v4052_v18 = vor.u32 %v4051_v11, %v4048_v10  ;;  %v1242_v25 = vrot.slane %v1241_v14, 4  ;;  %v4061_v26 = vrot.slane %v4059_v16, 4  ;;  %v4067_v31 = vrot.slane %v4065_v19, 5  ;;  %v3776_v16 = vld [vmem:[#allocation2 + $0x90] sm:$0xf] }
 0x10b   : > { %v1250_v33 = vrot.slane %v1248_v21, 4  ;;  %v1256_v34 = vrot.slane %v1254_v22, 5  ;;  %v1260_v38 = vrot.slane %v1258_v28, 4  ;;  %v1264_v39 = vshll.u32 %v990_v20, 16  ;;  %v3777_v22 = vld [vmem:[#allocation2 + $0x94] sm:$0xf] }
 0x10c   : > { %v4053_v30 = vrot.slane %v4052_v18, 4  ;;  %v1247_v36 = vsel %vm11982_vm2, %v1242_v25, %v1246_v8  ;;  %v4062_v37 = vor.u32 %v4061_v26, %v4057_v15  ;;  %v4069_v45 = vshrl.u32 %v3772_v3, 16 }
 0x10d   : > { %v9653_v42 = vcombine.low %v1237_v23, %v1247_v36  ;;  %v1251_v44 = vor.u32 %v1250_v33, %v1246_v8  ;;  %v1261_v48 = vor.u32 %v1260_v38, %v1256_v34  ;;  %v1266_v49 = vrot.slane %v1264_v39, 5  ;;  %v11120_v36 = vld [vmem:[%s13693_s3 + $0x60] ss:$8 sps:$4 sm:$0xff]  }
 0x10e   : > { %v4058_v43 = vsel %vm11982_vm2, %v4053_v30, %v4057_v15  ;;  %v4063_v47 = vrot.slane %v4062_v37, 4  ;;  %v4075_v50 = vshll.u32 %v3773_v29, 16  ;;  %v4071_v52 = vrot.slane %v4069_v45, 4  ;;  %v932_v30 = vld [vmem:[#allocation2 + $0x84] sm:$0xf]  ;;  %2571 = vmatpush1.bf16.msra.mxu1 %v11120_v36 }
 0x10f   : > { %v4079_v53 = vshrl.u32 %v3773_v29, 16  ;;  %v4085_v54 = vshll.u32 %v3774_v35, 16  ;;  %v1262_v56 = vrot.slane %v1261_v48, 4  ;;  %v1269_v59 = vshrl.u32 %v929_v46, 16  ;;  %v991_v45 = vld [vmem:[#allocation2 + $0x88] sm:$0x1] }
 0x110   : > { %2056 = vmatmul.mubr.bf16.gmra.mrb[36].mxu1 %v9652_v51  ;;  %4877 = vmatmul.mubr.bf16.gmra.mrb[36].mxu0 %v9828_v7  ;;  %v1252_v51 = vrot.slane %v1251_v44, 4  ;;  %v4068_v55 = vsel %vm11982_vm2, %v4063_v47, %v4067_v31  ;;  %v4077_v57 = vrot.slane %v4075_v50, 5  ;;  %v4072_v62 = vor.u32 %v4071_v52, %v4067_v31 }
 0x111   : > { %2065 = vmatprep.mubr.bf16.mxu1 %v13700_v24  ;;  %4886 = vmatprep.mubr.bf16.mxu0 %v13700_v24  ;;  %v9829_v60 = vcombine.low %v4058_v43, %v4068_v55  ;;  %v4081_v63 = vrot.slane %v4079_v53, 4  ;;  %v1267_v2 = vsel %vm11982_vm2, %v1262_v56, %v1266_v49  ;;  %v4087_v3 = vrot.slane %v4085_v54, 5  ;;  %v3778_v55 = vld [vmem:[#allocation2 + $0x98] sm:$0xf] }
 0x112   : > { %v1257_v61 = vsel %vm11982_vm2, %v1252_v51, %v1256_v34  ;;  %v1271_v5 = vrot.slane %v1269_v59, 4  ;;  %v1272_v6 = vshll.u32 %v929_v46, 16  ;;  %v4073_v8 = vrot.slane %v4072_v62, 4  ;;  %v3779_v59 = vld [vmem:[#allocation2 + $0x9c] sm:$0x1] }
 0x113   : > { %v9654_v7 = vcombine.low %v1257_v61, %v1267_v2  ;;  %v4082_v10 = vor.u32 %v4081_v63, %v4077_v57  ;;  %v1278_v11 = vshll.u32 %v930_v58, 16  ;;  %v1282_v14 = vshrl.u32 %v930_v58, 16 }
 0x114   : > { %v1274_v13 = vrot.slane %v1272_v6, 5  ;;  %v1288_v15 = vshll.u32 %v931_v0, 16  ;;  %v4090_v18 = vshrl.u32 %v3775_v1, 16  ;;  %v4078_v19 = vsel %vm11982_vm2, %v4073_v8, %v4077_v57  ;;  %v933_v6 = vld [vmem:[#allocation2 + $0x8c] sm:$0xf] }
 0x115   : > { %v4083_v20 = vrot.slane %v4082_v10, 4  ;;  %v1280_v21 = vrot.slane %v1278_v11, 5  ;;  %v4093_v23 = vshll.u32 %v3775_v1, 16  ;;  %v1284_v26 = vrot.slane %v1282_v14, 4 }
 0x116   : > { %v1275_v25 = vor.u32 %v1274_v13, %v1271_v5  ;;  %v1290_v28 = vrot.slane %v1288_v15, 5  ;;  %v4092_v29 = vrot.slane %v4090_v18, 4  ;;  %v4099_v34 = vshll.u32 %v3776_v16, 16  ;;  %v934_v13 = vld [vmem:[#allocation2 + $0x90] sm:$0xf] }
 0x117   : > { %v4088_v31 = vsel %vm11982_vm2, %v4083_v20, %v4087_v3  ;;  %v4095_v33 = vrot.slane %v4093_v23, 5  ;;  %v4103_v35 = vshrl.u32 %v3776_v16, 16  ;;  %v1285_v39 = vor.u32 %v1284_v26, %v1280_v21 }
 0x118   : > { %2066 = vmatmul.mubr.bf16.gmra.mrb[40].mxu1 %v9653_v42  ;;  %4887 = vmatmul.mubr.bf16.gmra.mrb[40].mxu0 %v9829_v60  ;;  %v9830_v37 = vcombine.low %v4078_v19, %v4088_v31  ;;  %v1276_v38 = vrot.slane %v1275_v25, 4  ;;  %v4109_v40 = vshll.u32 %v3777_v22, 16  ;;  %v4101_v43 = vrot.slane %v4099_v34, 5  ;;  %v12224_v19 = vld [vmem:[#allocation2 + $0x94] sm:$0xf] }
 0x119   : > { %2075 = vmatprep.mubr.bf16.mxu1 %v13700_v24  ;;  %4896 = vmatprep.mubr.bf16.mxu0 %v13700_v24  ;;  %v4096_v42 = vor.u32 %v4095_v33, %v4092_v29  ;;  %v4105_v44 = vrot.slane %v4103_v35, 4  ;;  %v1292_v46 = vshrl.u32 %v931_v0, 16  ;;  %v1286_v48 = vrot.slane %v1285_v39, 4  ;;  %v3780_v25 = vld [vmem:[#allocation2 + $0xa0] sm:$0xf] }
 0x11a   : > { %v1281_v47 = vsel %vm11982_vm2, %v1276_v38, %v1280_v21  ;;  %v4111_v49 = vrot.slane %v4109_v40, 5  ;;  %v1298_v50 = vshll.u32 %v932_v30, 16  ;;  %v1302_v54 = vshrl.u32 %v932_v30, 16  ;;  %v3781_v31 = vld [vmem:[#allocation2 + $0xa4] sm:$0xf] }
 0x11b   : > { %v4097_v51 = vrot.slane %v4096_v42, 4  ;;  %v4106_v52 = vor.u32 %v4105_v44, %v4101_v43  ;;  %v1294_v53 = vrot.slane %v1292_v46, 4  ;;  %v1291_v56 = vsel %vm11982_vm2, %v1286_v48, %v1290_v28  ;;  %v11126_v42 = vld [vmem:[%s13693_s3 + $0x70] ss:$8 sps:$4 sm:$0xff]  }
 0x11c   : > { %v1300_v57 = vrot.slane %v1298_v50, 5  ;;  %v1308_v58 = vshll.u32 %v991_v45, 16  ;;  %v4113_v60 = vshrl.u32 %v3777_v22, 16  ;;  %v9655_v61 = vcombine.low %v1281_v47, %v1291_v56  ;;  %v936_v56 = vld [vmem:[#allocation2 + $0x98] sm:$0xf] }
 0x11d   : > { %v4102_v62 = vsel %vm11982_vm2, %v4097_v51, %v4101_v43  ;;  %v4107_v63 = vrot.slane %v4106_v52, 4  ;;  %v1295_v0 = vor.u32 %v1294_v53, %v1290_v28  ;;  %v1304_v1 = vrot.slane %v1302_v54, 4  ;;  %v11128_v43 = vld [vmem:[%s13693_s3 + $0x74] ss:$8 sps:$4 sm:$0xff]  }
 0x11e   : > { %v1310_v2 = vrot.slane %v1308_v58, 5  ;;  %v4115_v3 = vrot.slane %v4113_v60, 4  ;;  %v4119_v5 = vshll.u32 %v3778_v55, 16  ;;  %v4123_v10 = vshrl.u32 %v3778_v55, 16  ;;  %2572 = vmatprep.subr.bf16.mxu1 %v11128_v43 }
 0x11f   : > { %v1296_v8 = vrot.slane %v1295_v0, 4  ;;  %v4129_v11 = vshll.u32 %v3779_v59, 16  ;;  %v1305_v15 = vor.u32 %v1304_v1, %v1300_v57  ;;  %v1313_v23 = vshrl.u32 %v933_v6, 16  ;;  %2573 = vmatpush1.bf16.msra.mxu1 %v11126_v42 }
 0x120   : > { %2076 = vmatmul.mubr.bf16.gmra.mrb[44].mxu1 %v9654_v7  ;;  %4897 = vmatmul.mubr.bf16.gmra.mrb[44].mxu0 %v9830_v37  ;;  %v4112_v7 = vsel %vm11982_vm2, %v4107_v63, %v4111_v49  ;;  %v4116_v16 = vor.u32 %v4115_v3, %v4111_v49  ;;  %v4121_v18 = vrot.slane %v4119_v5, 5  ;;  %v4125_v21 = vrot.slane %v4123_v10, 4  ;;  %v3782_v37 = vld [vmem:[#allocation2 + $0xa8] sm:$0xf] }
 0x121   : > { %2085 = vmatprep.mubr.bf16.mxu1 %v13700_v24  ;;  %4906 = vmatprep.mubr.bf16.mxu0 %v13700_v24  ;;  %v9831_v14 = vcombine.low %v4102_v62, %v4112_v7  ;;  %v1301_v20 = vsel %vm11982_vm2, %v1296_v8, %v1300_v57  ;;  %v4131_v22 = vrot.slane %v4129_v11, 5  ;;  %v1306_v26 = vrot.slane %v1305_v15, 4  ;;  %v3783_v7 = vld [vmem:[#allocation2 + $0xac] sm:$0xf] }
 0x122   : > { %v4117_v28 = vrot.slane %v4116_v16, 4  ;;  %v1316_v29 = vshll.u32 %v933_v6, 16  ;;  %v1322_v30 = vshll.u32 %v934_v13, 16  ;;  %v4126_v33 = vor.u32 %v4125_v21, %v4121_v18 }
 0x123   : > { %v1315_v34 = vrot.slane %v1313_v23, 4  ;;  %v1326_v35 = vshrl.u32 %v934_v13, 16  ;;  %v1332_v36 = vshll.u32 %v12224_v19, 16  ;;  %v1311_v38 = vsel %vm11982_vm2, %v1306_v26, %v1310_v2 }
 0x124   : > { %v4122_v39 = vsel %vm11982_vm2, %v4117_v28, %v4121_v18  ;;  %v1318_v40 = vrot.slane %v1316_v29, 5  ;;  %v1324_v41 = vrot.slane %v1322_v30, 5  ;;  %v9656_v44 = vcombine.low %v1301_v20, %v1311_v38 }
 0x125   : > { %v4127_v45 = vrot.slane %v4126_v33, 4  ;;  %v1328_v46 = vrot.slane %v1326_v35, 4  ;;  %v1334_v47 = vrot.slane %v1332_v36, 5  ;;  %v4134_v49 = vshrl.u32 %v3780_v25, 16  ;;  %v938_v36 = vld [vmem:[#allocation2 + $0xcc] sm:$0xf] }
 0x126   : > { %v1319_v48 = vor.u32 %v1318_v40, %v1315_v34  ;;  %v4137_v50 = vshll.u32 %v3780_v25, 16  ;;  %v4143_v51 = vshll.u32 %v3781_v31, 16  ;;  %v4147_v54 = vshrl.u32 %v3781_v31, 16  ;;  %v937_v25 = vld [vmem:[#allocation2 + $0xc8] sm:$0xf] }
 0x127   : > { %v4132_v52 = vsel %vm11982_vm2, %v4127_v45, %v4131_v22  ;;  %v1329_v53 = vor.u32 %v1328_v46, %v1324_v41  ;;  %v4153_v55 = vshll.u32 %v3782_v37, 16  ;;  %v4136_v59 = vrot.slane %v4134_v49, 4  ;;  %v5235_v46 = vld [vmem:[#allocation2 + $0x14] sm:$0xe] }
 0x128   : > { %2086 = vmatmul.mubr.bf16.gmra.mrb[48].mxu1 %v9655_v61  ;;  %4907 = vmatmul.mubr.bf16.gmra.mrb[48].mxu0 %v9831_v14  ;;  %v9832_v57 = vcombine.low %v4122_v39, %v4132_v52  ;;  %v1320_v58 = vrot.slane %v1319_v48, 4  ;;  %v4139_v60 = vrot.slane %v4137_v50, 5  ;;  %v992_v61 = vld [vmem:[#allocation2 + $0x9c] sm:$0x1]  ;;  %v4145_v63 = vrot.slane %v4143_v51, 5 }
 0x129   : > { %2095 = vmatprep.mubr.bf16.mxu1 %v13700_v24  ;;  %4916 = vmatprep.mubr.bf16.mxu0 %v13700_v24  ;;  %v1330_v62 = vrot.slane %v1329_v53, 4  ;;  %v4149_v0 = vrot.slane %v4147_v54, 4  ;;  %v4155_v1 = vrot.slane %v4153_v55, 5  ;;  %v1336_v5 = vshrl.u32 %v12224_v19, 16  ;;  %v3784_v14 = vld [vmem:[#allocation2 + $0xb0] sm:$0x1] }
 0x12a   : > { %v1325_v2 = vsel %vm11982_vm2, %v1320_v58, %v1324_v41  ;;  %v4140_v3 = vor.u32 %v4139_v60, %v4136_v59  ;;  %v1342_v6 = vshll.u32 %v936_v56, 16  ;;  %v1346_v11 = vshrl.u32 %v936_v56, 16  ;;  %v939_v41 = vld [vmem:[#allocation2 + $0xd0] sm:$0xf]  ;;  %v940_v55 = vld [vmem:[#allocation2 + $0xd4] sm:$0xf] }
 0x12b   : > { %v1335_v8 = vsel %vm11982_vm2, %v1330_v62, %v1334_v47  ;;  %v4150_v10 = vor.u32 %v4149_v0, %v4145_v63  ;;  %v1352_v13 = vshll.u32 %v992_v61, 16  ;;  %v1338_v18 = vrot.slane %v1336_v5, 4 }
 0x12c   : > { %v9657_v15 = vcombine.low %v1325_v2, %v1335_v8  ;;  %v4141_v16 = vrot.slane %v4140_v3, 4  ;;  %v1344_v20 = vrot.slane %v1342_v6, 5  ;;  %v1348_v22 = vrot.slane %v1346_v11, 4 }
 0x12d   : > { %v4151_v21 = vrot.slane %v4150_v10, 4  ;;  %v1354_v23 = vrot.slane %v1352_v13, 5  ;;  %v4157_v19 = vshrl.u32 %v3782_v37, 16  ;;  %v1339_v28 = vor.u32 %v1338_v18, %v1334_v47  ;;  %v941_v10 = vld [vmem:[#allocation2 + $0xdc] sm:$0xf] }
 0x12e   : > { %v4146_v26 = vsel %vm11982_vm2, %v4141_v16, %v4145_v63  ;;  %v4163_v29 = vshll.u32 %v3783_v7, 16  ;;  %v4167_v30 = vshrl.u32 %v3783_v7, 16  ;;  %v1349_v33 = vor.u32 %v1348_v22, %v1344_v20  ;;  %v993_v63 = vld [vmem:[#allocation2 + $0xd8] sm:$0x1] }
 0x12f   : > { %v4156_v31 = vsel %vm11982_vm2, %v4151_v21, %v4155_v1  ;;  %v4159_v34 = vrot.slane %v4157_v19, 4  ;;  %v4173_v35 = vshll.u32 %v3784_v14, 16  ;;  %v1340_v39 = vrot.slane %v1339_v28, 4 }
 0x130   : > { %2096 = vmatmul.mubr.bf16.gmra.mrb[52].mxu1 %v9656_v44  ;;  %4917 = vmatmul.mubr.bf16.gmra.mrb[52].mxu0 %v9832_v57  ;;  %v9833_v38 = vcombine.low %v4146_v26, %v4156_v31  ;;  %v4165_v37 = vrot.slane %v4163_v29, 5  ;;  %v4169_v40 = vrot.slane %v4167_v30, 4  ;;  %v1350_v42 = vrot.slane %v1349_v33, 4  ;;  %v11256_v26 = vld [vmem:[#allocation2 + $0x20] sm:$0xf] }
 0x131   : > { %2105 = vmatprep.mubr.bf16.mxu1 %v13700_v24  ;;  %4926 = vmatprep.mubr.bf16.mxu0 %v13700_v24  ;;  %v4160_v43 = vor.u32 %v4159_v34, %v4155_v1  ;;  %v4175_v44 = vrot.slane %v4173_v35, 5  ;;  %v1357_v45 = vshrl.u32 %v937_v25, 16  ;;  %v1345_v47 = vsel %vm11982_vm2, %v1340_v39, %v1344_v20  ;;  %v942_v29 = vld [vmem:[#allocation2 + $0xe0] sm:$0xf] }
 0x132   : > { %v4170_v48 = vor.u32 %v4169_v40, %v4165_v37  ;;  %v1360_v49 = vshll.u32 %v937_v25, 16  ;;  %v1366_v50 = vshll.u32 %v938_v36, 16  ;;  %v1355_v51 = vsel %vm11982_vm2, %v1350_v42, %v1354_v23  ;;  %v11111_v40 = vld [vmem:[%s13693_s3 + $0x280] ss:$8 sps:$4 sm:$0xff]  }
 0x133   : > { %v4161_v52 = vrot.slane %v4160_v43, 4  ;;  %v1359_v53 = vrot.slane %v1357_v45, 4  ;;  %v1370_v54 = vshrl.u32 %v938_v36, 16  ;;  %v9658_v56 = vcombine.low %v1345_v47, %v1355_v51  ;;  %v944_v45 = vld [vmem:[#allocation2 + $0xe8] sm:$0xf] }
 0x134   : > { %v4171_v57 = vrot.slane %v4170_v48, 4  ;;  %v1362_v58 = vrot.slane %v1360_v49, 5  ;;  %v1368_v59 = vrot.slane %v1366_v50, 5  ;;  %v1376_v62 = vshll.u32 %v939_v41, 16 }
 0x135   : > { %v4166_v60 = vsel %vm11982_vm2, %v4161_v52, %v4165_v37  ;;  %v1372_v61 = vrot.slane %v1370_v54, 4  ;;  %v9867_v2 = vrot.slane %v5235_v46, 9  ;;  %v1380_v8 = vshrl.u32 %v939_v41, 16  ;;  %v943_v37 = vld [vmem:[#allocation2 + $0xe4] sm:$0xf] }
 0x136   : > { %v4176_v0 = vsel %vm11982_vm2, %v4171_v57, %v4175_v44  ;;  %v1363_v1 = vor.u32 %v1362_v58, %v1359_v53  ;;  %v1378_v6 = vrot.slane %v1376_v62, 5  ;;  %v5340_v14 = vsel %vm12263_vm5, %v11998_v27, %v5339_v32  ;;  %v11135_v46 = vld [vmem:[%s13693_s3 + $0x104] ss:$8 sps:$4 sm:$0xff]   ;;  %v12295_v52 = vld [vmem:[#allocation2 + $0x28] sm:$0xe] }
 0x137   : > { %v9834_v3 = vcombine.low %v4166_v60, %v4176_v0  ;;  %v1373_v5 = vor.u32 %v1372_v61, %v1368_v59  ;;  %v5337_v13 = vsel %vm12263_vm5, %v9867_v2, %v5336_v17  ;;  %v1382_v20 = vrot.slane %v1380_v8, 4  ;;  %v11119_v53 = vld [vmem:[%s13693_s3 + $0x294] ss:$8 sps:$4 sm:$0xff]   ;;  %3264 = vmatprep.subr.bf16.mxu1 %v11135_v46  ;;  %v994_v58 = vld [vmem:[#allocation2 + $0xec] sm:$0x1] }
 0x138   : > { %2106 = vmatmul.mubr.bf16.gmra.mrb[56].mxu1 %v9657_v15  ;;  %4927 = vmatmul.mubr.bf16.gmra.mrb[56].mxu0 %v9833_v38  ;;  %v1364_v11 = vrot.slane %v1363_v1, 4  ;;  %v1386_v15 = vshll.u32 %v940_v55, 16  ;;  %v9899_v18 = vcombine.low %v5337_v13, %v5340_v14  ;;  %v1390_v21 = vshrl.u32 %v940_v55, 16  ;;  %v11257_v38 = vld [vmem:[#allocation2 + $0x24] sm:$0x1] }
 0x139   : > { %2115 = vmatprep.mubr.bf16.mxu1 %v13700_v24  ;;  %4936 = vmatprep.mubr.bf16.mxu0 %v13700_v24  ;;  %v1374_v16 = vrot.slane %v1373_v5, 4  ;;  %v1396_v19 = vshll.u32 %v993_v63, 16  ;;  %v1383_v17 = vor.u32 %v1382_v20, %v1378_v6  ;;  %v5342_v28 = vrot.slane %v11256_v26, 5  ;;  %v11258_v60 = vld [vmem:[#allocation2 + $0x2c] sm:$0xf] }
 0x13a   : > { %v1369_v22 = vsel %vm11982_vm2, %v1364_v11, %v1368_v59  ;;  %v1388_v23 = vrot.slane %v1386_v15, 5  ;;  %v1392_v25 = vrot.slane %v1390_v21, 4  ;;  %v5341_v31 = vrot.slane %v5339_v32, 4  ;;  %v945_v0 = vld [vmem:[#allocation2 + $0xf0] sm:$0xf] }
 0x13b   : > { %v1379_v4 = vsel %vm11982_vm2, %v1374_v16, %v1378_v6  ;;  %v1398_v30 = vrot.slane %v1396_v19, 5  ;;  %v1401_v33 = vshrl.u32 %v941_v10, 16  ;;  %v1384_v34 = vrot.slane %v1383_v17, 4  ;;  %v11117_v6 = vld [vmem:[%s13693_s3 + $0x290] ss:$8 sps:$4 sm:$0xff]  }
 0x13c   : > { %v9659_v27 = vcombine.low %v1369_v22, %v1379_v4  ;;  %v1393_v35 = vor.u32 %v1392_v25, %v1388_v23  ;;  %v5344_v36 = vrot.slane %v5342_v28, 4  ;;  %v5345_v39 = vrot.slane %v11257_v38, 5  ;;  %v946_v11 = vld [vmem:[#allocation2 + $0xf4] sm:$0xf]  ;;  %v11125_v13 = vld [vmem:[%s13693_s3 + $0x2a4] ss:$8 sps:$4 sm:$0xff]  }
 0x13d   : > { %v1403_v41 = vrot.slane %v1401_v33, 4  ;;  %v1404_v42 = vshll.u32 %v941_v10, 16  ;;  %v1410_v43 = vshll.u32 %v942_v29, 16  ;;  %v1414_v44 = vshrl.u32 %v942_v29, 16  ;;  %v11259_v16 = vld [vmem:[#allocation2 + $0x30] sm:$0xf] }
 0x13e   : > { %v1389_v9 = vsel %vm11982_vm2, %v1384_v34, %v1388_v23  ;;  %v1394_v32 = vrot.slane %v1393_v35, 4  ;;  %v1420_v50 = vshll.u32 %v943_v37, 16  ;;  %v5343_v54 = vsel %vm12263_vm5, %v5341_v31, %v5342_v28  ;;  %v947_v25 = vld [vmem:[#allocation2 + $0xf8] sm:$0xf]  ;;  %v11123_v29 = vld [vmem:[%s13693_s3 + $0x2a0] ss:$8 sps:$4 sm:$0xff]  }
 0x13f   : > { %v1406_v47 = vrot.slane %v1404_v42, 5  ;;  %v1412_v48 = vrot.slane %v1410_v43, 5  ;;  %v1416_v49 = vrot.slane %v1414_v44, 4  ;;  %v5346_v55 = vsel %vm12263_vm5, %v5344_v36, %v5345_v39  ;;  %v11260_v31 = vld [vmem:[#allocation2 + $0x34] sm:$0xf] }
 0x140   : > { %2116 = vmatmul.mubr.bf16.gmra.mrb[60].mxu1 %v9658_v56  ;;  %4937 = vmatmul.mubr.bf16.gmra.mrb[60].mxu0 %v9834_v3  ;;  %v1399_v51 = vsel %vm11982_vm2, %v1394_v32, %v1398_v30  ;;  %v5349_v61 = vrot.slane %v11258_v60, 5  ;;  %v1424_v62 = vshrl.u32 %v943_v37, 16  ;;  %v1430_v63 = vshll.u32 %v944_v45, 16  ;;  %v11131_v30 = vld [vmem:[%s13693_s3 + $0x2b4] ss:$8 sps:$4 sm:$0xff]  }
 0x141   : > { %2125 = vmatprep.mubr.bf16.mxu1 %v13700_v24  ;;  %5799 = vmatprep.mubr.bf16.mxu0 %v13700_v24  ;;  %v1407_v56 = vor.u32 %v1406_v47, %v1403_v41  ;;  %v1417_v57 = vor.u32 %v1416_v49, %v1412_v48  ;;  %v9660_v59 = vcombine.low %v1389_v9, %v1399_v51  ;;  %v1422_v3 = vrot.slane %v1420_v50, 5  ;;  %v948_v38 = vld [vmem:[#allocation2 + $0xfc] sm:$0xf]  ;;  %v11129_v39 = vld [vmem:[%s13693_s3 + $0x2b0] ss:$8 sps:$4 sm:$0xff]  }
 0x142   : > { %v1434_v5 = vshrl.u32 %v944_v45, 16  ;;  %v1426_v8 = vrot.slane %v1424_v62, 4  ;;  %v12308_v10 = vrot.slane %v1430_v63, 5  ;;  %v9900_v14 = vcombine.low %v5343_v54, %v5346_v55  ;;  %v11138_v47 = vld [vmem:[%s13693_s3 + $0x2c4] ss:$8 sps:$4 sm:$0xff]  }
 0x143   : > { %v1408_v1 = vrot.slane %v1407_v56, 4  ;;  %v1418_v2 = vrot.slane %v1417_v57, 4  ;;  %v9868_v15 = vrot.slane %v12295_v52, 9  ;;  %v5351_v22 = vrot.slane %v5349_v61, 4  ;;  %v11261_v49 = vld [vmem:[#allocation2 + $0x38] sm:$0x1] }
 0x144   : > { %v1436_v20 = vrot.slane %v1434_v5, 4  ;;  %v1427_v23 = vor.u32 %v1426_v8, %v1422_v3  ;;  %v1440_v19 = vshll.u32 %v994_v58, 16  ;;  %v1445_v26 = vshrl.u32 %v945_v0, 16  ;;  %v11136_v60 = vld [vmem:[%s13693_s3 + $0x2c0] ss:$8 sps:$4 sm:$0xff]  }
 0x145   : > { %v1413_v21 = vsel %vm11982_vm2, %v1408_v1, %v1412_v48  ;;  %v1423_v4 = vsel %vm11982_vm2, %v1418_v2, %v1422_v3  ;;  %v1448_v28 = vshll.u32 %v945_v0, 16  ;;  %v5355_v33 = vrot.slane %v11260_v31, 5  ;;  %v11262_v62 = vld [vmem:[#allocation2 + $0x40] sm:$0xf] }
 0x146   : > { %v1437_v17 = vor.u32 %v1436_v20, %v12308_v10  ;;  %v1447_v34 = vrot.slane %v1445_v26, 4  ;;  %v1458_v36 = vshrl.u32 %v946_v11, 16  ;;  %v9661_v37 = vcombine.low %v1413_v21, %v1423_v4  ;;  %v995_v0 = vld [vmem:[#allocation2 + $0x100] sm:$0x1]  ;;  %v950_v20 = vld [vmem:[#allocation2 + $0x108] sm:$0xf] }
 0x147   : > { %v1450_v35 = vrot.slane %v1448_v28, 5  ;;  %v1442_v41 = vrot.slane %v1440_v19, 5  ;;  %v5350_v43 = vsel %vm12263_vm5, %v9868_v15, %v5349_v61  ;;  %v1464_v46 = vshll.u32 %v947_v25, 16 }
 0x148   : > { %2126 = vmatmul.mubr.bf16.gmra.mrb[64].mxu1 %v9659_v27  ;;  %5800 = vmatmul.mubr.bf16.vlgmr.msra.gmra.mrb[0].mxu0 %v9899_v18  ;;  %v5352_v18 = vrot.slane %v11259_v16, 5  ;;  %v1454_v27 = vshll.u32 %v946_v11, 16  ;;  %v1438_v9 = vrot.slane %v1437_v17, 4  ;;  %v1460_v32 = vrot.slane %v1458_v36, 4  ;;  %v11263_v16 = vld [vmem:[#allocation2 + $0x44] sm:$0xf] }
 0x149   : > { %2135 = vmatprep.mubr.bf16.mxu1 %v13700_v24  ;;  %7258 = vmatpush1.bf16.msra.mxu0 %v11111_v40  ;;  %v1428_v40 = vrot.slane %v1427_v23, 4  ;;  %v5357_v48 = vrot.slane %v5355_v33, 4  ;;  %v5358_v50 = vrot.slane %v11261_v49, 5  ;;  %v1451_v51 = vor.u32 %v1450_v35, %v1447_v34  ;;  %v951_v34 = vld [vmem:[#allocation2 + $0x10c] sm:$0xf] }
 0x14a   : > { %5809 = vmatprep.mubr.bf16.mxu0 %v13700_v24  ;;  %7259 = vmatprep.subr.bf16.mxu0 %v11119_v53  ;;  %v12329_v42 = vrot.slane %v1454_v27, 5  ;;  %v5353_v44 = vsel %vm12263_vm5, %v5351_v22, %v5352_v18  ;;  %v5354_v45 = vrot.slane %v5352_v18, 4  ;;  %v1468_v54 = vshrl.u32 %v947_v25, 16  ;;  %v11264_v27 = vld [vmem:[#allocation2 + $0x48] sm:$0xf] }
 0x14b   : > { %v9901_v53 = vcombine.low %v5350_v43, %v5353_v44  ;;  %v1474_v55 = vshll.u32 %v948_v38, 16  ;;  %v1478_v56 = vshrl.u32 %v948_v38, 16  ;;  %v1433_v57 = vsel %vm11982_vm2, %v1428_v40, %v12308_v10 }
 0x14c   : > { %v1461_v52 = vor.u32 %v1460_v32, %v12329_v42  ;;  %v1443_v58 = vsel %vm11982_vm2, %v1438_v9, %v1442_v41  ;;  %v1466_v61 = vrot.slane %v1464_v46, 5  ;;  %v5362_v63 = vrot.slane %v11262_v62, 5  ;;  %v11265_v9 = vld [vmem:[#allocation2 + $0x4c] sm:$0x1]  ;;  %v952_v46 = vld [vmem:[#allocation2 + $0x110] sm:$0xf] }
 0x14d   : > { %7260 = vmatpush1.bf16.msra.mxu0 %v11117_v6  ;;  %v5356_v1 = vsel %vm12263_vm5, %v5354_v45, %v5355_v33  ;;  %v5359_v2 = vsel %vm12263_vm5, %v5357_v48, %v5358_v50  ;;  %v1452_v3 = vrot.slane %v1451_v51, 4  ;;  %v9662_v6 = vcombine.low %v1433_v57, %v1443_v58 }
 0x14e   : > { %7261 = vmatprep.subr.bf16.mxu0 %v11125_v13  ;;  %v1462_v5 = vrot.slane %v1461_v52, 4  ;;  %v1470_v8 = vrot.slane %v1468_v54, 4  ;;  %v1476_v10 = vrot.slane %v1474_v55, 5  ;;  %v1480_v11 = vrot.slane %v1478_v56, 4  ;;  %v949_v13 = vld [vmem:[#allocation2 + $0x104] sm:$0xf] }
 0x14f   : > { %v5365_v18 = vrot.slane %v11263_v16, 5  ;;  %v1457_v21 = vsel %vm11982_vm2, %v1452_v3, %v12329_v42  ;;  %v5364_v23 = vrot.slane %v5362_v63, 4  ;;  %v1484_v19 = vshll.u32 %v995_v0, 16  ;;  %v953_v55 = vld [vmem:[#allocation2 + $0x118] sm:$0xf] }
 0x150   : > { %2136 = vmatmul.mubr.bf16.gmra.mrb[68].mxu1 %v9660_v59  ;;  %5810 = vmatmul.mubr.bf16.gmra.mrb[4].mxu0 %v9900_v14  ;;  %v5237_v59 = vld [vmem:[#allocation2 + $0x3c] sm:$0xe]  ;;  %v9902_v14 = vcombine.low %v5356_v1, %v5359_v2  ;;  %v1467_v22 = vsel %vm11982_vm2, %v1462_v5, %v1466_v61  ;;  %v1471_v4 = vor.u32 %v1470_v8, %v1466_v61  ;;  %v1489_v25 = vshrl.u32 %v949_v13, 16  ;;  %v996_v61 = vld [vmem:[#allocation2 + $0x114] sm:$0x1] }
 0x151   : > { %2145 = vmatprep.mubr.bf16.mxu1 %v13700_v24  ;;  %5819 = vmatprep.mubr.bf16.mxu0 %v13700_v24  ;;  %v9869_v15 = vrot.slane %v5237_v59, 9  ;;  %v1481_v17 = vor.u32 %v1480_v11, %v1476_v10  ;;  %v1492_v26 = vshll.u32 %v949_v13, 16  ;;  %v1498_v28 = vshll.u32 %v950_v20, 16  ;;  %v954_v56 = vld [vmem:[#allocation2 + $0x11c] sm:$0xf] }
 0x152   : > { %7262 = vmatpush1.bf16.msra.mxu0 %v11123_v29  ;;  %v1502_v29 = vshrl.u32 %v950_v20, 16  ;;  %v9663_v31 = vcombine.low %v1457_v21, %v1467_v22  ;;  %v1486_v33 = vrot.slane %v1484_v19, 5  ;;  %v1472_v35 = vrot.slane %v1471_v4, 4  ;;  %v11266_v0 = vld [vmem:[#allocation2 + $0x54] sm:$0xf] }
 0x153   : > { %7263 = vmatprep.subr.bf16.mxu0 %v11131_v30  ;;  %v5368_v30 = vrot.slane %v11264_v27, 5  ;;  %v1482_v36 = vrot.slane %v1481_v17, 4  ;;  %v1491_v38 = vrot.slane %v1489_v25, 4  ;;  %v5366_v40 = vsel %vm12263_vm5, %v5364_v23, %v5365_v18  ;;  %v11146_v2 = vld [vmem:[%s13693_s3 + $0x2d0] ss:$8 sps:$4 sm:$0xff]  }
 0x154   : > { %v12365_v41 = vrot.slane %v1498_v28, 5  ;;  %v1504_v42 = vrot.slane %v1502_v29, 4  ;;  %v5367_v43 = vrot.slane %v5365_v18, 4  ;;  %v5371_v32 = vrot.slane %v11265_v9, 5  ;;  %v11148_v3 = vld [vmem:[%s13693_s3 + $0x2d4] ss:$8 sps:$4 sm:$0xff]  }
 0x155   : > { %v5370_v44 = vrot.slane %v5368_v30, 4  ;;  %v1508_v45 = vshll.u32 %v951_v34, 16  ;;  %v1477_v48 = vsel %vm11982_vm2, %v1472_v35, %v1476_v10  ;;  %v1487_v49 = vsel %vm11982_vm2, %v1482_v36, %v1486_v33  ;;  %v11267_v21 = vld [vmem:[#allocation2 + $0x58] sm:$0xf]  ;;  %v955_v35 = vld [vmem:[#allocation2 + $0x120] sm:$0xf] }
 0x156   : > { %7264 = vmatpush1.bf16.msra.mxu0 %v11129_v39  ;;  %v1494_v39 = vrot.slane %v1492_v26, 5  ;;  %v1505_v51 = vor.u32 %v1504_v42, %v12365_v41  ;;  %v1512_v52 = vshrl.u32 %v951_v34, 16  ;;  %v1522_v54 = vshrl.u32 %v952_v46, 16  ;;  %v11268_v26 = vld [vmem:[#allocation2 + $0x5c] sm:$0xf] }
 0x157   : > { %7265 = vmatprep.subr.bf16.mxu0 %v11138_v47  ;;  %v5369_v57 = vsel %vm12263_vm5, %v5367_v43, %v5368_v30  ;;  %v5372_v58 = vsel %vm12263_vm5, %v5370_v44, %v5371_v32  ;;  %v1510_v59 = vrot.slane %v1508_v45, 5  ;;  %v9664_v62 = vcombine.low %v1477_v48, %v1487_v49  ;;  %v956_v36 = vld [vmem:[#allocation2 + $0x124] sm:$0xf]  ;;  %v11269_v43 = vld [vmem:[#allocation2 + $0x60] sm:$0x1] }
 0x158   : > { %2146 = vmatmul.mubr.bf16.gmra.mrb[72].mxu1 %v9661_v37  ;;  %5820 = vmatmul.mubr.bf16.gmra.mrb[8].mxu0 %v9901_v53  ;;  %v5363_v37 = vsel %vm12263_vm5, %v9869_v15, %v5362_v63  ;;  %v1495_v50 = vor.u32 %v1494_v39, %v1491_v38  ;;  %v1518_v53 = vshll.u32 %v952_v46, 16  ;;  %v5375_v1 = vrot.slane %v11266_v0, 5 }
 0x159   : > { %2155 = vmatprep.mubr.bf16.mxu1 %v13700_v24  ;;  %5829 = vmatprep.mubr.bf16.mxu0 %v13700_v24  ;;  %v9903_v47 = vcombine.low %v5363_v37, %v5366_v40  ;;  %v1506_v5 = vrot.slane %v1505_v51, 4  ;;  %v1524_v10 = vrot.slane %v1522_v54, 4  ;;  %v9904_v11 = vcombine.low %v5369_v57, %v5372_v58  ;;  %v5239_v57 = vld [vmem:[#allocation2 + $0x64] sm:$0xe]  ;;  %v11270_v58 = vld [vmem:[#allocation2 + $0x68] sm:$0xf] }
 0x15a   : > { %7266 = vmatpush1.bf16.msra.mxu0 %v11136_v60  ;;  %v5238_v60 = vld [vmem:[#allocation2 + $0x50] sm:$0xe]  ;;  %v1496_v63 = vrot.slane %v1495_v50, 4  ;;  %v1520_v8 = vrot.slane %v1518_v53, 5  ;;  %v1533_v13 = vshrl.u32 %v953_v55, 16  ;;  %v1542_v15 = vshll.u32 %v954_v56, 16 }
 0x15b   : > { %7267 = vmatprep.subr.bf16.mxu0 %v11148_v3  ;;  %v1546_v16 = vshrl.u32 %v954_v56, 16  ;;  %v9870_v18 = vrot.slane %v5238_v60, 9  ;;  %v5377_v20 = vrot.slane %v5375_v1, 4  ;;  %v5378_v22 = vrot.slane %v11267_v21, 5 }
 0x15c   : > { %v1528_v23 = vshll.u32 %v996_v61, 16  ;;  %v1501_v19 = vsel %vm11982_vm2, %v1496_v63, %v12365_v41  ;;  %v1511_v4 = vsel %vm11982_vm2, %v1506_v5, %v1510_v59  ;;  %v1525_v25 = vor.u32 %v1524_v10, %v1520_v8  ;;  %v997_v61 = vld [vmem:[#allocation2 + $0x128] sm:$0x1]  ;;  %v11271_v5 = vld [vmem:[#allocation2 + $0x6c] sm:$0xf] }
 0x15d   : > { %v5381_v28 = vrot.slane %v11268_v26, 5  ;;  %v1535_v29 = vrot.slane %v1533_v13, 4  ;;  %v1544_v30 = vrot.slane %v1542_v15, 5  ;;  %v9665_v33 = vcombine.low %v1501_v19, %v1511_v4 }
 0x15e   : > { %7268 = vmatpush1.bf16.msra.mxu0 %v11146_v2  ;;  %v5376_v34 = vsel %vm12263_vm5, %v9870_v18, %v5375_v1  ;;  %v5379_v38 = vsel %vm12263_vm5, %v5377_v20, %v5378_v22  ;;  %v1526_v37 = vrot.slane %v1525_v25, 4  ;;  %v1530_v40 = vrot.slane %v1528_v23, 5  ;;  %v957_v1 = vld [vmem:[#allocation2 + $0x12c] sm:$0xf]  ;;  %v11272_v25 = vld [vmem:[#allocation2 + $0x70] sm:$0xf] }
 0x15f   : > { %v5380_v41 = vrot.slane %v5378_v22, 4  ;;  %v5383_v42 = vrot.slane %v5381_v28, 4  ;;  %v5384_v44 = vrot.slane %v11269_v43, 5  ;;  %v1552_v45 = vshll.u32 %v955_v35, 16 }
 0x160   : > { %2156 = vmatmul.mubr.bf16.gmra.mrb[76].mxu1 %v9662_v6  ;;  %5830 = vmatmul.mubr.bf16.gmra.mrb[12].mxu0 %v9902_v14  ;;  %v1514_v6 = vrot.slane %v1512_v52, 4  ;;  %v1536_v14 = vshll.u32 %v953_v55, 16  ;;  %v1556_v46 = vshrl.u32 %v955_v35, 16  ;;  %v1562_v48 = vshll.u32 %v956_v36, 16  ;;  %v960_v35 = vld [vmem:[#allocation2 + $0x138] sm:$0xf] }
 0x161   : > { %2165 = vmatprep.mubr.bf16.mxu1 %v13700_v24  ;;  %5839 = vmatprep.mubr.bf16.mxu0 %v13700_v24  ;;  %v1566_v49 = vshrl.u32 %v956_v36, 16  ;;  %v1531_v51 = vsel %vm11982_vm2, %v1526_v37, %v1530_v40  ;;  %v5382_v52 = vsel %vm12263_vm5, %v5380_v41, %v5381_v28  ;;  %v5385_v53 = vsel %vm12263_vm5, %v5383_v42, %v5384_v44  ;;  %v11273_v37 = vld [vmem:[#allocation2 + $0x74] sm:$0x1] }
 0x162   : > { %v1515_v17 = vor.u32 %v1514_v6, %v1510_v59  ;;  %v1538_v27 = vrot.slane %v1536_v14, 5  ;;  %v1554_v56 = vrot.slane %v1552_v45, 5  ;;  %v5388_v59 = vrot.slane %v11270_v58, 5  ;;  %v11156_v58 = vld [vmem:[%s13693_s3 + $0x2e0] ss:$8 sps:$4 sm:$0xff]  }
 0x163   : > { %v1564_v63 = vrot.slane %v1562_v48, 5  ;;  %v1568_v0 = vrot.slane %v1566_v49, 4  ;;  %v9906_v2 = vcombine.low %v5382_v52, %v5385_v53  ;;  %v9871_v3 = vrot.slane %v5239_v57, 9  ;;  %v962_v52 = vld [vmem:[#allocation2 + $0x144] sm:$0xf] }
 0x164   : > { %v1516_v39 = vrot.slane %v1515_v17, 4  ;;  %v1539_v9 = vor.u32 %v1538_v27, %v1535_v29  ;;  %v5391_v6 = vrot.slane %v11271_v5, 5  ;;  %v5390_v13 = vrot.slane %v5388_v59, 4 }
 0x165   : > { %v1572_v14 = vshll.u32 %v997_v61, 16  ;;  %v1577_v18 = vshrl.u32 %v957_v1, 16  ;;  %v1580_v20 = vshll.u32 %v957_v1, 16  ;;  %v5389_v23 = vsel %vm12263_vm5, %v9871_v3, %v5388_v59 }
 0x166   : > { %v1521_v50 = vsel %vm11982_vm2, %v1516_v39, %v1520_v8  ;;  %v1540_v54 = vrot.slane %v1539_v9, 4  ;;  %v958_v8 = vld [vmem:[#allocation2 + $0x130] sm:$0xf]  ;;  %v5392_v4 = vsel %vm12263_vm5, %v5390_v13, %v5391_v6  ;;  %v5394_v26 = vrot.slane %v11272_v25, 5 }
 0x167   : > { %v9666_v60 = vcombine.low %v1521_v50, %v1531_v51  ;;  %v1586_v21 = vshll.u32 %v958_v8, 16  ;;  %v1590_v22 = vshrl.u32 %v958_v8, 16  ;;  %v1574_v17 = vrot.slane %v1572_v14, 5  ;;  %v998_v50 = vld [vmem:[#allocation2 + $0x13c] sm:$0x1] }
 0x168   : > { %2166 = vmatmul.mubr.bf16.gmra.mrb[80].mxu1 %v9663_v31  ;;  %5840 = vmatmul.mubr.bf16.gmra.mrb[16].mxu0 %v9903_v47  ;;  %v1548_v31 = vrot.slane %v1546_v16, 4  ;;  %v9905_v47 = vcombine.low %v5376_v34, %v5379_v38  ;;  %v1545_v10 = vsel %vm11982_vm2, %v1540_v54, %v1544_v30  ;;  %v1569_v16 = vor.u32 %v1568_v0, %v1564_v63  ;;  %v961_v51 = vld [vmem:[#allocation2 + $0x140] sm:$0xf] }
 0x169   : > { %2175 = vmatprep.mubr.bf16.mxu1 %v13700_v24  ;;  %5849 = vmatprep.mubr.bf16.mxu0 %v13700_v24  ;;  %v1579_v27 = vrot.slane %v1577_v18, 4  ;;  %v1592_v34 = vrot.slane %v1590_v22, 4  ;;  %v9907_v36 = vcombine.low %v5389_v23, %v5392_v4  ;;  %v5393_v38 = vrot.slane %v5391_v6, 4 }
 0x16a   : > { %v1549_v32 = vor.u32 %v1548_v31, %v1544_v30  ;;  %v1570_v29 = vrot.slane %v1569_v16, 4  ;;  %v1582_v30 = vrot.slane %v1580_v20, 5  ;;  %v959_v31 = vld [vmem:[#allocation2 + $0x134] sm:$0xf]  ;;  %v5396_v39 = vrot.slane %v5394_v26, 4 }
 0x16b   : > { %v5397_v40 = vrot.slane %v11273_v37, 5  ;;  %v1596_v44 = vshll.u32 %v959_v31, 16  ;;  %v1606_v45 = vshll.u32 %v960_v35, 16  ;;  %v5395_v48 = vsel %vm12263_vm5, %v5393_v38, %v5394_v26  ;;  %v11276_v20 = vld [vmem:[#allocation2 + $0x84] sm:$0xf] }
 0x16c   : > { %v1550_v55 = vrot.slane %v1549_v32, 4  ;;  %v1575_v42 = vsel %vm11982_vm2, %v1570_v29, %v1574_v17  ;;  %v1583_v43 = vor.u32 %v1582_v30, %v1579_v27  ;;  %v1600_v32 = vshrl.u32 %v959_v31, 16  ;;  %v963_v26 = vld [vmem:[#allocation2 + $0x148] sm:$0xf]  ;;  %v964_v31 = vld [vmem:[#allocation2 + $0x14c] sm:$0xf] }
 0x16d   : > { %v5398_v49 = vsel %vm12263_vm5, %v5396_v39, %v5397_v40  ;;  %v1608_v61 = vrot.slane %v1606_v45, 5  ;;  %v1621_v1 = vshrl.u32 %v961_v51, 16  ;;  %v1630_v3 = vshll.u32 %v962_v52, 16 }
 0x16e   : > { %v1584_v54 = vrot.slane %v1583_v43, 4  ;;  %v1634_v5 = vshrl.u32 %v962_v52, 16  ;;  %v9908_v6 = vcombine.low %v5395_v48, %v5398_v49  ;;  %v1616_v13 = vshll.u32 %v998_v50, 16  ;;  %v5241_v49 = vld [vmem:[#allocation2 + $0x8c] sm:$0xe] }
 0x16f   : > { %v1623_v22 = vrot.slane %v1621_v1, 4  ;;  %v1640_v37 = vshll.u32 %v963_v26, 16  ;;  %v1654_v43 = vshrl.u32 %v964_v31, 16  ;;  %v11278_v50 = vld [vmem:[#allocation2 + $0x90] sm:$0xf] }
 0x170   : > { %2176 = vmatmul.mubr.bf16.gmra.mrb[84].mxu1 %v9664_v62  ;;  %5850 = vmatmul.mubr.bf16.gmra.mrb[20].mxu0 %v9904_v11  ;;  %v1558_v62 = vrot.slane %v1556_v46, 4  ;;  %v1555_v11 = vsel %vm11982_vm2, %v1550_v55, %v1554_v56  ;;  %v1610_v46 = vshrl.u32 %v960_v35, 16  ;;  %v1598_v55 = vrot.slane %v1596_v44, 5  ;;  %v11277_v35 = vld [vmem:[#allocation2 + $0x88] sm:$0x1] }
 0x171   : > { %2185 = vmatprep.mubr.bf16.mxu1 %v13700_v24  ;;  %5859 = vmatprep.mubr.bf16.mxu0 %v13700_v24  ;;  %v9667_v19 = vcombine.low %v1545_v10, %v1555_v11  ;;  %v11275_v10 = vld [vmem:[#allocation2 + $0x80] sm:$0xf]  ;;  %v1636_v4 = vrot.slane %v1634_v5, 4  ;;  %v1618_v30 = vrot.slane %v1616_v13, 5  ;;  %v1642_v48 = vrot.slane %v1640_v37, 5 }
 0x172   : > { %v1559_v15 = vor.u32 %v1558_v62, %v1554_v56  ;;  %v11274_v56 = vld [vmem:[#allocation2 + $0x7c] sm:$0xf]  ;;  %v1612_v62 = vrot.slane %v1610_v46, 4  ;;  %v5404_v11 = vrot.slane %v11275_v10, 5 }
 0x173   : > { %v5401_v57 = vrot.slane %v11274_v56, 5  ;;  %v1656_v56 = vrot.slane %v1654_v43, 4  ;;  %v5242_v43 = vld [vmem:[#allocation2 + $0xa0] sm:$0xe] }
 0x174   : > { %v1560_v28 = vrot.slane %v1559_v15, 4  ;;  %v1613_v18 = vor.u32 %v1612_v62, %v1608_v61  ;;  %v966_v62 = vld [vmem:[#allocation2 + $0x158] sm:$0xf] }
 0x175   : > { %v5403_v8 = vrot.slane %v5401_v57, 4  ;;  %v1674_v10 = vshll.u32 %v966_v62, 16 }
 0x176   : > { %v1565_v41 = vsel %vm11982_vm2, %v1560_v28, %v1564_v63  ;;  %v11158_v63 = vld [vmem:[%s13693_s3 + $0x2e4] ss:$8 sps:$4 sm:$0xff]   ;;  %v1614_v27 = vrot.slane %v1613_v18, 4  ;;  %v11280_v18 = vld [vmem:[#allocation2 + $0x98] sm:$0xf] }
 0x177   : > { %v9668_v53 = vcombine.low %v1565_v41, %v1575_v42  ;;  %7269 = vmatprep.subr.bf16.mxu0 %v11158_v63  ;;  %v5405_v28 = vsel %vm12263_vm5, %v5403_v8, %v5404_v11  ;;  %v1644_v41 = vshrl.u32 %v963_v26, 16  ;;  %v1650_v42 = vshll.u32 %v964_v31, 16  ;;  %v968_v26 = vld [vmem:[#allocation2 + $0x160] sm:$0xf] }
 0x178   : > { %2186 = vmatmul.mubr.bf16.gmra.mrb[88].mxu1 %v9665_v33  ;;  %5860 = vmatmul.mubr.bf16.gmra.mrb[24].mxu0 %v9905_v47  ;;  %v12415_v33 = vrot.slane %v1586_v21, 5  ;;  %v5240_v47 = vld [vmem:[#allocation2 + $0x78] sm:$0xe]  ;;  %v5407_v21 = vrot.slane %v11276_v20, 5  ;;  %v5420_v20 = vrot.slane %v11280_v18, 5  ;;  %v1694_v37 = vshll.u32 %v968_v26, 16 }
 0x179   : > { %2195 = vmatprep.mubr.bf16.mxu1 %v13700_v24  ;;  %5869 = vmatprep.mubr.bf16.mxu0 %v13700_v24  ;;  %v9872_v0 = vrot.slane %v5240_v47, 9  ;;  %v11285_v18 = vld [vmem:[#allocation2 + $0xb0] sm:$0x1] }
 0x17a   : > { %v1593_v9 = vor.u32 %v1592_v34, %v12415_v33  ;;  %7270 = vmatpush1.bf16.msra.mxu0 %v11156_v58  ;;  %v1589_v14 = vsel %vm11982_vm2, %v1584_v54, %v12415_v33  ;;  %v5406_v33 = vrot.slane %v5404_v11, 4  ;;  %v5409_v34 = vrot.slane %v5407_v21, 4 }
 0x17b   : > { %v5402_v25 = vsel %vm12263_vm5, %v9872_v0, %v5401_v57  ;;  %v1646_v54 = vrot.slane %v1644_v41, 4  ;;  %v965_v57 = vld [vmem:[#allocation2 + $0x154] sm:$0xf]  ;;  %v1678_v11 = vshrl.u32 %v966_v62, 16 }
 0x17c   : > { %v1594_v59 = vrot.slane %v1593_v9, 4  ;;  %v9909_v40 = vcombine.low %v5402_v25, %v5405_v28  ;;  %v1619_v9 = vsel %vm11982_vm2, %v1614_v27, %v1618_v30  ;;  %v1668_v8 = vshll.u32 %v965_v57, 16  ;;  %v11281_v27 = vld [vmem:[#allocation2 + $0x9c] sm:$0x1] }
 0x17d   : > { %v1680_v25 = vrot.slane %v1678_v11, 4  ;;  %v5423_v30 = vrot.slane %v11281_v27, 5 }
 0x17e   : > { %v1599_v15 = vsel %vm11982_vm2, %v1594_v59, %v1598_v55  ;;  %v9873_v59 = vrot.slane %v5241_v49, 9 }
 0x17f   : > { %v9669_v17 = vcombine.low %v1589_v14, %v1599_v15 }
 0x180   : > { %2196 = vmatmul.mubr.bf16.gmra.mrb[92].mxu1 %v9666_v60  ;;  %5870 = vmatmul.mubr.bf16.gmra.mrb[28].mxu0 %v9906_v2  ;;  %v1602_v60 = vrot.slane %v1600_v32, 4  ;;  %v1624_v2 = vshll.u32 %v961_v51, 16  ;;  %v5408_v32 = vsel %vm12263_vm5, %v5406_v33, %v5407_v21  ;;  %v5414_v51 = vrot.slane %v11278_v50, 5  ;;  %v1000_v50 = vld [vmem:[#allocation2 + $0x164] sm:$0x1] }
 0x181   : > { %2205 = vmatprep.mubr.bf16.mxu1 %v13700_v24  ;;  %5879 = vmatprep.mubr.bf16.mxu0 %v13700_v24 }
 0x182   : > { %v1603_v16 = vor.u32 %v1602_v60, %v1598_v55  ;;  %v1626_v23 = vrot.slane %v1624_v2, 5  ;;  %v1652_v55 = vrot.slane %v1650_v42, 5  ;;  %v11279_v60 = vld [vmem:[#allocation2 + $0x94] sm:$0xf]  ;;  %v5416_v1 = vrot.slane %v5414_v51, 4 }
 0x183   : > { %v5415_v13 = vsel %vm12263_vm5, %v9873_v59, %v5414_v51  ;;  %v1704_v59 = vshll.u32 %v1000_v50, 16 }
 0x184   : > { %v1604_v29 = vrot.slane %v1603_v16, 4  ;;  %v1627_v38 = vor.u32 %v1626_v23, %v1623_v22  ;;  %v1657_v5 = vor.u32 %v1656_v56, %v1652_v55  ;;  %v967_v23 = vld [vmem:[#allocation2 + $0x15c] sm:$0xf] }
 0x185   : > { %v1684_v31 = vshll.u32 %v967_v23, 16 }
 0x186   : > { %v1609_v44 = vsel %vm11982_vm2, %v1604_v29, %v1608_v61  ;;  %v1628_v46 = vrot.slane %v1627_v38, 4  ;;  %v5417_v61 = vrot.slane %v11279_v60, 5  ;;  %v1658_v22 = vrot.slane %v1657_v5, 4 }
 0x187   : > { %v9670_v52 = vcombine.low %v1609_v44, %v1619_v9  ;;  %v1686_v42 = vrot.slane %v1684_v31, 5  ;;  %v11286_v31 = vld [vmem:[#allocation2] sm:$0xf] }
 0x188   : > { %2206 = vmatmul.mubr.bf16.gmra.mrb[96].mxu1 %v9667_v19  ;;  %5880 = vmatmul.mubr.bf16.gmra.mrb[32].mxu0 %v9907_v36  ;;  %v1632_v19 = vrot.slane %v1630_v3, 5  ;;  %v5410_v36 = vrot.slane %v11277_v35, 5  ;;  %v1647_v3 = vor.u32 %v1646_v54, %v1642_v48  ;;  %v5418_v15 = vsel %vm12263_vm5, %v5416_v1, %v5417_v61 }
 0x189   : > { %2215 = vmatprep.mubr.bf16.mxu1 %v13700_v24  ;;  %5889 = vmatprep.mubr.bf16.mxu0 %v13700_v24  ;;  %v9911_v28 = vcombine.low %v5415_v13, %v5418_v15  ;;  %v5419_v29 = vrot.slane %v5417_v61, 4  ;;  %v5422_v35 = vrot.slane %v5420_v20, 4 }
 0x18a   : > { %v1637_v39 = vor.u32 %v1636_v4, %v1632_v19  ;;  %v5411_v45 = vsel %vm12263_vm5, %v5409_v34, %v5410_v36  ;;  %v1633_v63 = vsel %vm11982_vm2, %v1628_v46, %v1632_v19  ;;  %v1648_v21 = vrot.slane %v1647_v3, 4 }
 0x18b   : > { %v9910_v58 = vcombine.low %v5408_v32, %v5411_v45  ;;  %v1670_v4 = vrot.slane %v1668_v8, 5  ;;  %v5421_v41 = vsel %vm12263_vm5, %v5419_v29, %v5420_v20  ;;  %v5424_v9 = vsel %vm12263_vm5, %v5422_v35, %v5423_v30  ;;  %v11282_v45 = vld [vmem:[#allocation2 + $0xa4] sm:$0xf]  ;;  %v11284_v8 = vld [vmem:[#allocation2 + $0xac] sm:$0xf] }
 0x18c   : > { %v1638_v47 = vrot.slane %v1637_v39, 4  ;;  %v1653_v33 = vsel %vm11982_vm2, %v1648_v21, %v1652_v55  ;;  %v1688_v39 = vshrl.u32 %v967_v23, 16  ;;  %v5427_v46 = vrot.slane %v11282_v45, 5  ;;  %v3786_v21 = vld [vmem:[#allocation2 + $0xe0] sm:$0xf] }
 0x18d   : > { %v9912_v54 = vcombine.low %v5421_v41, %v5424_v9  ;;  %v9874_v55 = vrot.slane %v5242_v43, 9  ;;  %v5436_v20 = vrot.slane %v11285_v18, 5  ;;  %v3788_v30 = vld [vmem:[#allocation2 + $0xe8] sm:$0xf]  ;;  %v11143_v9 = vld [vmem:[%s13693_s3 + $0x110] ss:$8 sps:$4 sm:$0xff]  }
 0x18e   : > { %v1643_v0 = vsel %vm11982_vm2, %v1638_v47, %v1642_v48  ;;  %v11166_v47 = vld [vmem:[%s13693_s3 + $0x2f0] ss:$8 sps:$4 sm:$0xff]   ;;  %v11168_v48 = vld [vmem:[%s13693_s3 + $0x2f4] ss:$8 sps:$4 sm:$0xff]   ;;  %v1690_v51 = vrot.slane %v1688_v39, 4  ;;  %v5429_v56 = vrot.slane %v5427_v46, 4 }
 0x18f   : > { %v9671_v14 = vcombine.low %v1633_v63, %v1643_v0  ;;  %7271 = vmatprep.subr.bf16.mxu0 %v11168_v48  ;;  %v5428_v1 = vsel %vm12263_vm5, %v9874_v55, %v5427_v46  ;;  %v11133_v35 = vld [vmem:[%s13693_s3 + $0x100] ss:$8 sps:$4 sm:$0xff]   ;;  %v5446_v39 = vrot.slane %v3788_v30, 5  ;;  %v11155_v45 = vld [vmem:[%s13693_s3 + $0x124] ss:$8 sps:$4 sm:$0xff]  }
 0x190   : > { %2216 = vmatmul.mubr.bf16.gmra.mrb[100].mxu1 %v9668_v53  ;;  %5890 = vmatmul.mubr.bf16.gmra.mrb[36].mxu0 %v9908_v6  ;;  %v999_v53 = vld [vmem:[#allocation2 + $0x150] sm:$0x1]  ;;  %v1665_v6 = vshrl.u32 %v965_v57, 16  ;;  %v11283_v57 = vld [vmem:[#allocation2 + $0xa8] sm:$0xf]  ;;  %v1691_v62 = vor.u32 %v1690_v51, %v1686_v42 }
 0x191   : > { %2225 = vmatprep.mubr.bf16.mxu1 %v13700_v24  ;;  %5899 = vmatprep.mubr.bf16.mxu0 %v13700_v24  ;;  %v1660_v2 = vshll.u32 %v999_v53, 16  ;;  %v5448_v43 = vrot.slane %v5446_v39, 4  ;;  %v11288_v46 = vld [vmem:[#allocation2 + $0x8] sm:$0xf]  ;;  %v5244_v55 = vld [vmem:[#allocation2 + $0xf0] sm:$0xe] }
 0x192   : > { %v1667_v19 = vrot.slane %v1665_v6, 4  ;;  %7272 = vmatpush1.bf16.msra.mxu0 %v11166_v47  ;;  %v1692_v3 = vrot.slane %v1691_v62, 4  ;;  %v1706_v6 = vrot.slane %v1704_v59, 5  ;;  %v11289_v47 = vld [vmem:[#allocation2 + $0xc] sm:$0xf] }
 0x193   : > { %v1662_v16 = vrot.slane %v1660_v2, 5  ;;  %v9692_v48 = vcombine.low %v11288_v46, %v11289_v47  ;;  %v3793_v62 = vld [vmem:[#allocation2 + $0xfc] sm:$0xf]  ;;  %v11294_v30 = vld [vmem:[#allocation2 + $0x28] sm:$0xf] }
 0x194   : > { %v1671_v36 = vor.u32 %v1670_v4, %v1667_v19  ;;  %v5440_v4 = vrot.slane %v3786_v21, 5  ;;  %v11292_v18 = vld [vmem:[#allocation2 + $0x1c] sm:$0xf] }
 0x195   : > { %v1663_v34 = vsel %vm11982_vm2, %v1658_v22, %v1662_v16 }
 0x196   : > { %v9672_v44 = vcombine.low %v1653_v33, %v1663_v34  ;;  %v1672_v32 = vrot.slane %v1671_v36, 4  ;;  %v5442_v29 = vrot.slane %v5440_v4, 4  ;;  %v11287_v33 = vld [vmem:[#allocation2 + $0x4] sm:$0xf] }
 0x197   : > { %v9691_v34 = vcombine.low %v11286_v31, %v11287_v33  ;;  %v11295_v31 = vld [vmem:[#allocation2 + $0x2c] sm:$0xf] }
 0x198   : > { %2226 = vmatmul.mubr.bf16.gmra.mrb[104].mxu1 %v9669_v17  ;;  %5900 = vmatmul.mubr.bf16.gmra.mrb[40].mxu0 %v9909_v40  ;;  %v1676_v17 = vrot.slane %v1674_v10, 5  ;;  %v1698_v40 = vshrl.u32 %v968_v26, 16  ;;  %v5433_v10 = vrot.slane %v11284_v8, 5  ;;  %v11173_v8 = vld [vmem:[%s13693_s3 + $0x140] ss:$8 sps:$4 sm:$0xff]   ;;  %v9695_v33 = vcombine.low %v11294_v30, %v11295_v31 }
 0x199   : > { %2235 = vmatprep.mubr.bf16.mxu1 %v13700_v24  ;;  %5909 = vmatprep.mubr.bf16.mxu0 %v13700_v24  ;;  %v11195_v30 = vld [vmem:[%s13693_s3 + $0x164] ss:$8 sps:$4 sm:$0xff]  }
 0x19a   : > { %v1681_v38 = vor.u32 %v1680_v25, %v1676_v17  ;;  %v1700_v53 = vrot.slane %v1698_v40, 4  ;;  %v1677_v60 = vsel %vm11982_vm2, %v1672_v32, %v1676_v17  ;;  %v5435_v16 = vrot.slane %v5433_v10, 4  ;;  %v3787_v17 = vld [vmem:[#allocation2 + $0xe4] sm:$0xf]  ;;  %v5243_v25 = vld [vmem:[#allocation2 + $0xdc] sm:$0xe] }
 0x19b   : > { %v5443_v27 = vrot.slane %v3787_v17, 5  ;;  %v11145_v40 = vld [vmem:[%s13693_s3 + $0x114] ss:$8 sps:$4 sm:$0xff]   ;;  %v5245_v17 = vld [vmem:[#allocation2 + $0x104] sm:$0xe] }
 0x19c   : > { %v1682_v49 = vrot.slane %v1681_v38, 4  ;;  %v5437_v19 = vsel %vm12263_vm5, %v5435_v16, %v5436_v20  ;;  %v3791_v32 = vld [vmem:[#allocation2 + $0xf4] sm:$0xf]  ;;  %v3796_v16 = vld [vmem:[#allocation2 + $0x108] sm:$0xf] }
 0x19d   : > { %v5444_v38 = vsel %vm12263_vm5, %v5442_v29, %v5443_v27  ;;  %v11293_v20 = vld [vmem:[#allocation2 + $0x20] sm:$0xf] }
 0x19e   : > { %v1687_v61 = vsel %vm11982_vm2, %v1682_v49, %v1686_v42  ;;  %v5445_v42 = vrot.slane %v5443_v27, 4  ;;  %v11178_v49 = vld [vmem:[%s13693_s3 + $0x304] ss:$8 sps:$4 sm:$0xff]   ;;  %v9694_v21 = vcombine.low %v11292_v18, %v11293_v20  ;;  %v3798_v27 = vld [vmem:[#allocation2 + $0x110] sm:$0xf] }
 0x19f   : > { %v9673_v0 = vcombine.low %v1677_v60, %v1687_v61  ;;  %8267 = vmatprep.subr.bf16.mxu0 %v11178_v49  ;;  %v11163_v61 = vld [vmem:[%s13693_s3 + $0x130] ss:$8 sps:$4 sm:$0xff]   ;;  %v3802_v49 = vld [vmem:[#allocation2 + $0x120] sm:$0xf] }
 0x1a0   : > { %2236 = vmatmul.mubr.bf16.gmra.mrb[108].mxu1 %v9670_v52  ;;  %5910 = vmatmul.mubr.bf16.gmra.mrb[44].mxu0 %v9910_v58  ;;  %v1696_v52 = vrot.slane %v1694_v37, 5  ;;  %v5430_v58 = vrot.slane %v11283_v57, 5  ;;  %v3789_v37 = vld [vmem:[#allocation2 + $0xec] sm:$0x1]  ;;  %v5447_v50 = vsel %vm12263_vm5, %v5445_v42, %v5446_v39 }
 0x1a1   : > { %2245 = vmatprep.mubr.bf16.mxu1 %v13700_v24  ;;  %5919 = vmatprep.mubr.bf16.mxu0 %v13700_v24 }
 0x1a2   : > { %v1701_v63 = vor.u32 %v1700_v53, %v1696_v52  ;;  %v5431_v2 = vsel %vm12263_vm5, %v5429_v56, %v5430_v58  ;;  %v5432_v13 = vrot.slane %v5430_v58, 4  ;;  %v11153_v53 = vld [vmem:[%s13693_s3 + $0x120] ss:$8 sps:$4 sm:$0xff]   ;;  %v11165_v56 = vld [vmem:[%s13693_s3 + $0x134] ss:$8 sps:$4 sm:$0xff]   ;;  %v9876_v58 = vrot.slane %v5244_v55, 9 }
 0x1a3   : > { %v9913_v11 = vcombine.low %v5428_v1, %v5431_v2  ;;  %v11291_v1 = vld [vmem:[#allocation2 + $0x18] sm:$0xf]  ;;  %v3803_v55 = vld [vmem:[#allocation2 + $0x124] sm:$0xf] }
 0x1a4   : > { %v1702_v5 = vrot.slane %v1701_v63, 4  ;;  %v5434_v23 = vsel %vm12263_vm5, %v5432_v13, %v5433_v10  ;;  %v11175_v63 = vld [vmem:[%s13693_s3 + $0x144] ss:$8 sps:$4 sm:$0xff]   ;;  %v3794_v10 = vld [vmem:[#allocation2 + $0x100] sm:$0x1] }
 0x1a5   : > { %v9914_v26 = vcombine.low %v5434_v23, %v5437_v19  ;;  %v5466_v19 = vrot.slane %v3796_v16, 5 }
 0x1a6   : > { %v1707_v15 = vsel %vm11982_vm2, %v1702_v5, %v1706_v6  ;;  %v5459_v6 = vrot.slane %v3793_v62, 5  ;;  %v3804_v62 = vld [vmem:[#allocation2 + $0x128] sm:$0x1] }
 0x1a8   : > { %2246 = vmatmul.mubr.bf16.gmra.mrb[112].mxu1 %v9671_v14  ;;  %5920 = vmatmul.mubr.bf16.gmra.mrb[48].mxu0 %v9911_v28  ;;  %v1697_v14 = vsel %vm11982_vm2, %v1692_v3, %v1696_v52  ;;  %v9875_v28 = vrot.slane %v5243_v25, 9  ;;  %v5453_v52 = vrot.slane %v3791_v32, 5  ;;  %v11297_v32 = vld [vmem:[#allocation2 + $0x34] sm:$0xf] }
 0x1a9   : > { %2255 = vmatprep.mubr.bf16.mxu1 %v13700_v24  ;;  %5929 = vmatprep.mubr.bf16.mxu0 %v13700_v24  ;;  %v9674_v22 = vcombine.low %v1697_v14, %v1707_v15  ;;  %v5461_v14 = vrot.slane %v5459_v6, 4  ;;  %v5462_v15 = vrot.slane %v3794_v10, 5 }
 0x1aa   : > { %v5441_v36 = vsel %vm12263_vm5, %v9875_v28, %v5440_v4  ;;  %v5455_v59 = vrot.slane %v5453_v52, 4  ;;  %v5454_v3 = vsel %vm12263_vm5, %v9876_v58, %v5453_v52  ;;  %v3797_v4 = vld [vmem:[#allocation2 + $0x10c] sm:$0xf]  ;;  %v5468_v28 = vrot.slane %v5466_v19, 4 }
 0x1ab   : > { %v9915_v41 = vcombine.low %v5441_v36, %v5444_v38  ;;  %v5463_v23 = vsel %vm12263_vm5, %v5461_v14, %v5462_v15  ;;  %v5469_v29 = vrot.slane %v3797_v4, 5  ;;  %v5472_v36 = vrot.slane %v3798_v27, 5  ;;  %v3799_v38 = vld [vmem:[#allocation2 + $0x114] sm:$0x1]  ;;  %v5247_v15 = vld [vmem:[#allocation2 + $0x12c] sm:$0xe] }
 0x1ac   : > { %v3807_v14 = vld [vmem:[#allocation2 + $0x134] sm:$0xf]  ;;  %v9879_v18 = vrot.slane %v5247_v15, 9  ;;  %v11193_v27 = vld [vmem:[%s13693_s3 + $0x160] ss:$8 sps:$4 sm:$0xff]  }
 0x1ad   : > { %v5474_v42 = vrot.slane %v5472_v36, 4 }
 0x1b0   : > { %2256 = vmatmul.mubr.bf16.gmra.mrb[116].mxu1 %v9672_v44  ;;  %5930 = vmatmul.mubr.bf16.gmra.mrb[52].mxu0 %v9912_v54  ;;  %v5449_v44 = vrot.slane %v3789_v37, 5  ;;  %v3792_v54 = vld [vmem:[#allocation2 + $0xf8] sm:$0xf] }
 0x1b1   : > { %2265 = vmatprep.mubr.bf16.mxu1 %v13700_v24  ;;  %5939 = vmatprep.mubr.bf16.mxu0 %v13700_v24  ;;  %v5456_v60 = vrot.slane %v3792_v54, 5  ;;  %v11183_v37 = vld [vmem:[%s13693_s3 + $0x150] ss:$8 sps:$4 sm:$0xff]   ;;  %v5482_v54 = vrot.slane %v3802_v49, 5 }
 0x1b2   : > { %v5450_v51 = vsel %vm12263_vm5, %v5448_v43, %v5449_v44  ;;  %v5475_v43 = vrot.slane %v3799_v38, 5  ;;  %v3801_v44 = vld [vmem:[#allocation2 + $0x11c] sm:$0xf] }
 0x1b3   : > { %v9916_v57 = vcombine.low %v5447_v50, %v5450_v51  ;;  %v5457_v5 = vsel %vm12263_vm5, %v5455_v59, %v5456_v60  ;;  %v5458_v13 = vrot.slane %v5456_v60, 4  ;;  %v5246_v50 = vld [vmem:[#allocation2 + $0x118] sm:$0xe]  ;;  %v11305_v38 = vld [vmem:[#allocation2 + $0x5c] sm:$0xf] }
 0x1b4   : > { %v5476_v47 = vsel %vm12263_vm5, %v5474_v42, %v5475_v43  ;;  %v9878_v52 = vrot.slane %v5246_v50, 9  ;;  %v3812_v42 = vld [vmem:[#allocation2 + $0x148] sm:$0xf]  ;;  %v5248_v43 = vld [vmem:[#allocation2 + $0x140] sm:$0xe] }
 0x1b8   : > { %2266 = vmatmul.mubr.bf16.gmra.mrb[120].mxu1 %v9673_v0  ;;  %5940 = vmatmul.mubr.bf16.gmra.mrb[56].mxu0 %v9913_v11  ;;  %v11290_v0 = vld [vmem:[#allocation2 + $0x14] sm:$0xf]  ;;  %v9917_v11 = vcombine.low %v5454_v3, %v5457_v5  ;;  %v3806_v3 = vld [vmem:[#allocation2 + $0x130] sm:$0xf]  ;;  %v11300_v5 = vld [vmem:[#allocation2 + $0x44] sm:$0xf] }
 0x1b9   : > { %2275 = vmatprep.mubr.bf16.mxu1 %v13700_v24  ;;  %5949 = vmatprep.mubr.bf16.mxu0 %v13700_v24  ;;  %v9693_v2 = vcombine.low %v11290_v0, %v11291_v1  ;;  %v5484_v0 = vrot.slane %v5482_v54, 4 }
 0x1c0   : > { %2276 = vmatmul.mubr.bf16.gmra.mrb[124].mxu1 %v9674_v22  ;;  %5950 = vmatmul.mubr.bf16.gmra.mrb[60].mxu0 %v9914_v26  ;;  %v5460_v22 = vsel %vm12263_vm5, %v5458_v13, %v5459_v6  ;;  %v9877_v26 = vrot.slane %v5245_v17, 9  ;;  %v11301_v6 = vld [vmem:[#allocation2 + $0x48] sm:$0xf]  ;;  %v5492_v13 = vrot.slane %v3806_v3, 5 }
 0x1c1   : > { %2590 = vmatprep.mubr.bf16.mxu1 %v13700_v24  ;;  %5959 = vmatprep.mubr.bf16.mxu0 %v13700_v24  ;;  %v9918_v25 = vcombine.low %v5460_v22, %v5463_v23  ;;  %v3808_v22 = vld [vmem:[#allocation2 + $0x138] sm:$0xf]  ;;  %v11302_v23 = vld [vmem:[#allocation2 + $0x50] sm:$0xf] }
 0x1c2   : > { %v5494_v20 = vrot.slane %v5492_v13, 4  ;;  %v5493_v17 = vsel %vm12263_vm5, %v9879_v18, %v5492_v13  ;;  %v11311_v13 = vld [vmem:[#allocation2 + $0x7c] sm:$0xf] }
 0x1c8   : > { %2591 = vmatmul.mubr.bf16.vlgmr.msra.gmra.mrb[0].mxu1 %v9691_v34  ;;  %5960 = vmatmul.mubr.bf16.gmra.mrb[64].mxu0 %v9915_v41  ;;  %v5467_v34 = vsel %vm12263_vm5, %v9877_v26, %v5466_v19  ;;  %v5471_v41 = vrot.slane %v5469_v29, 4  ;;  %v11303_v19 = vld [vmem:[#allocation2 + $0x54] sm:$0xf]  ;;  %v5498_v26 = vrot.slane %v3808_v22, 5  ;;  %v11203_v22 = vld [vmem:[%s13693_s3 + $0x170] ss:$8 sps:$4 sm:$0xff]  }
 0x1c9   : > { %3265 = vmatpush1.bf16.msra.mxu1 %v11133_v35  ;;  %2600 = vmatprep.mubr.bf16.mxu1 %v13700_v24  ;;  %v5470_v35 = vsel %vm12263_vm5, %v5468_v28, %v5469_v29  ;;  %v9699_v4 = vcombine.low %v11302_v23, %v11303_v19  ;;  %v3809_v28 = vld [vmem:[#allocation2 + $0x13c] sm:$0x1] }
 0x1ca   : > { %3266 = vmatprep.subr.bf16.mxu1 %v11145_v40  ;;  %5969 = vmatprep.mubr.bf16.mxu0 %v13700_v24  ;;  %v9919_v39 = vcombine.low %v5467_v34, %v5470_v35  ;;  %v11185_v40 = vld [vmem:[%s13693_s3 + $0x154] ss:$8 sps:$4 sm:$0xff]   ;;  %v5473_v46 = vsel %vm12263_vm5, %v5471_v41, %v5472_v36  ;;  %v5501_v34 = vrot.slane %v3809_v28, 5  ;;  %v3811_v35 = vld [vmem:[#allocation2 + $0x144] sm:$0xf] }
 0x1cb   : > { %v9920_v51 = vcombine.low %v5473_v46, %v5476_v47  ;;  %v11304_v36 = vld [vmem:[#allocation2 + $0x58] sm:$0xf]  ;;  %v5505_v41 = vrot.slane %v3811_v35, 5  ;;  %v3813_v46 = vld [vmem:[#allocation2 + $0x14c] sm:$0xf] }
 0x1cc   : > { %v11306_v47 = vld [vmem:[#allocation2 + $0x64] sm:$0xf]  ;;  %v11205_v23 = vld [vmem:[%s13693_s3 + $0x174] ss:$8 sps:$4 sm:$0xff]   ;;  %v5250_v35 = vld [vmem:[#allocation2 + $0x168] sm:$0xe] }
 0x1cd   : > { %3267 = vmatpush1.bf16.msra.mxu1 %v11143_v9  ;;  %v11296_v9 = vld [vmem:[#allocation2 + $0x30] sm:$0xf]  ;;  %v11313_v28 = vld [vmem:[#allocation2 + $0x84] sm:$0xf] }
 0x1ce   : > { %3268 = vmatprep.subr.bf16.mxu1 %v11155_v45  ;;  %v9696_v45 = vcombine.low %v11296_v9, %v11297_v32  ;;  %v9880_v9 = vrot.slane %v5248_v43, 9  ;;  %v5507_v32 = vrot.slane %v5505_v41, 4 }
 0x1d0   : > { %2601 = vmatmul.mubr.bf16.gmra.mrb[4].mxu1 %v9692_v48  ;;  %5970 = vmatmul.mubr.bf16.gmra.mrb[68].mxu0 %v9916_v57  ;;  %v5479_v48 = vrot.slane %v3801_v44, 5  ;;  %v11299_v57 = vld [vmem:[#allocation2 + $0x40] sm:$0xf]  ;;  %v5506_v50 = vsel %vm12263_vm5, %v9880_v9, %v5505_v41 }
 0x1d1   : > { %2610 = vmatprep.mubr.bf16.mxu1 %v13700_v24  ;;  %3269 = vmatpush1.bf16.msra.mxu1 %v11153_v53 }
 0x1d2   : > { %3270 = vmatprep.subr.bf16.mxu1 %v11165_v56  ;;  %5979 = vmatprep.mubr.bf16.mxu0 %v13700_v24  ;;  %v5481_v53 = vrot.slane %v5479_v48, 4  ;;  %v11298_v56 = vld [vmem:[#allocation2 + $0x3c] sm:$0xf]  ;;  %v5480_v59 = vsel %vm12263_vm5, %v9878_v52, %v5479_v48  ;;  %v11307_v48 = vld [vmem:[#allocation2 + $0x68] sm:$0xf]  ;;  %v5511_v52 = vrot.slane %v3813_v46, 5 }
 0x1d3   : > { %v9697_v58 = vcombine.low %v11298_v56, %v11299_v57  ;;  %v9701_v49 = vcombine.low %v11306_v47, %v11307_v48  ;;  %v11316_v46 = vld [vmem:[#allocation2 + $0x90] sm:$0xf] }
 0x1d4   : > { %v5483_v60 = vsel %vm12263_vm5, %v5481_v53, %v5482_v54  ;;  %v3814_v53 = vld [vmem:[#allocation2 + $0x150] sm:$0x1]  ;;  %v5513_v56 = vrot.slane %v5511_v52, 4 }
 0x1d5   : > { %3271 = vmatpush1.bf16.msra.mxu1 %v11163_v61  ;;  %v5485_v61 = vrot.slane %v3803_v55, 5  ;;  %v5514_v57 = vrot.slane %v3814_v53, 5 }
 0x1d6   : > { %3272 = vmatprep.subr.bf16.mxu1 %v11175_v63  ;;  %v9921_v63 = vcombine.low %v5480_v59, %v5483_v60  ;;  %v11308_v59 = vld [vmem:[#allocation2 + $0x6c] sm:$0xf]  ;;  %v11309_v60 = vld [vmem:[#allocation2 + $0x70] sm:$0xf] }
 0x1d7   : > { %v5487_v1 = vrot.slane %v5485_v61, 4  ;;  %v5486_v10 = vsel %vm12263_vm5, %v5484_v0, %v5485_v61  ;;  %v9702_v61 = vcombine.low %v11308_v59, %v11309_v60 }
 0x1d8   : > { %2611 = vmatmul.mubr.bf16.gmra.mrb[8].mxu1 %v9693_v2  ;;  %5980 = vmatmul.mubr.bf16.gmra.mrb[72].mxu0 %v9917_v11  ;;  %v5488_v2 = vrot.slane %v3804_v62, 5 }
 0x1d9   : > { %2620 = vmatprep.mubr.bf16.mxu1 %v13700_v24  ;;  %3273 = vmatpush1.bf16.msra.mxu1 %v11173_v8  ;;  %v9698_v8 = vcombine.low %v11300_v5, %v11301_v6 }
 0x1da   : > { %5989 = vmatprep.mubr.bf16.mxu0 %v13700_v24  ;;  %3274 = vmatprep.subr.bf16.mxu1 %v11185_v40  ;;  %v5489_v11 = vsel %vm12263_vm5, %v5487_v1, %v5488_v2  ;;  %v3817_v1 = vld [vmem:[#allocation2 + $0x15c] sm:$0xf]  ;;  %v5249_v2 = vld [vmem:[#allocation2 + $0x154] sm:$0xe] }
 0x1db   : > { %v9922_v16 = vcombine.low %v5486_v10, %v5489_v11  ;;  %v9881_v5 = vrot.slane %v5249_v2, 9  ;;  %v3818_v10 = vld [vmem:[#allocation2 + $0x160] sm:$0xf]  ;;  %v11310_v11 = vld [vmem:[#allocation2 + $0x78] sm:$0xf] }
 0x1dc   : > { %v5524_v18 = vrot.slane %v3818_v10, 5  ;;  %v11317_v2 = vld [vmem:[#allocation2 + $0x94] sm:$0xf] }
 0x1dd   : > { %3275 = vmatpush1.bf16.msra.mxu1 %v11183_v37 }
 0x1de   : > { %3276 = vmatprep.subr.bf16.mxu1 %v11195_v30 }
 0x1e0   : > { %2621 = vmatmul.mubr.bf16.gmra.mrb[12].mxu1 %v9694_v21  ;;  %5990 = vmatmul.mubr.bf16.gmra.mrb[76].mxu0 %v9918_v25  ;;  %v5495_v21 = vrot.slane %v3807_v14, 5  ;;  %v9703_v14 = vcombine.low %v11310_v11, %v11311_v13 }
 0x1e1   : > { %2630 = vmatprep.mubr.bf16.mxu1 %v13700_v24  ;;  %5999 = vmatprep.mubr.bf16.mxu0 %v13700_v24 }
 0x1e2   : > { %v5496_v25 = vsel %vm12263_vm5, %v5494_v20, %v5495_v21  ;;  %v5497_v31 = vrot.slane %v5495_v21, 4  ;;  %3277 = vmatpush1.bf16.msra.mxu1 %v11193_v27  ;;  %v3819_v20 = vld [vmem:[#allocation2 + $0x164] sm:$0x1] }
 0x1e3   : > { %v9923_v29 = vcombine.low %v5493_v17, %v5496_v25  ;;  %v5527_v17 = vrot.slane %v3819_v20, 5  ;;  %v3821_v25 = vld [vmem:[#allocation2 + $0x16c] sm:$0xf]  ;;  %3278 = vmatprep.subr.bf16.mxu1 %v11205_v23  ;;  %v6253_v23 = vld [vmem:[#allocation2 + $0x3c] sm:$0xf] }
 0x1e4   : > { %v5499_v37 = vsel %vm12263_vm5, %v5497_v31, %v5498_v26  ;;  %v11314_v27 = vld [vmem:[%s13693_s3 + $0x184] ss:$8 sps:$4 sm:$0xff]  }
 0x1e6   : > { %3279 = vmatpush1.bf16.msra.mxu1 %v11203_v22  ;;  %v6252_v22 = vld [vmem:[#allocation2 + $0x38] sm:$0x1] }
 0x1e7   : > { %10120 = vmatprep.subr.bf16.mxu1 %v11314_v27 }
 0x1e8   : > { %2631 = vmatmul.mubr.bf16.gmra.mrb[16].mxu1 %v9695_v33  ;;  %6000 = vmatmul.mubr.bf16.gmra.mrb[80].mxu0 %v9919_v39  ;;  %v5500_v33 = vrot.slane %v5498_v26, 4  ;;  %v9700_v39 = vcombine.low %v11304_v36, %v11305_v38  ;;  %v11312_v26 = vld [vmem:[#allocation2 + $0x80] sm:$0xf]  ;;  %v6248_v38 = vld [vmem:[#allocation2 + $0x28] sm:$0xf] }
 0x1e9   : > { %2640 = vmatprep.mubr.bf16.mxu1 %v13700_v24  ;;  %6009 = vmatprep.mubr.bf16.mxu0 %v13700_v24  ;;  %v6329_v43 = vshrl.u32 %v6248_v38, 16 }
 0x1ea   : > { %v5502_v40 = vsel %vm12263_vm5, %v5500_v33, %v5501_v34  ;;  %v5531_v33 = vrot.slane %v3821_v25, 5  ;;  %v3822_v34 = vld [vmem:[#allocation2 + $0x170] sm:$0xf] }
 0x1eb   : > { %v9924_v44 = vcombine.low %v5499_v37, %v5502_v40  ;;  %v9882_v37 = vrot.slane %v5250_v35, 9  ;;  %v5534_v41 = vrot.slane %v3822_v34, 5 }
 0x1ec   : > { %v5533_v40 = vrot.slane %v5531_v33, 4 }
 0x1ed   : > { %v5532_v48 = vsel %vm12263_vm5, %v9882_v37, %v5531_v33  ;;  %v6376_v33 = vshll.u32 %v6253_v23, 16 }
 0x1f0   : > { %2641 = vmatmul.mubr.bf16.gmra.mrb[20].mxu1 %v9696_v45  ;;  %6010 = vmatmul.mubr.bf16.gmra.mrb[84].mxu0 %v9920_v51  ;;  %v5508_v45 = vrot.slane %v3812_v42, 5  ;;  %v3823_v42 = vld [vmem:[#allocation2 + $0x174] sm:$0xf] }
 0x1f1   : > { %2650 = vmatprep.mubr.bf16.mxu1 %v13700_v24  ;;  %6019 = vmatprep.mubr.bf16.mxu0 %v13700_v24 }
 0x1f2   : > { %v5509_v51 = vsel %vm12263_vm5, %v5507_v32, %v5508_v45  ;;  %v5510_v55 = vrot.slane %v5508_v45, 4  ;;  %v11315_v45 = vld [vmem:[#allocation2 + $0x8c] sm:$0xf] }
 0x1f3   : > { %v9925_v54 = vcombine.low %v5506_v50, %v5509_v51  ;;  %v9705_v47 = vcombine.low %v11315_v45, %v11316_v46  ;;  %v5537_v50 = vrot.slane %v3823_v42, 5  ;;  %v3824_v51 = vld [vmem:[#allocation2 + $0x178] sm:$0x1]  ;;  %v11176_v42 = vld [vmem:[%s13693_s3 + $0x300] ss:$8 sps:$4 sm:$0xff]  }
 0x1f4   : > { %v5512_v62 = vsel %vm12263_vm5, %v5510_v55, %v5511_v52  ;;  %v6331_v52 = vrot.slane %v6329_v43, 4  ;;  %v5540_v60 = vrot.slane %v3824_v51, 5  ;;  %v11188_v45 = vld [vmem:[%s13693_s3 + $0x314] ss:$8 sps:$4 sm:$0xff]   ;;  %v11321_v46 = vld [vmem:[#allocation2 + $0xd0] sm:$0xf] }
 0x1f5   : > { %v5539_v59 = vrot.slane %v5537_v50, 4 }
 0x1f7   : > { %v5541_v11 = vsel %vm12263_vm5, %v5539_v59, %v5540_v60 }
 0x1f8   : > { %2651 = vmatmul.mubr.bf16.gmra.mrb[24].mxu1 %v9697_v58  ;;  %6020 = vmatmul.mubr.bf16.gmra.mrb[88].mxu0 %v9921_v63  ;;  %v3816_v58 = vld [vmem:[#allocation2 + $0x158] sm:$0xf]  ;;  %v5515_v63 = vsel %vm12263_vm5, %v5513_v56, %v5514_v57  ;;  %v6250_v57 = vld [vmem:[#allocation2 + $0x30] sm:$0xf] }
 0x1f9   : > { %2660 = vmatprep.mubr.bf16.mxu1 %v13700_v24  ;;  %6029 = vmatprep.mubr.bf16.mxu0 %v13700_v24  ;;  %v5518_v0 = vrot.slane %v3816_v58, 5  ;;  %v9926_v3 = vcombine.low %v5512_v62, %v5515_v63  ;;  %v5536_v58 = vrot.slane %v5534_v41, 4 }
 0x1fb   : > { %v5520_v6 = vrot.slane %v5518_v0, 4  ;;  %v5519_v15 = vsel %vm12263_vm5, %v9881_v5, %v5518_v0  ;;  %v6348_v0 = vshll.u32 %v6250_v57, 16  ;;  %v5538_v10 = vsel %vm12263_vm5, %v5536_v58, %v5537_v50  ;;  %v11198_v58 = vld [vmem:[%s13693_s3 + $0x324] ss:$8 sps:$4 sm:$0xff]  }
 0x200   : > { %2661 = vmatmul.mubr.bf16.gmra.mrb[28].mxu1 %v9698_v8  ;;  %6030 = vmatmul.mubr.bf16.gmra.mrb[92].mxu0 %v9922_v16  ;;  %v5521_v8 = vrot.slane %v3817_v1, 5  ;;  %v6352_v1 = vshrl.u32 %v6250_v57, 16  ;;  %v11186_v57 = vld [vmem:[%s13693_s3 + $0x310] ss:$8 sps:$4 sm:$0xff]  }
 0x201   : > { %2670 = vmatprep.mubr.bf16.mxu1 %v13700_v24  ;;  %6039 = vmatprep.mubr.bf16.mxu0 %v13700_v24 }
 0x202   : > { %v5522_v16 = vsel %vm12263_vm5, %v5520_v6, %v5521_v8  ;;  %v5523_v19 = vrot.slane %v5521_v8, 4 }
 0x203   : > { %v9927_v21 = vcombine.low %v5519_v15, %v5522_v16  ;;  %v6350_v15 = vrot.slane %v6348_v0, 5  ;;  %v6354_v16 = vrot.slane %v6352_v1, 4 }
 0x204   : > { %v5525_v30 = vsel %vm12263_vm5, %v5523_v19, %v5524_v18  ;;  %v6254_v19 = vld [vmem:[#allocation2 + $0x40] sm:$0xf] }
 0x205   : > { %v6382_v34 = vshll.u32 %v6254_v19, 16  ;;  %v6386_v35 = vshrl.u32 %v6254_v19, 16 }
 0x207   : > { %v6384_v43 = vrot.slane %v6382_v34, 5 }
 0x208   : > { %2671 = vmatmul.mubr.bf16.gmra.mrb[32].mxu1 %v9699_v4  ;;  %6040 = vmatmul.mubr.bf16.gmra.mrb[96].mxu0 %v9923_v29  ;;  %v5526_v4 = vrot.slane %v5524_v18, 4  ;;  %v9704_v29 = vcombine.low %v11312_v26, %v11313_v28  ;;  %v9930_v18 = vcombine.low %v5538_v10, %v5541_v11 }
 0x209   : > { %2680 = vmatprep.mubr.bf16.mxu1 %v13700_v24  ;;  %6049 = vmatprep.mubr.bf16.mxu0 %v13700_v24 }
 0x20a   : > { %v5528_v31 = vsel %vm12263_vm5, %v5526_v4, %v5527_v17  ;;  %v11319_v4 = vld [vmem:[#allocation2 + $0xc8] sm:$0xf]  ;;  %v11320_v17 = vld [vmem:[#allocation2 + $0xcc] sm:$0xf] }
 0x20b   : > { %v9928_v36 = vcombine.low %v5525_v30, %v5528_v31  ;;  %v9707_v25 = vcombine.low %v11319_v4, %v11320_v17  ;;  %v6368_v30 = vshll.u32 %v6252_v22, 16  ;;  %v6373_v31 = vshrl.u32 %v6253_v23, 16  ;;  %v11206_v4 = vld [vmem:[%s13693_s3 + $0x330] ss:$8 sps:$4 sm:$0xff]   ;;  %v11215_v17 = vld [vmem:[%s13693_s3 + $0x344] ss:$8 sps:$4 sm:$0xff]  }
 0x20d   : > { %v6370_v37 = vrot.slane %v6368_v30, 5 }
 0x210   : > { %2681 = vmatmul.mubr.bf16.gmra.mrb[36].mxu1 %v9700_v39  ;;  %6050 = vmatmul.mubr.bf16.gmra.mrb[100].mxu0 %v9924_v44  ;;  %v6249_v39 = vld [vmem:[#allocation2 + $0x2c] sm:$0xf]  ;;  %v6332_v44 = vshll.u32 %v6248_v38, 16 }
 0x211   : > { %2690 = vmatprep.mubr.bf16.mxu1 %v13700_v24  ;;  %6059 = vmatprep.mubr.bf16.mxu0 %v13700_v24  ;;  %v6338_v9 = vshll.u32 %v6249_v39, 16  ;;  %v6342_v32 = vshrl.u32 %v6249_v39, 16 }
 0x212   : > { %v6334_v53 = vrot.slane %v6332_v44, 5  ;;  %v6388_v44 = vrot.slane %v6386_v35, 4  ;;  %v6261_v35 = vld [vmem:[#allocation2 + $0x5c] sm:$0xf] }
 0x213   : > { %v6344_v55 = vrot.slane %v6342_v32, 4  ;;  %v6256_v32 = vld [vmem:[#allocation2 + $0x48] sm:$0xf] }
 0x214   : > { %v6335_v62 = vor.u32 %v6334_v53, %v6331_v52  ;;  %v6389_v53 = vor.u32 %v6388_v44, %v6384_v43  ;;  %v6446_v44 = vshll.u32 %v6261_v35, 16 }
 0x216   : > { %v6336_v13 = vrot.slane %v6335_v62, 4  ;;  %v6258_v62 = vld [vmem:[#allocation2 + $0x50] sm:$0xf]  ;;  %v6390_v0 = vrot.slane %v6389_v53, 4  ;;  %v6262_v53 = vld [vmem:[#allocation2 + $0x60] sm:$0x1] }
 0x217   : > { %v6417_v10 = vshrl.u32 %v6258_v62, 16  ;;  %v6420_v11 = vshll.u32 %v6258_v62, 16 }
 0x218   : > { %2691 = vmatmul.mubr.bf16.gmra.mrb[40].mxu1 %v9701_v49  ;;  %6060 = vmatmul.mubr.bf16.gmra.mrb[104].mxu0 %v9925_v54  ;;  %v5535_v49 = vsel %vm12263_vm5, %v5533_v40, %v5534_v41  ;;  %v6340_v54 = vrot.slane %v6338_v9, 5  ;;  %v6375_v40 = vrot.slane %v6373_v31, 4  ;;  %v6378_v41 = vrot.slane %v6376_v33, 5  ;;  %v6255_v9 = vld [vmem:[#allocation2 + $0x44] sm:$0xf] }
 0x219   : > { %2700 = vmatprep.mubr.bf16.mxu1 %v13700_v24  ;;  %6069 = vmatprep.mubr.bf16.mxu0 %v13700_v24  ;;  %v9929_v56 = vcombine.low %v5532_v48, %v5535_v49  ;;  %v6396_v52 = vshrl.u32 %v6255_v9, 16  ;;  %v6260_v31 = vld [vmem:[#allocation2 + $0x58] sm:$0xf] }
 0x21a   : > { %v6345_v63 = vor.u32 %v6344_v55, %v6340_v54  ;;  %v6341_v26 = vsel %vm11982_vm2, %v6336_v13, %v6340_v54  ;;  %v6379_v51 = vor.u32 %v6378_v41, %v6375_v40  ;;  %v6392_v54 = vshll.u32 %v6255_v9, 16  ;;  %v11325_v41 = vld [vmem:[#allocation2 + $0xe4] sm:$0xf] }
 0x21b   : > { %v6402_v55 = vshll.u32 %v6256_v32, 16  ;;  %v6440_v40 = vshrl.u32 %v6260_v31, 16  ;;  %v6450_v9 = vshrl.u32 %v6261_v35, 16  ;;  %v6268_v35 = vld [vmem:[#allocation2 + $0x78] sm:$0xf] }
 0x21c   : > { %v6380_v60 = vrot.slane %v6379_v51, 4  ;;  %v6394_v1 = vrot.slane %v6392_v54, 5  ;;  %v6448_v51 = vrot.slane %v6446_v44, 5  ;;  %v6263_v54 = vld [vmem:[#allocation2 + $0x64] sm:$0xf] }
 0x21e   : > { %v6395_v22 = vsel %vm11982_vm2, %v6390_v0, %v6394_v1  ;;  %v6461_v0 = vshrl.u32 %v6263_v54, 16 }
 0x220   : > { %2701 = vmatmul.mubr.bf16.gmra.mrb[44].mxu1 %v9702_v61  ;;  %6070 = vmatmul.mubr.bf16.gmra.mrb[108].mxu0 %v9926_v3  ;;  %v6251_v61 = vld [vmem:[#allocation2 + $0x34] sm:$0xf]  ;;  %v11318_v3 = vld [vmem:[#allocation2 + $0x98] sm:$0xf] }
 0x221   : > { %2710 = vmatprep.mubr.bf16.mxu1 %v13700_v24  ;;  %6079 = vmatprep.mubr.bf16.mxu0 %v13700_v24  ;;  %v9706_v5 = vcombine.low %v11317_v2, %v11318_v3  ;;  %v6358_v6 = vshll.u32 %v6251_v61, 16  ;;  %v6362_v8 = vshrl.u32 %v6251_v61, 16  ;;  %v6398_v61 = vrot.slane %v6396_v52, 4 }
 0x222   : > { %v6404_v2 = vrot.slane %v6402_v55, 5  ;;  %v6452_v52 = vrot.slane %v6450_v9, 4  ;;  %v6264_v55 = vld [vmem:[#allocation2 + $0x68] sm:$0xf] }
 0x223   : > { %v6360_v20 = vrot.slane %v6358_v6, 5  ;;  %v6257_v6 = vld [vmem:[#allocation2 + $0x4c] sm:$0x1] }
 0x224   : > { %v6412_v19 = vshll.u32 %v6257_v6, 16  ;;  %v6453_v62 = vor.u32 %v6452_v52, %v6448_v51 }
 0x226   : > { %v6414_v34 = vrot.slane %v6412_v19, 5 }
 0x228   : > { %2711 = vmatmul.mubr.bf16.gmra.mrb[48].mxu1 %v9703_v14  ;;  %6080 = vmatmul.mubr.bf16.gmra.mrb[112].mxu0 %v9927_v21  ;;  %v6346_v14 = vrot.slane %v6345_v63, 4  ;;  %v6364_v21 = vrot.slane %v6362_v8, 4  ;;  %v6259_v63 = vld [vmem:[#allocation2 + $0x54] sm:$0xf] }
 0x229   : > { %2720 = vmatprep.mubr.bf16.mxu1 %v13700_v24  ;;  %6089 = vmatprep.mubr.bf16.mxu0 %v13700_v24  ;;  %v11208_v8 = vld [vmem:[%s13693_s3 + $0x334] ss:$8 sps:$4 sm:$0xff]   ;;  %v6426_v13 = vshll.u32 %v6259_v63, 16 }
 0x22a   : > { %v6351_v28 = vsel %vm11982_vm2, %v6346_v14, %v6350_v15  ;;  %v6365_v27 = vor.u32 %v6364_v21, %v6360_v20  ;;  %v6430_v14 = vshrl.u32 %v6259_v63, 16  ;;  %v6385_v21 = vsel %vm11982_vm2, %v6380_v60, %v6384_v43 }
 0x22b   : > { %v6456_v63 = vshll.u32 %v6262_v53, 16 }
 0x22c   : > { %v6366_v39 = vrot.slane %v6365_v27, 4  ;;  %v9965_v27 = vcombine.low %v6385_v21, %v6395_v22  ;;  %v11330_v21 = vld [vmem:[#allocation2 + $0xfc] sm:$0xf] }
 0x22e   : > { %v6371_v50 = vsel %vm11982_vm2, %v6366_v39, %v6370_v37  ;;  %v6436_v37 = vshll.u32 %v6260_v31, 16 }
 0x230   : > { %2721 = vmatmul.mubr.bf16.gmra.mrb[52].mxu1 %v9704_v29  ;;  %6090 = vmatmul.mubr.bf16.gmra.mrb[116].mxu0 %v9928_v36  ;;  %v6355_v29 = vor.u32 %v6354_v16, %v6350_v15  ;;  %v9963_v36 = vcombine.low %v6341_v26, %v6351_v28  ;;  %v11323_v15 = vld [vmem:[#allocation2 + $0xdc] sm:$0xf]  ;;  %v11324_v16 = vld [vmem:[#allocation2 + $0xe0] sm:$0xf]  ;;  %v6422_v26 = vrot.slane %v6420_v11, 5  ;;  %v6428_v28 = vrot.slane %v6426_v13, 5 }
 0x231   : > { %2730 = vmatprep.mubr.bf16.mxu1 %v13700_v24  ;;  %6099 = vmatprep.mubr.bf16.mxu0 %v13700_v24  ;;  %v6463_v11 = vrot.slane %v6461_v0, 4 }
 0x232   : > { %v6356_v38 = vrot.slane %v6355_v29, 4  ;;  %v6432_v29 = vrot.slane %v6430_v14, 4  ;;  %v6265_v14 = vld [vmem:[#allocation2 + $0x6c] sm:$0xf] }
 0x234   : > { %v6361_v49 = vsel %vm11982_vm2, %v6356_v38, %v6360_v20  ;;  %v6399_v20 = vor.u32 %v6398_v61, %v6394_v1  ;;  %v6433_v39 = vor.u32 %v6432_v29, %v6428_v28  ;;  %v6464_v1 = vshll.u32 %v6263_v54, 16 }
 0x235   : > { %v9964_v59 = vcombine.low %v6361_v49, %v6371_v50  ;;  %v6442_v49 = vrot.slane %v6440_v40, 4  ;;  %v6484_v29 = vshrl.u32 %v6265_v14, 16 }
 0x236   : > { %v6400_v30 = vrot.slane %v6399_v20, 4  ;;  %v6466_v13 = vrot.slane %v6464_v1, 5  ;;  %v11329_v20 = vld [vmem:[#allocation2 + $0xf8] sm:$0xf] }
 0x237   : > { %v9712_v22 = vcombine.low %v11329_v20, %v11330_v21 }
 0x238   : > { %2731 = vmatmul.mubr.bf16.gmra.mrb[56].mxu1 %v9705_v47  ;;  %6100 = vmatmul.mubr.bf16.gmra.mrb[120].mxu0 %v9929_v56  ;;  %v11322_v47 = vld [vmem:[#allocation2 + $0xd4] sm:$0xf]  ;;  %v6406_v56 = vshrl.u32 %v6256_v32, 16  ;;  %v6405_v32 = vsel %vm11982_vm2, %v6400_v30, %v6404_v2 }
 0x239   : > { %2740 = vmatprep.mubr.bf16.mxu1 %v13700_v24  ;;  %6109 = vmatprep.mubr.bf16.mxu0 %v13700_v24  ;;  %v9708_v48 = vcombine.low %v11321_v46, %v11322_v47  ;;  %v6434_v47 = vrot.slane %v6433_v39, 4  ;;  %v6486_v39 = vrot.slane %v6484_v29, 4 }
 0x23a   : > { %v6408_v3 = vrot.slane %v6406_v56, 4  ;;  %v11327_v56 = vld [vmem:[#allocation2 + $0xf0] sm:$0xf] }
 0x23c   : > { %v6409_v23 = vor.u32 %v6408_v3, %v6404_v2  ;;  %v6470_v2 = vshll.u32 %v6264_v55, 16  ;;  %v6474_v3 = vshrl.u32 %v6264_v55, 16 }
 0x23e   : > { %v6410_v33 = vrot.slane %v6409_v23, 4 }
 0x240   : > { %2741 = vmatmul.mubr.bf16.gmra.mrb[60].mxu1 %v9706_v5  ;;  %6110 = vmatmul.mubr.bf16.gmra.mrb[124].mxu0 %v9930_v18  ;;  %v11196_v5 = vld [vmem:[%s13693_s3 + $0x320] ss:$8 sps:$4 sm:$0xff]   ;;  %v9709_v18 = vcombine.low %v11323_v15, %v11324_v16  ;;  %v6472_v15 = vrot.slane %v6470_v2, 5  ;;  %v6476_v16 = vrot.slane %v6474_v3, 4  ;;  %v11333_v2 = vld [vmem:[#allocation2 + $0x10c] sm:$0xf] }
 0x241   : > { %2750 = vmatprep.mubr.bf16.mxu1 %v13700_v24  ;;  %7289 = vmatprep.mubr.bf16.mxu0 %v13700_v24  ;;  %v11334_v3 = vld [vmem:[#allocation2 + $0x110] sm:$0xf] }
 0x248   : > { %2751 = vmatmul.mubr.bf16.gmra.mrb[64].mxu1 %v9707_v25  ;;  %7290 = vmatmul.mubr.bf16.vlgmr.msra.gmra.mrb[0].mxu0 %v9963_v36  ;;  %v6419_v25 = vrot.slane %v6417_v10, 4  ;;  %v11213_v36 = vld [vmem:[%s13693_s3 + $0x340] ss:$8 sps:$4 sm:$0xff]   ;;  %v6458_v10 = vrot.slane %v6456_v63, 5 }
 0x249   : > { %2760 = vmatprep.mubr.bf16.mxu1 %v13700_v24  ;;  %8268 = vmatpush1.bf16.msra.mxu0 %v11176_v42  ;;  %v11326_v42 = vld [vmem:[#allocation2 + $0xe8] sm:$0xf] }
 0x24a   : > { %7299 = vmatprep.mubr.bf16.mxu0 %v13700_v24  ;;  %8269 = vmatprep.subr.bf16.mxu0 %v11188_v45  ;;  %v6423_v38 = vor.u32 %v6422_v26, %v6419_v25  ;;  %v9710_v43 = vcombine.low %v11325_v41, %v11326_v42  ;;  %v6415_v45 = vsel %vm11982_vm2, %v6410_v33, %v6414_v34  ;;  %v11220_v25 = vld [vmem:[%s13693_s3 + $0x350] ss:$8 sps:$4 sm:$0xff]   ;;  %v11222_v26 = vld [vmem:[%s13693_s3 + $0x354] ss:$8 sps:$4 sm:$0xff]   ;;  %v6505_v42 = vshrl.u32 %v6268_v35, 16 }
 0x24b   : > { %v9966_v50 = vcombine.low %v6405_v32, %v6415_v45  ;;  %v6267_v41 = vld [vmem:[#allocation2 + $0x74] sm:$0x1]  ;;  %v11331_v32 = vld [vmem:[#allocation2 + $0x104] sm:$0xf]  ;;  %v11332_v45 = vld [vmem:[#allocation2 + $0x108] sm:$0xf] }
 0x24c   : > { %v6424_v46 = vrot.slane %v6423_v38, 4  ;;  %v6507_v52 = vrot.slane %v6505_v42, 4  ;;  %v6275_v42 = vld [vmem:[#allocation2 + $0x94] sm:$0xf] }
 0x24d   : > { %8270 = vmatpush1.bf16.msra.mxu0 %v11186_v57  ;;  %v11328_v57 = vld [vmem:[#allocation2 + $0xf4] sm:$0xf] }
 0x24e   : > { %8271 = vmatprep.subr.bf16.mxu0 %v11198_v58  ;;  %v9711_v58 = vcombine.low %v11327_v56, %v11328_v57  ;;  %v6270_v57 = vld [vmem:[#allocation2 + $0x80] sm:$0xf] }
 0x24f   : > { %v6524_v0 = vshll.u32 %v6270_v57, 16  ;;  %v6528_v1 = vshrl.u32 %v6270_v57, 16 }
 0x250   : > { %2761 = vmatmul.mubr.bf16.gmra.mrb[68].mxu1 %v9708_v48  ;;  %7300 = vmatmul.mubr.bf16.gmra.mrb[4].mxu0 %v9964_v59  ;;  %v6438_v48 = vrot.slane %v6436_v37, 5  ;;  %v6429_v59 = vsel %vm11982_vm2, %v6424_v46, %v6428_v28  ;;  %v6477_v28 = vor.u32 %v6476_v16, %v6472_v15  ;;  %v9713_v46 = vcombine.low %v11331_v32, %v11332_v45  ;;  %v11337_v32 = vld [vmem:[#allocation2 + $0x120] sm:$0xf]  ;;  %v11338_v45 = vld [vmem:[#allocation2 + $0x124] sm:$0xf] }
 0x251   : > { %2770 = vmatprep.mubr.bf16.mxu1 %v13700_v24  ;;  %7309 = vmatprep.mubr.bf16.mxu0 %v13700_v24  ;;  %v6530_v16 = vrot.slane %v6528_v1, 4 }
 0x252   : > { %8272 = vmatpush1.bf16.msra.mxu0 %v11196_v5  ;;  %v6439_v60 = vsel %vm11982_vm2, %v6434_v47, %v6438_v48  ;;  %v6443_v61 = vor.u32 %v6442_v49, %v6438_v48  ;;  %v6478_v38 = vrot.slane %v6477_v28, 4 }
 0x253   : > { %8273 = vmatprep.subr.bf16.mxu0 %v11208_v8  ;;  %v9967_v5 = vcombine.low %v6429_v59, %v6439_v60  ;;  %v6454_v8 = vrot.slane %v6453_v62, 4 }
 0x254   : > { %v6444_v6 = vrot.slane %v6443_v61, 4  ;;  %v6271_v61 = vld [vmem:[#allocation2 + $0x84] sm:$0xf] }
 0x255   : > { %v6459_v19 = vsel %vm11982_vm2, %v6454_v8, %v6458_v10  ;;  %v6538_v8 = vshrl.u32 %v6271_v61, 16 }
 0x256   : > { %8274 = vmatpush1.bf16.msra.mxu0 %v11206_v4  ;;  %v6449_v23 = vsel %vm11982_vm2, %v6444_v6, %v6448_v51  ;;  %v6467_v4 = vor.u32 %v6466_v13, %v6463_v11  ;;  %v6500_v51 = vshll.u32 %v6267_v41, 16  ;;  %v6534_v6 = vshll.u32 %v6271_v61, 16  ;;  %v6279_v61 = vld [vmem:[#allocation2 + $0xa4] sm:$0xf] }
 0x257   : > { %8275 = vmatprep.subr.bf16.mxu0 %v11215_v17  ;;  %v6480_v17 = vshll.u32 %v6265_v14, 16  ;;  %v9968_v31 = vcombine.low %v6449_v23, %v6459_v19  ;;  %v6540_v21 = vrot.slane %v6538_v8, 4  ;;  %v6273_v23 = vld [vmem:[#allocation2 + $0x8c] sm:$0xf]  ;;  %v6274_v19 = vld [vmem:[#allocation2 + $0x90] sm:$0xf] }
 0x258   : > { %2771 = vmatmul.mubr.bf16.gmra.mrb[72].mxu1 %v9709_v18  ;;  %7310 = vmatmul.mubr.bf16.gmra.mrb[8].mxu0 %v9965_v27  ;;  %v6266_v18 = vld [vmem:[#allocation2 + $0x70] sm:$0xf]  ;;  %v6468_v33 = vrot.slane %v6467_v4, 4  ;;  %v6502_v60 = vrot.slane %v6500_v51, 5  ;;  %v6536_v20 = vrot.slane %v6534_v6, 5  ;;  %v6602_v6 = vshll.u32 %v6279_v61, 16 }
 0x259   : > { %2780 = vmatprep.mubr.bf16.mxu1 %v13700_v24  ;;  %7319 = vmatprep.mubr.bf16.mxu0 %v13700_v24  ;;  %v6490_v27 = vshll.u32 %v6266_v18, 16  ;;  %v6494_v30 = vshrl.u32 %v6266_v18, 16  ;;  %v6482_v34 = vrot.slane %v6480_v17, 5  ;;  %v11335_v4 = vld [vmem:[#allocation2 + $0x118] sm:$0xf]  ;;  %v6606_v8 = vshrl.u32 %v6279_v61, 16 }
 0x25a   : > { %8276 = vmatpush1.bf16.msra.mxu0 %v11213_v36  ;;  %v6269_v36 = vld [vmem:[#allocation2 + $0x7c] sm:$0xf]  ;;  %v6473_v47 = vsel %vm11982_vm2, %v6468_v33, %v6472_v15  ;;  %v6526_v15 = vrot.slane %v6524_v0, 5  ;;  %v6552_v33 = vshll.u32 %v6273_v23, 16  ;;  %v11227_v51 = vld [vmem:[%s13693_s3 + $0x360] ss:$8 sps:$4 sm:$0xff]  }
 0x25b   : > { %8277 = vmatprep.subr.bf16.mxu0 %v11222_v26  ;;  %v6492_v37 = vrot.slane %v6490_v27, 5  ;;  %v6496_v40 = vrot.slane %v6494_v30, 4  ;;  %v6514_v44 = vshll.u32 %v6269_v36, 16  ;;  %v6518_v9 = vshrl.u32 %v6269_v36, 16  ;;  %v11336_v17 = vld [vmem:[#allocation2 + $0x11c] sm:$0xf] }
 0x25c   : > { %v6483_v48 = vsel %vm11982_vm2, %v6478_v38, %v6482_v34  ;;  %v6487_v49 = vor.u32 %v6486_v39, %v6482_v34  ;;  %v6531_v29 = vor.u32 %v6530_v16, %v6526_v15  ;;  %v6541_v27 = vor.u32 %v6540_v21, %v6536_v20 }
 0x25d   : > { %v6516_v54 = vrot.slane %v6514_v44, 5  ;;  %v6520_v55 = vrot.slane %v6518_v9, 4  ;;  %v9969_v56 = vcombine.low %v6473_v47, %v6483_v48  ;;  %v6558_v34 = vshll.u32 %v6274_v19, 16  ;;  %v6276_v9 = vld [vmem:[#allocation2 + $0x98] sm:$0xf] }
 0x25e   : > { %8278 = vmatpush1.bf16.msra.mxu0 %v11220_v25  ;;  %v9715_v25 = vcombine.low %v11335_v4, %v11336_v17  ;;  %v6532_v38 = vrot.slane %v6531_v29, 4  ;;  %v6542_v39 = vrot.slane %v6541_v27, 4  ;;  %v6554_v41 = vrot.slane %v6552_v33, 5  ;;  %v6280_v17 = vld [vmem:[#allocation2 + $0xa8] sm:$0xf] }
 0x25f   : > { %v6521_v63 = vor.u32 %v6520_v55, %v6516_v54  ;;  %v6578_v55 = vshll.u32 %v6276_v9, 16  ;;  %v6281_v29 = vld [vmem:[#allocation2 + $0xac] sm:$0xf]  ;;  %v6616_v33 = vshrl.u32 %v6280_v17, 16 }
 0x260   : > { %2781 = vmatmul.mubr.bf16.gmra.mrb[76].mxu1 %v9710_v43  ;;  %7320 = vmatmul.mubr.bf16.gmra.mrb[12].mxu0 %v9966_v50  ;;  %v6508_v43 = vshll.u32 %v6268_v35, 16  ;;  %v6497_v50 = vor.u32 %v6496_v40, %v6492_v37  ;;  %v6562_v35 = vshrl.u32 %v6274_v19, 16  ;;  %v6537_v47 = vsel %vm11982_vm2, %v6532_v38, %v6536_v20 }
 0x261   : > { %2790 = vmatprep.mubr.bf16.mxu1 %v13700_v24  ;;  %7329 = vmatprep.mubr.bf16.mxu0 %v13700_v24  ;;  %v6522_v14 = vrot.slane %v6521_v63, 4  ;;  %v6580_v0 = vrot.slane %v6578_v55, 5  ;;  %v6608_v19 = vrot.slane %v6606_v8, 4  ;;  %v6622_v38 = vshll.u32 %v6281_v29, 16  ;;  %v6286_v8 = vld [vmem:[#allocation2 + $0xc0] sm:$0xf] }
 0x262   : > { %v6510_v53 = vrot.slane %v6508_v43, 5  ;;  %v6498_v59 = vrot.slane %v6497_v50, 4  ;;  %v6560_v43 = vrot.slane %v6558_v34, 5  ;;  %v6564_v44 = vrot.slane %v6562_v35, 4  ;;  %v11341_v34 = vld [vmem:[#allocation2 + $0x134] sm:$0xf] }
 0x263   : > { %v6527_v28 = vsel %vm11982_vm2, %v6522_v14, %v6526_v15  ;;  %v6568_v50 = vshll.u32 %v6275_v42, 16  ;;  %v11342_v35 = vld [vmem:[#allocation2 + $0x138] sm:$0xf] }
 0x264   : > { %v6511_v62 = vor.u32 %v6510_v53, %v6507_v52  ;;  %v6503_v11 = vsel %vm11982_vm2, %v6498_v59, %v6502_v60  ;;  %v11229_v52 = vld [vmem:[%s13693_s3 + $0x364] ss:$8 sps:$4 sm:$0xff]   ;;  %v6565_v53 = vor.u32 %v6564_v44, %v6560_v43  ;;  %v6278_v60 = vld [vmem:[#allocation2 + $0xa0] sm:$0xf]  ;;  %v6618_v44 = vrot.slane %v6616_v33, 4 }
 0x265   : > { %8279 = vmatprep.subr.bf16.mxu0 %v11229_v52  ;;  %v6570_v59 = vrot.slane %v6568_v50, 5  ;;  %v11344_v50 = vld [vmem:[#allocation2 + $0x144] sm:$0xf] }
 0x266   : > { %v6512_v13 = vrot.slane %v6511_v62, 4  ;;  %8280 = vmatpush1.bf16.msra.mxu0 %v11227_v51  ;;  %v6566_v62 = vrot.slane %v6565_v53, 4 }
 0x268   : > { %2791 = vmatmul.mubr.bf16.gmra.mrb[80].mxu1 %v9711_v58  ;;  %7330 = vmatmul.mubr.bf16.gmra.mrb[16].mxu0 %v9967_v5  ;;  %v6488_v58 = vrot.slane %v6487_v49, 4  ;;  %v9714_v5 = vcombine.low %v11333_v2, %v11334_v3  ;;  %v6517_v26 = vsel %vm11982_vm2, %v6512_v13, %v6516_v54  ;;  %v6572_v54 = vshrl.u32 %v6275_v42, 16  ;;  %v6277_v2 = vld [vmem:[#allocation2 + $0x9c] sm:$0x1] }
 0x269   : > { %2800 = vmatprep.mubr.bf16.mxu1 %v13700_v24  ;;  %7339 = vmatprep.mubr.bf16.mxu0 %v13700_v24  ;;  %v9971_v36 = vcombine.low %v6517_v26, %v6527_v28  ;;  %v6593_v3 = vshrl.u32 %v6278_v60, 16  ;;  %v6571_v15 = vsel %vm11982_vm2, %v6566_v62, %v6570_v59  ;;  %v6588_v20 = vshll.u32 %v6277_v2, 16 }
 0x26a   : > { %v6493_v10 = vsel %vm11982_vm2, %v6488_v58, %v6492_v37  ;;  %v6574_v63 = vrot.slane %v6572_v54, 4 }
 0x26b   : > { %v9970_v18 = vcombine.low %v6493_v10, %v6503_v11  ;;  %v11339_v10 = vld [vmem:[#allocation2 + $0x12c] sm:$0xf]  ;;  %v11340_v11 = vld [vmem:[#allocation2 + $0x130] sm:$0xf]  ;;  %v6595_v21 = vrot.slane %v6593_v3, 4  ;;  %v6590_v28 = vrot.slane %v6588_v20, 5 }
 0x26c   : > { %v9717_v13 = vcombine.low %v11339_v10, %v11340_v11  ;;  %v6575_v16 = vor.u32 %v6574_v63, %v6570_v59  ;;  %v6285_v3 = vld [vmem:[#allocation2 + $0xbc] sm:$0xf]  ;;  %v11345_v10 = vld [vmem:[#allocation2 + $0x148] sm:$0xf]  ;;  %v11346_v11 = vld [vmem:[#allocation2 + $0x14c] sm:$0xf] }
 0x26d   : > { %v11234_v20 = vld [vmem:[%s13693_s3 + $0x370] ss:$8 sps:$4 sm:$0xff]  }
 0x270   : > { %2801 = vmatmul.mubr.bf16.gmra.mrb[84].mxu1 %v9712_v22  ;;  %7340 = vmatmul.mubr.bf16.gmra.mrb[20].mxu0 %v9968_v31  ;;  %v6272_v22 = vld [vmem:[#allocation2 + $0x88] sm:$0x1]  ;;  %v6549_v31 = vshrl.u32 %v6273_v23, 16  ;;  %v6604_v23 = vrot.slane %v6602_v6, 5 }
 0x271   : > { %2810 = vmatprep.mubr.bf16.mxu1 %v13700_v24  ;;  %7349 = vmatprep.mubr.bf16.mxu0 %v13700_v24  ;;  %v6544_v30 = vshll.u32 %v6272_v22, 16 }
 0x272   : > { %v6551_v40 = vrot.slane %v6549_v31, 4  ;;  %v6612_v31 = vshll.u32 %v6280_v17, 16 }
 0x273   : > { %v6546_v37 = vrot.slane %v6544_v30, 5  ;;  %v6609_v30 = vor.u32 %v6608_v19, %v6604_v23  ;;  %v6666_v19 = vshll.u32 %v6286_v8, 16 }
 0x274   : > { %v6555_v49 = vor.u32 %v6554_v41, %v6551_v40 }
 0x275   : > { %v6547_v48 = vsel %vm11982_vm2, %v6542_v39, %v6546_v37  ;;  %v6626_v39 = vshrl.u32 %v6281_v29, 16  ;;  %v6610_v42 = vrot.slane %v6609_v30, 4  ;;  %v6289_v29 = vld [vmem:[#allocation2 + $0xf4] sm:$0xf] }
 0x276   : > { %v9972_v57 = vcombine.low %v6537_v47, %v6547_v48  ;;  %v6556_v58 = vrot.slane %v6555_v49, 4  ;;  %v6283_v47 = vld [vmem:[#allocation2 + $0xb4] sm:$0xf]  ;;  %v6284_v48 = vld [vmem:[#allocation2 + $0xb8] sm:$0xf] }
 0x277   : > { %v11343_v49 = vld [vmem:[#allocation2 + $0x140] sm:$0xf]  ;;  %v6646_v59 = vshll.u32 %v6284_v48, 16 }
 0x278   : > { %2811 = vmatmul.mubr.bf16.gmra.mrb[88].mxu1 %v9713_v46  ;;  %7350 = vmatmul.mubr.bf16.gmra.mrb[24].mxu0 %v9969_v56  ;;  %v9716_v46 = vcombine.low %v11337_v32, %v11338_v45  ;;  %v6582_v56 = vshrl.u32 %v6276_v9, 16  ;;  %v6561_v14 = vsel %vm11982_vm2, %v6556_v58, %v6560_v43  ;;  %v6614_v43 = vrot.slane %v6612_v31, 5 }
 0x279   : > { %2820 = vmatprep.mubr.bf16.mxu1 %v13700_v24  ;;  %7359 = vmatprep.mubr.bf16.mxu0 %v13700_v24  ;;  %v9973_v4 = vcombine.low %v6561_v14, %v6571_v15  ;;  %v6624_v32 = vrot.slane %v6622_v38, 5  ;;  %v6628_v45 = vrot.slane %v6626_v39, 4  ;;  %v9719_v51 = vcombine.low %v11343_v49, %v11344_v50  ;;  %v6290_v50 = vld [vmem:[#allocation2 + $0xf8] sm:$0xf] }
 0x27a   : > { %v6584_v1 = vrot.slane %v6582_v56, 4  ;;  %v6615_v53 = vsel %vm11982_vm2, %v6610_v42, %v6614_v43  ;;  %v6619_v54 = vor.u32 %v6618_v44, %v6614_v43  ;;  %v6640_v58 = vshll.u32 %v6283_v47, 16 }
 0x27b   : > { %v6629_v55 = vor.u32 %v6628_v45, %v6624_v32  ;;  %v6668_v31 = vrot.slane %v6666_v19, 5  ;;  %v6690_v38 = vshll.u32 %v6289_v29, 16  ;;  %v6694_v39 = vshrl.u32 %v6289_v29, 16 }
 0x27c   : > { %v6620_v62 = vrot.slane %v6619_v54, 4  ;;  %v6642_v2 = vrot.slane %v6640_v58, 5  ;;  %v6291_v54 = vld [vmem:[#allocation2 + $0xfc] sm:$0xf]  ;;  %v6704_v58 = vshrl.u32 %v6290_v50, 16 }
 0x27d   : > { %v6630_v63 = vrot.slane %v6629_v55, 4 }
 0x27e   : > { %v6625_v14 = vsel %vm11982_vm2, %v6620_v62, %v6624_v32  ;;  %v6710_v62 = vshll.u32 %v6291_v54, 16 }
 0x280   : > { %2821 = vmatmul.mubr.bf16.gmra.mrb[92].mxu1 %v9714_v5  ;;  %7360 = vmatmul.mubr.bf16.gmra.mrb[28].mxu0 %v9970_v18  ;;  %v6596_v5 = vshll.u32 %v6278_v60, 16  ;;  %v6585_v18 = vor.u32 %v6584_v1, %v6580_v0  ;;  %v6650_v60 = vshrl.u32 %v6284_v48, 16  ;;  %v6696_v48 = vrot.slane %v6694_v39, 4  ;;  %v11352_v39 = vld [vmem:[%s13693_s3 + $0x194] ss:$8 sps:$4 sm:$0xff]  }
 0x281   : > { %2830 = vmatprep.mubr.bf16.mxu1 %v13700_v24  ;;  %7369 = vmatprep.mubr.bf16.mxu0 %v13700_v24 }
 0x282   : > { %v6598_v22 = vrot.slane %v6596_v5, 5  ;;  %v6586_v26 = vrot.slane %v6585_v18, 4  ;;  %v6648_v5 = vrot.slane %v6646_v59, 5  ;;  %v6652_v6 = vrot.slane %v6650_v60, 4  ;;  %v11349_v59 = vld [vmem:[#allocation2 + $0x15c] sm:$0xf] }
 0x283   : > { %v6656_v18 = vshll.u32 %v6285_v3, 16  ;;  %v11350_v60 = vld [vmem:[#allocation2 + $0x160] sm:$0xf] }
 0x284   : > { %v6599_v27 = vor.u32 %v6598_v22, %v6595_v21  ;;  %v6591_v40 = vsel %vm11982_vm2, %v6586_v26, %v6590_v28  ;;  %v11236_v21 = vld [vmem:[%s13693_s3 + $0x374] ss:$8 sps:$4 sm:$0xff]   ;;  %v6653_v22 = vor.u32 %v6652_v6, %v6648_v5  ;;  %v6288_v28 = vld [vmem:[#allocation2 + $0xf0] sm:$0xf]  ;;  %v6706_v6 = vrot.slane %v6704_v58, 4 }
 0x285   : > { %8281 = vmatprep.subr.bf16.mxu0 %v11236_v21  ;;  %v6658_v26 = vrot.slane %v6656_v18, 5  ;;  %v11212_v21 = vld [vmem:[#allocation2 + $0x14] sm:$0xff]  }
 0x286   : > { %v6600_v41 = vrot.slane %v6599_v27, 4  ;;  %8282 = vmatpush1.bf16.msra.mxu0 %v11234_v20  ;;  %v6654_v27 = vrot.slane %v6653_v22, 4  ;;  %v6297_v58 = vld [vmem:[#allocation2 + $0x114] sm:$0x1] }
 0x288   : > { %2831 = vmatmul.mubr.bf16.gmra.mrb[96].mxu1 %v9715_v25  ;;  %7370 = vmatmul.mubr.bf16.gmra.mrb[32].mxu0 %v9971_v36  ;;  %v6576_v25 = vrot.slane %v6575_v16, 4  ;;  %v9718_v36 = vcombine.low %v11341_v34, %v11342_v35  ;;  %v6605_v52 = vsel %vm11982_vm2, %v6600_v41, %v6604_v23  ;;  %v6660_v23 = vshrl.u32 %v6285_v3, 16  ;;  %v6287_v34 = vld [vmem:[#allocation2 + $0xc4] sm:$0x1] }
 0x289   : > { %2840 = vmatprep.mubr.bf16.mxu1 %v13700_v24  ;;  %7379 = vmatprep.mubr.bf16.mxu0 %v13700_v24  ;;  %v9975_v61 = vcombine.low %v6605_v52, %v6615_v53  ;;  %v6681_v35 = vshrl.u32 %v6288_v28, 16  ;;  %v6659_v43 = vsel %vm11982_vm2, %v6654_v27, %v6658_v26  ;;  %v6676_v32 = vshll.u32 %v6287_v34, 16  ;;  %v6295_v34 = vld [vmem:[#allocation2 + $0x10c] sm:$0xf] }
 0x28a   : > { %v6581_v37 = vsel %vm11982_vm2, %v6576_v25, %v6580_v0  ;;  %v6662_v30 = vrot.slane %v6660_v23, 4 }
 0x28b   : > { %v9974_v9 = vcombine.low %v6581_v37, %v6591_v40  ;;  %v11347_v37 = vld [vmem:[#allocation2 + $0x154] sm:$0xf]  ;;  %v11348_v40 = vld [vmem:[#allocation2 + $0x158] sm:$0xf]  ;;  %v6683_v45 = vrot.slane %v6681_v35, 4  ;;  %v6678_v53 = vrot.slane %v6676_v32, 5 }
 0x28c   : > { %v9721_v41 = vcombine.low %v11347_v37, %v11348_v40  ;;  %v6663_v44 = vor.u32 %v6662_v30, %v6658_v26  ;;  %v11216_v37 = vld [vmem:[#allocation2 + $0x1c] sm:$0xff]  }
 0x290   : > { %2841 = vmatmul.mubr.bf16.gmra.mrb[100].mxu1 %v9716_v46  ;;  %7380 = vmatmul.mubr.bf16.gmra.mrb[36].mxu0 %v9972_v57  ;;  %v6282_v46 = vld [vmem:[#allocation2 + $0xb0] sm:$0x1]  ;;  %v6637_v57 = vshrl.u32 %v6283_v47, 16  ;;  %v6692_v47 = vrot.slane %v6690_v38, 5 }
 0x291   : > { %2850 = vmatprep.mubr.bf16.mxu1 %v13700_v24  ;;  %7389 = vmatprep.mubr.bf16.mxu0 %v13700_v24  ;;  %v6632_v56 = vshll.u32 %v6282_v46, 16  ;;  %v6296_v38 = vld [vmem:[#allocation2 + $0x110] sm:$0xf] }
 0x292   : > { %v6639_v1 = vrot.slane %v6637_v57, 4  ;;  %v6700_v57 = vshll.u32 %v6290_v50, 16  ;;  %v6754_v32 = vshll.u32 %v6296_v38, 16 }
 0x293   : > { %v6634_v0 = vrot.slane %v6632_v56, 5  ;;  %v6697_v56 = vor.u32 %v6696_v48, %v6692_v47 }
 0x294   : > { %v6643_v16 = vor.u32 %v6642_v2, %v6639_v1 }
 0x295   : > { %v6635_v15 = vsel %vm11982_vm2, %v6630_v63, %v6634_v0  ;;  %v6714_v63 = vshrl.u32 %v6291_v54, 16  ;;  %v6698_v3 = vrot.slane %v6697_v56, 4 }
 0x296   : > { %v9976_v17 = vcombine.low %v6625_v14, %v6635_v15  ;;  %v6644_v25 = vrot.slane %v6643_v16, 4  ;;  %v6293_v14 = vld [vmem:[#allocation2 + $0x104] sm:$0xf]  ;;  %v6294_v15 = vld [vmem:[#allocation2 + $0x108] sm:$0xf] }
 0x297   : > { %v6725_v19 = vshrl.u32 %v6293_v14, 16 }
 0x298   : > { %2851 = vmatmul.mubr.bf16.gmra.mrb[104].mxu1 %v9717_v13  ;;  %7390 = vmatmul.mubr.bf16.gmra.mrb[40].mxu0 %v9973_v4  ;;  %v9720_v13 = vcombine.low %v11345_v10, %v11346_v11  ;;  %v6670_v4 = vshrl.u32 %v6286_v8, 16  ;;  %v6649_v42 = vsel %vm11982_vm2, %v6644_v25, %v6648_v5  ;;  %v6702_v5 = vrot.slane %v6700_v57, 5  ;;  %v11355_v57 = vld [vmem:[%s13693_s3 + $0x1a0] ss:$8 sps:$4 sm:$0xff]  }
 0x299   : > { %2860 = vmatprep.mubr.bf16.mxu1 %v13700_v24  ;;  %7399 = vmatprep.mubr.bf16.mxu0 %v13700_v24  ;;  %v9977_v49 = vcombine.low %v6649_v42, %v6659_v43  ;;  %v6712_v10 = vrot.slane %v6710_v62, 5  ;;  %v6716_v11 = vrot.slane %v6714_v63, 4  ;;  %v6738_v25 = vshrl.u32 %v6294_v15, 16 }
 0x29a   : > { %v6672_v33 = vrot.slane %v6670_v4, 4  ;;  %v6703_v18 = vsel %vm11982_vm2, %v6698_v3, %v6702_v5  ;;  %v6707_v20 = vor.u32 %v6706_v6, %v6702_v5  ;;  %v6728_v4 = vshll.u32 %v6293_v14, 16 }
 0x29b   : > { %v6717_v22 = vor.u32 %v6716_v11, %v6712_v10  ;;  %v6727_v30 = vrot.slane %v6725_v19, 4  ;;  %v6744_v43 = vshll.u32 %v6295_v34, 16  ;;  %v6764_v6 = vshll.u32 %v6297_v58, 16  ;;  %v11359_v19 = vld [vmem:[%s13693_s3 + $0x1c0] ss:$8 sps:$4 sm:$0xff]  }
 0x29d   : > { %v6718_v29 = vrot.slane %v6717_v22, 4  ;;  %v6746_v50 = vrot.slane %v6744_v43, 5  ;;  %v6766_v22 = vrot.slane %v6764_v6, 5  ;;  %v6302_v43 = vld [vmem:[#allocation2 + $0x128] sm:$0x1] }
 0x2a0   : > { %2861 = vmatmul.mubr.bf16.gmra.mrb[108].mxu1 %v9718_v36  ;;  %7400 = vmatmul.mubr.bf16.gmra.mrb[44].mxu0 %v9974_v9  ;;  %v6684_v36 = vshll.u32 %v6288_v28, 16  ;;  %v6673_v9 = vor.u32 %v6672_v33, %v6668_v31  ;;  %v6708_v28 = vrot.slane %v6707_v20, 4  ;;  %v11351_v33 = vld [vmem:[%s13693_s3 + $0x180] ss:$8 sps:$4 sm:$0xff]  }
 0x2a1   : > { %2870 = vmatprep.mubr.bf16.mxu1 %v13700_v24  ;;  %7409 = vmatprep.mubr.bf16.mxu0 %v13700_v24 }
 0x2a2   : > { %v6686_v46 = vrot.slane %v6684_v36, 5  ;;  %v6674_v52 = vrot.slane %v6673_v9, 4  ;;  %v6740_v36 = vrot.slane %v6738_v25, 4  ;;  %v6713_v40 = vsel %vm11982_vm2, %v6708_v28, %v6712_v10  ;;  %v11358_v10 = vld [vmem:[%s13693_s3 + $0x1c4] ss:$8 sps:$4 sm:$0xff]  }
 0x2a3   : > { %v6748_v9 = vshrl.u32 %v6295_v34, 16  ;;  %v11361_v34 = vld [vmem:[%s13693_s3 + $0x1d0] ss:$8 sps:$4 sm:$0xff]  }
 0x2a4   : > { %v6687_v55 = vor.u32 %v6686_v46, %v6683_v45  ;;  %v6679_v1 = vsel %vm11982_vm2, %v6674_v52, %v6678_v53  ;;  %v6758_v45 = vshrl.u32 %v6296_v38, 16  ;;  %v11353_v46 = vld [vmem:[%s13693_s3 + $0x190] ss:$8 sps:$4 sm:$0xff]   ;;  %v6299_v52 = vld [vmem:[#allocation2 + $0x11c] sm:$0xf] }
 0x2a5   : > { %v6750_v54 = vrot.slane %v6748_v9, 4  ;;  %v6778_v62 = vshll.u32 %v6299_v52, 16  ;;  %v6782_v63 = vshrl.u32 %v6299_v52, 16  ;;  %v11363_v9 = vld [vmem:[%s13693_s3 + $0x1e0] ss:$8 sps:$4 sm:$0xff]  }
 0x2a6   : > { %v6688_v2 = vrot.slane %v6687_v55, 4  ;;  %v6756_v55 = vrot.slane %v6754_v32, 5  ;;  %v6760_v56 = vrot.slane %v6758_v45, 4  ;;  %v6304_v32 = vld [vmem:[#allocation2 + $0x130] sm:$0xf] }
 0x2a7   : > { %v6751_v3 = vor.u32 %v6750_v54, %v6746_v50  ;;  %v6780_v14 = vrot.slane %v6778_v62, 5  ;;  %v11364_v45 = vld [vmem:[%s13693_s3 + $0x1f4] ss:$8 sps:$4 sm:$0xff]   ;;  %v6822_v54 = vshll.u32 %v6304_v32, 16 }
 0x2a8   : > { %2871 = vmatmul.mubr.bf16.gmra.mrb[112].mxu1 %v9719_v51  ;;  %7410 = vmatmul.mubr.bf16.gmra.mrb[48].mxu0 %v9975_v61  ;;  %v6664_v51 = vrot.slane %v6663_v44, 4  ;;  %v9722_v61 = vcombine.low %v11349_v59, %v11350_v60  ;;  %v6693_v16 = vsel %vm11982_vm2, %v6688_v2, %v6692_v47  ;;  %v11354_v47 = vld [vmem:[%s13693_s3 + $0x1a4] ss:$8 sps:$4 sm:$0xff]   ;;  %v11356_v59 = vld [vmem:[%s13693_s3 + $0x1b4] ss:$8 sps:$4 sm:$0xff]   ;;  %v6761_v5 = vor.u32 %v6760_v56, %v6756_v55 }
 0x2a9   : > { %2880 = vmatprep.mubr.bf16.mxu1 %v13700_v24  ;;  %7419 = vmatprep.mubr.bf16.mxu0 %v13700_v24  ;;  %v9979_v26 = vcombine.low %v6693_v16, %v6703_v18  ;;  %v6300_v18 = vld [vmem:[#allocation2 + $0x120] sm:$0xf]  ;;  %v6752_v20 = vrot.slane %v6751_v3, 4  ;;  %v11365_v56 = vld [vmem:[%s13693_s3 + $0x1f0] ss:$8 sps:$4 sm:$0xff]   ;;  %v11223_v3 = vld [vmem:[#allocation2 + $0x44] sm:$0xff]  }
 0x2aa   : > { %v6669_v0 = vsel %vm11982_vm2, %v6664_v51, %v6668_v31  ;;  %v6730_v31 = vrot.slane %v6728_v4, 5  ;;  %v6298_v51 = vld [vmem:[#allocation2 + $0x118] sm:$0xf]  ;;  %v11360_v4 = vld [vmem:[%s13693_s3 + $0x1d4] ss:$8 sps:$4 sm:$0xff]   ;;  %v6792_v28 = vshrl.u32 %v6300_v18, 16 }
 0x2ab   : > { %v9978_v8 = vcombine.low %v6669_v0, %v6679_v1  ;;  %v6769_v60 = vshrl.u32 %v6298_v51, 16  ;;  %v11217_v0 = vld [vmem:[#allocation2 + $0x28] sm:$0xff]  }
 0x2ac   : > { %v6731_v42 = vor.u32 %v6730_v31, %v6727_v30  ;;  %v6757_v31 = vsel %vm11982_vm2, %v6752_v20, %v6756_v55  ;;  %v6826_v55 = vshrl.u32 %v6304_v32, 16  ;;  %v6311_v32 = vld [vmem:[#allocation2 + $0x14c] sm:$0xf] }
 0x2ad   : > { %v6771_v11 = vrot.slane %v6769_v60, 4 }
 0x2b0   : > { %2881 = vmatmul.mubr.bf16.gmra.mrb[116].mxu1 %v9720_v13  ;;  %7420 = vmatmul.mubr.bf16.gmra.mrb[52].mxu0 %v9976_v17  ;;  %v6292_v13 = vld [vmem:[#allocation2 + $0x100] sm:$0x1]  ;;  %v6734_v17 = vshll.u32 %v6294_v15, 16  ;;  %v6784_v15 = vrot.slane %v6782_v63, 4  ;;  %v6305_v63 = vld [vmem:[#allocation2 + $0x134] sm:$0xf] }
 0x2b1   : > { %2890 = vmatprep.mubr.bf16.mxu1 %v13700_v24  ;;  %7429 = vmatprep.mubr.bf16.mxu0 %v13700_v24  ;;  %v6720_v23 = vshll.u32 %v6292_v13, 16 }
 0x2b2   : > { %v6736_v35 = vrot.slane %v6734_v17, 5  ;;  %v6785_v25 = vor.u32 %v6784_v15, %v6780_v14 }
 0x2b3   : > { %v6722_v27 = vrot.slane %v6720_v23, 5  ;;  %v6301_v23 = vld [vmem:[#allocation2 + $0x124] sm:$0xf] }
 0x2b4   : > { %v6741_v44 = vor.u32 %v6740_v36, %v6736_v35  ;;  %v6802_v30 = vshrl.u32 %v6301_v23, 16  ;;  %v6786_v38 = vrot.slane %v6785_v25, 4  ;;  %v6307_v25 = vld [vmem:[#allocation2 + $0x13c] sm:$0x1] }
 0x2b6   : > { %v6742_v53 = vrot.slane %v6741_v44, 4  ;;  %v6303_v44 = vld [vmem:[#allocation2 + $0x12c] sm:$0xf] }
 0x2b7   : > { %v6813_v52 = vshrl.u32 %v6303_v44, 16 }
 0x2b8   : > { %2891 = vmatmul.mubr.bf16.gmra.mrb[120].mxu1 %v9721_v41  ;;  %7430 = vmatmul.mubr.bf16.gmra.mrb[56].mxu0 %v9977_v49  ;;  %v6723_v41 = vsel %vm11982_vm2, %v6718_v29, %v6722_v27  ;;  %v6732_v49 = vrot.slane %v6731_v42, 4  ;;  %v6747_v2 = vsel %vm11982_vm2, %v6742_v53, %v6746_v50  ;;  %v11218_v29 = vld [vmem:[#allocation2 + $0x30] sm:$0xff]   ;;  %v6798_v27 = vshll.u32 %v6301_v23, 16 }
 0x2b9   : > { %2900 = vmatprep.mubr.bf16.mxu1 %v13700_v24  ;;  %7439 = vmatprep.mubr.bf16.mxu0 %v13700_v24  ;;  %v9980_v48 = vcombine.low %v6713_v40, %v6723_v41  ;;  %v6804_v42 = vrot.slane %v6802_v30, 4  ;;  %v6816_v53 = vshll.u32 %v6303_v44, 16  ;;  %v11224_v30 = vld [vmem:[#allocation2 + $0x50] sm:$0xff]  }
 0x2ba   : > { %v6737_v1 = vsel %vm11982_vm2, %v6732_v49, %v6736_v35  ;;  %v11362_v35 = vld [vmem:[%s13693_s3 + $0x1e4] ss:$8 sps:$4 sm:$0xff]   ;;  %v6800_v41 = vrot.slane %v6798_v27, 5  ;;  %v11219_v49 = vld [vmem:[#allocation2 + $0x3c] sm:$0xff]  }
 0x2bb   : > { %v9981_v16 = vcombine.low %v6737_v1, %v6747_v2  ;;  %v6818_v62 = vrot.slane %v6816_v53, 5  ;;  %v6828_v1 = vrot.slane %v6826_v55, 4  ;;  %v6306_v2 = vld [vmem:[#allocation2 + $0x138] sm:$0xf] }
 0x2bc   : > { %v6805_v50 = vor.u32 %v6804_v42, %v6800_v41  ;;  %v6846_v15 = vshrl.u32 %v6306_v2, 16  ;;  %v6310_v42 = vld [vmem:[#allocation2 + $0x148] sm:$0xf] }
 0x2c0   : > { %2901 = vmatmul.mubr.bf16.gmra.mrb[124].mxu1 %v9722_v61  ;;  %7440 = vmatmul.mubr.bf16.gmra.mrb[60].mxu0 %v9978_v8  ;;  %v6772_v61 = vshll.u32 %v6298_v51, 16  ;;  %v11357_v8 = vld [vmem:[%s13693_s3 + $0x1b0] ss:$8 sps:$4 sm:$0xff]   ;;  %v6808_v51 = vshll.u32 %v6302_v43, 16 }
 0x2c1   : > { %3296 = vmatprep.mubr.bf16.mxu1 %v13700_v24  ;;  %7449 = vmatprep.mubr.bf16.mxu0 %v13700_v24 }
 0x2c2   : > { %v6774_v13 = vrot.slane %v6772_v61, 5  ;;  %v6810_v60 = vrot.slane %v6808_v51, 5  ;;  %v6815_v61 = vrot.slane %v6813_v52, 4  ;;  %v6890_v51 = vshrl.u32 %v6311_v32, 16 }
 0x2c4   : > { %v6775_v17 = vor.u32 %v6774_v13, %v6771_v11  ;;  %v6836_v13 = vshrl.u32 %v6305_v63, 16 }
 0x2c6   : > { %v6776_v36 = vrot.slane %v6775_v17, 4  ;;  %v6848_v17 = vrot.slane %v6846_v15, 4 }
 0x2c8   : > { %3297 = vmatmul.mubr.bf16.vlgmr.msra.gmra.mrb[0].mxu1 %v11212_v21  ;;  %7450 = vmatmul.mubr.bf16.gmra.mrb[64].mxu0 %v9979_v26  ;;  %v6762_v21 = vrot.slane %v6761_v5, 4  ;;  %v6788_v26 = vshll.u32 %v6300_v18, 16 }
 0x2c9   : > { %10128 = vmatpush1.bf16.msra.mxu1 %v11351_v33  ;;  %3306 = vmatprep.mubr.bf16.mxu1 %v13700_v24 }
 0x2ca   : > { %10121 = vmatprep.subr.bf16.mxu1 %v11352_v39  ;;  %7459 = vmatprep.mubr.bf16.mxu0 %v13700_v24  ;;  %v6767_v33 = vsel %vm11982_vm2, %v6762_v21, %v6766_v22  ;;  %v6790_v39 = vrot.slane %v6788_v26, 5  ;;  %v6308_v21 = vld [vmem:[#allocation2 + $0x140] sm:$0xf]  ;;  %v6309_v22 = vld [vmem:[#allocation2 + $0x144] sm:$0xf] }
 0x2cb   : > { %v9982_v40 = vcombine.low %v6757_v31, %v6767_v33  ;;  %v6857_v26 = vshrl.u32 %v6308_v21, 16  ;;  %v6870_v27 = vshrl.u32 %v6309_v22, 16 }
 0x2cd   : > { %10129 = vmatpush1.bf16.msra.mxu1 %v11353_v46  ;;  %v6781_v46 = vsel %vm11982_vm2, %v6776_v36, %v6780_v14  ;;  %v6842_v14 = vshll.u32 %v6306_v2, 16  ;;  %v6852_v36 = vshll.u32 %v6307_v25, 16 }
 0x2ce   : > { %10122 = vmatprep.subr.bf16.mxu1 %v11354_v47  ;;  %v6791_v47 = vsel %vm11982_vm2, %v6786_v38, %v6790_v39  ;;  %v6859_v38 = vrot.slane %v6857_v26, 4 }
 0x2d0   : > { %3307 = vmatmul.mubr.bf16.gmra.mrb[4].mxu1 %v11216_v37  ;;  %7460 = vmatmul.mubr.bf16.gmra.mrb[68].mxu0 %v9980_v48  ;;  %v6794_v37 = vrot.slane %v6792_v28, 4  ;;  %v6860_v28 = vshll.u32 %v6308_v21, 16 }
 0x2d1   : > { %3316 = vmatprep.mubr.bf16.mxu1 %v13700_v24  ;;  %10130 = vmatpush1.bf16.msra.mxu1 %v11355_v57  ;;  %v9983_v57 = vcombine.low %v6781_v46, %v6791_v47  ;;  %v6876_v47 = vshll.u32 %v6310_v42, 16 }
 0x2d2   : > { %10123 = vmatprep.subr.bf16.mxu1 %v11356_v59  ;;  %7469 = vmatprep.mubr.bf16.mxu0 %v13700_v24  ;;  %v6795_v48 = vor.u32 %v6794_v37, %v6790_v39  ;;  %v6806_v59 = vrot.slane %v6805_v50, 4  ;;  %v6862_v39 = vrot.slane %v6860_v28, 5  ;;  %v6886_v50 = vshll.u32 %v6311_v32, 16 }
 0x2d4   : > { %v6796_v58 = vrot.slane %v6795_v48, 4  ;;  %v6811_v6 = vsel %vm11982_vm2, %v6806_v59, %v6810_v60  ;;  %v6880_v48 = vshrl.u32 %v6310_v42, 16  ;;  %v6888_v59 = vrot.slane %v6886_v50, 5 }
 0x2d5   : > { %10131 = vmatpush1.bf16.msra.mxu1 %v11357_v8  ;;  %v6819_v8 = vor.u32 %v6818_v62, %v6815_v61  ;;  %v6892_v60 = vrot.slane %v6890_v51, 4  ;;  %v6312_v61 = vld [vmem:[#allocation2 + $0x150] sm:$0x1]  ;;  %v6313_v62 = vld [vmem:[#allocation2 + $0x154] sm:$0xf] }
 0x2d6   : > { %10124 = vmatprep.subr.bf16.mxu1 %v11358_v10  ;;  %v6801_v5 = vsel %vm11982_vm2, %v6796_v58, %v6800_v41  ;;  %v6832_v10 = vshll.u32 %v6305_v63, 16  ;;  %v6314_v63 = vld [vmem:[#allocation2 + $0x158] sm:$0xf] }
 0x2d7   : > { %v6820_v18 = vrot.slane %v6819_v8, 4  ;;  %v6901_v8 = vshrl.u32 %v6313_v62, 16 }
 0x2d8   : > { %3317 = vmatmul.mubr.bf16.gmra.mrb[8].mxu1 %v11217_v0  ;;  %7470 = vmatmul.mubr.bf16.gmra.mrb[72].mxu0 %v9981_v16  ;;  %v6824_v0 = vrot.slane %v6822_v54, 5  ;;  %v9984_v16 = vcombine.low %v6801_v5, %v6811_v6  ;;  %v6834_v20 = vrot.slane %v6832_v10, 5  ;;  %v6893_v5 = vor.u32 %v6892_v60, %v6888_v59 }
 0x2d9   : > { %3326 = vmatprep.mubr.bf16.mxu1 %v13700_v24  ;;  %10132 = vmatpush1.bf16.msra.mxu1 %v11359_v19  ;;  %v6838_v19 = vrot.slane %v6836_v13, 4  ;;  %v6896_v6 = vshll.u32 %v6312_v61, 16  ;;  %v6904_v10 = vshll.u32 %v6313_v62, 16  ;;  %v6914_v13 = vshrl.u32 %v6314_v63, 16  ;;  %v6321_v61 = vld [vmem:[#allocation2 + $0x174] sm:$0xf] }
 0x2da   : > { %10125 = vmatprep.subr.bf16.mxu1 %v11360_v4  ;;  %7479 = vmatprep.mubr.bf16.mxu0 %v13700_v24  ;;  %v6829_v11 = vor.u32 %v6828_v1, %v6824_v0  ;;  %v6844_v4 = vrot.slane %v6842_v14, 5  ;;  %v6825_v31 = vsel %vm11982_vm2, %v6820_v18, %v6824_v0 }
 0x2db   : > { %v6898_v18 = vrot.slane %v6896_v6, 5  ;;  %v6906_v21 = vrot.slane %v6904_v10, 5 }
 0x2dc   : > { %v6830_v23 = vrot.slane %v6829_v11, 4  ;;  %v6910_v11 = vshll.u32 %v6314_v63, 16 }
 0x2dd   : > { %10133 = vmatpush1.bf16.msra.mxu1 %v11361_v34  ;;  %v6839_v34 = vor.u32 %v6838_v19, %v6834_v20  ;;  %v6916_v19 = vrot.slane %v6914_v13, 4 }
 0x2de   : > { %10126 = vmatprep.subr.bf16.mxu1 %v11362_v35  ;;  %v6835_v33 = vsel %vm11982_vm2, %v6830_v23, %v6834_v20  ;;  %v6849_v35 = vor.u32 %v6848_v17, %v6844_v4  ;;  %v6903_v20 = vrot.slane %v6901_v8, 4  ;;  %v6912_v23 = vrot.slane %v6910_v11, 5  ;;  %v11230_v17 = vld [vmem:[#allocation2 + $0x6c] sm:$0xff]  }
 0x2df   : > { %v9985_v41 = vcombine.low %v6825_v31, %v6835_v33  ;;  %v6840_v43 = vrot.slane %v6839_v34, 4 }
 0x2e0   : > { %3327 = vmatmul.mubr.bf16.gmra.mrb[12].mxu1 %v11218_v29  ;;  %7480 = vmatmul.mubr.bf16.gmra.mrb[76].mxu0 %v9982_v40  ;;  %v6866_v29 = vshll.u32 %v6309_v22, 16  ;;  %v6872_v40 = vrot.slane %v6870_v27, 4  ;;  %v6850_v44 = vrot.slane %v6849_v35, 4  ;;  %v6315_v22 = vld [vmem:[#allocation2 + $0x15c] sm:$0xf]  ;;  %v6907_v28 = vor.u32 %v6906_v21, %v6903_v20 }
 0x2e1   : > { %3336 = vmatprep.mubr.bf16.mxu1 %v13700_v24  ;;  %10134 = vmatpush1.bf16.msra.mxu1 %v11363_v9  ;;  %v6854_v9 = vrot.slane %v6852_v36, 5  ;;  %v6845_v52 = vsel %vm11982_vm2, %v6840_v43, %v6844_v4  ;;  %v6316_v4 = vld [vmem:[#allocation2 + $0x160] sm:$0xf]  ;;  %v6917_v27 = vor.u32 %v6916_v19, %v6912_v23  ;;  %v6317_v43 = vld [vmem:[#allocation2 + $0x164] sm:$0x1] }
 0x2e2   : > { %10127 = vmatprep.subr.bf16.mxu1 %v11364_v45  ;;  %7489 = vmatprep.mubr.bf16.mxu0 %v13700_v24  ;;  %v6868_v37 = vrot.slane %v6866_v29, 5  ;;  %v6863_v45 = vor.u32 %v6862_v39, %v6859_v38  ;;  %v6920_v29 = vshll.u32 %v6315_v22, 16  ;;  %v6930_v31 = vshll.u32 %v6316_v4, 16  ;;  %v6318_v38 = vld [vmem:[#allocation2 + $0x168] sm:$0xf] }
 0x2e3   : > { %v6855_v53 = vsel %vm11982_vm2, %v6850_v44, %v6854_v9  ;;  %v6934_v33 = vshrl.u32 %v6316_v4, 16  ;;  %v6908_v35 = vrot.slane %v6907_v28, 4  ;;  %v6319_v39 = vld [vmem:[#allocation2 + $0x16c] sm:$0xf]  ;;  %v6945_v44 = vshrl.u32 %v6318_v38, 16 }
 0x2e4   : > { %v6873_v46 = vor.u32 %v6872_v40, %v6868_v37  ;;  %v6864_v54 = vrot.slane %v6863_v45, 4  ;;  %v9986_v58 = vcombine.low %v6845_v52, %v6855_v53  ;;  %v6922_v36 = vrot.slane %v6920_v29, 5  ;;  %v6322_v20 = vld [vmem:[#allocation2 + $0x178] sm:$0x1]  ;;  %v6323_v21 = vld [vmem:[#allocation2 + $0x17c] sm:$0xf] }
 0x2e5   : > { %10135 = vmatpush1.bf16.msra.mxu1 %v11365_v56  ;;  %v6878_v56 = vrot.slane %v6876_v47, 5  ;;  %v6936_v42 = vrot.slane %v6934_v33, 4  ;;  %v6948_v9 = vshll.u32 %v6318_v38, 16  ;;  %v6954_v32 = vshll.u32 %v6319_v39, 16 }
 0x2e6   : > { %v6874_v55 = vrot.slane %v6873_v46, 4  ;;  %v6869_v0 = vsel %vm11982_vm2, %v6864_v54, %v6868_v37  ;;  %v6918_v37 = vrot.slane %v6917_v27, 4  ;;  %v6958_v45 = vshrl.u32 %v6319_v39, 16  ;;  %v11231_v46 = vld [vmem:[#allocation2 + $0x78] sm:$0xff]   ;;  %v6325_v39 = vld [vmem:[#allocation2 + $0x184] sm:$0xf] }
 0x2e7   : > { %v6913_v47 = vsel %vm11982_vm2, %v6908_v35, %v6912_v23  ;;  %v6940_v51 = vshll.u32 %v6317_v43, 16  ;;  %v6947_v52 = vrot.slane %v6945_v44, 4  ;;  %v6950_v53 = vrot.slane %v6948_v9, 5 }
 0x2e8   : > { %3337 = vmatmul.mubr.bf16.gmra.mrb[16].mxu1 %v11219_v49  ;;  %7490 = vmatmul.mubr.bf16.gmra.mrb[80].mxu0 %v9983_v57  ;;  %v11225_v49 = vld [vmem:[#allocation2 + $0x58] sm:$0xff]   ;;  %v6882_v57 = vrot.slane %v6880_v48, 4  ;;  %v6879_v1 = vsel %vm11982_vm2, %v6874_v55, %v6878_v56  ;;  %v6923_v48 = vsel %vm11982_vm2, %v6918_v37, %v6922_v36  ;;  %v6956_v54 = vrot.slane %v6954_v32, 5 }
 0x2e9   : > { %3346 = vmatprep.mubr.bf16.mxu1 %v13700_v24  ;;  %7499 = vmatprep.mubr.bf16.mxu0 %v13700_v24  ;;  %v9987_v14 = vcombine.low %v6869_v0, %v6879_v1  ;;  %v6960_v55 = vrot.slane %v6958_v45, 4  ;;  %v6942_v60 = vrot.slane %v6940_v51, 5  ;;  %v6951_v62 = vor.u32 %v6950_v53, %v6947_v52 }
 0x2ea   : > { %v6883_v2 = vor.u32 %v6882_v57, %v6878_v56  ;;  %v9989_v56 = vcombine.low %v6913_v47, %v6923_v48  ;;  %v6320_v57 = vld [vmem:[#allocation2 + $0x170] sm:$0xf]  ;;  %v6989_v28 = vshrl.u32 %v6323_v21, 16  ;;  %v6992_v29 = vshll.u32 %v6323_v21, 16 }
 0x2eb   : > { %v6961_v63 = vor.u32 %v6960_v55, %v6956_v54  ;;  %v6964_v0 = vshll.u32 %v6320_v57, 16  ;;  %v6968_v1 = vshrl.u32 %v6320_v57, 16  ;;  %v6952_v10 = vrot.slane %v6951_v62, 4  ;;  %v11238_v57 = vld [vmem:[#allocation2 + $0xa0] sm:$0xff]  }
 0x2ec   : > { %v6884_v15 = vrot.slane %v6883_v2, 4  ;;  %v11232_v2 = vld [vmem:[#allocation2 + $0x80] sm:$0xff]   ;;  %v6994_v38 = vrot.slane %v6992_v29, 5  ;;  %v7008_v32 = vshll.u32 %v6325_v39, 16 }
 0x2ed   : > { %v6962_v11 = vrot.slane %v6961_v63, 4  ;;  %v6966_v13 = vrot.slane %v6964_v0, 5  ;;  %v6957_v23 = vsel %vm11982_vm2, %v6952_v10, %v6956_v54  ;;  %v11241_v29 = vld [vmem:[#allocation2 + $0xe4] sm:$0xff]  }
 0x2ee   : > { %v6889_v25 = vsel %vm11982_vm2, %v6884_v15, %v6888_v59  ;;  %v7010_v51 = vrot.slane %v7008_v32, 5 }
 0x2ef   : > { %v6967_v19 = vsel %vm11982_vm2, %v6962_v11, %v6966_v13  ;;  %v7738_v11 = vld [vmem:[#allocation2 + $0x28] sm:$0xe] }
 0x2f0   : > { %3347 = vmatmul.mubr.bf16.gmra.mrb[20].mxu1 %v11223_v3  ;;  %7500 = vmatmul.mubr.bf16.gmra.mrb[84].mxu0 %v9984_v16  ;;  %v11226_v3 = vld [vmem:[#allocation2 + $0x64] sm:$0xff]   ;;  %v6894_v16 = vrot.slane %v6893_v5, 4  ;;  %v6978_v5 = vshrl.u32 %v6321_v61, 16 }
 0x2f1   : > { %3356 = vmatprep.mubr.bf16.mxu1 %v13700_v24  ;;  %7509 = vmatprep.mubr.bf16.mxu0 %v13700_v24 }
 0x2f2   : > { %v6899_v26 = vsel %vm11982_vm2, %v6894_v16, %v6898_v18  ;;  %v6980_v18 = vrot.slane %v6978_v5, 4 }
 0x2f3   : > { %v9988_v34 = vcombine.low %v6889_v25, %v6899_v26  ;;  %v6984_v26 = vshll.u32 %v6322_v20, 16  ;;  %v11240_v20 = vld [vmem:[#allocation2 + $0xdc] sm:$0xff]  }
 0x2f5   : > { %v6986_v35 = vrot.slane %v6984_v26, 5  ;;  %v11369_v26 = vld [vmem:[#allocation2 + $0x38] sm:$0x1] }
 0x2f8   : > { %3357 = vmatmul.mubr.bf16.gmra.mrb[24].mxu1 %v11224_v30  ;;  %7510 = vmatmul.mubr.bf16.gmra.mrb[88].mxu0 %v9985_v41  ;;  %v6924_v30 = vshrl.u32 %v6315_v22, 16  ;;  %v6932_v41 = vrot.slane %v6930_v31, 5  ;;  %v6324_v22 = vld [vmem:[#allocation2 + $0x180] sm:$0xf]  ;;  %v9991_v31 = vcombine.low %v6957_v23, %v6967_v19  ;;  %v11368_v23 = vld [vmem:[#allocation2 + $0x34] sm:$0xf] }
 0x2f9   : > { %3366 = vmatprep.mubr.bf16.mxu1 %v13700_v24  ;;  %7519 = vmatprep.mubr.bf16.mxu0 %v13700_v24  ;;  %v6998_v27 = vshll.u32 %v6324_v22, 16  ;;  %v7842_v19 = vrot.slane %v11368_v23, 5 }
 0x2fa   : > { %v6926_v40 = vrot.slane %v6924_v30, 4  ;;  %v6937_v50 = vor.u32 %v6936_v42, %v6932_v41  ;;  %v7002_v30 = vshrl.u32 %v6324_v22, 16  ;;  %v11237_v42 = vld [vmem:[#allocation2 + $0x94] sm:$0xff]  }
 0x2fb   : > { %v7000_v37 = vrot.slane %v6998_v27, 5 }
 0x2fc   : > { %v6938_v59 = vrot.slane %v6937_v50, 4 }
 0x2fe   : > { %v6943_v8 = vsel %vm11982_vm2, %v6938_v59, %v6942_v60 }
 0x300   : > { %3367 = vmatmul.mubr.bf16.gmra.mrb[28].mxu1 %v11225_v49  ;;  %7520 = vmatmul.mubr.bf16.gmra.mrb[92].mxu0 %v9986_v58  ;;  %v6927_v49 = vor.u32 %v6926_v40, %v6922_v36  ;;  %v6991_v36 = vrot.slane %v6989_v28, 4  ;;  %v7004_v40 = vrot.slane %v7002_v30, 4  ;;  %v7845_v28 = vrot.slane %v11369_v26, 5 }
 0x301   : > { %3376 = vmatprep.mubr.bf16.mxu1 %v13700_v24  ;;  %7529 = vmatprep.mubr.bf16.mxu0 %v13700_v24 }
 0x302   : > { %v6928_v58 = vrot.slane %v6927_v49, 4  ;;  %v6995_v9 = vor.u32 %v6994_v38, %v6991_v36  ;;  %v7005_v45 = vor.u32 %v7004_v40, %v7000_v37  ;;  %v11242_v40 = vld [vmem:[#allocation2 + $0xf0] sm:$0xff]  }
 0x304   : > { %v6933_v6 = vsel %vm11982_vm2, %v6928_v58, %v6932_v41  ;;  %v6326_v41 = vld [vmem:[#allocation2 + $0x188] sm:$0xf]  ;;  %v6996_v50 = vrot.slane %v6995_v9, 4  ;;  %v7006_v52 = vrot.slane %v7005_v45, 4 }
 0x305   : > { %v9990_v15 = vcombine.low %v6933_v6, %v6943_v8  ;;  %v7018_v47 = vshll.u32 %v6326_v41, 16  ;;  %v7022_v48 = vshrl.u32 %v6326_v41, 16  ;;  %v11366_v8 = vld [vmem:[#allocation2 + $0x2c] sm:$0xf] }
 0x306   : > { %v7001_v58 = vsel %vm11982_vm2, %v6996_v50, %v7000_v37  ;;  %v7011_v59 = vsel %vm11982_vm2, %v7006_v52, %v7010_v51  ;;  %v7836_v10 = vrot.slane %v11366_v8, 5 }
 0x307   : > { %v7020_v54 = vrot.slane %v7018_v47, 5  ;;  %v7024_v55 = vrot.slane %v7022_v48, 4  ;;  %v9993_v63 = vcombine.low %v7001_v58, %v7011_v59  ;;  %v11243_v48 = vld [vmem:[#allocation2 + $0xf8] sm:$0xff]   ;;  %v11244_v59 = vld [vmem:[#allocation2 + $0x104] sm:$0xff]  }
 0x308   : > { %3377 = vmatmul.mubr.bf16.gmra.mrb[32].mxu1 %v11226_v3  ;;  %7530 = vmatmul.mubr.bf16.gmra.mrb[96].mxu0 %v9987_v14  ;;  %v6974_v3 = vshll.u32 %v6321_v61, 16  ;;  %v6970_v14 = vrot.slane %v6968_v1, 4 }
 0x309   : > { %3386 = vmatprep.mubr.bf16.mxu1 %v13700_v24  ;;  %7539 = vmatprep.mubr.bf16.mxu0 %v13700_v24  ;;  %v7025_v61 = vor.u32 %v7024_v55, %v7020_v54 }
 0x30a   : > { %v6976_v16 = vrot.slane %v6974_v3, 5  ;;  %v6971_v4 = vor.u32 %v6970_v14, %v6966_v13  ;;  %v11239_v3 = vld [vmem:[#allocation2 + $0xa8] sm:$0xff]   ;;  %v10011_v14 = vrot.slane %v7738_v11, 9 }
 0x30b   : > { %v7026_v1 = vrot.slane %v7025_v61, 4  ;;  %v11378_v11 = vld [vmem:[#allocation2 + $0x68] sm:$0xf] }
 0x30c   : > { %v6981_v25 = vor.u32 %v6980_v18, %v6976_v16  ;;  %v6972_v33 = vrot.slane %v6971_v4, 4  ;;  %v7837_v21 = vsel %vm12263_vm5, %v10011_v14, %v7836_v10  ;;  %v7741_v14 = vld [vmem:[#allocation2 + $0x64] sm:$0xe] }
 0x30e   : > { %v6977_v43 = vsel %vm11982_vm2, %v6972_v33, %v6976_v16  ;;  %v11367_v16 = vld [vmem:[#allocation2 + $0x30] sm:$0xf] }
 0x30f   : > { %v7839_v18 = vrot.slane %v11367_v16, 5  ;;  %v10014_v16 = vrot.slane %v7741_v14, 9 }
 0x310   : > { %3387 = vmatmul.mubr.bf16.gmra.mrb[36].mxu1 %v11230_v17  ;;  %7540 = vmatmul.mubr.bf16.gmra.mrb[100].mxu0 %v9988_v34  ;;  %v11233_v17 = vld [vmem:[#allocation2 + $0x8c] sm:$0xff]   ;;  %v6982_v34 = vrot.slane %v6981_v25, 4  ;;  %v7844_v25 = vrot.slane %v7842_v19, 4 }
 0x311   : > { %3396 = vmatprep.mubr.bf16.mxu1 %v13700_v24  ;;  %7549 = vmatprep.mubr.bf16.mxu0 %v13700_v24 }
 0x312   : > { %v6987_v44 = vsel %vm11982_vm2, %v6982_v34, %v6986_v35  ;;  %v7846_v30 = vsel %vm12263_vm5, %v7844_v25, %v7845_v28  ;;  %v7739_v34 = vld [vmem:[#allocation2 + $0x3c] sm:$0xe] }
 0x313   : > { %v9992_v49 = vcombine.low %v6977_v43, %v6987_v44  ;;  %v10012_v36 = vrot.slane %v7739_v34, 9  ;;  %v11372_v43 = vld [vmem:[#allocation2 + $0x48] sm:$0xf]  ;;  %v11382_v34 = vld [vmem:[#allocation2 + $0x7c] sm:$0xf] }
 0x314   : > { %v7855_v44 = vrot.slane %v11372_v43, 5 }
 0x316   : > { %v7857_v45 = vrot.slane %v7855_v44, 4 }
 0x318   : > { %3397 = vmatmul.mubr.bf16.gmra.mrb[40].mxu1 %v11231_v46  ;;  %7550 = vmatmul.mubr.bf16.gmra.mrb[104].mxu0 %v9989_v56  ;;  %v7012_v46 = vshrl.u32 %v6325_v39, 16  ;;  %v6327_v56 = vld [vmem:[#allocation2 + $0x18c] sm:$0x1]  ;;  %v11371_v39 = vld [vmem:[#allocation2 + $0x44] sm:$0xf] }
 0x319   : > { %3406 = vmatprep.mubr.bf16.mxu1 %v13700_v24  ;;  %7559 = vmatprep.mubr.bf16.mxu0 %v13700_v24  ;;  %v7028_v62 = vshll.u32 %v6327_v56, 16  ;;  %v7852_v37 = vrot.slane %v11371_v39, 5 }
 0x31a   : > { %v7014_v53 = vrot.slane %v7012_v46, 4  ;;  %v11373_v46 = vld [vmem:[#allocation2 + $0x4c] sm:$0x1] }
 0x31b   : > { %v7854_v32 = vrot.slane %v7852_v37, 4  ;;  %v7858_v47 = vrot.slane %v11373_v46, 5 }
 0x31c   : > { %v7015_v60 = vor.u32 %v7014_v53, %v7010_v51  ;;  %v11374_v51 = vld [vmem:[#allocation2 + $0x54] sm:$0xf]  ;;  %v7740_v53 = vld [vmem:[#allocation2 + $0x50] sm:$0xe] }
 0x31d   : > { %v7859_v50 = vsel %vm12263_vm5, %v7857_v45, %v7858_v47  ;;  %v7862_v52 = vrot.slane %v11374_v51, 5  ;;  %v10013_v55 = vrot.slane %v7740_v53, 9  ;;  %v11386_v53 = vld [vmem:[#allocation2 + $0x90] sm:$0xf] }
 0x31e   : > { %v7016_v0 = vrot.slane %v7015_v60, 4 }
 0x31f   : > { %v7864_v56 = vrot.slane %v7862_v52, 4  ;;  %v7863_v60 = vsel %vm12263_vm5, %v10013_v55, %v7862_v52  ;;  %v7743_v55 = vld [vmem:[#allocation2 + $0x8c] sm:$0xe] }
 0x320   : > { %3407 = vmatmul.mubr.bf16.gmra.mrb[44].mxu1 %v11232_v2  ;;  %7560 = vmatmul.mubr.bf16.gmra.mrb[108].mxu0 %v9990_v15  ;;  %v7030_v2 = vrot.slane %v7028_v62, 5  ;;  %v7021_v5 = vsel %vm11982_vm2, %v7016_v0, %v7020_v54  ;;  %v7838_v15 = vrot.slane %v7836_v10, 4  ;;  %v11376_v62 = vld [vmem:[#allocation2 + $0x5c] sm:$0xf] }
 0x321   : > { %3416 = vmatprep.mubr.bf16.mxu1 %v13700_v24  ;;  %7569 = vmatprep.mubr.bf16.mxu0 %v13700_v24 }
 0x322   : > { %v7031_v6 = vsel %vm11982_vm2, %v7026_v1, %v7030_v2  ;;  %v7840_v22 = vsel %vm12263_vm5, %v7838_v15, %v7839_v18 }
 0x323   : > { %v9994_v13 = vcombine.low %v7021_v5, %v7031_v6  ;;  %v10043_v4 = vcombine.low %v7837_v21, %v7840_v22  ;;  %v11245_v6 = vld [vmem:[#allocation2 + $0x10c] sm:$0xff]   ;;  %v11246_v22 = vld [vmem:[#allocation2 + $0x118] sm:$0xff]  }
 0x328   : > { %3417 = vmatmul.mubr.bf16.gmra.mrb[48].mxu1 %v11233_v17  ;;  %7570 = vmatmul.mubr.bf16.gmra.mrb[112].mxu0 %v9991_v31  ;;  %v7841_v17 = vrot.slane %v7839_v18, 4  ;;  %v11370_v31 = vld [vmem:[#allocation2 + $0x40] sm:$0xf] }
 0x329   : > { %3426 = vmatprep.mubr.bf16.mxu1 %v13700_v24  ;;  %7579 = vmatprep.mubr.bf16.mxu0 %v13700_v24  ;;  %v7849_v33 = vrot.slane %v11370_v31, 5 }
 0x32a   : > { %v7843_v27 = vsel %vm12263_vm5, %v7841_v17, %v7842_v19 }
 0x32b   : > { %v10044_v35 = vcombine.low %v7843_v27, %v7846_v30  ;;  %v7851_v38 = vrot.slane %v7849_v33, 4  ;;  %v7850_v41 = vsel %vm12263_vm5, %v10012_v36, %v7849_v33  ;;  %v11247_v30 = vld [vmem:[#allocation2 + $0x120] sm:$0xff]   ;;  %v7742_v36 = vld [vmem:[#allocation2 + $0x78] sm:$0xe] }
 0x32c   : > { %v10015_v39 = vrot.slane %v7742_v36, 9 }
 0x330   : > { %3427 = vmatmul.mubr.bf16.gmra.mrb[52].mxu1 %v11237_v42  ;;  %7580 = vmatmul.mubr.bf16.gmra.mrb[116].mxu0 %v9992_v49  ;;  %v7853_v42 = vsel %vm12263_vm5, %v7851_v38, %v7852_v37  ;;  %v7856_v49 = vsel %vm12263_vm5, %v7854_v32, %v7855_v44 }
 0x331   : > { %3436 = vmatprep.mubr.bf16.mxu1 %v13700_v24  ;;  %7589 = vmatprep.mubr.bf16.mxu0 %v13700_v24  ;;  %v10045_v9 = vcombine.low %v7850_v41, %v7853_v42  ;;  %v10046_v54 = vcombine.low %v7856_v49, %v7859_v50  ;;  %v11248_v42 = vld [vmem:[#allocation2 + $0x12c] sm:$0xff]   ;;  %v11249_v50 = vld [vmem:[#allocation2 + $0x134] sm:$0xff]  }
 0x338   : > { %3437 = vmatmul.mubr.bf16.gmra.mrb[56].mxu1 %v11238_v57  ;;  %7590 = vmatmul.mubr.bf16.gmra.mrb[120].mxu0 %v9993_v63  ;;  %v11375_v57 = vld [vmem:[#allocation2 + $0x58] sm:$0xf]  ;;  %v7868_v63 = vrot.slane %v11376_v62, 5 }
 0x339   : > { %3446 = vmatprep.mubr.bf16.mxu1 %v13700_v24  ;;  %7599 = vmatprep.mubr.bf16.mxu0 %v13700_v24  ;;  %v7865_v58 = vrot.slane %v11375_v57, 5  ;;  %v10016_v57 = vrot.slane %v7743_v55, 9 }
 0x33a   : > { %v7870_v2 = vrot.slane %v7868_v63, 4 }
 0x33b   : > { %v7866_v61 = vsel %vm12263_vm5, %v7864_v56, %v7865_v58  ;;  %v7867_v1 = vrot.slane %v7865_v58, 4 }
 0x33c   : > { %v10047_v0 = vcombine.low %v7863_v60, %v7866_v61  ;;  %v11250_v61 = vld [vmem:[#allocation2 + $0x140] sm:$0xff]  }
 0x33d   : > { %v7869_v8 = vsel %vm12263_vm5, %v7867_v1, %v7868_v63 }
 0x340   : > { %3447 = vmatmul.mubr.bf16.gmra.mrb[60].mxu1 %v11239_v3  ;;  %7600 = vmatmul.mubr.bf16.gmra.mrb[124].mxu0 %v9994_v13  ;;  %v11377_v3 = vld [vmem:[#allocation2 + $0x60] sm:$0x1]  ;;  %v7875_v13 = vrot.slane %v11378_v11, 5 }
 0x341   : > { %3456 = vmatprep.mubr.bf16.mxu1 %v13700_v24  ;;  %8299 = vmatprep.mubr.bf16.mxu0 %v13700_v24  ;;  %v7871_v5 = vrot.slane %v11377_v3, 5 }
 0x342   : > { %v7877_v18 = vrot.slane %v7875_v13, 4  ;;  %v7876_v23 = vsel %vm12263_vm5, %v10014_v16, %v7875_v13  ;;  %v11251_v13 = vld [vmem:[#allocation2 + $0x148] sm:$0xff]  }
 0x343   : > { %v7872_v10 = vsel %vm12263_vm5, %v7870_v2, %v7871_v5 }
 0x344   : > { %v10048_v15 = vcombine.low %v7869_v8, %v7872_v10 }
 0x348   : > { %3457 = vmatmul.mubr.bf16.gmra.mrb[64].mxu1 %v11240_v20  ;;  %8300 = vmatmul.mubr.bf16.vlgmr.msra.gmra.mrb[0].mxu0 %v10043_v4  ;;  %v11379_v20 = vld [vmem:[#allocation2 + $0x6c] sm:$0xf]  ;;  %v11380_v4 = vld [vmem:[#allocation2 + $0x70] sm:$0xf] }
 0x349   : > { %3466 = vmatprep.mubr.bf16.mxu1 %v13700_v24  ;;  %8309 = vmatprep.mubr.bf16.mxu0 %v13700_v24  ;;  %v7878_v21 = vrot.slane %v11379_v20, 5  ;;  %v7881_v17 = vrot.slane %v11380_v4, 5 }
 0x34b   : > { %v7879_v19 = vsel %vm12263_vm5, %v7877_v18, %v7878_v21  ;;  %v7880_v26 = vrot.slane %v7878_v21, 4  ;;  %v7883_v28 = vrot.slane %v7881_v17, 4  ;;  %v11390_v18 = vld [vmem:[#allocation2 + $0xa4] sm:$0xf] }
 0x34c   : > { %v10049_v25 = vcombine.low %v7876_v23, %v7879_v19  ;;  %v7914_v20 = vrot.slane %v11390_v18, 5 }
 0x34d   : > { %v7882_v31 = vsel %vm12263_vm5, %v7880_v26, %v7881_v17  ;;  %v11391_v17 = vld [vmem:[#allocation2 + $0xa8] sm:$0xf] }
 0x34e   : > { %v7916_v4 = vrot.slane %v7914_v20, 4 }
 0x350   : > { %3467 = vmatmul.mubr.bf16.gmra.mrb[68].mxu1 %v11241_v29  ;;  %8310 = vmatmul.mubr.bf16.gmra.mrb[4].mxu0 %v10044_v35  ;;  %v11381_v29 = vld [vmem:[#allocation2 + $0x74] sm:$0x1]  ;;  %v7888_v35 = vrot.slane %v11382_v34, 5 }
 0x351   : > { %3476 = vmatprep.mubr.bf16.mxu1 %v13700_v24  ;;  %8319 = vmatprep.mubr.bf16.mxu0 %v13700_v24  ;;  %v7884_v27 = vrot.slane %v11381_v29, 5  ;;  %v11252_v29 = vld [vmem:[#allocation2 + $0x154] sm:$0xff]  }
 0x352   : > { %v7890_v37 = vrot.slane %v7888_v35, 4  ;;  %v7889_v43 = vsel %vm12263_vm5, %v10015_v39, %v7888_v35 }
 0x353   : > { %v7885_v33 = vsel %vm12263_vm5, %v7883_v28, %v7884_v27 }
 0x354   : > { %v10050_v38 = vcombine.low %v7882_v31, %v7885_v33  ;;  %v11392_v33 = vld [vmem:[#allocation2 + $0xac] sm:$0xf] }
 0x355   : > { %v7920_v34 = vrot.slane %v11392_v33, 5 }
 0x357   : > { %v7922_v39 = vrot.slane %v7920_v34, 4 }
 0x358   : > { %3477 = vmatmul.mubr.bf16.gmra.mrb[72].mxu1 %v11242_v40  ;;  %8320 = vmatmul.mubr.bf16.gmra.mrb[8].mxu0 %v10045_v9  ;;  %v11383_v40 = vld [vmem:[#allocation2 + $0x80] sm:$0xf]  ;;  %v11384_v9 = vld [vmem:[#allocation2 + $0x84] sm:$0xf] }
 0x359   : > { %3486 = vmatprep.mubr.bf16.mxu1 %v13700_v24  ;;  %8329 = vmatprep.mubr.bf16.mxu0 %v13700_v24  ;;  %v7891_v41 = vrot.slane %v11383_v40, 5  ;;  %v7894_v32 = vrot.slane %v11384_v9, 5 }
 0x35b   : > { %v7892_v44 = vsel %vm12263_vm5, %v7890_v37, %v7891_v41  ;;  %v7893_v46 = vrot.slane %v7891_v41, 4  ;;  %v7896_v47 = vrot.slane %v7894_v32, 4  ;;  %v11393_v37 = vld [vmem:[#allocation2 + $0xb0] sm:$0x1] }
 0x35c   : > { %v10051_v45 = vcombine.low %v7889_v43, %v7892_v44  ;;  %v7923_v40 = vrot.slane %v11393_v37, 5  ;;  %v11253_v43 = vld [vmem:[#allocation2 + $0x15c] sm:$0xff]   ;;  %v7746_v37 = vld [vmem:[#allocation2 + $0xf0] sm:$0xe] }
 0x35d   : > { %v7895_v51 = vsel %vm12263_vm5, %v7893_v46, %v7894_v32  ;;  %v11394_v46 = vld [vmem:[#allocation2 + $0xb8] sm:$0xf] }
 0x35e   : > { %v7924_v32 = vsel %vm12263_vm5, %v7922_v39, %v7923_v40 }
 0x360   : > { %3487 = vmatmul.mubr.bf16.gmra.mrb[76].mxu1 %v11243_v48  ;;  %8330 = vmatmul.mubr.bf16.gmra.mrb[12].mxu0 %v10046_v54  ;;  %v11385_v48 = vld [vmem:[#allocation2 + $0x88] sm:$0x1]  ;;  %v7901_v54 = vrot.slane %v11386_v53, 5 }
 0x361   : > { %3496 = vmatprep.mubr.bf16.mxu1 %v13700_v24  ;;  %8339 = vmatprep.mubr.bf16.mxu0 %v13700_v24  ;;  %v7897_v49 = vrot.slane %v11385_v48, 5 }
 0x362   : > { %v7903_v58 = vrot.slane %v7901_v54, 4  ;;  %v7902_v62 = vsel %vm12263_vm5, %v10016_v57, %v7901_v54 }
 0x363   : > { %v7898_v52 = vsel %vm12263_vm5, %v7896_v47, %v7897_v49  ;;  %v7927_v47 = vrot.slane %v11394_v46, 5  ;;  %v3785_v49 = vld [vmem:[#allocation2 + $0xdc] sm:$0xf]  ;;  %v3790_v46 = vld [vmem:[#allocation2 + $0xf0] sm:$0xf] }
 0x364   : > { %v10052_v56 = vcombine.low %v7895_v51, %v7898_v52 }
 0x365   : > { %v7929_v55 = vrot.slane %v7927_v47, 4 }
 0x368   : > { %3497 = vmatmul.mubr.bf16.gmra.mrb[80].mxu1 %v11244_v59  ;;  %8340 = vmatmul.mubr.bf16.gmra.mrb[16].mxu0 %v10047_v0  ;;  %v11387_v59 = vld [vmem:[#allocation2 + $0x94] sm:$0xf]  ;;  %v11388_v0 = vld [vmem:[#allocation2 + $0x98] sm:$0xf] }
 0x369   : > { %3506 = vmatprep.mubr.bf16.mxu1 %v13700_v24  ;;  %8349 = vmatprep.mubr.bf16.mxu0 %v13700_v24  ;;  %v7904_v60 = vrot.slane %v11387_v59, 5  ;;  %v7907_v1 = vrot.slane %v11388_v0, 5  ;;  %v4181_v59 = vshll.u32 %v3785_v49, 16  ;;  %v11254_v0 = vld [vmem:[#allocation2 + $0x168] sm:$0xff]  }
 0x36b   : > { %v7905_v63 = vsel %vm12263_vm5, %v7903_v58, %v7904_v60  ;;  %v7906_v3 = vrot.slane %v7904_v60, 4  ;;  %v7909_v5 = vrot.slane %v7907_v1, 4  ;;  %v4178_v58 = vshrl.u32 %v3785_v49, 16 }
 0x36c   : > { %v10053_v2 = vcombine.low %v7902_v62, %v7905_v63 }
 0x370   : > { %3507 = vmatmul.mubr.bf16.gmra.mrb[84].mxu1 %v11245_v6  ;;  %8350 = vmatmul.mubr.bf16.gmra.mrb[20].mxu0 %v10048_v15  ;;  %v11389_v6 = vld [vmem:[#allocation2 + $0x9c] sm:$0x1]  ;;  %v7908_v15 = vsel %vm12263_vm5, %v7906_v3, %v7907_v1 }
 0x371   : > { %3516 = vmatprep.mubr.bf16.mxu1 %v13700_v24  ;;  %8359 = vmatprep.mubr.bf16.mxu0 %v13700_v24  ;;  %v7910_v8 = vrot.slane %v11389_v6, 5 }
 0x373   : > { %v7911_v16 = vsel %vm12263_vm5, %v7909_v5, %v7910_v8  ;;  %v11397_v5 = vld [vmem:[#allocation2 + $0xc0] sm:$0xf]  ;;  %v4180_v8 = vrot.slane %v4178_v58, 4 }
 0x374   : > { %v10054_v23 = vcombine.low %v7908_v15, %v7911_v16  ;;  %v7933_v6 = vrot.slane %v11397_v5, 5  ;;  %v11398_v16 = vld [vmem:[#allocation2 + $0xe4] sm:$0xf] }
 0x375   : > { %v4201_v18 = vshrl.u32 %v11398_v16, 16 }
 0x378   : > { %3517 = vmatmul.mubr.bf16.gmra.mrb[88].mxu1 %v11246_v22  ;;  %8360 = vmatmul.mubr.bf16.gmra.mrb[24].mxu0 %v10049_v25  ;;  %v7744_v22 = vld [vmem:[#allocation2 + $0xa0] sm:$0xe]  ;;  %v7917_v25 = vrot.slane %v11391_v17, 5 }
 0x379   : > { %3526 = vmatprep.mubr.bf16.mxu1 %v13700_v24  ;;  %8369 = vmatprep.mubr.bf16.mxu0 %v13700_v24  ;;  %v10017_v19 = vrot.slane %v7744_v22, 9 }
 0x37a   : > { %v7918_v31 = vsel %vm12263_vm5, %v7916_v4, %v7917_v25  ;;  %v4197_v4 = vshll.u32 %v11398_v16, 16 }
 0x380   : > { %3527 = vmatmul.mubr.bf16.gmra.mrb[92].mxu1 %v11247_v30  ;;  %8370 = vmatmul.mubr.bf16.gmra.mrb[28].mxu0 %v10050_v38  ;;  %v7915_v30 = vsel %vm12263_vm5, %v10017_v19, %v7914_v20  ;;  %v7919_v38 = vrot.slane %v7917_v25, 4  ;;  %v11399_v20 = vld [vmem:[#allocation2 + $0xe8] sm:$0xf] }
 0x381   : > { %3536 = vmatprep.mubr.bf16.mxu1 %v13700_v24  ;;  %8379 = vmatprep.mubr.bf16.mxu0 %v13700_v24  ;;  %v10055_v36 = vcombine.low %v7915_v30, %v7918_v31  ;;  %v4207_v22 = vshll.u32 %v11399_v20, 16  ;;  %v11400_v30 = vld [vmem:[#allocation2 + $0xc4] sm:$0x1] }
 0x382   : > { %v7921_v9 = vsel %vm12263_vm5, %v7919_v38, %v7920_v34  ;;  %v7936_v31 = vrot.slane %v11400_v30, 5  ;;  %v11401_v34 = vld [vmem:[#allocation2 + $0xf4] sm:$0xf]  ;;  %v4203_v38 = vrot.slane %v4201_v18, 4 }
 0x383   : > { %v10056_v53 = vcombine.low %v7921_v9, %v7924_v32  ;;  %v13058_v40 = vrot.slane %v4207_v22, 5  ;;  %v4199_v9 = vrot.slane %v4197_v4, 5 }
 0x385   : > { %v4204_v58 = vor.u32 %v4203_v38, %v4199_v9 }
 0x388   : > { %3537 = vmatmul.mubr.bf16.gmra.mrb[96].mxu1 %v11248_v42  ;;  %8380 = vmatmul.mubr.bf16.gmra.mrb[32].mxu0 %v10051_v45  ;;  %v7745_v45 = vld [vmem:[#allocation2 + $0xb4] sm:$0xe] }
 0x389   : > { %3546 = vmatprep.mubr.bf16.mxu1 %v13700_v24  ;;  %8389 = vmatprep.mubr.bf16.mxu0 %v13700_v24  ;;  %v10018_v54 = vrot.slane %v7745_v45, 9  ;;  %v11255_v45 = vld [vmem:[#allocation2 + $0x170] sm:$0xff]  }
 0x38b   : > { %v7928_v1 = vsel %vm12263_vm5, %v10018_v54, %v7927_v47  ;;  %v10019_v54 = vrot.slane %v7746_v37, 9 }
 0x390   : > { %3547 = vmatmul.mubr.bf16.gmra.mrb[100].mxu1 %v11249_v50  ;;  %8390 = vmatmul.mubr.bf16.gmra.mrb[36].mxu0 %v10052_v56  ;;  %v11395_v50 = vld [vmem:[#allocation2 + $0xe0] sm:$0xf]  ;;  %v11396_v56 = vld [vmem:[#allocation2 + $0xbc] sm:$0xf] }
 0x391   : > { %3556 = vmatprep.mubr.bf16.mxu1 %v13700_v24  ;;  %8399 = vmatprep.mubr.bf16.mxu0 %v13700_v24  ;;  %v4187_v51 = vshll.u32 %v11395_v50, 16  ;;  %v4191_v52 = vshrl.u32 %v11395_v50, 16  ;;  %v7930_v57 = vrot.slane %v11396_v56, 5  ;;  %v11402_v56 = vld [vmem:[#allocation2 + $0xf8] sm:$0xf] }
 0x393   : > { %v4193_v62 = vrot.slane %v4191_v52, 4  ;;  %v7931_v3 = vsel %vm12263_vm5, %v7929_v55, %v7930_v57  ;;  %v7932_v25 = vrot.slane %v7930_v57, 4  ;;  %v7943_v57 = vrot.slane %v11402_v56, 5 }
 0x394   : > { %v10057_v17 = vcombine.low %v7928_v1, %v7931_v3  ;;  %v4222_v1 = vshrl.u32 %v3790_v46, 16  ;;  %v4225_v3 = vshll.u32 %v3790_v46, 16  ;;  %v11406_v46 = vld [vmem:[#allocation2 + $0x100] sm:$0x1] }
 0x395   : > { %v7934_v50 = vsel %vm12263_vm5, %v7932_v25, %v7933_v6 }
 0x396   : > { %v4224_v30 = vrot.slane %v4222_v1, 4 }
 0x398   : > { %3557 = vmatmul.mubr.bf16.gmra.mrb[104].mxu1 %v11250_v61  ;;  %8400 = vmatmul.mubr.bf16.gmra.mrb[40].mxu0 %v10053_v2  ;;  %v13041_v61 = vrot.slane %v4187_v51, 5 }
 0x399   : > { %3566 = vmatprep.mubr.bf16.mxu1 %v13700_v24  ;;  %8409 = vmatprep.mubr.bf16.mxu0 %v13700_v24 }
 0x39a   : > { %v4194_v19 = vor.u32 %v4193_v62, %v13041_v61  ;;  %v11403_v62 = vld [vmem:[#allocation2 + $0xec] sm:$0x1] }
 0x39b   : > { %v12997_v10 = vpop.f32.mrb[0].mxu1 }
 0x39c   : > { %v12999_v11 = vpop.f32.mrb[1].mxu1  ;;  %v4195_v47 = vrot.slane %v4194_v19, 4  ;;  %v11405_v19 = vld [vmem:[#allocation2 + $0xfc] sm:$0xf] }
 0x39d   : > { %v13001_v14 = vpop.f32.mrb[2].mxu1  ;;  %v7946_v4 = vrot.slane %v11405_v19, 5 }
 0x39e   : > { %v13008_v21 = vpop.f32.mrb[3].mxu1  ;;  %v4200_v18 = vsel %vm11982_vm2, %v4195_v47, %v4199_v9  ;;  %v7945_v9 = vrot.slane %v7943_v57, 4  ;;  %v7949_v47 = vrot.slane %v11406_v46, 5 }
 0x3a0   : > { %3567 = vmatmul.mubr.bf16.gmra.mrb[108].mxu1 %v11251_v13  ;;  %8410 = vmatmul.mubr.bf16.gmra.mrb[44].mxu0 %v10054_v23  ;;  %v4183_v13 = vrot.slane %v4181_v59, 5  ;;  %v4211_v23 = vshrl.u32 %v11399_v20, 16 }
 0x3a1   : > { %3576 = vmatprep.mubr.bf16.mxu1 %v13700_v24  ;;  %8419 = vmatprep.mubr.bf16.mxu0 %v13700_v24 }
 0x3a2   : > { %v4184_v33 = vor.u32 %v4183_v13, %v4180_v8 }
 0x3a3   : > { %v13011_v26 = vpop.f32.mrb[4].mxu1 }
 0x3a4   : > { %v13013_v28 = vpop.f32.mrb[5].mxu1  ;;  %v4185_v52 = vrot.slane %v4184_v33, 4 }
 0x3a5   : > { %v13015_v27 = vpop.f32.mrb[6].mxu1 }
 0x3a6   : > { %v13022_v35 = vpop.f32.mrb[7].mxu1  ;;  %v4190_v16 = vsel %vm11982_vm2, %v4185_v52, %v13041_v61 }
 0x3a7   : > { %v9835_v33 = vcombine.low %v4190_v16, %v4200_v18 }
 0x3a8   : > { %3577 = vmatmul.mubr.bf16.gmra.mrb[112].mxu1 %v11252_v29  ;;  %8420 = vmatmul.mubr.bf16.gmra.mrb[48].mxu0 %v10055_v36  ;;  %v7935_v29 = vrot.slane %v7933_v6, 4  ;;  %v7940_v36 = vrot.slane %v11401_v34, 5  ;;  %v11404_v6 = vld [vmem:[#allocation2 + $0xf4] sm:$0xf] }
 0x3a9   : > { %3586 = vmatprep.mubr.bf16.mxu1 %v13700_v24  ;;  %8429 = vmatprep.mubr.bf16.mxu0 %v13700_v24  ;;  %v4231_v8 = vshll.u32 %v11404_v6, 16  ;;  %v4235_v13 = vshrl.u32 %v11404_v6, 16 }
 0x3aa   : > { %v7937_v51 = vsel %vm12263_vm5, %v7935_v29, %v7936_v31  ;;  %v7942_v55 = vrot.slane %v7940_v36, 4  ;;  %v7941_v20 = vsel %vm12263_vm5, %v10019_v54, %v7940_v36  ;;  %v4227_v31 = vrot.slane %v4225_v3, 5  ;;  %v11407_v54 = vld [vmem:[#allocation2 + $0xf8] sm:$0xf] }
 0x3ab   : > { %v13025_v41 = vpop.f32.mrb[8].mxu1  ;;  %v10058_v5 = vcombine.low %v7934_v50, %v7937_v51  ;;  %v4233_v34 = vrot.slane %v4231_v8, 5  ;;  %v4237_v38 = vrot.slane %v4235_v13, 4  ;;  %v7747_v8 = vld [vmem:[#allocation2 + $0x104] sm:$0xe] }
 0x3ac   : > { %v13027_v42 = vpop.f32.mrb[9].mxu1  ;;  %v7944_v22 = vsel %vm12263_vm5, %v7942_v55, %v7943_v57  ;;  %v4228_v52 = vor.u32 %v4227_v31, %v4224_v30  ;;  %v4241_v55 = vshll.u32 %v11407_v54, 16  ;;  %v7947_v57 = vsel %vm12263_vm5, %v7945_v9, %v7946_v4  ;;  %v11409_v13 = vld [vmem:[#allocation2 + $0x108] sm:$0xf]  ;;  %v3795_v30 = vld [vmem:[#allocation2 + $0x104] sm:$0xf] }
 0x3ad   : > { %v13029_v44 = vpop.f32.mrb[10].mxu1  ;;  %v4238_v56 = vor.u32 %v4237_v38, %v4233_v34  ;;  %v7953_v16 = vrot.slane %v11409_v13, 5 }
 0x3ae   : > { %v13036_v48 = vpop.f32.mrb[11].mxu1  ;;  %v4243_v6 = vrot.slane %v4241_v55, 5  ;;  %v11412_v55 = vld [vmem:[#allocation2 + $0x108] sm:$0xf] }
 0x3af   : > { %v7955_v38 = vrot.slane %v7953_v16, 4 }
 0x3b0   : > { %3587 = vmatmul.mubr.bf16.gmra.mrb[116].mxu1 %v11253_v43  ;;  %8430 = vmatmul.mubr.bf16.gmra.mrb[52].mxu0 %v10056_v53  ;;  %v4213_v43 = vrot.slane %v4211_v23, 4  ;;  %v4205_v23 = vrot.slane %v4204_v58, 4  ;;  %v4245_v58 = vshrl.u32 %v11407_v54, 16  ;;  %v4269_v54 = vshll.u32 %v3795_v30, 16 }
 0x3b1   : > { %3596 = vmatprep.mubr.bf16.mxu1 %v13700_v24  ;;  %8439 = vmatprep.mubr.bf16.mxu0 %v13700_v24 }
 0x3b2   : > { %v4214_v59 = vor.u32 %v4213_v43, %v13058_v40  ;;  %v10059_v43 = vcombine.low %v7941_v20, %v7944_v22  ;;  %v4210_v50 = vsel %vm11982_vm2, %v4205_v23, %v13058_v40  ;;  %v4239_v20 = vrot.slane %v4238_v56, 4 }
 0x3b3   : > { %v13039_v60 = vpop.f32.mrb[12].mxu1  ;;  %v4247_v22 = vrot.slane %v4245_v58, 4  ;;  %v4275_v56 = vshll.u32 %v11412_v55, 16 }
 0x3b4   : > { %v13043_v63 = vpop.f32.mrb[13].mxu1  ;;  %v4215_v25 = vrot.slane %v4214_v59, 4  ;;  %v11408_v59 = vld [vmem:[#allocation2 + $0xfc] sm:$0xf] }
 0x3b5   : > { %v13047_v2 = vpop.f32.mrb[14].mxu1  ;;  %v4248_v46 = vor.u32 %v4247_v22, %v4243_v6  ;;  %v4271_v22 = vrot.slane %v4269_v54, 5 }
 0x3b6   : > { %v13052_v15 = vpop.f32.mrb[15].mxu1 }
 0x3b8   : > { %3597 = vmatmul.mubr.bf16.gmra.mrb[120].mxu1 %v11254_v0  ;;  %8440 = vmatmul.mubr.bf16.gmra.mrb[56].mxu0 %v10057_v17  ;;  %v4217_v0 = vshll.u32 %v11403_v62, 16  ;;  %v4251_v62 = vshll.u32 %v11408_v59, 16 }
 0x3b9   : > { %3606 = vmatprep.mubr.bf16.mxu1 %v13700_v24  ;;  %8449 = vmatprep.mubr.bf16.mxu0 %v13700_v24 }
 0x3ba   : > { %v4219_v29 = vrot.slane %v4217_v0, 5  ;;  %v4255_v0 = vshrl.u32 %v11408_v59, 16  ;;  %v13105_v23 = vrot.slane %v4251_v62, 5 }
 0x3bb   : > { %v13056_v39 = vpop.f32.mrb[16].mxu1 }
 0x3bc   : > { %v13060_v32 = vpop.f32.mrb[17].mxu1  ;;  %v4220_v51 = vsel %vm11982_vm2, %v4215_v25, %v4219_v29  ;;  %v4257_v19 = vrot.slane %v4255_v0, 4 }
 0x3bd   : > { %v13062_v49 = vpop.f32.mrb[18].mxu1  ;;  %v9836_v3 = vcombine.low %v4210_v50, %v4220_v51  ;;  %v11411_v50 = vld [vmem:[#allocation2 + $0x100] sm:$0x1] }
 0x3be   : > { %v13069_v53 = vpop.f32.mrb[19].mxu1  ;;  %v4261_v51 = vshll.u32 %v11411_v50, 16  ;;  %v11416_v50 = vld [vmem:[#allocation2 + $0x114] sm:$0x1] }
 0x3c0   : > { %3607 = vmatmul.mubr.bf16.gmra.mrb[124].mxu1 %v11255_v45  ;;  %8450 = vmatmul.mubr.bf16.gmra.mrb[60].mxu0 %v10058_v5  ;;  %v7948_v45 = vrot.slane %v7946_v4, 4  ;;  %v4229_v5 = vrot.slane %v4228_v52, 4  ;;  %v4266_v52 = vshrl.u32 %v3795_v30, 16 }
 0x3c1   : > { %4946 = vmatprep.mubr.bf16.mxu1 %v13700_v24  ;;  %8459 = vmatprep.mubr.bf16.mxu0 %v13700_v24 }
 0x3c2   : > { %v7950_v40 = vsel %vm12263_vm5, %v7948_v45, %v7949_v47  ;;  %v4234_v31 = vsel %vm11982_vm2, %v4229_v5, %v4233_v34  ;;  %v4244_v45 = vsel %vm11982_vm2, %v4239_v20, %v4243_v6  ;;  %v4258_v47 = vor.u32 %v4257_v19, %v13105_v23  ;;  %v11413_v6 = vld [vmem:[#allocation2 + $0x110] sm:$0xf] }
 0x3c3   : > { %v13082_v17 = vpop.f32.mrb[20].mxu1  ;;  %v10060_v29 = vcombine.low %v7947_v57, %v7950_v40  ;;  %v4279_v34 = vshrl.u32 %v11412_v55, 16  ;;  %v9837_v59 = vcombine.low %v4234_v31, %v4244_v45  ;;  %v4249_v40 = vrot.slane %v4248_v46, 4  ;;  %v11414_v31 = vld [vmem:[#allocation2 + $0x10c] sm:$0xf] }
 0x3c4   : > { %v13084_v61 = vpop.f32.mrb[21].mxu1  ;;  %v4263_v5 = vrot.slane %v4261_v51, 5  ;;  %v4268_v20 = vrot.slane %v4266_v52, 4  ;;  %v13129_v19 = vrot.slane %v4275_v56, 5  ;;  %v7962_v51 = vrot.slane %v11416_v50, 5 }
 0x3c5   : > { %v13086_v37 = vpop.f32.mrb[22].mxu1  ;;  %v4285_v55 = vshll.u32 %v11414_v31, 16  ;;  %v4254_v52 = vsel %vm11982_vm2, %v4249_v40, %v13105_v23  ;;  %v3800_v40 = vld [vmem:[#allocation2 + $0x118] sm:$0xf] }
 0x3c6   : > { %v13089_v36 = vpop.f32.mrb[23].mxu1  ;;  %v4272_v56 = vor.u32 %v4271_v22, %v4268_v20 }
 0x3c7   : > { %v4287_v23 = vrot.slane %v4285_v55, 5 }
 0x3c8   : > { %4947 = vmatmul.mubr.bf16.vlgmr.msra.gmra.mrb[64].mxu1 %v9835_v33  ;;  %8460 = vmatmul.mubr.bf16.gmra.mrb[64].mxu0 %v10059_v43  ;;  %v10020_v33 = vrot.slane %v7747_v8, 9  ;;  %v11410_v43 = vld [vmem:[#allocation2 + $0x10c] sm:$0xf]  ;;  %v7959_v8 = vrot.slane %v11413_v6, 5  ;;  %v7748_v6 = vld [vmem:[#allocation2 + $0x118] sm:$0xe] }
 0x3c9   : > { %4956 = vmatprep.mubr.bf16.mxu1 %v13700_v24  ;;  %8469 = vmatprep.mubr.bf16.mxu0 %v13700_v24  ;;  %v7956_v9 = vrot.slane %v11410_v43, 5  ;;  %v4273_v22 = vrot.slane %v4272_v56, 4 }
 0x3ca   : > { %v7954_v62 = vsel %vm12263_vm5, %v10020_v33, %v7953_v16  ;;  %v4281_v16 = vrot.slane %v4279_v34, 4 }
 0x3cb   : > { %v13101_v1 = vpop.f32.mrb[24].mxu1  ;;  %v7957_v0 = vsel %vm12263_vm5, %v7955_v38, %v7956_v9  ;;  %v11415_v38 = vld [vmem:[#allocation2 + $0x110] sm:$0xf]  ;;  %v7958_v46 = vrot.slane %v7956_v9, 4 }
 0x3cc   : > { %v13103_v18 = vpop.f32.mrb[25].mxu1  ;;  %v10061_v33 = vcombine.low %v7954_v62, %v7957_v0  ;;  %v4295_v43 = vshll.u32 %v11415_v38, 16  ;;  %v4299_v45 = vshrl.u32 %v11415_v38, 16  ;;  %v4282_v34 = vor.u32 %v4281_v16, %v13129_v19  ;;  %v11417_v62 = vld [vmem:[#allocation2 + $0x11c] sm:$0xf] }
 0x3cd   : > { %v13107_v4 = vpop.f32.mrb[26].mxu1  ;;  %v7966_v0 = vrot.slane %v11417_v62, 5  ;;  %v11419_v62 = vld [vmem:[#allocation2 + $0x114] sm:$0x1] }
 0x3ce   : > { %v13110_v25 = vpop.f32.mrb[27].mxu1  ;;  %v13142_v38 = vrot.slane %v4295_v43, 5  ;;  %v4283_v16 = vrot.slane %v4282_v34, 4 }
 0x3cf   : > { %v7968_v43 = vrot.slane %v7966_v0, 4 }
 0x3d0   : > { %4957 = vmatmul.mubr.bf16.gmra.mrb[68].mxu1 %v9836_v3  ;;  %8470 = vmatmul.mubr.bf16.gmra.mrb[68].mxu0 %v10060_v29  ;;  %v4259_v3 = vrot.slane %v4258_v47, 4  ;;  %v4289_v29 = vshrl.u32 %v11414_v31, 16  ;;  %v7961_v47 = vrot.slane %v7959_v8, 4  ;;  %v4301_v31 = vrot.slane %v4299_v45, 4  ;;  %v11418_v45 = vld [vmem:[#allocation2 + $0x120] sm:$0xf] }
 0x3d1   : > { %4966 = vmatprep.mubr.bf16.mxu1 %v13700_v24  ;;  %8479 = vmatprep.mubr.bf16.mxu0 %v13700_v24  ;;  %v4288_v56 = vsel %vm11982_vm2, %v4283_v16, %v4287_v23 }
 0x3d2   : > { %v4264_v54 = vsel %vm11982_vm2, %v4259_v3, %v4263_v5  ;;  %v13723_v3 = vmov 0   ;;  %v7960_v5 = vsel %vm12263_vm5, %v7958_v46, %v7959_v8  ;;  %v7963_v20 = vsel %vm12263_vm5, %v7961_v47, %v7962_v51  ;;  %v11420_v46 = vld [vmem:[#allocation2 + $0x11c] sm:$0xf] }
 0x3d3   : > { %v13118_v58 = vpop.f32.mrb[28].mxu1  ;;  %v10062_v8 = vcombine.low %v7960_v5, %v7963_v20  ;;  %v4323_v47 = vshrl.u32 %v11420_v46, 16  ;;  %v4278_v51 = vsel %vm11982_vm2, %v4273_v22, %v13129_v19 }
 0x3d4   : > { %13716 = vst [vmem:[#allocation20_spill] sm:$0xff] %v13118_v58  ;;  %v13124_v57 = vpop.f32.mrb[29].mxu1  ;;  %v9839_v22 = vcombine.low %v4278_v51, %v4288_v56  ;;  %v11424_v56 = vld [vmem:[#allocation2 + $0x124] sm:$0xf] }
 0x3d5   : > { %13717 = vst [vmem:[#allocation21_spill] sm:$0xff] %v13124_v57  ;;  %v13126_v13 = vpop.f32.mrb[30].mxu1  ;;  %v4325_v16 = vrot.slane %v4323_v47, 4 }
 0x3d6   : > { %13718 = vst [vmem:[#allocation22_spill] sm:$0xff] %v13126_v13  ;;  %v13131_v30 = vpop.f32.mrb[31].mxu1  ;;  %v4319_v13 = vshll.u32 %v11420_v46, 16 }
 0x3d7   : > { %13719 = vst [vmem:[#allocation23_spill] sm:$0xff] %v13131_v30 }
 0x3d8   : > { %4967 = vmatmul.mubr.bf16.gmra.mrb[72].mxu1 %v9837_v59  ;;  %v4291_v59 = vrot.slane %v4289_v29, 4  ;;  %8480 = vmatmul.mubr.bf16.gmra.mrb[72].mxu0 %v10061_v33  ;;  %v10021_v33 = vrot.slane %v7748_v6, 9  ;;  %v11421_v6 = vld [vmem:[#allocation2 + $0x124] sm:$0xf] }
 0x3d9   : > { %4976 = vmatprep.mubr.bf16.mxu1 %v13700_v24  ;;  %v9838_v24 = vcombine.low %v4254_v52, %v4264_v54  ;;  %8489 = vmatprep.mubr.bf16.mxu0 %v13723_v3  ;;  %v7969_v52 = vrot.slane %v11418_v45, 5  ;;  %v4302_v54 = vor.u32 %v4301_v31, %v13142_v38  ;;  %v7972_v31 = vrot.slane %v11421_v6, 5  ;;  %v11422_v6 = vld [vmem:[#allocation2 + $0x128] sm:$0x1] }
 0x3da   : > { %v4292_v55 = vor.u32 %v4291_v59, %v4287_v23  ;;  %v7967_v34 = vsel %vm12263_vm5, %v10021_v33, %v7966_v0  ;;  %v4321_v23 = vrot.slane %v4319_v13, 5 }
 0x3db   : > { %v13140_v9 = vpop.f32.mrb[32].mxu1  ;;  %v7970_v59 = vsel %vm12263_vm5, %v7968_v43, %v7969_v52  ;;  %v4303_v5 = vrot.slane %v4302_v54, 4  ;;  %v7971_v43 = vrot.slane %v7969_v52, 4  ;;  %v7975_v54 = vrot.slane %v11422_v6, 5 }
 0x3dc   : > { %13720 = vst [vmem:[#allocation24_spill] sm:$0xff] %v13140_v9  ;;  %v13144_v50 = vpop.f32.mrb[33].mxu1  ;;  %v4313_v9 = vshll.u32 %v3800_v40, 16  ;;  %v10063_v33 = vcombine.low %v7967_v34, %v7970_v59  ;;  %v4326_v47 = vor.u32 %v4325_v16, %v4321_v23  ;;  %v4343_v34 = vshrl.u32 %v11424_v56, 16 }
 0x3dd   : > { %13721 = vst [vmem:[#allocation25_spill] sm:$0xff] %v13144_v50  ;;  %v13146_v30 = vpop.f32.mrb[34].mxu1  ;;  %v4310_v50 = vshrl.u32 %v3800_v40, 16  ;;  %v7973_v52 = vsel %vm12263_vm5, %v7971_v43, %v7972_v31 }
 0x3de   : > { %13722 = vst [vmem:[#allocation26_spill] sm:$0xff] %v13146_v30  ;;  %v13153_v29 = vpop.f32.mrb[35].mxu1  ;;  %v4305_v30 = vshll.u32 %v11419_v62, 16  ;;  %v4315_v62 = vrot.slane %v4313_v9, 5  ;;  %v4327_v6 = vrot.slane %v4326_v47, 4 }
 0x3df   : > { %13724 = vst [vmem:[#allocation27_spill] sm:$0xff] %v13153_v29  ;;  %v4312_v45 = vrot.slane %v4310_v50, 4  ;;  %v11423_v50 = vld [vmem:[#allocation2 + $0x120] sm:$0xf] }
 0x3e0   : > { %4977 = vmatmul.mubr.bf16.gmra.mrb[76].mxu1 %v9838_v24  ;;  %v4293_v24 = vrot.slane %v4292_v55, 4  ;;  %v4307_v20 = vrot.slane %v4305_v30, 5  ;;  %8490 = vmatmul.mubr.bf16.gmra.mrb[76].mxu0 %v10062_v8  ;;  %v7974_v55 = vrot.slane %v7972_v31, 4  ;;  %v4329_v8 = vshll.u32 %v11423_v50, 16 }
 0x3e1   : > { %4986 = vmatprep.mubr.bf16.mxu1 %v13723_v3  ;;  %8499 = vmatprep.mubr.bf16.mxu0 %v13723_v3  ;;  %v4316_v13 = vor.u32 %v4315_v62, %v4312_v45  ;;  %v4333_v51 = vshrl.u32 %v11423_v50, 16  ;;  %v7749_v45 = vld [vmem:[#allocation2 + $0x12c] sm:$0xe]  ;;  %v11425_v62 = vld [vmem:[#allocation2 + $0x130] sm:$0xf] }
 0x3e2   : > { %v4298_v30 = vsel %vm11982_vm2, %v4293_v24, %v13142_v38  ;;  %v4308_v9 = vsel %vm11982_vm2, %v4303_v5, %v4307_v20  ;;  %v7976_v38 = vsel %vm12263_vm5, %v7974_v55, %v7975_v54  ;;  %v4331_v20 = vrot.slane %v4329_v8, 5  ;;  %v3805_v54 = vld [vmem:[#allocation2 + $0x12c] sm:$0xf] }
 0x3e3   : > { %v13166_v40 = vpop.f32.mrb[36].mxu1  ;;  %v9840_v24 = vcombine.low %v4298_v30, %v4308_v9  ;;  %v4317_v5 = vrot.slane %v4316_v13, 4  ;;  %v4335_v50 = vrot.slane %v4333_v51, 4  ;;  %v10064_v55 = vcombine.low %v7973_v52, %v7976_v38  ;;  %v11426_v13 = vld [vmem:[#allocation2 + $0x134] sm:$0xf] }
 0x3e4   : > { %13725 = vst [vmem:[#allocation28_spill] sm:$0xff] %v13166_v40  ;;  %v13168_v19 = vpop.f32.mrb[37].mxu1  ;;  %v10022_v9 = vrot.slane %v7749_v45, 9  ;;  %v7982_v8 = vrot.slane %v11426_v13, 5  ;;  %v4354_v52 = vshrl.u32 %v3805_v54, 16  ;;  %v4357_v38 = vshll.u32 %v3805_v54, 16 }
 0x3e5   : > { %13726 = vst [vmem:[#allocation29_spill] sm:$0xff] %v13168_v19  ;;  %v13170_v46 = vpop.f32.mrb[38].mxu1  ;;  %v4322_v30 = vsel %vm11982_vm2, %v4317_v5, %v4321_v23  ;;  %v4336_v47 = vor.u32 %v4335_v50, %v4331_v20 }
 0x3e6   : > { %13727 = vst [vmem:[#allocation30_spill] sm:$0xff] %v13170_v46  ;;  %v13173_v0 = vpop.f32.mrb[39].mxu1  ;;  %v4345_v46 = vrot.slane %v4343_v34, 4  ;;  %v11427_v34 = vld [vmem:[#allocation2 + $0x128] sm:$0x1] }
 0x3e7   : > { %13728 = vst [vmem:[#allocation31_spill] sm:$0xff] %v13173_v0  ;;  %v4339_v0 = vshll.u32 %v11424_v56, 16 }
 0x3e8   : > { %4987 = vmatmul.mubr.bf16.gmra.mrb[80].mxu1 %v9839_v22  ;;  %v7979_v22 = vrot.slane %v11425_v62, 5  ;;  %8500 = vmatmul.mubr.bf16.gmra.mrb[80].mxu0 %v10063_v33  ;;  %v4349_v62 = vshll.u32 %v11427_v34, 16  ;;  %v11429_v34 = vld [vmem:[#allocation2 + $0x138] sm:$0xf] }
 0x3e9   : > { %4996 = vmatprep.mubr.bf16.mxu1 %v13723_v3  ;;  %v13189_v56 = vrot.slane %v4339_v0, 5  ;;  %8509 = vmatprep.mubr.bf16.mxu0 %v13723_v3  ;;  %v4332_v0 = vsel %vm11982_vm2, %v4327_v6, %v4331_v20  ;;  %v4337_v6 = vrot.slane %v4336_v47, 4  ;;  %v7985_v54 = vrot.slane %v11429_v34, 5 }
 0x3ea   : > { %v7981_v33 = vrot.slane %v7979_v22, 4  ;;  %v9841_v45 = vcombine.low %v4322_v30, %v4332_v0  ;;  %v4351_v13 = vrot.slane %v4349_v62, 5  ;;  %v4359_v30 = vrot.slane %v4357_v38, 5 }
 0x3eb   : > { %v13185_v59 = vpop.f32.mrb[40].mxu1  ;;  %v4346_v51 = vor.u32 %v4345_v46, %v13189_v56  ;;  %v7984_v62 = vrot.slane %v7982_v8, 4  ;;  %v7987_v34 = vrot.slane %v7985_v54, 4 }
 0x3ec   : > { %13729 = vst [vmem:[#allocation32_spill] sm:$0xff] %v13185_v59  ;;  %v13187_v16 = vpop.f32.mrb[41].mxu1  ;;  %v7983_v20 = vsel %vm12263_vm5, %v7981_v33, %v7982_v8  ;;  %v11430_v33 = vld [vmem:[#allocation2 + $0x134] sm:$0xf]  ;;  %v11432_v59 = vld [vmem:[#allocation2 + $0x13c] sm:$0x1] }
 0x3ed   : > { %13730 = vst [vmem:[#allocation33_spill] sm:$0xff] %v13187_v16  ;;  %v13191_v31 = vpop.f32.mrb[42].mxu1  ;;  %v4347_v50 = vrot.slane %v4346_v51, 4  ;;  %v4373_v19 = vshll.u32 %v11430_v33, 16 }
 0x3ee   : > { %13731 = vst [vmem:[#allocation34_spill] sm:$0xff] %v13191_v31  ;;  %v13194_v43 = vpop.f32.mrb[43].mxu1 }
 0x3ef   : > { %13732 = vst [vmem:[#allocation35_spill] sm:$0xff] %v13194_v43  ;;  %v11428_v43 = vld [vmem:[#allocation2 + $0x130] sm:$0xf] }
 0x3f0   : > { %4997 = vmatmul.mubr.bf16.gmra.mrb[84].mxu1 %v9840_v24  ;;  %v4363_v31 = vshll.u32 %v11428_v43, 16  ;;  %v4367_v23 = vshrl.u32 %v11428_v43, 16  ;;  %v7980_v24 = vsel %vm12263_vm5, %v10022_v9, %v7979_v22  ;;  %8510 = vmatmul.mubr.bf16.gmra.mrb[84].mxu0 %v10064_v55  ;;  %v4356_v43 = vrot.slane %v4354_v52, 4 }
 0x3f1   : > { %5006 = vmatprep.mubr.bf16.mxu1 %v13723_v3  ;;  %8519 = vmatprep.mubr.bf16.mxu0 %v13723_v3  ;;  %v4377_v55 = vshrl.u32 %v11430_v33, 16  ;;  %v4352_v52 = vsel %vm11982_vm2, %v4347_v50, %v4351_v13  ;;  %v7986_v50 = vsel %vm12263_vm5, %v7984_v62, %v7985_v54  ;;  %v11436_v62 = vld [vmem:[#allocation2 + $0x144] sm:$0xf] }
 0x3f2   : > { %v13213_v0 = vrot.slane %v4363_v31, 5  ;;  %v4369_v22 = vrot.slane %v4367_v23, 4  ;;  %v4342_v31 = vsel %vm11982_vm2, %v4337_v6, %v13189_v56  ;;  %v4360_v38 = vor.u32 %v4359_v30, %v4356_v43  ;;  %v3810_v6 = vld [vmem:[#allocation2 + $0x140] sm:$0xf] }
 0x3f3   : > { %v13202_v5 = vpop.f32.mrb[44].mxu1  ;;  %v9842_v40 = vcombine.low %v4342_v31, %v4352_v52  ;;  %v4375_v56 = vrot.slane %v4373_v19, 5  ;;  %v11435_v52 = vld [vmem:[#allocation2 + $0x13c] sm:$0x1] }
 0x3f4   : > { %13733 = vst [vmem:[#allocation36_spill] sm:$0xff] %v13202_v5  ;;  %v13208_v46 = vpop.f32.mrb[45].mxu1  ;;  %v10065_v5 = vcombine.low %v7980_v24, %v7983_v20  ;;  %v4370_v23 = vor.u32 %v4369_v22, %v13213_v0  ;;  %v11433_v24 = vld [vmem:[#allocation2 + $0x144] sm:$0xf]  ;;  %v4361_v43 = vrot.slane %v4360_v38, 4 }
 0x3f5   : > { %13734 = vst [vmem:[#allocation37_spill] sm:$0xff] %v13208_v46  ;;  %v13210_v16 = vpop.f32.mrb[46].mxu1  ;;  %v11431_v46 = vld [vmem:[#allocation2 + $0x138] sm:$0xf]  ;;  %v7992_v20 = vrot.slane %v11433_v24, 5  ;;  %v4393_v24 = vshll.u32 %v11435_v52, 16 }
 0x3f6   : > { %13735 = vst [vmem:[#allocation38_spill] sm:$0xff] %v13210_v16  ;;  %v13215_v9 = vpop.f32.mrb[47].mxu1  ;;  %v4383_v47 = vshll.u32 %v11431_v46, 16  ;;  %v4387_v51 = vshrl.u32 %v11431_v46, 16  ;;  %v7988_v16 = vrot.slane %v11432_v59, 5  ;;  %v4371_v30 = vrot.slane %v4370_v23, 4 }
 0x3f7   : > { %13736 = vst [vmem:[#allocation39_spill] sm:$0xff] %v13215_v9  ;;  %v7750_v46 = vld [vmem:[#allocation2 + $0x140] sm:$0xe] }
 0x3f8   : > { %5007 = vmatmul.mubr.bf16.gmra.mrb[88].mxu1 %v9841_v45  ;;  %v4379_v45 = vrot.slane %v4377_v55, 4  ;;  %v13226_v59 = vrot.slane %v4383_v47, 5  ;;  %v4389_v33 = vrot.slane %v4387_v51, 4  ;;  %8520 = vmatmul.mubr.bf16.gmra.mrb[88].mxu0 %v10065_v5  ;;  %v7989_v13 = vsel %vm12263_vm5, %v7987_v34, %v7988_v16  ;;  %v11434_v47 = vld [vmem:[#allocation2 + $0x148] sm:$0xf] }
 0x3f9   : > { %5016 = vmatprep.mubr.bf16.mxu1 %v13723_v3  ;;  %8529 = vmatprep.mubr.bf16.mxu0 %v13723_v3  ;;  %v10023_v5 = vrot.slane %v7750_v46, 9  ;;  %v7994_v55 = vrot.slane %v7992_v20, 4  ;;  %v7995_v51 = vrot.slane %v11434_v47, 5  ;;  %v10066_v54 = vcombine.low %v7986_v50, %v7989_v13  ;;  %v11437_v46 = vld [vmem:[#allocation2 + $0x14c] sm:$0xf] }
 0x3fa   : > { %v4380_v19 = vor.u32 %v4379_v45, %v4375_v56  ;;  %v4390_v31 = vor.u32 %v4389_v33, %v13226_v59  ;;  %v4411_v16 = vshrl.u32 %v11436_v62, 16  ;;  %v4366_v34 = vsel %vm11982_vm2, %v4361_v43, %v13213_v0 }
 0x3fb   : > { %v13224_v8 = vpop.f32.mrb[48].mxu1  ;;  %v4376_v38 = vsel %vm11982_vm2, %v4371_v30, %v4375_v56  ;;  %v7993_v23 = vsel %vm12263_vm5, %v10023_v5, %v7992_v20  ;;  %v7996_v45 = vsel %vm12263_vm5, %v7994_v55, %v7995_v51  ;;  %v7998_v33 = vrot.slane %v11437_v46, 5  ;;  %v11440_v46 = vld [vmem:[#allocation2 + $0x14c] sm:$0xf] }
 0x3fc   : > { %13737 = vst [vmem:[#allocation40_spill] sm:$0xff] %v13224_v8  ;;  %v13228_v9 = vpop.f32.mrb[49].mxu1  ;;  %v4407_v8 = vshll.u32 %v11436_v62, 16  ;;  %v4391_v50 = vrot.slane %v4390_v31, 4  ;;  %v4395_v13 = vrot.slane %v4393_v24, 5  ;;  %v9843_v43 = vcombine.low %v4366_v34, %v4376_v38 }
 0x3fd   : > { %13738 = vst [vmem:[#allocation41_spill] sm:$0xff] %v13228_v9  ;;  %v13230_v29 = vpop.f32.mrb[50].mxu1  ;;  %v4401_v9 = vshll.u32 %v3810_v6, 16  ;;  %v4413_v30 = vrot.slane %v4411_v16, 4  ;;  %v10067_v55 = vcombine.low %v7993_v23, %v7996_v45  ;;  %v8000_v62 = vrot.slane %v7998_v33, 4 }
 0x3fe   : > { %13739 = vst [vmem:[#allocation42_spill] sm:$0xff] %v13230_v29  ;;  %v13237_v22 = vpop.f32.mrb[51].mxu1  ;;  %v4398_v29 = vshrl.u32 %v3810_v6, 16  ;;  %v13254_v56 = vrot.slane %v4407_v8, 5  ;;  %v11438_v31 = vld [vmem:[#allocation2 + $0x150] sm:$0x1] }
 0x3ff   : > { %13740 = vst [vmem:[#allocation43_spill] sm:$0xff] %v13237_v22  ;;  %v4403_v52 = vrot.slane %v4401_v9, 5  ;;  %v8001_v24 = vrot.slane %v11438_v31, 5  ;;  %v4396_v9 = vsel %vm11982_vm2, %v4391_v50, %v4395_v13  ;;  %v4427_v23 = vshll.u32 %v11440_v46, 16 }
 0x400   : > { %5017 = vmatmul.mubr.bf16.gmra.mrb[92].mxu1 %v9842_v40  ;;  %v4381_v40 = vrot.slane %v4380_v19, 4  ;;  %v4400_v47 = vrot.slane %v4398_v29, 4  ;;  %8530 = vmatmul.mubr.bf16.gmra.mrb[92].mxu0 %v10066_v54  ;;  %v7997_v19 = vrot.slane %v7995_v51, 4  ;;  %v11439_v54 = vld [vmem:[#allocation2 + $0x148] sm:$0xf]  ;;  %v4414_v34 = vor.u32 %v4413_v30, %v13254_v56 }
 0x401   : > { %5026 = vmatprep.mubr.bf16.mxu1 %v13723_v3  ;;  %8539 = vmatprep.mubr.bf16.mxu0 %v13723_v3  ;;  %v4417_v16 = vshll.u32 %v11439_v54, 16  ;;  %v4421_v38 = vshrl.u32 %v11439_v54, 16  ;;  %v4431_v51 = vshrl.u32 %v11440_v46, 16  ;;  %v11441_v30 = vld [vmem:[#allocation2 + $0x158] sm:$0xf] }
 0x402   : > { %v4386_v29 = vsel %vm11982_vm2, %v4381_v40, %v13226_v59  ;;  %v4404_v8 = vor.u32 %v4403_v52, %v4400_v47  ;;  %v7999_v45 = vsel %vm12263_vm5, %v7997_v19, %v7998_v33  ;;  %v8002_v59 = vsel %vm12263_vm5, %v8000_v62, %v8001_v24  ;;  %v3815_v40 = vld [vmem:[#allocation2 + $0x154] sm:$0xf] }
 0x403   : > { %v13250_v6 = vpop.f32.mrb[52].mxu1  ;;  %v9844_v13 = vcombine.low %v4386_v29, %v4396_v9  ;;  %v4419_v52 = vrot.slane %v4417_v16, 5  ;;  %v8005_v31 = vrot.slane %v11441_v30, 5  ;;  %v4415_v46 = vrot.slane %v4414_v34, 4  ;;  %v11442_v29 = vld [vmem:[#allocation2 + $0x158] sm:$0xf] }
 0x404   : > { %13741 = vst [vmem:[#allocation44_spill] sm:$0xff] %v13250_v6  ;;  %v13252_v0 = vpop.f32.mrb[53].mxu1  ;;  %v4405_v47 = vrot.slane %v4404_v8, 4  ;;  %v4433_v33 = vrot.slane %v4431_v51, 4  ;;  %v4442_v62 = vshrl.u32 %v3815_v40, 16  ;;  %v4445_v24 = vshll.u32 %v3815_v40, 16 }
 0x405   : > { %13742 = vst [vmem:[#allocation45_spill] sm:$0xff] %v13252_v0  ;;  %v13256_v20 = vpop.f32.mrb[54].mxu1  ;;  %v4451_v9 = vshll.u32 %v11442_v29, 16  ;;  %v4455_v8 = vshrl.u32 %v11442_v29, 16  ;;  %v10068_v30 = vcombine.low %v7999_v45, %v8002_v59  ;;  %v11446_v0 = vld [vmem:[#allocation2 + $0x15c] sm:$0xf] }
 0x406   : > { %13743 = vst [vmem:[#allocation46_spill] sm:$0xff] %v13256_v20  ;;  %v13259_v5 = vpop.f32.mrb[55].mxu1  ;;  %v13276_v20 = vrot.slane %v4427_v23, 5  ;;  %v11443_v23 = vld [vmem:[#allocation2 + $0x15c] sm:$0xf]  ;;  %v4444_v45 = vrot.slane %v4442_v62, 4 }
 0x407   : > { %13744 = vst [vmem:[#allocation47_spill] sm:$0xff] %v13259_v5  ;;  %v4423_v5 = vrot.slane %v4421_v38, 4  ;;  %v8007_v38 = vrot.slane %v8005_v31, 4  ;;  %v8008_v51 = vrot.slane %v11443_v23, 5  ;;  %v4447_v59 = vrot.slane %v4445_v24, 5 }
 0x408   : > { %5027 = vmatmul.mubr.bf16.gmra.mrb[96].mxu1 %v9843_v43  ;;  %v7751_v43 = vld [vmem:[#allocation2 + $0x154] sm:$0xe]  ;;  %8540 = vmatmul.mubr.bf16.gmra.mrb[96].mxu0 %v10067_v55  ;;  %v4410_v55 = vsel %vm11982_vm2, %v4405_v47, %v13254_v56  ;;  %v4434_v40 = vor.u32 %v4433_v33, %v13276_v20  ;;  %v4457_v56 = vrot.slane %v4455_v8, 4  ;;  %v11445_v47 = vld [vmem:[#allocation2 + $0x160] sm:$0xf]  ;;  %v4465_v23 = vshrl.u32 %v11446_v0, 16 }
 0x409   : > { %5036 = vmatprep.mubr.bf16.mxu1 %v13723_v3  ;;  %8549 = vmatprep.mubr.bf16.mxu0 %v13723_v3  ;;  %v10024_v34 = vrot.slane %v7751_v43, 9  ;;  %v8011_v43 = vrot.slane %v11445_v47, 5  ;;  %v8009_v24 = vsel %vm12263_vm5, %v8007_v38, %v8008_v51  ;;  %v4461_v8 = vshll.u32 %v11446_v0, 16 }
 0x40a   : > { %v4448_v22 = vor.u32 %v4447_v59, %v4444_v45 }
 0x40b   : > { %v13272_v50 = vpop.f32.mrb[56].mxu1  ;;  %v4463_v38 = vrot.slane %v4461_v8, 5 }
 0x40c   : > { %13745 = vst [vmem:[#allocation48_spill] sm:$0xff] %v13272_v50  ;;  %v13274_v54 = vpop.f32.mrb[57].mxu1  ;;  %v11444_v50 = vld [vmem:[#allocation2 + $0x150] sm:$0x1]  ;;  %v4449_v45 = vrot.slane %v4448_v22, 4 }
 0x40d   : > { %13746 = vst [vmem:[#allocation49_spill] sm:$0xff] %v13274_v54  ;;  %v13278_v19 = vpop.f32.mrb[58].mxu1  ;;  %v4424_v54 = vor.u32 %v4423_v5, %v4419_v52  ;;  %v4437_v29 = vshll.u32 %v11444_v50, 16  ;;  %v8006_v5 = vsel %vm12263_vm5, %v10024_v34, %v8005_v31  ;;  %v11451_v22 = vld [vmem:[#allocation2 + $0x170] sm:$0xf] }
 0x40e   : > { %13747 = vst [vmem:[#allocation50_spill] sm:$0xff] %v13278_v19  ;;  %v13281_v16 = vpop.f32.mrb[59].mxu1  ;;  %v4420_v19 = vsel %vm11982_vm2, %v4415_v46, %v4419_v52  ;;  %v11447_v52 = vld [vmem:[#allocation2 + $0x160] sm:$0xf]  ;;  %v10069_v0 = vcombine.low %v8006_v5, %v8009_v24 }
 0x40f   : > { %13748 = vst [vmem:[#allocation51_spill] sm:$0xff] %v13281_v16  ;;  %v13290_v16 = vrot.slane %v4451_v9, 5  ;;  %v4471_v46 = vshll.u32 %v11447_v52, 16  ;;  %v4475_v33 = vshrl.u32 %v11447_v52, 16  ;;  %v9845_v62 = vcombine.low %v4410_v55, %v4420_v19 }
 0x410   : > { %5037 = vmatmul.mubr.bf16.gmra.mrb[100].mxu1 %v9844_v13  ;;  %8550 = vmatmul.mubr.bf16.gmra.mrb[100].mxu0 %v10068_v30  ;;  %v4425_v9 = vrot.slane %v4424_v54, 4  ;;  %v4439_v6 = vrot.slane %v4437_v29, 5  ;;  %v8010_v30 = vrot.slane %v8008_v51, 4  ;;  %v8013_v52 = vrot.slane %v8011_v43, 4 }
 0x411   : > { %5046 = vmatprep.mubr.bf16.mxu1 %v13723_v3  ;;  %8559 = vmatprep.mubr.bf16.mxu0 %v13723_v3  ;;  %v4458_v31 = vor.u32 %v4457_v56, %v13290_v16  ;;  %v4467_v55 = vrot.slane %v4465_v23, 4  ;;  %v13306_v57 = vrot.slane %v4471_v46, 5  ;;  %v4477_v54 = vrot.slane %v4475_v33, 4  ;;  %v7752_v56 = vld [vmem:[#allocation2 + $0x168] sm:$0xe] }
 0x412   : > { %v4430_v29 = vsel %vm11982_vm2, %v4425_v9, %v13276_v20  ;;  %v8012_v23 = vsel %vm12263_vm5, %v8010_v30, %v8011_v43  ;;  %v10025_v9 = vrot.slane %v7752_v56, 9  ;;  %v4454_v43 = vsel %vm11982_vm2, %v4449_v45, %v13290_v16 }
 0x413   : > { %v13292_v13 = vpop.f32.mrb[60].mxu1  ;;  %v4459_v59 = vrot.slane %v4458_v31, 4  ;;  %v4468_v46 = vor.u32 %v4467_v55, %v4463_v38  ;;  %v4478_v33 = vor.u32 %v4477_v54, %v13306_v57  ;;  %v11452_v31 = vld [vmem:[#allocation2 + $0x16c] sm:$0xf]  ;;  %v11453_v54 = vld [vmem:[#allocation2 + $0x174] sm:$0xf] }
 0x414   : > { %13749 = vst [vmem:[#allocation52_spill] sm:$0xff] %v13292_v13  ;;  %v13296_v50 = vpop.f32.mrb[61].mxu1  ;;  %v4435_v13 = vrot.slane %v4434_v40, 4  ;;  %v3820_v40 = vld [vmem:[#allocation2 + $0x168] sm:$0xf]  ;;  %v4495_v30 = vshll.u32 %v11452_v31, 16 }
 0x415   : > { %13750 = vst [vmem:[#allocation53_spill] sm:$0xff] %v13296_v50  ;;  %v13300_v47 = vpop.f32.mrb[62].mxu1  ;;  %v11448_v50 = vld [vmem:[#allocation2 + $0x164] sm:$0x1]  ;;  %v4486_v24 = vshrl.u32 %v3820_v40, 16  ;;  %v4489_v8 = vshll.u32 %v3820_v40, 16 }
 0x416   : > { %13751 = vst [vmem:[#allocation54_spill] sm:$0xff] %v13300_v47  ;;  %v13304_v34 = vpop.f32.mrb[63].mxu1  ;;  %v8014_v19 = vrot.slane %v11448_v50, 5  ;;  %v11449_v47 = vld [vmem:[#allocation2 + $0x16c] sm:$0xf]  ;;  %v4440_v51 = vsel %vm11982_vm2, %v4435_v13, %v4439_v6  ;;  %v8021_v13 = vrot.slane %v11451_v22, 5 }
 0x417   : > { %13752 = vst [vmem:[#allocation55_spill] sm:$0xff] %v13304_v34  ;;  %v8018_v58 = vrot.slane %v11449_v47, 5  ;;  %v11450_v50 = vld [vmem:[#allocation2 + $0x164] sm:$0x1]  ;;  %v9846_v20 = vcombine.low %v4430_v29, %v4440_v51  ;;  %v4464_v47 = vsel %vm11982_vm2, %v4459_v59, %v4463_v38  ;;  %v4469_v55 = vrot.slane %v4468_v46, 4 }
 0x418   : > { %5047 = vmatmul.mubr.bf16.gmra.mrb[104].mxu1 %v9845_v62  ;;  %v8015_v5 = vsel %vm12263_vm5, %v8013_v52, %v8014_v19  ;;  %v4481_v62 = vshll.u32 %v11450_v50, 16  ;;  %8560 = vmatmul.mubr.bf16.gmra.mrb[104].mxu0 %v10069_v0  ;;  %v4499_v52 = vshrl.u32 %v11452_v31, 16  ;;  %v8024_v0 = vrot.slane %v11453_v54, 5  ;;  %v13348_v31 = vld [vmem:[#allocation2 + $0x180] sm:$0xf] }
 0x419   : > { %5056 = vmatprep.mubr.bf16.mxu1 %v13723_v3  ;;  %v8020_v6 = vrot.slane %v8018_v58, 4  ;;  %8569 = vmatprep.mubr.bf16.mxu0 %v13723_v3  ;;  %v10070_v19 = vcombine.low %v8012_v23, %v8015_v5  ;;  %v4479_v29 = vrot.slane %v4478_v33, 4  ;;  %v4488_v56 = vrot.slane %v4486_v24, 4  ;;  %v7753_v54 = vld [vmem:[#allocation2 + $0x17c] sm:$0xe] }
 0x41a   : > { %v4483_v51 = vrot.slane %v4481_v62, 5  ;;  %v4491_v50 = vrot.slane %v4489_v8, 5  ;;  %v9847_v16 = vcombine.low %v4454_v43, %v4464_v47  ;;  %v13328_v38 = vsel %vm12263_vm5, %v10025_v9, %v8018_v58  ;;  %v11454_v8 = vld [vmem:[#allocation2 + $0x178] sm:$0x1] }
 0x41b   : > { %v8301_v40 = vpop.f32.mrb[0].mxu0  ;;  %v13332_v45 = vsel %vm12263_vm5, %v8020_v6, %v8021_v13  ;;  %v8023_v5 = vrot.slane %v8021_v13, 4  ;;  %v13336_v46 = vrot.slane %v4495_v30, 5  ;;  %v4474_v58 = vsel %vm11982_vm2, %v4469_v55, %v13306_v57  ;;  %v11455_v6 = vld [vmem:[#allocation2 + $0x170] sm:$0xf] }
 0x41c   : > { %v10136_v22 = vadd.f32 %v8301_v40, %v12997_v10  ;;  %v8303_v34 = vpop.f32.mrb[1].mxu0  ;;  %v4501_v10 = vrot.slane %v4499_v52, 4  ;;  %v8026_v24 = vrot.slane %v8024_v0, 4  ;;  %v4492_v9 = vor.u32 %v4491_v50, %v4488_v56 }
 0x41d   : > { %v10137_v59 = vadd.f32 %v8303_v34, %v12999_v11  ;;  %v8305_v23 = vpop.f32.mrb[2].mxu0  ;;  %v4484_v34 = vsel %vm11982_vm2, %v4479_v29, %v4483_v51  ;;  %v4505_v13 = vshll.u32 %v11455_v6, 16  ;;  %v8031_v57 = vrot.slane %v13348_v31, 5 }
 0x41e   : > { %9195 = vst [vmem:[%s11856_s9] sm:$0xff] %v10136_v22  ;;  %v10138_v33 = vadd.f32 %v8305_v23, %v13001_v14  ;;  %v8307_v62 = vpop.f32.mrb[3].mxu0  ;;  %v8909_v43 = vmul.f32 %v10136_v22, %v10136_v22  ;;  %v10071_v29 = vcombine.low %v13328_v38, %v13332_v45  ;;  %v4509_v23 = vshrl.u32 %v11455_v6, 16  ;;  %v11457_v45 = vld [vmem:[#allocation2 + $0x174] sm:$0xf] }
 0x41f   : > { %9259 = vst [vmem:[%s11860_s15] sm:$0xff] %v10137_v59  ;;  %v10139_v11 = vadd.f32 %v8307_v62, %v13008_v21  ;;  %v8910_v30 = vmul.f32 %v10137_v59, %v10137_v59  ;;  %v4502_v21 = vor.u32 %v4501_v10, %v13336_v46  ;;  %v13365_v62 = vrot.slane %v4505_v13, 5 }
 0x420   : > { %5057 = vmatmul.mubr.bf16.gmra.mrb[108].mxu1 %v9846_v20  ;;  %v8027_v20 = vrot.slane %v11454_v8, 5  ;;  %v8748_v14 = vadd.f32 %v10138_v33, %v10136_v22  ;;  %v8911_v47 = vmul.f32 %v10138_v33, %v10138_v33  ;;  %9196 = vst [vmem:[%s11856_s9 + $0x8] sm:$0xff] %v10138_v33  ;;  %8570 = vmatmul.mubr.bf16.gmra.mrb[108].mxu0 %v10070_v19  ;;  %v10026_v38 = vrot.slane %v7753_v54, 9 }
 0x421   : > { %5066 = vmatprep.mubr.bf16.mxu1 %v13723_v3  ;;  %v8817_v52 = vadd.f32 %v10139_v11, %v10137_v59  ;;  %v8912_v55 = vmul.f32 %v10139_v11, %v10139_v11  ;;  %9260 = vst [vmem:[%s11860_s15 + $0x8] sm:$0xff] %v10139_v11  ;;  %8579 = vmatprep.mubr.bf16.mxu0 %v13723_v3  ;;  %v4493_v59 = vrot.slane %v4492_v9, 4  ;;  %v4503_v8 = vrot.slane %v4502_v21, 4  ;;  %v13373_v9 = vld [vmem:[#allocation2 + $0x184] sm:$0xf] }
 0x422   : > { %v9037_v40 = vadd.f32 %v8911_v47, %v8909_v43  ;;  %v13358_v19 = vsel %vm12263_vm5, %v8023_v5, %v8024_v0  ;;  %v13362_v51 = vsel %vm12263_vm5, %v8026_v24, %v8027_v20  ;;  %v9848_v22 = vcombine.low %v4474_v58, %v4484_v34 }
 0x423   : > { %v9106_v56 = vadd.f32 %v8912_v55, %v8910_v30  ;;  %v8311_v50 = vpop.f32.mrb[4].mxu0  ;;  %v4515_v0 = vshll.u32 %v11457_v45, 16  ;;  %v8033_v58 = vrot.slane %v8031_v57, 4  ;;  %v4519_v20 = vshrl.u32 %v11457_v45, 16 }
 0x424   : > { %v10140_v10 = vadd.f32 %v8311_v50, %v13011_v26  ;;  %v8313_v33 = vpop.f32.mrb[5].mxu0  ;;  %v4511_v47 = vrot.slane %v4509_v23, 4 }
 0x425   : > { %v10141_v5 = vadd.f32 %v8313_v33, %v13013_v28  ;;  %v8315_v24 = vpop.f32.mrb[6].mxu0  ;;  %v8034_v28 = vrot.slane %v13373_v9, 5 }
 0x426   : > { %v8749_v26 = vadd.f32 %v10140_v10, %v8748_v14  ;;  %v8913_v11 = vmul.f32 %v10140_v10, %v10140_v10  ;;  %9197 = vst [vmem:[%s11856_s9 + $0x10] sm:$0xff] %v10140_v10  ;;  %v8317_v34 = vpop.f32.mrb[7].mxu0  ;;  %v13379_v14 = vrot.slane %v4515_v0, 5  ;;  %v4521_v10 = vrot.slane %v4519_v20, 4 }
 0x427   : > { %v8818_v6 = vadd.f32 %v10141_v5, %v8817_v52  ;;  %v8914_v13 = vmul.f32 %v10141_v5, %v10141_v5  ;;  %9261 = vst [vmem:[%s11860_s15 + $0x10] sm:$0xff] %v10141_v5  ;;  %v10143_v43 = vadd.f32 %v8317_v34, %v13022_v35  ;;  %v4498_v35 = vsel %vm11982_vm2, %v4493_v59, %v13336_v46  ;;  %v11459_v59 = vld [vmem:[#allocation2 + $0x178] sm:$0x1] }
 0x428   : > { %5067 = vmatmul.mubr.bf16.gmra.mrb[112].mxu1 %v9847_v16  ;;  %v10142_v16 = vadd.f32 %v8315_v24, %v13015_v27  ;;  %v9038_v30 = vadd.f32 %v9037_v40, %v8913_v11  ;;  %8580 = vmatmul.mubr.bf16.gmra.mrb[112].mxu0 %v10071_v29  ;;  %v4508_v40 = vsel %vm11982_vm2, %v4503_v8, %v13365_v62  ;;  %v4525_v5 = vshll.u32 %v11459_v59, 16  ;;  %v11460_v8 = vld [vmem:[#allocation2 + $0x188] sm:$0xf] }
 0x429   : > { %5076 = vmatprep.mubr.bf16.mxu1 %v13723_v3  ;;  %v9107_v27 = vadd.f32 %v9106_v56, %v8914_v13  ;;  %v8819_v54 = vadd.f32 %v10143_v43, %v8818_v6  ;;  %v8916_v50 = vmul.f32 %v10143_v43, %v10143_v43  ;;  %9262 = vst [vmem:[%s11860_s15 + $0x18] sm:$0xff] %v10143_v43 }
 0x42a   : > { %v8750_v55 = vadd.f32 %v10142_v16, %v8749_v26  ;;  %v8915_v21 = vmul.f32 %v10142_v16, %v10142_v16  ;;  %9198 = vst [vmem:[%s11856_s9 + $0x18] sm:$0xff] %v10142_v16  ;;  %8589 = vmatprep.mubr.bf16.mxu0 %v13723_v3  ;;  %v4512_v33 = vor.u32 %v4511_v47, %v13365_v62  ;;  %v4527_v13 = vrot.slane %v4525_v5, 5 }
 0x42b   : > { %v9108_v23 = vadd.f32 %v9107_v27, %v8916_v50  ;;  %v8321_v29 = vpop.f32.mrb[8].mxu0  ;;  %v10072_v0 = vcombine.low %v13358_v19, %v13362_v51  ;;  %v13397_v46 = vsel %vm12263_vm5, %v10026_v38, %v8031_v57  ;;  %v8035_v19 = vsel %vm12263_vm5, %v8033_v58, %v8034_v28 }
 0x42c   : > { %v9039_v52 = vadd.f32 %v9038_v30, %v8915_v21  ;;  %v10144_v56 = vadd.f32 %v8321_v29, %v13025_v41  ;;  %v8323_v45 = vpop.f32.mrb[9].mxu0  ;;  %v9849_v41 = vcombine.low %v4498_v35, %v4508_v40  ;;  %v4522_v31 = vor.u32 %v4521_v10, %v13379_v14 }
 0x42d   : > { %v10145_v24 = vadd.f32 %v8323_v45, %v13027_v42  ;;  %v8325_v62 = vpop.f32.mrb[10].mxu0  ;;  %v8037_v42 = vrot.slane %v11460_v8, 5  ;;  %v4513_v16 = vrot.slane %v4512_v33, 4  ;;  %v10073_v10 = vcombine.low %v13397_v46, %v8035_v19 }
 0x42e   : > { %v8751_v51 = vadd.f32 %v10144_v56, %v8750_v55  ;;  %v8917_v57 = vmul.f32 %v10144_v56, %v10144_v56  ;;  %9199 = vst [vmem:[%s11856_s9 + $0x20] sm:$0xff] %v10144_v56  ;;  %v8327_v38 = vpop.f32.mrb[11].mxu0 }
 0x42f   : > { %v8820_v20 = vadd.f32 %v10145_v24, %v8819_v54  ;;  %v8918_v26 = vmul.f32 %v10145_v24, %v10145_v24  ;;  %9263 = vst [vmem:[%s11860_s15 + $0x20] sm:$0xff] %v10145_v24  ;;  %v10147_v11 = vadd.f32 %v8327_v38, %v13036_v48  ;;  %v8036_v48 = vrot.slane %v8034_v28, 4 }
 0x430   : > { %5077 = vmatmul.mubr.bf16.gmra.mrb[116].mxu1 %v9848_v22  ;;  %v10146_v22 = vadd.f32 %v8325_v62, %v13029_v44  ;;  %v9040_v34 = vadd.f32 %v9039_v52, %v8917_v57  ;;  %8590 = vmatmul.mubr.bf16.gmra.mrb[116].mxu0 %v10072_v0  ;;  %v4523_v44 = vrot.slane %v4522_v31, 4  ;;  %v8039_v52 = vrot.slane %v8037_v42, 4 }
 0x431   : > { %5086 = vmatprep.mubr.bf16.mxu1 %v13723_v3  ;;  %v9109_v43 = vadd.f32 %v9108_v23, %v8918_v26  ;;  %v8821_v47 = vadd.f32 %v10147_v11, %v8820_v20  ;;  %v8920_v30 = vmul.f32 %v10147_v11, %v10147_v11  ;;  %9264 = vst [vmem:[%s11860_s15 + $0x28] sm:$0xff] %v10147_v11 }
 0x432   : > { %v8752_v58 = vadd.f32 %v10146_v22, %v8751_v51  ;;  %v8919_v6 = vmul.f32 %v10146_v22, %v10146_v22  ;;  %9200 = vst [vmem:[%s11856_s9 + $0x28] sm:$0xff] %v10146_v22  ;;  %8599 = vmatprep.mubr.bf16.mxu0 %v13723_v3  ;;  %v4518_v23 = vsel %vm11982_vm2, %v4513_v16, %v13379_v14 }
 0x433   : > { %v9110_v21 = vadd.f32 %v9109_v43, %v8920_v30  ;;  %v8331_v27 = vpop.f32.mrb[12].mxu0  ;;  %v4528_v9 = vsel %vm11982_vm2, %v4523_v44, %v4527_v13  ;;  %v8038_v14 = vsel %vm12263_vm5, %v8036_v48, %v8037_v42 }
 0x434   : > { %v9041_v55 = vadd.f32 %v9040_v34, %v8919_v6  ;;  %v10148_v54 = vadd.f32 %v8331_v27, %v13039_v60  ;;  %v8333_v50 = vpop.f32.mrb[13].mxu0  ;;  %v11461_v60 = vld [vmem:[#allocation2 + $0x18c] sm:$0x1]  ;;  %v9850_v24 = vcombine.low %v4518_v23, %v4528_v9 }
 0x435   : > { %v10149_v35 = vadd.f32 %v8333_v50, %v13043_v63  ;;  %v8335_v40 = vpop.f32.mrb[14].mxu0  ;;  %v8040_v28 = vrot.slane %v11461_v60, 5 }
 0x436   : > { %v8753_v29 = vadd.f32 %v10148_v54, %v8752_v58  ;;  %v8921_v33 = vmul.f32 %v10148_v54, %v10148_v54  ;;  %9201 = vst [vmem:[%s11856_s9 + $0x30] sm:$0xff] %v10148_v54  ;;  %v10150_v56 = vadd.f32 %v8335_v40, %v13047_v2  ;;  %v8337_v63 = vpop.f32.mrb[15].mxu0 }
 0x437   : > { %v8822_v45 = vadd.f32 %v10149_v35, %v8821_v47  ;;  %v8922_v0 = vmul.f32 %v10149_v35, %v10149_v35  ;;  %9265 = vst [vmem:[%s11860_s15 + $0x30] sm:$0xff] %v10149_v35  ;;  %v10151_v46 = vadd.f32 %v8337_v63, %v13052_v15  ;;  %v8041_v19 = vsel %vm12263_vm5, %v8039_v52, %v8040_v28 }
 0x438   : > { %5087 = vmatmul.mubr.bf16.gmra.mrb[120].mxu1 %v9849_v41  ;;  %v9042_v12 = vadd.f32 %v9041_v55, %v8921_v33  ;;  %v8754_v59 = vadd.f32 %v10150_v56, %v8753_v29  ;;  %v8923_v5 = vmul.f32 %v10150_v56, %v10150_v56  ;;  %9202 = vst [vmem:[%s11856_s9 + $0x38] sm:$0xff] %v10150_v56 }
 0x439   : > { %5096 = vmatprep.mubr.bf16.mxu1 %v13723_v3  ;;  %8600 = vmatmul.mubr.bf16.gmra.mrb[120].mxu0 %v10073_v10  ;;  %v9111_v62 = vadd.f32 %v9110_v21, %v8922_v0  ;;  %v8823_v41 = vadd.f32 %v10151_v46, %v8822_v45  ;;  %v8924_v2 = vmul.f32 %v10151_v46, %v10151_v46 }
 0x43a   : > { %9266 = vst [vmem:[%s11860_s15 + $0x38] sm:$0xff] %v10151_v46  ;;  %8609 = vmatprep.mubr.bf16.mxu0 %v13723_v3  ;;  %v9043_v15 = vadd.f32 %v9042_v12, %v8923_v5  ;;  %v10074_v38 = vcombine.low %v8038_v14, %v8041_v19 }
 0x43b   : > { %v9112_v31 = vadd.f32 %v9111_v62, %v8924_v2  ;;  %v8341_v51 = vpop.f32.mrb[16].mxu0 }
 0x43c   : > { %v10152_v57 = vadd.f32 %v8341_v51, %v13056_v39  ;;  %v8343_v22 = vpop.f32.mrb[17].mxu0 }
 0x43d   : > { %v10153_v8 = vadd.f32 %v8343_v22, %v13060_v32  ;;  %v8345_v42 = vpop.f32.mrb[18].mxu0  ;;  %v13754_v22 = vld [vmem:[#allocation21_spill] sm:$0xff] }
 0x43e   : > { %v8755_v20 = vadd.f32 %v10152_v57, %v8754_v59  ;;  %v8925_v26 = vmul.f32 %v10152_v57, %v10152_v57  ;;  %9203 = vst [vmem:[%s11856_s9 + $0x40] sm:$0xff] %v10152_v57  ;;  %v10154_v7 = vadd.f32 %v8345_v42, %v13062_v49  ;;  %v8347_v3 = vpop.f32.mrb[19].mxu0 }
 0x43f   : > { %v8824_v11 = vadd.f32 %v10153_v8, %v8823_v41  ;;  %v8926_v16 = vmul.f32 %v10153_v8, %v10153_v8  ;;  %9267 = vst [vmem:[%s11860_s15 + $0x40] sm:$0xff] %v10153_v8  ;;  %v10155_v34 = vadd.f32 %v8347_v3, %v13069_v53 }
 0x440   : > { %5097 = vmatmul.mubr.bf16.gmra.mrb[124].mxu1 %v9850_v24  ;;  %v9044_v39 = vadd.f32 %v9043_v15, %v8925_v26  ;;  %v8756_v58 = vadd.f32 %v10154_v7, %v8755_v20  ;;  %v8927_v6 = vmul.f32 %v10154_v7, %v10154_v7  ;;  %9204 = vst [vmem:[%s11856_s9 + $0x48] sm:$0xff] %v10154_v7  ;;  %v13755_v20 = vld [vmem:[#allocation22_spill] sm:$0xff] }
 0x441   : > { %8610 = vmatmul.mubr.bf16.gmra.mrb[124].mxu0 %v10074_v38  ;;  %v9113_v32 = vadd.f32 %v9112_v31, %v8926_v16  ;;  %v8825_v13 = vadd.f32 %v10155_v34, %v8824_v11  ;;  %v8928_v43 = vmul.f32 %v10155_v34, %v10155_v34  ;;  %9268 = vst [vmem:[%s11860_s15 + $0x48] sm:$0xff] %v10155_v34  ;;  %v13756_v16 = vld [vmem:[#allocation23_spill] sm:$0xff] }
 0x442   : > { %v9045_v47 = vadd.f32 %v9044_v39, %v8927_v6 }
 0x443   : > { %v9114_v30 = vadd.f32 %v9113_v32, %v8928_v43  ;;  %v8351_v49 = vpop.f32.mrb[20].mxu0 }
 0x444   : > { %v10156_v44 = vadd.f32 %v8351_v49, %v13082_v17  ;;  %v8353_v55 = vpop.f32.mrb[21].mxu0 }
 0x445   : > { %v10157_v53 = vadd.f32 %v8353_v55, %v13084_v61  ;;  %v8355_v21 = vpop.f32.mrb[22].mxu0 }
 0x446   : > { %v8757_v27 = vadd.f32 %v10156_v44, %v8756_v58  ;;  %v8929_v48 = vmul.f32 %v10156_v44, %v10156_v44  ;;  %9205 = vst [vmem:[%s11856_s9 + $0x50] sm:$0xff] %v10156_v44  ;;  %v10158_v54 = vadd.f32 %v8355_v21, %v13086_v37  ;;  %v8357_v50 = vpop.f32.mrb[23].mxu0  ;;  %v13757_v44 = vld [vmem:[#allocation24_spill] sm:$0xff]  ;;  %v13758_v21 = vld [vmem:[#allocation25_spill] sm:$0xff] }
 0x447   : > { %v8826_v10 = vadd.f32 %v10157_v53, %v8825_v13  ;;  %v8930_v52 = vmul.f32 %v10157_v53, %v10157_v53  ;;  %9269 = vst [vmem:[%s11860_s15 + $0x50] sm:$0xff] %v10157_v53  ;;  %v10159_v35 = vadd.f32 %v8357_v50, %v13089_v36 }
 0x448   : > { %v9046_v40 = vadd.f32 %v9045_v47, %v8929_v48  ;;  %v8758_v23 = vadd.f32 %v10158_v54, %v8757_v27  ;;  %v8931_v17 = vmul.f32 %v10158_v54, %v10158_v54  ;;  %9206 = vst [vmem:[%s11856_s9 + $0x58] sm:$0xff] %v10158_v54 }
 0x449   : > { %v9115_v9 = vadd.f32 %v9114_v30, %v8930_v52  ;;  %v8827_v61 = vadd.f32 %v10159_v35, %v8826_v10  ;;  %v8932_v60 = vmul.f32 %v10159_v35, %v10159_v35  ;;  %9270 = vst [vmem:[%s11860_s15 + $0x58] sm:$0xff] %v10159_v35  ;;  %v13759_v10 = vld [vmem:[#allocation26_spill] sm:$0xff] }
 0x44a   : > { %v9047_v28 = vadd.f32 %v9046_v40, %v8931_v17  ;;  %v13760_v17 = vld [vmem:[#allocation27_spill] sm:$0xff] }
 0x44b   : > { %v9116_v29 = vadd.f32 %v9115_v9, %v8932_v60  ;;  %v8361_v33 = vpop.f32.mrb[24].mxu0 }
 0x44c   : > { %v10160_v37 = vadd.f32 %v8361_v33, %v13101_v1  ;;  %v8363_v56 = vpop.f32.mrb[25].mxu0 }
 0x44d   : > { %v10161_v63 = vadd.f32 %v8363_v56, %v13103_v18  ;;  %v8365_v36 = vpop.f32.mrb[26].mxu0 }
 0x44e   : > { %v8759_v45 = vadd.f32 %v10160_v37, %v8758_v23  ;;  %v8933_v0 = vmul.f32 %v10160_v37, %v10160_v37  ;;  %9207 = vst [vmem:[%s11856_s9 + $0x60] sm:$0xff] %v10160_v37  ;;  %v10162_v46 = vadd.f32 %v8365_v36, %v13107_v4  ;;  %v8367_v14 = vpop.f32.mrb[27].mxu0  ;;  %v13753_v4 = vld [vmem:[#allocation20_spill] sm:$0xff] }
 0x44f   : > { %v8828_v12 = vadd.f32 %v10161_v63, %v8827_v61  ;;  %v8934_v59 = vmul.f32 %v10161_v63, %v10161_v63  ;;  %9271 = vst [vmem:[%s11860_s15 + $0x60] sm:$0xff] %v10161_v63  ;;  %v10163_v5 = vadd.f32 %v8367_v14, %v13110_v25  ;;  %v13762_v14 = vld [vmem:[#allocation29_spill] sm:$0xff] }
 0x450   : > { %v9048_v24 = vadd.f32 %v9047_v28, %v8933_v0  ;;  %v8760_v62 = vadd.f32 %v10162_v46, %v8759_v45  ;;  %v8935_v1 = vmul.f32 %v10162_v46, %v10162_v46  ;;  %9208 = vst [vmem:[%s11856_s9 + $0x68] sm:$0xff] %v10162_v46  ;;  %v13761_v45 = vld [vmem:[#allocation28_spill] sm:$0xff] }
 0x451   : > { %v9117_v41 = vadd.f32 %v9116_v29, %v8934_v59  ;;  %v8829_v18 = vadd.f32 %v10163_v5, %v8828_v12  ;;  %v8936_v2 = vmul.f32 %v10163_v5, %v10163_v5  ;;  %9272 = vst [vmem:[%s11860_s15 + $0x68] sm:$0xff] %v10163_v5 }
 0x452   : > { %v9049_v19 = vadd.f32 %v9048_v24, %v8935_v1 }
 0x453   : > { %v9118_v15 = vadd.f32 %v9117_v41, %v8936_v2  ;;  %v8371_v31 = vpop.f32.mrb[28].mxu0 }
 0x454   : > { %v10164_v51 = vadd.f32 %v8371_v31, %v13753_v4  ;;  %v8373_v57 = vpop.f32.mrb[29].mxu0 }
 0x455   : > { %v10165_v38 = vadd.f32 %v8373_v57, %v13754_v22  ;;  %v8375_v25 = vpop.f32.mrb[30].mxu0 }
 0x456   : > { %v8761_v8 = vadd.f32 %v10164_v51, %v8760_v62  ;;  %v8937_v42 = vmul.f32 %v10164_v51, %v10164_v51  ;;  %9209 = vst [vmem:[%s11856_s9 + $0x70] sm:$0xff] %v10164_v51  ;;  %v10166_v26 = vadd.f32 %v8375_v25, %v13755_v20  ;;  %v8377_v7 = vpop.f32.mrb[31].mxu0  ;;  %v13763_v62 = vld [vmem:[#allocation30_spill] sm:$0xff]  ;;  %v13765_v20 = vld [vmem:[#allocation32_spill] sm:$0xff] }
 0x457   : > { %v8830_v3 = vadd.f32 %v10165_v38, %v8829_v18  ;;  %v8938_v11 = vmul.f32 %v10165_v38, %v10165_v38  ;;  %9273 = vst [vmem:[%s11860_s15 + $0x70] sm:$0xff] %v10165_v38  ;;  %v10167_v34 = vadd.f32 %v8377_v7, %v13756_v16 }
 0x458   : > { %v9050_v39 = vadd.f32 %v9049_v19, %v8937_v42  ;;  %v8762_v58 = vadd.f32 %v10166_v26, %v8761_v8  ;;  %v8939_v6 = vmul.f32 %v10166_v26, %v10166_v26  ;;  %9210 = vst [vmem:[%s11856_s9 + $0x78] sm:$0xff] %v10166_v26  ;;  %v13764_v19 = vld [vmem:[#allocation31_spill] sm:$0xff] }
 0x459   : > { %v9119_v32 = vadd.f32 %v9118_v15, %v8938_v11  ;;  %v8831_v13 = vadd.f32 %v10167_v34, %v8830_v3  ;;  %v8940_v43 = vmul.f32 %v10167_v34, %v10167_v34  ;;  %9274 = vst [vmem:[%s11860_s15 + $0x78] sm:$0xff] %v10167_v34  ;;  %v13766_v3 = vld [vmem:[#allocation33_spill] sm:$0xff] }
 0x45a   : > { %v9051_v47 = vadd.f32 %v9050_v39, %v8939_v6 }
 0x45b   : > { %v9120_v30 = vadd.f32 %v9119_v32, %v8940_v43  ;;  %v8381_v49 = vpop.f32.mrb[32].mxu0 }
 0x45c   : > { %v10168_v55 = vadd.f32 %v8381_v49, %v13757_v44  ;;  %v8383_v53 = vpop.f32.mrb[33].mxu0 }
 0x45d   : > { %v10169_v27 = vadd.f32 %v8383_v53, %v13758_v21  ;;  %v8385_v48 = vpop.f32.mrb[34].mxu0 }
 0x45e   : > { %v8763_v54 = vadd.f32 %v10168_v55, %v8762_v58  ;;  %v8941_v50 = vmul.f32 %v10168_v55, %v10168_v55  ;;  %9211 = vst [vmem:[%s11856_s9 + $0x80] sm:$0xff] %v10168_v55  ;;  %v10170_v52 = vadd.f32 %v8385_v48, %v13759_v10  ;;  %v8387_v35 = vpop.f32.mrb[35].mxu0  ;;  %v13767_v58 = vld [vmem:[#allocation34_spill] sm:$0xff]  ;;  %v13769_v10 = vld [vmem:[#allocation36_spill] sm:$0xff] }
 0x45f   : > { %v8832_v40 = vadd.f32 %v10169_v27, %v8831_v13  ;;  %v8942_v23 = vmul.f32 %v10169_v27, %v10169_v27  ;;  %9275 = vst [vmem:[%s11860_s15 + $0x80] sm:$0xff] %v10169_v27  ;;  %v10171_v9 = vadd.f32 %v8387_v35, %v13760_v17 }
 0x460   : > { %v9052_v61 = vadd.f32 %v9051_v47, %v8941_v50  ;;  %v8764_v60 = vadd.f32 %v10170_v52, %v8763_v54  ;;  %v8943_v28 = vmul.f32 %v10170_v52, %v10170_v52  ;;  %9212 = vst [vmem:[%s11856_s9 + $0x88] sm:$0xff] %v10170_v52  ;;  %v13768_v47 = vld [vmem:[#allocation35_spill] sm:$0xff] }
 0x461   : > { %v9121_v29 = vadd.f32 %v9120_v30, %v8942_v23  ;;  %v8833_v33 = vadd.f32 %v10171_v9, %v8832_v40  ;;  %v8944_v37 = vmul.f32 %v10171_v9, %v10171_v9  ;;  %9276 = vst [vmem:[%s11860_s15 + $0x88] sm:$0xff] %v10171_v9  ;;  %v13770_v40 = vld [vmem:[#allocation37_spill] sm:$0xff] }
 0x462   : > { %v9053_v56 = vadd.f32 %v9052_v61, %v8943_v28 }
 0x463   : > { %v9122_v63 = vadd.f32 %v9121_v29, %v8944_v37  ;;  %v8391_v36 = vpop.f32.mrb[36].mxu0 }
 0x464   : > { %v10172_v0 = vadd.f32 %v8391_v36, %v13761_v45  ;;  %v8393_v46 = vpop.f32.mrb[37].mxu0 }
 0x465   : > { %v10173_v12 = vadd.f32 %v8393_v46, %v13762_v14  ;;  %v8395_v59 = vpop.f32.mrb[38].mxu0 }
 0x466   : > { %v8765_v5 = vadd.f32 %v10172_v0, %v8764_v60  ;;  %v8945_v24 = vmul.f32 %v10172_v0, %v10172_v0  ;;  %9213 = vst [vmem:[%s11856_s9 + $0x90] sm:$0xff] %v10172_v0  ;;  %v10174_v1 = vadd.f32 %v8395_v59, %v13763_v62  ;;  %v8397_v41 = vpop.f32.mrb[39].mxu0  ;;  %v13771_v60 = vld [vmem:[#allocation38_spill] sm:$0xff]  ;;  %v13773_v62 = vld [vmem:[#allocation40_spill] sm:$0xff] }
 0x467   : > { %v8834_v18 = vadd.f32 %v10173_v12, %v8833_v33  ;;  %v8946_v2 = vmul.f32 %v10173_v12, %v10173_v12  ;;  %9277 = vst [vmem:[%s11860_s15 + $0x90] sm:$0xff] %v10173_v12  ;;  %v10175_v15 = vadd.f32 %v8397_v41, %v13764_v19 }
 0x468   : > { %v9054_v31 = vadd.f32 %v9053_v56, %v8945_v24  ;;  %v8766_v4 = vadd.f32 %v10174_v1, %v8765_v5  ;;  %v8947_v51 = vmul.f32 %v10174_v1, %v10174_v1  ;;  %9214 = vst [vmem:[%s11856_s9 + $0x98] sm:$0xff] %v10174_v1  ;;  %v13772_v56 = vld [vmem:[#allocation39_spill] sm:$0xff] }
 0x469   : > { %v9123_v57 = vadd.f32 %v9122_v63, %v8946_v2  ;;  %v8835_v22 = vadd.f32 %v10175_v15, %v8834_v18  ;;  %v8948_v38 = vmul.f32 %v10175_v15, %v10175_v15  ;;  %9278 = vst [vmem:[%s11860_s15 + $0x98] sm:$0xff] %v10175_v15  ;;  %v13774_v18 = vld [vmem:[#allocation41_spill] sm:$0xff] }
 0x46a   : > { %v9055_v25 = vadd.f32 %v9054_v31, %v8947_v51 }
 0x46b   : > { %v9124_v8 = vadd.f32 %v9123_v57, %v8948_v38  ;;  %v8401_v42 = vpop.f32.mrb[40].mxu0 }
 0x46c   : > { %v10176_v26 = vadd.f32 %v8401_v42, %v13765_v20  ;;  %v8403_v7 = vpop.f32.mrb[41].mxu0 }
 0x46d   : > { %v10177_v11 = vadd.f32 %v8403_v7, %v13766_v3  ;;  %v8405_v16 = vpop.f32.mrb[42].mxu0 }
 0x46e   : > { %v8767_v34 = vadd.f32 %v10176_v26, %v8766_v4  ;;  %v8949_v39 = vmul.f32 %v10176_v26, %v10176_v26  ;;  %9215 = vst [vmem:[%s11856_s9 + $0xa0] sm:$0xff] %v10176_v26  ;;  %v10178_v6 = vadd.f32 %v8405_v16, %v13767_v58  ;;  %v8407_v32 = vpop.f32.mrb[43].mxu0  ;;  %v13775_v4 = vld [vmem:[#allocation42_spill] sm:$0xff]  ;;  %v13777_v58 = vld [vmem:[#allocation44_spill] sm:$0xff] }
 0x46f   : > { %v8836_v13 = vadd.f32 %v10177_v11, %v8835_v22  ;;  %v8950_v43 = vmul.f32 %v10177_v11, %v10177_v11  ;;  %9279 = vst [vmem:[%s11860_s15 + $0xa0] sm:$0xff] %v10177_v11  ;;  %v10179_v30 = vadd.f32 %v8407_v32, %v13768_v47 }
 0x470   : > { %v9056_v49 = vadd.f32 %v9055_v25, %v8949_v39  ;;  %v8768_v44 = vadd.f32 %v10178_v6, %v8767_v34  ;;  %v8951_v55 = vmul.f32 %v10178_v6, %v10178_v6  ;;  %9216 = vst [vmem:[%s11856_s9 + $0xa8] sm:$0xff] %v10178_v6  ;;  %v13776_v25 = vld [vmem:[#allocation43_spill] sm:$0xff] }
 0x471   : > { %v9125_v53 = vadd.f32 %v9124_v8, %v8950_v43  ;;  %v8837_v21 = vadd.f32 %v10179_v30, %v8836_v13  ;;  %v8952_v27 = vmul.f32 %v10179_v30, %v10179_v30  ;;  %9280 = vst [vmem:[%s11860_s15 + $0xa8] sm:$0xff] %v10179_v30  ;;  %v13778_v13 = vld [vmem:[#allocation45_spill] sm:$0xff] }
 0x472   : > { %v9057_v48 = vadd.f32 %v9056_v49, %v8951_v55 }
 0x473   : > { %v9126_v54 = vadd.f32 %v9125_v53, %v8952_v27  ;;  %v8411_v50 = vpop.f32.mrb[44].mxu0 }
 0x474   : > { %v10180_v52 = vadd.f32 %v8411_v50, %v13769_v10  ;;  %v8413_v35 = vpop.f32.mrb[45].mxu0 }
 0x475   : > { %v10181_v23 = vadd.f32 %v8413_v35, %v13770_v40  ;;  %v8415_v17 = vpop.f32.mrb[46].mxu0 }
 0x476   : > { %v8769_v9 = vadd.f32 %v10180_v52, %v8768_v44  ;;  %v8953_v61 = vmul.f32 %v10180_v52, %v10180_v52  ;;  %9217 = vst [vmem:[%s11856_s9 + $0xb0] sm:$0xff] %v10180_v52  ;;  %v10182_v28 = vadd.f32 %v8415_v17, %v13771_v60  ;;  %v8417_v29 = vpop.f32.mrb[47].mxu0  ;;  %v13779_v44 = vld [vmem:[#allocation46_spill] sm:$0xff]  ;;  %v13781_v60 = vld [vmem:[#allocation48_spill] sm:$0xff] }
 0x477   : > { %v8838_v33 = vadd.f32 %v10181_v23, %v8837_v21  ;;  %v8954_v37 = vmul.f32 %v10181_v23, %v10181_v23  ;;  %9281 = vst [vmem:[%s11860_s15 + $0xb0] sm:$0xff] %v10181_v23  ;;  %v10183_v63 = vadd.f32 %v8417_v29, %v13772_v56 }
 0x478   : > { %v9058_v36 = vadd.f32 %v9057_v48, %v8953_v61  ;;  %v8770_v45 = vadd.f32 %v10182_v28, %v8769_v9  ;;  %v8955_v0 = vmul.f32 %v10182_v28, %v10182_v28  ;;  %9218 = vst [vmem:[%s11856_s9 + $0xb8] sm:$0xff] %v10182_v28  ;;  %v13780_v48 = vld [vmem:[#allocation47_spill] sm:$0xff] }
 0x479   : > { %v9127_v46 = vadd.f32 %v9126_v54, %v8954_v37  ;;  %v8839_v14 = vadd.f32 %v10183_v63, %v8838_v33  ;;  %v8956_v12 = vmul.f32 %v10183_v63, %v10183_v63  ;;  %9282 = vst [vmem:[%s11860_s15 + $0xb8] sm:$0xff] %v10183_v63  ;;  %v13782_v33 = vld [vmem:[#allocation49_spill] sm:$0xff] }
 0x47a   : > { %v9059_v59 = vadd.f32 %v9058_v36, %v8955_v0 }
 0x47b   : > { %v9128_v5 = vadd.f32 %v9127_v46, %v8956_v12  ;;  %v8421_v24 = vpop.f32.mrb[48].mxu0 }
 0x47c   : > { %v10184_v1 = vadd.f32 %v8421_v24, %v13773_v62  ;;  %v8423_v41 = vpop.f32.mrb[49].mxu0 }
 0x47d   : > { %v10185_v2 = vadd.f32 %v8423_v41, %v13774_v18  ;;  %v8425_v19 = vpop.f32.mrb[50].mxu0 }
 0x47e   : > { %v8771_v15 = vadd.f32 %v10184_v1, %v8770_v45  ;;  %v8957_v31 = vmul.f32 %v10184_v1, %v10184_v1  ;;  %9219 = vst [vmem:[%s11856_s9 + $0xc0] sm:$0xff] %v10184_v1  ;;  %v10186_v51 = vadd.f32 %v8425_v19, %v13775_v4  ;;  %v8427_v57 = vpop.f32.mrb[51].mxu0  ;;  %v13783_v45 = vld [vmem:[#allocation50_spill] sm:$0xff]  ;;  %v13785_v4 = vld [vmem:[#allocation52_spill] sm:$0xff] }
 0x47f   : > { %v8840_v22 = vadd.f32 %v10185_v2, %v8839_v14  ;;  %v8958_v38 = vmul.f32 %v10185_v2, %v10185_v2  ;;  %9283 = vst [vmem:[%s11860_s15 + $0xc0] sm:$0xff] %v10185_v2  ;;  %v10187_v8 = vadd.f32 %v8427_v57, %v13776_v25 }
 0x480   : > { %v9060_v42 = vadd.f32 %v9059_v59, %v8957_v31  ;;  %v8772_v20 = vadd.f32 %v10186_v51, %v8771_v15  ;;  %v8959_v26 = vmul.f32 %v10186_v51, %v10186_v51  ;;  %9220 = vst [vmem:[%s11856_s9 + $0xc8] sm:$0xff] %v10186_v51  ;;  %v13784_v59 = vld [vmem:[#allocation51_spill] sm:$0xff] }
 0x481   : > { %v9129_v7 = vadd.f32 %v9128_v5, %v8958_v38  ;;  %v8841_v3 = vadd.f32 %v10187_v8, %v8840_v22  ;;  %v8960_v11 = vmul.f32 %v10187_v8, %v10187_v8  ;;  %9284 = vst [vmem:[%s11860_s15 + $0xc8] sm:$0xff] %v10187_v8  ;;  %v13786_v22 = vld [vmem:[#allocation53_spill] sm:$0xff] }
 0x482   : > { %v9061_v16 = vadd.f32 %v9060_v42, %v8959_v26 }
 0x483   : > { %v9130_v34 = vadd.f32 %v9129_v7, %v8960_v11  ;;  %v8431_v39 = vpop.f32.mrb[52].mxu0 }
 0x484   : > { %v10188_v6 = vadd.f32 %v8431_v39, %v13777_v58  ;;  %v8433_v32 = vpop.f32.mrb[53].mxu0 }
 0x485   : > { %v10189_v43 = vadd.f32 %v8433_v32, %v13778_v13  ;;  %v8435_v47 = vpop.f32.mrb[54].mxu0 }
 0x486   : > { %v8773_v30 = vadd.f32 %v10188_v6, %v8772_v20  ;;  %v8961_v49 = vmul.f32 %v10188_v6, %v10188_v6  ;;  %9221 = vst [vmem:[%s11856_s9 + $0xd0] sm:$0xff] %v10188_v6  ;;  %v10190_v55 = vadd.f32 %v8435_v47, %v13779_v44  ;;  %v8437_v53 = vpop.f32.mrb[55].mxu0  ;;  %v13787_v20 = vld [vmem:[#allocation54_spill] sm:$0xff] }
 0x487   : > { %v8842_v21 = vadd.f32 %v10189_v43, %v8841_v3  ;;  %v8962_v27 = vmul.f32 %v10189_v43, %v10189_v43  ;;  %9285 = vst [vmem:[%s11860_s15 + $0xd0] sm:$0xff] %v10189_v43  ;;  %v10191_v54 = vadd.f32 %v8437_v53, %v13780_v48 }
 0x488   : > { %v9062_v50 = vadd.f32 %v9061_v16, %v8961_v49  ;;  %v8774_v10 = vadd.f32 %v10190_v55, %v8773_v30  ;;  %v8963_v52 = vmul.f32 %v10190_v55, %v10190_v55  ;;  %9222 = vst [vmem:[%s11856_s9 + $0xd8] sm:$0xff] %v10190_v55  ;;  %v13788_v16 = vld [vmem:[#allocation55_spill] sm:$0xff] }
 0x489   : > { %v9131_v35 = vadd.f32 %v9130_v34, %v8962_v27  ;;  %v8843_v40 = vadd.f32 %v10191_v54, %v8842_v21  ;;  %v8964_v23 = vmul.f32 %v10191_v54, %v10191_v54  ;;  %9286 = vst [vmem:[%s11860_s15 + $0xd8] sm:$0xff] %v10191_v54 }
 0x48a   : > { %v9063_v17 = vadd.f32 %v9062_v50, %v8963_v52 }
 0x48b   : > { %v9132_v9 = vadd.f32 %v9131_v35, %v8964_v23  ;;  %v8441_v61 = vpop.f32.mrb[56].mxu0 }
 0x48c   : > { %v10192_v28 = vadd.f32 %v8441_v61, %v13781_v60  ;;  %v8443_v29 = vpop.f32.mrb[57].mxu0 }
 0x48d   : > { %v10193_v37 = vadd.f32 %v8443_v29, %v13782_v33  ;;  %v8445_v56 = vpop.f32.mrb[58].mxu0 }
 0x48e   : > { %v8775_v63 = vadd.f32 %v10192_v28, %v8774_v10  ;;  %v8965_v36 = vmul.f32 %v10192_v28, %v10192_v28  ;;  %9223 = vst [vmem:[%s11856_s9 + $0xe0] sm:$0xff] %v10192_v28  ;;  %v10194_v0 = vadd.f32 %v8445_v56, %v13783_v45  ;;  %v8447_v46 = vpop.f32.mrb[59].mxu0 }
 0x48f   : > { %v8844_v14 = vadd.f32 %v10193_v37, %v8843_v40  ;;  %v8966_v12 = vmul.f32 %v10193_v37, %v10193_v37  ;;  %9287 = vst [vmem:[%s11860_s15 + $0xe0] sm:$0xff] %v10193_v37  ;;  %v10195_v5 = vadd.f32 %v8447_v46, %v13784_v59 }
 0x490   : > { %v9064_v24 = vadd.f32 %v9063_v17, %v8965_v36  ;;  %v8776_v62 = vadd.f32 %v10194_v0, %v8775_v63  ;;  %v8967_v1 = vmul.f32 %v10194_v0, %v10194_v0  ;;  %9224 = vst [vmem:[%s11856_s9 + $0xe8] sm:$0xff] %v10194_v0 }
 0x491   : > { %v9133_v41 = vadd.f32 %v9132_v9, %v8966_v12  ;;  %v8845_v18 = vadd.f32 %v10195_v5, %v8844_v14  ;;  %v8968_v2 = vmul.f32 %v10195_v5, %v10195_v5  ;;  %9288 = vst [vmem:[%s11860_s15 + $0xe8] sm:$0xff] %v10195_v5 }
 0x492   : > { %v9065_v19 = vadd.f32 %v9064_v24, %v8967_v1 }
 0x493   : > { %v9134_v15 = vadd.f32 %v9133_v41, %v8968_v2  ;;  %v8451_v31 = vpop.f32.mrb[60].mxu0 }
 0x494   : > { %v10196_v51 = vadd.f32 %v8451_v31, %v13785_v4  ;;  %v8453_v57 = vpop.f32.mrb[61].mxu0 }
 0x495   : > { %v10197_v38 = vadd.f32 %v8453_v57, %v13786_v22  ;;  %v8455_v25 = vpop.f32.mrb[62].mxu0 }
 0x496   : > { %v8777_v8 = vadd.f32 %v10196_v51, %v8776_v62  ;;  %v8969_v42 = vmul.f32 %v10196_v51, %v10196_v51  ;;  %9225 = vst [vmem:[%s11856_s9 + $0xf0] sm:$0xff] %v10196_v51  ;;  %v10198_v26 = vadd.f32 %v8455_v25, %v13787_v20  ;;  %v8457_v7 = vpop.f32.mrb[63].mxu0 }
 0x497   : > { %v8846_v3 = vadd.f32 %v10197_v38, %v8845_v18  ;;  %v8970_v11 = vmul.f32 %v10197_v38, %v10197_v38  ;;  %9289 = vst [vmem:[%s11860_s15 + $0xf0] sm:$0xff] %v10197_v38  ;;  %v10199_v34 = vadd.f32 %v8457_v7, %v13788_v16 }
 0x498   : > { %v9066_v58 = vadd.f32 %v9065_v19, %v8969_v42  ;;  %v8778_v6 = vadd.f32 %v10198_v26, %v8777_v8  ;;  %v8971_v32 = vmul.f32 %v10198_v26, %v10198_v26  ;;  %9226 = vst [vmem:[%s11856_s9 + $0xf8] sm:$0xff] %v10198_v26 }
 0x499   : > { %v9135_v43 = vadd.f32 %v9134_v15, %v8970_v11  ;;  %v8847_v47 = vadd.f32 %v10199_v34, %v8846_v3  ;;  %v8972_v30 = vmul.f32 %v10199_v34, %v10199_v34  ;;  %9290 = vst [vmem:[%s11860_s15 + $0xf8] sm:$0xff] %v10199_v34 }
 0x49a   : > { %v9067_v44 = vadd.f32 %v9066_v58, %v8971_v32 }
 0x49b   : > { %v4948_v39 = vpop.f32.mrb[64].mxu1  ;;  %v9136_v53 = vadd.f32 %v9135_v43, %v8972_v30  ;;  %v8461_v21 = vpop.f32.mrb[64].mxu0 }
 0x49c   : > { %v4950_v13 = vpop.f32.mrb[65].mxu1  ;;  %v10200_v27 = vadd.f32 %v8461_v21, %v4948_v39  ;;  %v8463_v48 = vpop.f32.mrb[65].mxu0 }
 0x49d   : > { %v4952_v49 = vpop.f32.mrb[66].mxu1  ;;  %v10201_v54 = vadd.f32 %v8463_v48, %v4950_v13  ;;  %v8465_v50 = vpop.f32.mrb[66].mxu0 }
 0x49e   : > { %v4954_v55 = vpop.f32.mrb[67].mxu1  ;;  %v8779_v10 = vadd.f32 %v10200_v27, %v8778_v6  ;;  %v8973_v52 = vmul.f32 %v10200_v27, %v10200_v27  ;;  %9227 = vst [vmem:[%s11856_s9 + $0x100] sm:$0xff] %v10200_v27  ;;  %v10202_v35 = vadd.f32 %v8465_v50, %v4952_v49  ;;  %v8467_v40 = vpop.f32.mrb[67].mxu0 }
 0x49f   : > { %v8848_v23 = vadd.f32 %v10201_v54, %v8847_v47  ;;  %v8974_v17 = vmul.f32 %v10201_v54, %v10201_v54  ;;  %9291 = vst [vmem:[%s11860_s15 + $0x100] sm:$0xff] %v10201_v54  ;;  %v10203_v9 = vadd.f32 %v8467_v40, %v4954_v55 }
 0x4a0   : > { %v9068_v60 = vadd.f32 %v9067_v44, %v8973_v52  ;;  %v8780_v28 = vadd.f32 %v10202_v35, %v8779_v10  ;;  %v8975_v29 = vmul.f32 %v10202_v35, %v10202_v35  ;;  %9228 = vst [vmem:[%s11856_s9 + $0x108] sm:$0xff] %v10202_v35 }
 0x4a1   : > { %v9137_v37 = vadd.f32 %v9136_v53, %v8974_v17  ;;  %v8849_v56 = vadd.f32 %v10203_v9, %v8848_v23  ;;  %v8976_v63 = vmul.f32 %v10203_v9, %v10203_v9  ;;  %9292 = vst [vmem:[%s11860_s15 + $0x108] sm:$0xff] %v10203_v9 }
 0x4a2   : > { %v9069_v45 = vadd.f32 %v9068_v60, %v8975_v29 }
 0x4a3   : > { %v4958_v61 = vpop.f32.mrb[68].mxu1  ;;  %v9138_v46 = vadd.f32 %v9137_v37, %v8976_v63  ;;  %v8471_v14 = vpop.f32.mrb[68].mxu0 }
 0x4a4   : > { %v4960_v33 = vpop.f32.mrb[69].mxu1  ;;  %v10204_v12 = vadd.f32 %v8471_v14, %v4958_v61  ;;  %v8473_v59 = vpop.f32.mrb[69].mxu0 }
 0x4a5   : > { %v4962_v36 = vpop.f32.mrb[70].mxu1  ;;  %v10205_v5 = vadd.f32 %v8473_v59, %v4960_v33  ;;  %v8475_v24 = vpop.f32.mrb[70].mxu0 }
 0x4a6   : > { %v4964_v0 = vpop.f32.mrb[71].mxu1  ;;  %v8781_v62 = vadd.f32 %v10204_v12, %v8780_v28  ;;  %v8977_v1 = vmul.f32 %v10204_v12, %v10204_v12  ;;  %9229 = vst [vmem:[%s11856_s9 + $0x110] sm:$0xff] %v10204_v12  ;;  %v10206_v41 = vadd.f32 %v8475_v24, %v4962_v36  ;;  %v8477_v18 = vpop.f32.mrb[71].mxu0 }
 0x4a7   : > { %v8850_v2 = vadd.f32 %v10205_v5, %v8849_v56  ;;  %v8978_v19 = vmul.f32 %v10205_v5, %v10205_v5  ;;  %9293 = vst [vmem:[%s11860_s15 + $0x110] sm:$0xff] %v10205_v5  ;;  %v10207_v15 = vadd.f32 %v8477_v18, %v4964_v0 }
 0x4a8   : > { %v9070_v4 = vadd.f32 %v9069_v45, %v8977_v1  ;;  %v8782_v51 = vadd.f32 %v10206_v41, %v8781_v62  ;;  %v8979_v57 = vmul.f32 %v10206_v41, %v10206_v41  ;;  %9230 = vst [vmem:[%s11856_s9 + $0x118] sm:$0xff] %v10206_v41 }
 0x4a9   : > { %v9139_v38 = vadd.f32 %v9138_v46, %v8978_v19  ;;  %v8851_v25 = vadd.f32 %v10207_v15, %v8850_v2  ;;  %v8980_v8 = vmul.f32 %v10207_v15, %v10207_v15  ;;  %9294 = vst [vmem:[%s11860_s15 + $0x118] sm:$0xff] %v10207_v15 }
 0x4aa   : > { %v9071_v20 = vadd.f32 %v9070_v4, %v8979_v57 }
 0x4ab   : > { %v4968_v31 = vpop.f32.mrb[72].mxu1  ;;  %v9140_v7 = vadd.f32 %v9139_v38, %v8980_v8  ;;  %v8481_v3 = vpop.f32.mrb[72].mxu0 }
 0x4ac   : > { %v4970_v22 = vpop.f32.mrb[73].mxu1  ;;  %v10208_v11 = vadd.f32 %v8481_v3, %v4968_v31  ;;  %v8483_v16 = vpop.f32.mrb[73].mxu0 }
 0x4ad   : > { %v4972_v42 = vpop.f32.mrb[74].mxu1  ;;  %v10209_v34 = vadd.f32 %v8483_v16, %v4970_v22  ;;  %v8485_v39 = vpop.f32.mrb[74].mxu0 }
 0x4ae   : > { %v4974_v26 = vpop.f32.mrb[75].mxu1  ;;  %v8783_v58 = vadd.f32 %v10208_v11, %v8782_v51  ;;  %v8981_v6 = vmul.f32 %v10208_v11, %v10208_v11  ;;  %9231 = vst [vmem:[%s11856_s9 + $0x120] sm:$0xff] %v10208_v11  ;;  %v10210_v32 = vadd.f32 %v8485_v39, %v4972_v42  ;;  %v8487_v13 = vpop.f32.mrb[75].mxu0 }
 0x4af   : > { %v8852_v43 = vadd.f32 %v10209_v34, %v8851_v25  ;;  %v8982_v47 = vmul.f32 %v10209_v34, %v10209_v34  ;;  %9295 = vst [vmem:[%s11860_s15 + $0x120] sm:$0xff] %v10209_v34  ;;  %v10211_v30 = vadd.f32 %v8487_v13, %v4974_v26 }
 0x4b0   : > { %v9072_v44 = vadd.f32 %v9071_v20, %v8981_v6  ;;  %v8784_v55 = vadd.f32 %v10210_v32, %v8783_v58  ;;  %v8983_v53 = vmul.f32 %v10210_v32, %v10210_v32  ;;  %9232 = vst [vmem:[%s11856_s9 + $0x128] sm:$0xff] %v10210_v32 }
 0x4b1   : > { %v9141_v27 = vadd.f32 %v9140_v7, %v8982_v47  ;;  %v8853_v48 = vadd.f32 %v10211_v30, %v8852_v43  ;;  %v8984_v54 = vmul.f32 %v10211_v30, %v10211_v30  ;;  %9296 = vst [vmem:[%s11860_s15 + $0x128] sm:$0xff] %v10211_v30 }
 0x4b2   : > { %v9073_v10 = vadd.f32 %v9072_v44, %v8983_v53 }
 0x4b3   : > { %v4978_v49 = vpop.f32.mrb[76].mxu1  ;;  %v9142_v35 = vadd.f32 %v9141_v27, %v8984_v54  ;;  %v8491_v40 = vpop.f32.mrb[76].mxu0 }
 0x4b4   : > { %v4980_v21 = vpop.f32.mrb[77].mxu1  ;;  %v10212_v23 = vadd.f32 %v8491_v40, %v4978_v49  ;;  %v8493_v17 = vpop.f32.mrb[77].mxu0 }
 0x4b5   : > { %v4982_v50 = vpop.f32.mrb[78].mxu1  ;;  %v10213_v9 = vadd.f32 %v8493_v17, %v4980_v21  ;;  %v8495_v61 = vpop.f32.mrb[78].mxu0 }
 0x4b6   : > { %v4984_v52 = vpop.f32.mrb[79].mxu1  ;;  %v8785_v60 = vadd.f32 %v10212_v23, %v8784_v55  ;;  %v8985_v28 = vmul.f32 %v10212_v23, %v10212_v23  ;;  %9233 = vst [vmem:[%s11856_s9 + $0x130] sm:$0xff] %v10212_v23  ;;  %v10214_v29 = vadd.f32 %v8495_v61, %v4982_v50  ;;  %v8497_v33 = vpop.f32.mrb[79].mxu0 }
 0x4b7   : > { %v8854_v37 = vadd.f32 %v10213_v9, %v8853_v48  ;;  %v8986_v56 = vmul.f32 %v10213_v9, %v10213_v9  ;;  %9297 = vst [vmem:[%s11860_s15 + $0x130] sm:$0xff] %v10213_v9  ;;  %v10215_v63 = vadd.f32 %v8497_v33, %v4984_v52 }
 0x4b8   : > { %v9074_v45 = vadd.f32 %v9073_v10, %v8985_v28  ;;  %v8786_v0 = vadd.f32 %v10214_v29, %v8785_v60  ;;  %v8987_v46 = vmul.f32 %v10214_v29, %v10214_v29  ;;  %9234 = vst [vmem:[%s11856_s9 + $0x138] sm:$0xff] %v10214_v29 }
 0x4b9   : > { %v9143_v12 = vadd.f32 %v9142_v35, %v8986_v56  ;;  %v8855_v59 = vadd.f32 %v10215_v63, %v8854_v37  ;;  %v8988_v5 = vmul.f32 %v10215_v63, %v10215_v63  ;;  %9298 = vst [vmem:[%s11860_s15 + $0x138] sm:$0xff] %v10215_v63 }
 0x4ba   : > { %v9075_v62 = vadd.f32 %v9074_v45, %v8987_v46 }
 0x4bb   : > { %v4988_v36 = vpop.f32.mrb[80].mxu1  ;;  %v9144_v41 = vadd.f32 %v9143_v12, %v8988_v5  ;;  %v8501_v18 = vpop.f32.mrb[80].mxu0 }
 0x4bc   : > { %v4990_v14 = vpop.f32.mrb[81].mxu1  ;;  %v10216_v2 = vadd.f32 %v8501_v18, %v4988_v36  ;;  %v8503_v19 = vpop.f32.mrb[81].mxu0 }
 0x4bd   : > { %v4992_v24 = vpop.f32.mrb[82].mxu1  ;;  %v10217_v15 = vadd.f32 %v8503_v19, %v4990_v14  ;;  %v8505_v31 = vpop.f32.mrb[82].mxu0 }
 0x4be   : > { %v4994_v1 = vpop.f32.mrb[83].mxu1  ;;  %v8787_v4 = vadd.f32 %v10216_v2, %v8786_v0  ;;  %v8989_v51 = vmul.f32 %v10216_v2, %v10216_v2  ;;  %9235 = vst [vmem:[%s11856_s9 + $0x140] sm:$0xff] %v10216_v2  ;;  %v10218_v57 = vadd.f32 %v8505_v31, %v4992_v24  ;;  %v8507_v22 = vpop.f32.mrb[83].mxu0 }
 0x4bf   : > { %v8856_v38 = vadd.f32 %v10217_v15, %v8855_v59  ;;  %v8990_v25 = vmul.f32 %v10217_v15, %v10217_v15  ;;  %9299 = vst [vmem:[%s11860_s15 + $0x140] sm:$0xff] %v10217_v15  ;;  %v10219_v8 = vadd.f32 %v8507_v22, %v4994_v1 }
 0x4c0   : > { %v9076_v20 = vadd.f32 %v9075_v62, %v8989_v51  ;;  %v8788_v26 = vadd.f32 %v10218_v57, %v8787_v4  ;;  %v8991_v7 = vmul.f32 %v10218_v57, %v10218_v57  ;;  %9236 = vst [vmem:[%s11856_s9 + $0x148] sm:$0xff] %v10218_v57 }
 0x4c1   : > { %v9145_v11 = vadd.f32 %v9144_v41, %v8990_v25  ;;  %v8857_v16 = vadd.f32 %v10219_v8, %v8856_v38  ;;  %v8992_v34 = vmul.f32 %v10219_v8, %v10219_v8  ;;  %9300 = vst [vmem:[%s11860_s15 + $0x148] sm:$0xff] %v10219_v8 }
 0x4c2   : > { %v9077_v58 = vadd.f32 %v9076_v20, %v8991_v7 }
 0x4c3   : > { %v4998_v42 = vpop.f32.mrb[84].mxu1  ;;  %v9146_v32 = vadd.f32 %v9145_v11, %v8992_v34  ;;  %v8511_v13 = vpop.f32.mrb[84].mxu0 }
 0x4c4   : > { %v5000_v3 = vpop.f32.mrb[85].mxu1  ;;  %v10220_v43 = vadd.f32 %v8511_v13, %v4998_v42  ;;  %v8513_v47 = vpop.f32.mrb[85].mxu0 }
 0x4c5   : > { %v5002_v39 = vpop.f32.mrb[86].mxu1  ;;  %v10221_v30 = vadd.f32 %v8513_v47, %v5000_v3  ;;  %v8515_v49 = vpop.f32.mrb[86].mxu0 }
 0x4c6   : > { %v5004_v6 = vpop.f32.mrb[87].mxu1  ;;  %v8789_v44 = vadd.f32 %v10220_v43, %v8788_v26  ;;  %v8993_v55 = vmul.f32 %v10220_v43, %v10220_v43  ;;  %9237 = vst [vmem:[%s11856_s9 + $0x150] sm:$0xff] %v10220_v43  ;;  %v10222_v53 = vadd.f32 %v8515_v49, %v5002_v39  ;;  %v8517_v21 = vpop.f32.mrb[87].mxu0 }
 0x4c7   : > { %v8858_v27 = vadd.f32 %v10221_v30, %v8857_v16  ;;  %v8994_v48 = vmul.f32 %v10221_v30, %v10221_v30  ;;  %9301 = vst [vmem:[%s11860_s15 + $0x150] sm:$0xff] %v10221_v30  ;;  %v10223_v54 = vadd.f32 %v8517_v21, %v5004_v6 }
 0x4c8   : > { %v9078_v10 = vadd.f32 %v9077_v58, %v8993_v55  ;;  %v8790_v52 = vadd.f32 %v10222_v53, %v8789_v44  ;;  %v8995_v35 = vmul.f32 %v10222_v53, %v10222_v53  ;;  %9238 = vst [vmem:[%s11856_s9 + $0x158] sm:$0xff] %v10222_v53 }
 0x4c9   : > { %v9147_v23 = vadd.f32 %v9146_v32, %v8994_v48  ;;  %v8859_v17 = vadd.f32 %v10223_v54, %v8858_v27  ;;  %v8996_v9 = vmul.f32 %v10223_v54, %v10223_v54  ;;  %9302 = vst [vmem:[%s11860_s15 + $0x158] sm:$0xff] %v10223_v54 }
 0x4ca   : > { %v9079_v60 = vadd.f32 %v9078_v10, %v8995_v35 }
 0x4cb   : > { %v5008_v50 = vpop.f32.mrb[88].mxu1  ;;  %v9148_v29 = vadd.f32 %v9147_v23, %v8996_v9  ;;  %v8521_v33 = vpop.f32.mrb[88].mxu0 }
 0x4cc   : > { %v5010_v40 = vpop.f32.mrb[89].mxu1  ;;  %v10224_v37 = vadd.f32 %v8521_v33, %v5008_v50  ;;  %v8523_v56 = vpop.f32.mrb[89].mxu0 }
 0x4cd   : > { %v5012_v61 = vpop.f32.mrb[90].mxu1  ;;  %v10225_v63 = vadd.f32 %v8523_v56, %v5010_v40  ;;  %v8525_v36 = vpop.f32.mrb[90].mxu0 }
 0x4ce   : > { %v5014_v28 = vpop.f32.mrb[91].mxu1  ;;  %v8791_v45 = vadd.f32 %v10224_v37, %v8790_v52  ;;  %v8997_v0 = vmul.f32 %v10224_v37, %v10224_v37  ;;  %9239 = vst [vmem:[%s11856_s9 + $0x160] sm:$0xff] %v10224_v37  ;;  %v10226_v46 = vadd.f32 %v8525_v36, %v5012_v61  ;;  %v8527_v14 = vpop.f32.mrb[91].mxu0 }
 0x4cf   : > { %v8860_v12 = vadd.f32 %v10225_v63, %v8859_v17  ;;  %v8998_v59 = vmul.f32 %v10225_v63, %v10225_v63  ;;  %9303 = vst [vmem:[%s11860_s15 + $0x160] sm:$0xff] %v10225_v63  ;;  %v10227_v5 = vadd.f32 %v8527_v14, %v5014_v28 }
 0x4d0   : > { %v9080_v62 = vadd.f32 %v9079_v60, %v8997_v0  ;;  %v8792_v1 = vadd.f32 %v10226_v46, %v8791_v45  ;;  %v8999_v41 = vmul.f32 %v10226_v46, %v10226_v46  ;;  %9240 = vst [vmem:[%s11856_s9 + $0x168] sm:$0xff] %v10226_v46 }
 0x4d1   : > { %v9149_v2 = vadd.f32 %v9148_v29, %v8998_v59  ;;  %v8861_v19 = vadd.f32 %v10227_v5, %v8860_v12  ;;  %v9000_v15 = vmul.f32 %v10227_v5, %v10227_v5  ;;  %9304 = vst [vmem:[%s11860_s15 + $0x168] sm:$0xff] %v10227_v5 }
 0x4d2   : > { %v9081_v4 = vadd.f32 %v9080_v62, %v8999_v41 }
 0x4d3   : > { %v5018_v24 = vpop.f32.mrb[92].mxu1  ;;  %v9150_v57 = vadd.f32 %v9149_v2, %v9000_v15  ;;  %v8531_v22 = vpop.f32.mrb[92].mxu0 }
 0x4d4   : > { %v5020_v18 = vpop.f32.mrb[93].mxu1  ;;  %v10228_v38 = vadd.f32 %v8531_v22, %v5018_v24  ;;  %v8533_v25 = vpop.f32.mrb[93].mxu0 }
 0x4d5   : > { %v5022_v31 = vpop.f32.mrb[94].mxu1  ;;  %v10229_v8 = vadd.f32 %v8533_v25, %v5020_v18  ;;  %v8535_v42 = vpop.f32.mrb[94].mxu0 }
 0x4d6   : > { %v5024_v51 = vpop.f32.mrb[95].mxu1  ;;  %v8793_v20 = vadd.f32 %v10228_v38, %v8792_v1  ;;  %v9001_v26 = vmul.f32 %v10228_v38, %v10228_v38  ;;  %9241 = vst [vmem:[%s11856_s9 + $0x170] sm:$0xff] %v10228_v38  ;;  %v10230_v7 = vadd.f32 %v8535_v42, %v5022_v31  ;;  %v8537_v3 = vpop.f32.mrb[95].mxu0 }
 0x4d7   : > { %v8862_v11 = vadd.f32 %v10229_v8, %v8861_v19  ;;  %v9002_v16 = vmul.f32 %v10229_v8, %v10229_v8  ;;  %9305 = vst [vmem:[%s11860_s15 + $0x170] sm:$0xff] %v10229_v8  ;;  %v10231_v34 = vadd.f32 %v8537_v3, %v5024_v51 }
 0x4d8   : > { %v9082_v58 = vadd.f32 %v9081_v4, %v9001_v26  ;;  %v8794_v6 = vadd.f32 %v10230_v7, %v8793_v20  ;;  %v9003_v32 = vmul.f32 %v10230_v7, %v10230_v7  ;;  %9242 = vst [vmem:[%s11856_s9 + $0x178] sm:$0xff] %v10230_v7 }
 0x4d9   : > { %v9151_v43 = vadd.f32 %v9150_v57, %v9002_v16  ;;  %v8863_v47 = vadd.f32 %v10231_v34, %v8862_v11  ;;  %v9004_v30 = vmul.f32 %v10231_v34, %v10231_v34  ;;  %9306 = vst [vmem:[%s11860_s15 + $0x178] sm:$0xff] %v10231_v34 }
 0x4da   : > { %v9083_v44 = vadd.f32 %v9082_v58, %v9003_v32 }
 0x4db   : > { %v5028_v39 = vpop.f32.mrb[96].mxu1  ;;  %v9152_v53 = vadd.f32 %v9151_v43, %v9004_v30  ;;  %v8541_v21 = vpop.f32.mrb[96].mxu0 }
 0x4dc   : > { %v5030_v13 = vpop.f32.mrb[97].mxu1  ;;  %v10232_v27 = vadd.f32 %v8541_v21, %v5028_v39  ;;  %v8543_v48 = vpop.f32.mrb[97].mxu0 }
 0x4dd   : > { %v5032_v49 = vpop.f32.mrb[98].mxu1  ;;  %v10233_v54 = vadd.f32 %v8543_v48, %v5030_v13  ;;  %v8545_v50 = vpop.f32.mrb[98].mxu0 }
 0x4de   : > { %v5034_v55 = vpop.f32.mrb[99].mxu1  ;;  %v8795_v10 = vadd.f32 %v10232_v27, %v8794_v6  ;;  %v9005_v52 = vmul.f32 %v10232_v27, %v10232_v27  ;;  %9243 = vst [vmem:[%s11856_s9 + $0x180] sm:$0xff] %v10232_v27  ;;  %v10234_v35 = vadd.f32 %v8545_v50, %v5032_v49  ;;  %v8547_v40 = vpop.f32.mrb[99].mxu0 }
 0x4df   : > { %v8864_v23 = vadd.f32 %v10233_v54, %v8863_v47  ;;  %v9006_v17 = vmul.f32 %v10233_v54, %v10233_v54  ;;  %9307 = vst [vmem:[%s11860_s15 + $0x180] sm:$0xff] %v10233_v54  ;;  %v10235_v9 = vadd.f32 %v8547_v40, %v5034_v55 }
 0x4e0   : > { %v9084_v60 = vadd.f32 %v9083_v44, %v9005_v52  ;;  %v8796_v28 = vadd.f32 %v10234_v35, %v8795_v10  ;;  %v9007_v29 = vmul.f32 %v10234_v35, %v10234_v35  ;;  %9244 = vst [vmem:[%s11856_s9 + $0x188] sm:$0xff] %v10234_v35 }
 0x4e1   : > { %v9153_v37 = vadd.f32 %v9152_v53, %v9006_v17  ;;  %v8865_v56 = vadd.f32 %v10235_v9, %v8864_v23  ;;  %v9008_v63 = vmul.f32 %v10235_v9, %v10235_v9  ;;  %9308 = vst [vmem:[%s11860_s15 + $0x188] sm:$0xff] %v10235_v9 }
 0x4e2   : > { %v9085_v45 = vadd.f32 %v9084_v60, %v9007_v29 }
 0x4e3   : > { %v5038_v61 = vpop.f32.mrb[100].mxu1  ;;  %v9154_v46 = vadd.f32 %v9153_v37, %v9008_v63  ;;  %v8551_v14 = vpop.f32.mrb[100].mxu0 }
 0x4e4   : > { %v5040_v33 = vpop.f32.mrb[101].mxu1  ;;  %v10236_v12 = vadd.f32 %v8551_v14, %v5038_v61  ;;  %v8553_v59 = vpop.f32.mrb[101].mxu0 }
 0x4e5   : > { %v5042_v36 = vpop.f32.mrb[102].mxu1  ;;  %v10237_v5 = vadd.f32 %v8553_v59, %v5040_v33  ;;  %v8555_v24 = vpop.f32.mrb[102].mxu0 }
 0x4e6   : > { %v5044_v0 = vpop.f32.mrb[103].mxu1  ;;  %v8797_v62 = vadd.f32 %v10236_v12, %v8796_v28  ;;  %v9009_v1 = vmul.f32 %v10236_v12, %v10236_v12  ;;  %9245 = vst [vmem:[%s11856_s9 + $0x190] sm:$0xff] %v10236_v12  ;;  %v10238_v41 = vadd.f32 %v8555_v24, %v5042_v36  ;;  %v8557_v18 = vpop.f32.mrb[103].mxu0 }
 0x4e7   : > { %v8866_v2 = vadd.f32 %v10237_v5, %v8865_v56  ;;  %v9010_v19 = vmul.f32 %v10237_v5, %v10237_v5  ;;  %9309 = vst [vmem:[%s11860_s15 + $0x190] sm:$0xff] %v10237_v5  ;;  %v10239_v15 = vadd.f32 %v8557_v18, %v5044_v0 }
 0x4e8   : > { %v9086_v4 = vadd.f32 %v9085_v45, %v9009_v1  ;;  %v8798_v51 = vadd.f32 %v10238_v41, %v8797_v62  ;;  %v9011_v57 = vmul.f32 %v10238_v41, %v10238_v41  ;;  %9246 = vst [vmem:[%s11856_s9 + $0x198] sm:$0xff] %v10238_v41 }
 0x4e9   : > { %v9155_v38 = vadd.f32 %v9154_v46, %v9010_v19  ;;  %v8867_v25 = vadd.f32 %v10239_v15, %v8866_v2  ;;  %v9012_v8 = vmul.f32 %v10239_v15, %v10239_v15  ;;  %9310 = vst [vmem:[%s11860_s15 + $0x198] sm:$0xff] %v10239_v15 }
 0x4ea   : > { %v9087_v20 = vadd.f32 %v9086_v4, %v9011_v57 }
 0x4eb   : > { %v5048_v31 = vpop.f32.mrb[104].mxu1  ;;  %v9156_v7 = vadd.f32 %v9155_v38, %v9012_v8  ;;  %v8561_v3 = vpop.f32.mrb[104].mxu0 }
 0x4ec   : > { %v5050_v22 = vpop.f32.mrb[105].mxu1  ;;  %v10240_v11 = vadd.f32 %v8561_v3, %v5048_v31  ;;  %v8563_v16 = vpop.f32.mrb[105].mxu0 }
 0x4ed   : > { %v5052_v42 = vpop.f32.mrb[106].mxu1  ;;  %v10241_v34 = vadd.f32 %v8563_v16, %v5050_v22  ;;  %v8565_v39 = vpop.f32.mrb[106].mxu0 }
 0x4ee   : > { %v5054_v26 = vpop.f32.mrb[107].mxu1  ;;  %v8799_v58 = vadd.f32 %v10240_v11, %v8798_v51  ;;  %v9013_v6 = vmul.f32 %v10240_v11, %v10240_v11  ;;  %9247 = vst [vmem:[%s11856_s9 + $0x1a0] sm:$0xff] %v10240_v11  ;;  %v10242_v32 = vadd.f32 %v8565_v39, %v5052_v42  ;;  %v8567_v13 = vpop.f32.mrb[107].mxu0 }
 0x4ef   : > { %v8868_v43 = vadd.f32 %v10241_v34, %v8867_v25  ;;  %v9014_v47 = vmul.f32 %v10241_v34, %v10241_v34  ;;  %9311 = vst [vmem:[%s11860_s15 + $0x1a0] sm:$0xff] %v10241_v34  ;;  %v10243_v30 = vadd.f32 %v8567_v13, %v5054_v26 }
 0x4f0   : > { %v9088_v44 = vadd.f32 %v9087_v20, %v9013_v6  ;;  %v8800_v55 = vadd.f32 %v10242_v32, %v8799_v58  ;;  %v9015_v53 = vmul.f32 %v10242_v32, %v10242_v32  ;;  %9248 = vst [vmem:[%s11856_s9 + $0x1a8] sm:$0xff] %v10242_v32 }
 0x4f1   : > { %v9157_v27 = vadd.f32 %v9156_v7, %v9014_v47  ;;  %v8869_v48 = vadd.f32 %v10243_v30, %v8868_v43  ;;  %v9016_v54 = vmul.f32 %v10243_v30, %v10243_v30  ;;  %9312 = vst [vmem:[%s11860_s15 + $0x1a8] sm:$0xff] %v10243_v30 }
 0x4f2   : > { %v9089_v10 = vadd.f32 %v9088_v44, %v9015_v53 }
 0x4f3   : > { %v5058_v49 = vpop.f32.mrb[108].mxu1  ;;  %v9158_v35 = vadd.f32 %v9157_v27, %v9016_v54  ;;  %v8571_v40 = vpop.f32.mrb[108].mxu0 }
 0x4f4   : > { %v5060_v21 = vpop.f32.mrb[109].mxu1  ;;  %v10244_v23 = vadd.f32 %v8571_v40, %v5058_v49  ;;  %v8573_v17 = vpop.f32.mrb[109].mxu0 }
 0x4f5   : > { %v5062_v50 = vpop.f32.mrb[110].mxu1  ;;  %v10245_v9 = vadd.f32 %v8573_v17, %v5060_v21  ;;  %v8575_v61 = vpop.f32.mrb[110].mxu0 }
 0x4f6   : > { %v5064_v52 = vpop.f32.mrb[111].mxu1  ;;  %v8801_v60 = vadd.f32 %v10244_v23, %v8800_v55  ;;  %v9017_v28 = vmul.f32 %v10244_v23, %v10244_v23  ;;  %9249 = vst [vmem:[%s11856_s9 + $0x1b0] sm:$0xff] %v10244_v23  ;;  %v10246_v29 = vadd.f32 %v8575_v61, %v5062_v50  ;;  %v8577_v33 = vpop.f32.mrb[111].mxu0 }
 0x4f7   : > { %v8870_v37 = vadd.f32 %v10245_v9, %v8869_v48  ;;  %v9018_v56 = vmul.f32 %v10245_v9, %v10245_v9  ;;  %9313 = vst [vmem:[%s11860_s15 + $0x1b0] sm:$0xff] %v10245_v9  ;;  %v10247_v63 = vadd.f32 %v8577_v33, %v5064_v52 }
 0x4f8   : > { %v9090_v45 = vadd.f32 %v9089_v10, %v9017_v28  ;;  %v8802_v0 = vadd.f32 %v10246_v29, %v8801_v60  ;;  %v9019_v46 = vmul.f32 %v10246_v29, %v10246_v29  ;;  %9250 = vst [vmem:[%s11856_s9 + $0x1b8] sm:$0xff] %v10246_v29 }
 0x4f9   : > { %v9159_v12 = vadd.f32 %v9158_v35, %v9018_v56  ;;  %v8871_v59 = vadd.f32 %v10247_v63, %v8870_v37  ;;  %v9020_v5 = vmul.f32 %v10247_v63, %v10247_v63  ;;  %9314 = vst [vmem:[%s11860_s15 + $0x1b8] sm:$0xff] %v10247_v63 }
 0x4fa   : > { %v9091_v62 = vadd.f32 %v9090_v45, %v9019_v46 }
 0x4fb   : > { %v5068_v36 = vpop.f32.mrb[112].mxu1  ;;  %v9160_v41 = vadd.f32 %v9159_v12, %v9020_v5  ;;  %v8581_v18 = vpop.f32.mrb[112].mxu0 }
 0x4fc   : > { %v5070_v14 = vpop.f32.mrb[113].mxu1  ;;  %v10248_v2 = vadd.f32 %v8581_v18, %v5068_v36  ;;  %v8583_v19 = vpop.f32.mrb[113].mxu0 }
 0x4fd   : > { %v5072_v24 = vpop.f32.mrb[114].mxu1  ;;  %v10249_v15 = vadd.f32 %v8583_v19, %v5070_v14  ;;  %v8585_v31 = vpop.f32.mrb[114].mxu0 }
 0x4fe   : > { %v5074_v1 = vpop.f32.mrb[115].mxu1  ;;  %v8803_v4 = vadd.f32 %v10248_v2, %v8802_v0  ;;  %v9021_v51 = vmul.f32 %v10248_v2, %v10248_v2  ;;  %9251 = vst [vmem:[%s11856_s9 + $0x1c0] sm:$0xff] %v10248_v2  ;;  %v10250_v57 = vadd.f32 %v8585_v31, %v5072_v24  ;;  %v8587_v22 = vpop.f32.mrb[115].mxu0 }
 0x4ff   : > { %v8872_v38 = vadd.f32 %v10249_v15, %v8871_v59  ;;  %v9022_v25 = vmul.f32 %v10249_v15, %v10249_v15  ;;  %9315 = vst [vmem:[%s11860_s15 + $0x1c0] sm:$0xff] %v10249_v15  ;;  %v10251_v8 = vadd.f32 %v8587_v22, %v5074_v1 }
 0x500   : > { %v9092_v20 = vadd.f32 %v9091_v62, %v9021_v51  ;;  %v8804_v26 = vadd.f32 %v10250_v57, %v8803_v4  ;;  %v9023_v7 = vmul.f32 %v10250_v57, %v10250_v57  ;;  %9252 = vst [vmem:[%s11856_s9 + $0x1c8] sm:$0xff] %v10250_v57 }
 0x501   : > { %v9161_v11 = vadd.f32 %v9160_v41, %v9022_v25  ;;  %v8873_v16 = vadd.f32 %v10251_v8, %v8872_v38  ;;  %v9024_v34 = vmul.f32 %v10251_v8, %v10251_v8  ;;  %9316 = vst [vmem:[%s11860_s15 + $0x1c8] sm:$0xff] %v10251_v8 }
 0x502   : > { %v9093_v58 = vadd.f32 %v9092_v20, %v9023_v7 }
 0x503   : > { %v5078_v42 = vpop.f32.mrb[116].mxu1  ;;  %v9162_v32 = vadd.f32 %v9161_v11, %v9024_v34  ;;  %v8591_v13 = vpop.f32.mrb[116].mxu0 }
 0x504   : > { %v5080_v3 = vpop.f32.mrb[117].mxu1  ;;  %v10252_v43 = vadd.f32 %v8591_v13, %v5078_v42  ;;  %v8593_v47 = vpop.f32.mrb[117].mxu0 }
 0x505   : > { %v5082_v39 = vpop.f32.mrb[118].mxu1  ;;  %v10253_v30 = vadd.f32 %v8593_v47, %v5080_v3  ;;  %v8595_v49 = vpop.f32.mrb[118].mxu0 }
 0x506   : > { %v5084_v6 = vpop.f32.mrb[119].mxu1  ;;  %v8805_v44 = vadd.f32 %v10252_v43, %v8804_v26  ;;  %v9025_v55 = vmul.f32 %v10252_v43, %v10252_v43  ;;  %9253 = vst [vmem:[%s11856_s9 + $0x1d0] sm:$0xff] %v10252_v43  ;;  %v10254_v53 = vadd.f32 %v8595_v49, %v5082_v39  ;;  %v8597_v21 = vpop.f32.mrb[119].mxu0 }
 0x507   : > { %v8874_v27 = vadd.f32 %v10253_v30, %v8873_v16  ;;  %v9026_v48 = vmul.f32 %v10253_v30, %v10253_v30  ;;  %9317 = vst [vmem:[%s11860_s15 + $0x1d0] sm:$0xff] %v10253_v30  ;;  %v10255_v54 = vadd.f32 %v8597_v21, %v5084_v6 }
 0x508   : > { %v9094_v10 = vadd.f32 %v9093_v58, %v9025_v55  ;;  %v8806_v52 = vadd.f32 %v10254_v53, %v8805_v44  ;;  %v9027_v35 = vmul.f32 %v10254_v53, %v10254_v53  ;;  %9254 = vst [vmem:[%s11856_s9 + $0x1d8] sm:$0xff] %v10254_v53 }
 0x509   : > { %v9163_v23 = vadd.f32 %v9162_v32, %v9026_v48  ;;  %v8875_v17 = vadd.f32 %v10255_v54, %v8874_v27  ;;  %v9028_v9 = vmul.f32 %v10255_v54, %v10255_v54  ;;  %9318 = vst [vmem:[%s11860_s15 + $0x1d8] sm:$0xff] %v10255_v54  ;;  %v11565_v27 = vmov 1966171168  }
 0x50a   : > { %v9095_v60 = vadd.f32 %v9094_v10, %v9027_v35  ;;  %v8890_v48 = vunpack.c.l.s4 %v11565_v27  ;;  %v8892_v54 = vlaneseq }
 0x50b   : > { %v5088_v50 = vpop.f32.mrb[120].mxu1  ;;  %v9164_v29 = vadd.f32 %v9163_v23, %v9028_v9 }
 0x50c   : > { %v5090_v40 = vpop.f32.mrb[121].mxu1  ;;  %v8601_v33 = vpop.f32.mrb[120].mxu0  ;;  %vm8906_vm6 = vcmp.lt.s32.totalorder %v8892_v54, 256 }
 0x50d   : > { %v5092_v61 = vpop.f32.mrb[122].mxu1  ;;  %v10256_v37 = vadd.f32 %v8601_v33, %v5088_v50  ;;  %v8603_v56 = vpop.f32.mrb[121].mxu0 }
 0x50e   : > { %v5094_v28 = vpop.f32.mrb[123].mxu1  ;;  %v10257_v63 = vadd.f32 %v8603_v56, %v5090_v40  ;;  %v8605_v36 = vpop.f32.mrb[122].mxu0 }
 0x50f   : > { %v8807_v45 = vadd.f32 %v10256_v37, %v8806_v52  ;;  %v9029_v0 = vmul.f32 %v10256_v37, %v10256_v37  ;;  %9255 = vst [vmem:[%s11856_s9 + $0x1e0] sm:$0xff] %v10256_v37  ;;  %v10258_v46 = vadd.f32 %v8605_v36, %v5092_v61  ;;  %v8607_v14 = vpop.f32.mrb[123].mxu0  ;;  %v8891_v61 = vunpack.c.0.s8 %v8890_v48 }
 0x510   : > { %v8876_v12 = vadd.f32 %v10257_v63, %v8875_v17  ;;  %v9030_v59 = vmul.f32 %v10257_v63, %v10257_v63  ;;  %9319 = vst [vmem:[%s11860_s15 + $0x1e0] sm:$0xff] %v10257_v63  ;;  %v10259_v5 = vadd.f32 %v8607_v14, %v5094_v28 }
 0x511   : > { %v9096_v62 = vadd.f32 %v9095_v60, %v9029_v0  ;;  %v8808_v1 = vadd.f32 %v10258_v46, %v8807_v45  ;;  %v9031_v41 = vmul.f32 %v10258_v46, %v10258_v46  ;;  %9256 = vst [vmem:[%s11856_s9 + $0x1e8] sm:$0xff] %v10258_v46  ;;  %v8893_v60 = vshrl.u32 %v8892_v54, 7 }
 0x512   : > { %v9165_v2 = vadd.f32 %v9164_v29, %v9030_v59  ;;  %v8877_v19 = vadd.f32 %v10259_v5, %v8876_v12  ;;  %v9032_v15 = vmul.f32 %v10259_v5, %v10259_v5  ;;  %9320 = vst [vmem:[%s11860_s15 + $0x1e8] sm:$0xff] %v10259_v5 }
 0x513   : > { %v5098_v24 = vpop.f32.mrb[124].mxu1  ;;  %v9097_v4 = vadd.f32 %v9096_v62, %v9031_v41  ;;  %v8894_v0 = vsub.s32 %v8891_v61, %v8893_v60 }
 0x514   : > { %v5100_v18 = vpop.f32.mrb[125].mxu1  ;;  %v9166_v57 = vadd.f32 %v9165_v2, %v9032_v15  ;;  %v8611_v22 = vpop.f32.mrb[124].mxu0 }
 0x515   : > { %v5102_v31 = vpop.f32.mrb[126].mxu1  ;;  %v10260_v38 = vadd.f32 %v8611_v22, %v5098_v24  ;;  %v8613_v25 = vpop.f32.mrb[125].mxu0 }
 0x516   : > { %v5104_v51 = vpop.f32.mrb[127].mxu1  ;;  %v10261_v8 = vadd.f32 %v8613_v25, %v5100_v18  ;;  %v8615_v42 = vpop.f32.mrb[126].mxu0 }
 0x517   : > { %v8809_v20 = vadd.f32 %v10260_v38, %v8808_v1  ;;  %v9033_v26 = vmul.f32 %v10260_v38, %v10260_v38  ;;  %9257 = vst [vmem:[%s11856_s9 + $0x1f0] sm:$0xff] %v10260_v38  ;;  %v10262_v7 = vadd.f32 %v8615_v42, %v5102_v31  ;;  %v8617_v3 = vpop.f32.mrb[127].mxu0 }
 0x518   : > { %v8878_v11 = vadd.f32 %v10261_v8, %v8877_v19  ;;  %v9034_v16 = vmul.f32 %v10261_v8, %v10261_v8  ;;  %9321 = vst [vmem:[%s11860_s15 + $0x1f0] sm:$0xff] %v10261_v8  ;;  %v10263_v34 = vadd.f32 %v8617_v3, %v5104_v51 }
 0x519   : > { %v9098_v39 = vadd.f32 %v9097_v4, %v9033_v26  ;;  %v8810_v58 = vadd.f32 %v10262_v7, %v8809_v20  ;;  %v9035_v6 = vmul.f32 %v10262_v7, %v10262_v7  ;;  %9258 = vst [vmem:[%s11856_s9 + $0x1f8] sm:$0xff] %v10262_v7 }
 0x51a   : > { %v9167_v32 = vadd.f32 %v9166_v57, %v9034_v16  ;;  %v8879_v13 = vadd.f32 %v10263_v34, %v8878_v11  ;;  %v9036_v43 = vmul.f32 %v10263_v34, %v10263_v34  ;;  %9322 = vst [vmem:[%s11860_s15 + $0x1f8] sm:$0xff] %v10263_v34 }
 0x51b   : > { %v8811_v47 = vrot.slane %v8810_v58, 4  ;;  %v9099_v30 = vadd.f32 %v9098_v39, %v9035_v6 }
 0x51c   : > { %v8880_v49 = vrot.slane %v8879_v13, 4  ;;  %v9168_v44 = vadd.f32 %v9167_v32, %v9036_v43 }
 0x51d   : > { %v8812_v55 = vadd.f32 %v8811_v47, %v8810_v58  ;;  %v9100_v53 = vrot.slane %v9099_v30, 4 }
 0x51e   : > { %v8881_v21 = vadd.f32 %v8880_v49, %v8879_v13  ;;  %v9169_v50 = vrot.slane %v9168_v44, 4 }
 0x51f   : > { %v8813_v10 = vrot.slane %v8812_v55, 2  ;;  %v9101_v52 = vadd.f32 %v9100_v53, %v9099_v30 }
 0x520   : > { %v8882_v35 = vrot.slane %v8881_v21, 2  ;;  %v9170_v40 = vadd.f32 %v9169_v50, %v9168_v44 }
 0x521   : > { %v8814_v23 = vadd.f32 %v8813_v10, %v8812_v55  ;;  %v9102_v17 = vrot.slane %v9101_v52, 2 }
 0x522   : > { %v8883_v9 = vadd.f32 %v8882_v35, %v8881_v21  ;;  %v9171_v28 = vrot.slane %v9170_v40, 2 }
 0x523   : > { %v8815_v29 = vrot.slane %v8814_v23, 1  ;;  %v9103_v33 = vadd.f32 %v9102_v17, %v9101_v52 }
 0x524   : > { %v8884_v37 = vrot.slane %v8883_v9, 1  ;;  %v9172_v56 = vadd.f32 %v9171_v28, %v9170_v40 }
 0x525   : > { %v8816_v63 = vadd.f32 %v8815_v29, %v8814_v23  ;;  %v9104_v36 = vrot.slane %v9103_v33, 1 }
 0x526   : > { %v8885_v45 = vadd.f32 %v8884_v37, %v8883_v9  ;;  %v9173_v46 = vrot.slane %v9172_v56, 1 }
 0x527   : > { %v9105_v14 = vadd.f32 %v9104_v36, %v9103_v33 }
 0x528   : > { %v8888_v12 = vcombine.low %v8816_v63, %v8885_v45  ;;  %v9174_v59 = vadd.f32 %v9173_v46, %v9172_v56 }
 0x52a   : > { %v8895_v5 = vrot.slane %v8888_v12, %v8894_v0  ;;  %v9177_v24 = vcombine.low %v9105_v14, %v9174_v59 }
 0x52c   : > { %v8902_v62 = vrot.slane %v8895_v5, %v8894_v0  ;;  %v9184_v1 = vrot.slane %v9177_v24, %v8894_v0 }
 0x52e   : > { %8908 = vst.msk [vmem:[%s11864_s18] ss:$2 sm:$0x3] %vm8906_vm6, %v8902_v62  ;;  %v9191_v41 = vrot.slane %v9184_v1, %v8894_v0 }
 0x530   : > { %10091 = vst.msk [vmem:[%s11864_s18 + $0x1] ss:$2 sm:$0x3] %vm8906_vm6, %v9191_v41 }
 0x531   : > { %s10114_s7 = sshll.u32 %s11657_s29, 12  ;;  %s9364_s10 = sshll.u32 %s11856_s9, 4  ;;  %s9365_s10 = int_to_ptr.vmem [resolvable:$true] %s9364_s10 }
 0x532   : > { %s9347_s30 = scalar_lea.hbm %s13694_s4, %s10114_s7  ;;  %s11566_s12 = smov 4096  }
 0x533   : > { %10913 = sst [smem:[#allocation12]] (%p11715_p2), %s11566_s12  ;;  %s11567_s8 = smov 16384  }
 0x534   : > { %10914 = sst [smem:[#allocation12 + $0x1]] (%p11715_p2), %s11567_s8  ;;  %s11568_s11 = smov 32  }
 0x535   : > { %10915 = sst [smem:[#allocation12 + $0x2]] (%p11715_p2), %s11568_s11  ;;  %s11569_s20 = smov 128  }
 0x536   : > { %10916 = sst [smem:[#allocation12 + $0x3]] (%p11715_p2), %s11569_s20  ;;  %s11570_s9 = smov 8  }
 0x537   : > { %10917 = sst [smem:[#allocation12 + $0x4]] (%p11715_p2), %s11569_s20  ;;  %s11571_s17 = smov [#allocation11]  }
 0x538   : > { %10918 = sst [smem:[#allocation12 + $0x5]] (%p11715_p2), %s11570_s9  ;;  %s11572_s19 = smov 0  }
 0x539   : > { %10919 = dma.general (%p11715_p2), %s9365_s10, 8192, %s9347_s30, %s9324_s26, %s11571_s17, [#allocation12], %s11572_s19, 0  }
 0x53a   : > { %s9393_s8 = scalar_lea.hbm %s13695_s5, %s10114_s7  ;;  %s9410_s11 = sshll.u32 %s11860_s15, 4  ;;  %s9411_s11 = int_to_ptr.vmem [resolvable:$true] %s9410_s11 }
 0x53b   : > { %s11573_s20 = smov 4096   ;;  %s11574_s9 = smov 16384  }
 0x53c   : > { %10920 = sst [smem:[#allocation14]] (%p11715_p2), %s11573_s20  ;;  %s11575_s26 = smov 32  }
 0x53d   : > { %10921 = sst [smem:[#allocation14 + $0x1]] (%p11715_p2), %s11574_s9  ;;  %s11576_s0 = smov 128  }
 0x53e   : > { %10922 = sst [smem:[#allocation14 + $0x2]] (%p11715_p2), %s11575_s26  ;;  %s11577_s10 = smov 8  }
 0x53f   : > { %10923 = sst [smem:[#allocation14 + $0x3]] (%p11715_p2), %s11576_s0  ;;  %s11578_s7 = smov [#allocation13]  }
 0x540   : > { %10924 = sst [smem:[#allocation14 + $0x4]] (%p11715_p2), %s11576_s0  ;;  %s11579_s15 = smov 0  }
 0x541   : > { %10925 = sst [smem:[#allocation14 + $0x5]] (%p11715_p2), %s11577_s10  ;;  %s10117_s30 = sshll.u32 %s11657_s29, 6 }
 0x542   : > { %10926 = dma.general (%p11715_p2), %s9411_s11, 8192, %s9393_s8, %s13601_s22, %s11578_s7, [#allocation14], %s11579_s15, 0  }
 0x543   : > { %s9440_s17 = sshll.u32 %s11864_s18, 4  ;;  %s9438_s20 = scalar_lea.hbm %s13696_s6, %s10117_s30  ;;  %s9441_s17 = int_to_ptr.vmem [resolvable:$true] %s9440_s17 }
 0x544   : > { %s11462_s9 = scalar_lea.vmem %s9441_s17, 64  ;;  %s11580_s26 = smov [#allocation10]  }
 0x545   : > { %p11463_p13 = scmp.ne.s32.totalorder %s9441_s17, %s11462_s9  ;;  %s11466_s0 = sshll.u32 %s11580_s26, 4  ;;  %s11467_s0 = int_to_ptr.vmem [resolvable:$false] %s11466_s0 }
 0x546   : > { %s11468_s10 = scalar_lea.vmem %s11467_s0, 128  ;;  %p11469_p4 = scmp.lt.s32.totalorder %s9441_s17, %s11467_s0 }
 0x547   : > { %p11464_p0 = pnand %p11463_p13, %p11715_p2  ;;  %p11470_p8 = scmp.lt.s32.totalorder %s11468_s10, %s11462_s9 }
 0x549   : > { %p11465_p1 = pneg %p11464_p0  ;;  %p11471_p3 = por %p11470_p8, %p11469_p4 }
 0x54b   : > { %p11472_p5 = pnand %p11471_p3, %p11465_p1 }
 0x54d   : > { %11475 = shalt.err (!%p11472_p5)
}
 0x54e   : > { %s11476_s29 = scalar_lea.hbm %s9438_s20, 64  ;;  %s11480_s11 = scalar_lea.hbm %s13696_s6, 256 }
 0x54f   : > { %p11477_p7 = scmp.ne.s32.totalorder %s9438_s20, %s11476_s29  ;;  %p11481_p11 = scmp.lt.u32.totalorder %s9438_s20, %s13696_s6 }
 0x550   : > { %p11482_p12 = scmp.lt.u32.totalorder %s11480_s11, %s11476_s29  ;;  %p11484_p0 = scmp.lt.u32.totalorder %s11476_s29, %s9438_s20 }
 0x551   : > { %p11478_p9 = pnand %p11477_p7, %p11715_p2 }
 0x552   : > { %p11483_p13 = por %p11482_p12, %p11481_p11 }
 0x553   : > { %p11479_p10 = pneg %p11478_p9 }
 0x554   : > { %p11485_p4 = por %p11484_p0, %p11483_p13 }
 0x556   : > { %p11486_p1 = pnand %p11485_p4, %p11479_p10 }
 0x558   : > { %11489 = shalt.err (!%p11486_p1)
}
 0x559   : > { %10927 = dma.vmem_to_hbm [thread:$0]  (%p11715_p2), %s9441_s17, 64, %s9438_s20, %s13601_s22  }
 0x55a PF: > { %p10941_p8 = scmp.ge.s32.totalorder %s11560_s28, 2  ;;  %s9452_s30 = sand.u32 1, %s11532_s21  }
 0x55b   : > { %s9453_s19 = scalar_lea.sflag [#allocation7], %s9452_s30 }
 0x55c   : > { %p10932_p3 = pnand %p10941_p8, %p11724_p6 }
 0x55e   : > { %11523 = dma.done.wait (!%p10932_p3), %s9453_s19, 8192  }
 0x55f   : > { %11525 = vsyncadd (!%p10932_p3), %s9453_s19, 4294959104  ;;  %s13789_s12 = sadd.s32 4294967294, %s11560_s28  }
 0x560   : > { %s9461_s9 = sand.u32 1, %s13789_s12  }
 0x561   : > { %s9462_s26 = scalar_lea.sflag [#allocation9], %s9461_s9 }
 0x562   : > { %11527 = dma.done.wait (!%p10932_p3), %s9462_s26, 8256  }
 0x563   : > { %11529 = vsyncadd (!%p10932_p3), %s9462_s26, 4294959040  ;;  %s13790_s28 = sld [smem:[#allocation17_spill]]  ;;  %s13791_s13 = sld [smem:[#allocation19_spill]] }
 0x564   : > { %s13792_s17 = sld [smem:[#allocation18_spill]]  ;;  %s13793_s21 = smov %s11544_s24 }
 0x565   : > { %s13794_s22 = smov %s11540_s23  ;;  %s13795_s23 = smov %s11722_s14 }
 0x566   : > { %s13796_s24 = smov %s11548_s25  ;;  %s13798_s26 = smov %s11556_s27 }
 0x569   : > { %p20_p2 = scmp.ge.s32.totalorder %s13790_s28, 6   ;;  %s13797_s25 = smov %s13791_s13 }
 0x56a   : > { %s13799_s27 = smov %s13792_s17 }
 0x56b   :  { %22 = sbr.rel (!%p20_p2) target bundleno = 9 (0x9), region = 290 }
 0x572   :  { %9476 = vsyncpa [#allocation7], 1 }
 0x573   :  { %9478 = vsyncpa [#allocation7 + $0x1], 1 }
 0x574   :  { %9479 = vsyncpa [#allocation9], 1 }
 0x575   :  { %9481 = vsyncpa [#allocation9 + $0x1], 1 }

</bundles_post_ra>
